<compile_context>
chip_gen: v7x
topology: tpu7x:2x2x1
jax: 0.10.0
libtpu: 0.0.40
codegen_flags: <defaults>
</compile_context>

<pallas_src>
import functools

import jax
import jax.numpy as jnp
from jax.experimental import pallas as pl
from jax.experimental.pallas import tpu as pltpu

LINEAR_IN = 7 * 7 * 64   # 3136 (from the module's conv2d_size_out arithmetic on 84)
K_PAD = 3200             # LINEAR_IN rounded up to a multiple of 128
FC_HIDDEN = 512
CH_PAD = 128             # lane-padded conv channel count carried between conv layers


def _round_up(x, m):
    return (x + m - 1) // m * m


# ----------------------------------------------------------------------------
# Pallas kernels
# ----------------------------------------------------------------------------
def _gemm_bias_relu_kernel(x_ref, w_ref, b_ref, o_ref):
    """o = relu(x @ w + b); bf16 x bf16 on the MXU, f32 accumulate + f32 epilogue."""
    acc = jnp.dot(x_ref[...].astype(jnp.bfloat16), w_ref[...],
                  preferred_element_type=jnp.float32)
    o_ref[...] = jnp.maximum(acc + b_ref[...], 0.0)


def _fc_dueling_kernel(x_ref, w1_ref, b1_ref, w2_ref, b2_ref, o_ref, acc_ref, *,
                       n_actions):
    """Fused fc_value + fc_advantage + dueling combine.

    grid axis 0 tiles K of the first (fused, 1024-wide) GEMM.  On the last step:
      h      = relu(acc + b1)                      # [h_value | h_advantage]
      q_raw  = h @ W2_fused + b2_fused             # col j<A : value + advantage_j
                                                   # col A   : value
      q[:,j] = q_raw[:,j] - (mean_j q_raw[:,j<A] - q_raw[:,A])
             = value + advantage_j - mean(advantage)
    """
    k = pl.program_id(0)

    @pl.when(k == 0)
    def _():
        acc_ref[...] = jnp.zeros_like(acc_ref)

    acc_ref[...] += jnp.dot(x_ref[...].astype(jnp.bfloat16), w1_ref[...],
                            preferred_element_type=jnp.float32)

    @pl.when(k == pl.num_programs(0) - 1)
    def _():
        h = jnp.maximum(acc_ref[...] + b1_ref[...], 0.0)
        q_raw = jnp.dot(h.astype(jnp.bfloat16), w2_ref[...],
                        preferred_element_type=jnp.float32) + b2_ref[...]
        col = jax.lax.broadcasted_iota(jnp.int32, q_raw.shape, 1)
        adv_sum = jnp.sum(jnp.where(col < n_actions, q_raw, 0.0),
                          axis=1, keepdims=True)
        val = jnp.sum(jnp.where(col == n_actions, q_raw, 0.0),
                      axis=1, keepdims=True)
        mean_adv = adv_sum * (1.0 / n_actions) - val
        o_ref[...] = q_raw - mean_adv


# ----------------------------------------------------------------------------
# pallas_call wrappers
# ----------------------------------------------------------------------------
def _conv_gemm(x, w, b):
    """x: (M, K) f32 patches, w: (K, N) bf16, b: (1, N) f32 -> relu(x@w+b) f32."""
    M, K = x.shape
    N = w.shape[1]
    return pl.pallas_call(
        _gemm_bias_relu_kernel,
        out_shape=jax.ShapeDtypeStruct((M, N), jnp.float32),
        grid=(1,),
        in_specs=[pl.BlockSpec((M, K), lambda i: (0, 0)),
                  pl.BlockSpec((K, N), lambda i: (0, 0)),
                  pl.BlockSpec((1, N), lambda i: (0, 0))],
        out_specs=pl.BlockSpec((M, N), lambda i: (0, 0)),
        compiler_params=pltpu.CompilerParams(dimension_semantics=("arbitrary",)),
    )(x, w, b)


def _fc_dueling(x, w1, b1, w2, b2, n_actions, tk=640):
    """x: (Mp, K_PAD) f32; w1: (K_PAD, 1024) bf16; w2: (1024, 128) bf16."""
    M, Kp = x.shape
    N1 = w1.shape[1]
    N2 = w2.shape[1]
    return pl.pallas_call(
        functools.partial(_fc_dueling_kernel, n_actions=n_actions),
        out_shape=jax.ShapeDtypeStruct((M, N2), jnp.float32),
        grid=(Kp // tk,),
        in_specs=[
            pl.BlockSpec((M, tk), lambda k: (0, k)),
            pl.BlockSpec((tk, N1), lambda k: (k, 0)),
            pl.BlockSpec((1, N1), lambda k: (0, 0)),
            pl.BlockSpec((N1, N2), lambda k: (0, 0)),
            pl.BlockSpec((1, N2), lambda k: (0, 0)),
        ],
        out_specs=pl.BlockSpec((M, N2), lambda k: (0, 0)),
        scratch_shapes=[pltpu.VMEM((M, N1), jnp.float32)],
        compiler_params=pltpu.CompilerParams(dimension_semantics=("arbitrary",)),
    )(x, w1, b1, w2, b2)


# ----------------------------------------------------------------------------
# im2col (NHWC, pure strided slices + concat; no transposes)
# ----------------------------------------------------------------------------
# TODO(synk): patch extraction is plain-JAX glue feeding the GEMM kernel rather than
# an in-kernel gather; at these sizes XLA fuses it into a single small fusion.
def _im2col_nhwc(x, k, s):
    B, H, W, C = x.shape
    Ho = (H - k) // s + 1
    Wo = (W - k) // s + 1
    cols = [x[:, i:i + s * Ho:s, j:j + s * Wo:s, :]
            for i in range(k) for j in range(k)]
    p = jnp.concatenate(cols, axis=-1)                 # (B, Ho, Wo, k*k*C)
    return p.reshape(B * Ho * Wo, k * k * C), Ho, Wo


# ----------------------------------------------------------------------------
# DuelingDQN forward
# ----------------------------------------------------------------------------
def dueling_dqn_forward(p, x, action_size):
    x = jnp.transpose(x, (0, 2, 3, 1))                 # NCHW -> NHWC, once
    B = x.shape[0]

    pat, ho, wo = _im2col_nhwc(x, 8, 4)
    x = _conv_gemm(pat, p["c1_w"], p["c1_b"]).reshape(B, ho, wo, CH_PAD)   # (B,20,20,128)
    pat, ho, wo = _im2col_nhwc(x, 4, 2)
    x = _conv_gemm(pat, p["c2_w"], p["c2_b"]).reshape(B, ho, wo, CH_PAD)   # (B,9,9,128)
    pat, ho, wo = _im2col_nhwc(x, 3, 1)
    x = _conv_gemm(pat, p["c3_w"], p["c3_b"])                              # (B*49, 64)

    flat = x.reshape(B, ho * wo * 64)                  # (B, 3136), NHWC flatten order
    Mp = _round_up(B, 8)
    flat = jnp.pad(flat, ((0, Mp - B), (0, K_PAD - LINEAR_IN)))

    q = _fc_dueling(flat, p["fc1_w"], p["fc1_b"], p["fc2_w"], p["fc2_b"], action_size)
    return q[:B, :action_size]


# ----------------------------------------------------------------------------
# Parameters: PyTorch-convention init, then one-time packing for the kernels
# ----------------------------------------------------------------------------
def init_torch_params(key, action_size):
    """Parameters in PyTorch nn.Module layout (f32)."""
    def u(k, shape, fan_in):
        bound = 1.0 / jnp.sqrt(jnp.float32(fan_in))
        return jax.random.uniform(k, shape, jnp.float32, -bound, bound)

    ks = jax.random.split(key, 14)
    return {
        "conv1_w": u(ks[0], (32, 4, 8, 8), 4 * 8 * 8),
        "conv1_b": u(ks[1], (32,), 4 * 8 * 8),
        "conv2_w": u(ks[2], (64, 32, 4, 4), 32 * 4 * 4),
        "conv2_b": u(ks[3], (64,), 32 * 4 * 4),
        "conv3_w": u(ks[4], (64, 64, 3, 3), 64 * 3 * 3),
        "conv3_b": u(ks[5], (64,), 64 * 3 * 3),
        "fcv1_w": u(ks[6], (FC_HIDDEN, LINEAR_IN), LINEAR_IN),
        "fcv1_b": u(ks[7], (FC_HIDDEN,), LINEAR_IN),
        "fcv2_w": u(ks[8], (1, FC_HIDDEN), FC_HIDDEN),
        "fcv2_b": u(ks[9], (1,), FC_HIDDEN),
        "fca1_w": u(ks[10], (FC_HIDDEN, LINEAR_IN), LINEAR_IN),
        "fca1_b": u(ks[11], (FC_HIDDEN,), LINEAR_IN),
        "fca2_w": u(ks[12], (action_size, FC_HIDDEN), FC_HIDDEN),
        "fca2_b": u(ks[13], (action_size,), FC_HIDDEN),
    }


def _pack_conv(w, b, cin_pad, cout_pad):
    """torch (Cout,Cin,kh,kw) -> ((kh*kw*cin_pad, cout_pad) bf16, (1,cout_pad) f32)."""
    cout, cin, kh, kw = w.shape
    wm = jnp.transpose(w, (2, 3, 1, 0))                       # (kh, kw, Cin, Cout)
    wm = jnp.pad(wm, ((0, 0), (0, 0), (0, cin_pad - cin), (0, cout_pad - cout)))
    wm = wm.reshape(kh * kw * cin_pad, cout_pad)
    bp = jnp.pad(b, (0, cout_pad - cout))[None, :]
    return wm.astype(jnp.bfloat16), bp.astype(jnp.float32)


def _fc1_rows_nhwc(w):
    """torch fc1 weight (512, 3136) with NCHW-flatten input order -> (3136, 512)
    with rows reordered to the NHWC (h, w, c) flatten order used by our conv3 output."""
    wt = w.T.reshape(64, 49, FC_HIDDEN)        # rows were c*49 + hw
    wt = jnp.transpose(wt, (1, 0, 2))          # now hw*64 + c
    return wt.reshape(LINEAR_IN, FC_HIDDEN)


def prepare_params(tp, action_size):
    """One-time packing: done outside the forward, never per call."""
    assert action_size + 1 <= 128
    A = action_size
    p = {}
    p["c1_w"], p["c1_b"] = _pack_conv(tp["conv1_w"], tp["conv1_b"], 4, CH_PAD)
    p["c2_w"], p["c2_b"] = _pack_conv(tp["conv2_w"], tp["conv2_b"], CH_PAD, CH_PAD)
    p["c3_w"], p["c3_b"] = _pack_conv(tp["conv3_w"], tp["conv3_b"], CH_PAD, 64)

    # Fused FC1: [value | advantage] along N, NHWC row order, K zero-padded to 3200.
    w1 = jnp.concatenate([_fc1_rows_nhwc(tp["fcv1_w"]),
                          _fc1_rows_nhwc(tp["fca1_w"])], axis=1)       # (3136, 1024)
    w1 = jnp.pad(w1, ((0, K_PAD - LINEAR_IN), (0, 0)))
    b1 = jnp.concatenate([tp["fcv1_b"], tp["fca1_b"]])[None, :]        # (1, 1024)

    # Fused FC2: column j<A -> value + advantage_j ; column A -> value only.
    wv2 = tp["fcv2_w"].T                                               # (512, 1)
    wa2 = tp["fca2_w"].T                                               # (512, A)
    w2 = jnp.zeros((2 * FC_HIDDEN, 128), jnp.float32)
    w2 = w2.at[:FC_HIDDEN, :A].set(jnp.broadcast_to(wv2, (FC_HIDDEN, A)))
    w2 = w2.at[FC_HIDDEN:, :A].set(wa2)
    w2 = w2.at[:FC_HIDDEN, A].set(wv2[:, 0])
    b2 = jnp.zeros((1, 128), jnp.float32)
    b2 = b2.at[0, :A].set(tp["fcv2_b"][0] + tp["fca2_b"])
    b2 = b2.at[0, A].set(tp["fcv2_b"][0])

    p["fc1_w"] = w1.astype(jnp.bfloat16)
    p["fc1_b"] = b1.astype(jnp.float32)
    p["fc2_w"] = w2.astype(jnp.bfloat16)
    p["fc2_b"] = b2
    return p


if __name__ == "__main__":
    ACTION_SIZE = 6
    key = jax.random.PRNGKey(0)
    k_x, k_p = jax.random.split(key)

    # batch=2; spatial must be 84x84 since the module hard-codes linear_input_size from 84.
    x = jax.random.normal(k_x, (2, 4, 84, 84), dtype=jnp.float32)
    torch_params = init_torch_params(k_p, ACTION_SIZE)
    params = prepare_params(torch_params, ACTION_SIZE)   # one-time weight packing

    fwd = jax.jit(dueling_dqn_forward, static_argnames=("action_size",))
    q_values = jax.block_until_ready(fwd(params, x, action_size=ACTION_SIZE))

    assert q_values.shape == (2, ACTION_SIZE), q_values.shape
    assert bool(jnp.all(jnp.isfinite(q_values)))
    print("KERNEL_OK")
</pallas_src>

<mosaic_0001>
module attributes {stable_mosaic.version = 11 : i64} {
  func.func @_gemm_bias_relu_kernel(%arg0: i32, %arg1: memref<800x256xf32, #tpu.memory_space<vmem>>, %arg2: memref<256x128xbf16, #tpu.memory_space<vmem>>, %arg3: memref<1x128xf32, #tpu.memory_space<vmem>>, %arg4: memref<800x128xf32, #tpu.memory_space<vmem>>) attributes {dimension_semantics = [#tpu.dimension_semantics<arbitrary>], iteration_bounds = array<i64: 1>, scalar_prefetch = 0 : i64, scratch_operands = 0 : i64, tpu.core_type = #tpu.core_type<tc>, window_params = [{pipeline_mode = #tpu.pipeline_mode<synchronous>, transform_indices = @transform_0, window_bounds = array<i64: 800, 256>}, {pipeline_mode = #tpu.pipeline_mode<synchronous>, transform_indices = @transform_1, window_bounds = array<i64: 256, 128>}, {pipeline_mode = #tpu.pipeline_mode<synchronous>, transform_indices = @transform_2, window_bounds = array<i64: 1, 128>}, {pipeline_mode = #tpu.pipeline_mode<synchronous>, transform_indices = @transform_3, window_bounds = array<i64: 800, 128>}]} {
    %c0 = arith.constant 0 : index
    %c0_0 = arith.constant 0 : index
    %0 = vector.load %arg1[%c0, %c0_0] : memref<800x256xf32, #tpu.memory_space<vmem>>, vector<800x256xf32>
    %1 = arith.truncf %0 : vector<800x256xf32> to vector<800x256xbf16>
    %c0_1 = arith.constant 0 : index
    %c0_2 = arith.constant 0 : index
    %2 = vector.load %arg2[%c0_1, %c0_2] : memref<256x128xbf16, #tpu.memory_space<vmem>>, vector<256x128xbf16>
    %cst = arith.constant dense<0.000000e+00> : vector<800x128xf32>
    %3 = tpu.matmul %1, %2, %cst {dimension_numbers = #tpu.dot_dimension_numbers<[1], [0], [0], [1], [0, 0, 1, 1], [], []>} : vector<800x256xbf16>, vector<256x128xbf16>, vector<800x128xf32> -> vector<800x128xf32>
    %c0_3 = arith.constant 0 : index
    %c0_4 = arith.constant 0 : index
    %4 = vector.load %arg3[%c0_3, %c0_4] : memref<1x128xf32, #tpu.memory_space<vmem>>, vector<1x128xf32>
    %5 = vector.broadcast %4 : vector<1x128xf32> to vector<800x128xf32>
    %6 = arith.addf %3, %5 : vector<800x128xf32>
    %cst_5 = arith.constant 0.000000e+00 : f32
    %7 = vector.broadcast %cst_5 : f32 to vector<800x128xf32>
    %8 = arith.maximumf %6, %7 : vector<800x128xf32>
    %c0_6 = arith.constant 0 : index
    %c0_7 = arith.constant 0 : index
    %9 = vector.load %arg4[%c0_6, %c0_7] : memref<800x128xf32, #tpu.memory_space<vmem>>, vector<800x128xf32>
    tpu.vector_store %arg4[%c0_6, %c0_7], %8 {strides = array<i32>} : memref<800x128xf32, #tpu.memory_space<vmem>>, vector<800x128xf32>,
    return
  }
  func.func @transform_0(%arg0: i32) -> (i32, i32) {
    %c0_i32 = arith.constant 0 : i32
    %c0_i32_0 = arith.constant 0 : i32
    %c0_i32_1 = arith.constant 0 : i32
    return %c0_i32, %c0_i32_0 : i32, i32
  }
  func.func @transform_1(%arg0: i32) -> (i32, i32) {
    %c0_i32 = arith.constant 0 : i32
    %c0_i32_0 = arith.constant 0 : i32
    %c0_i32_1 = arith.constant 0 : i32
    return %c0_i32, %c0_i32_0 : i32, i32
  }
  func.func @transform_2(%arg0: i32) -> (i32, i32) {
    %c0_i32 = arith.constant 0 : i32
    %c0_i32_0 = arith.constant 0 : i32
    %c0_i32_1 = arith.constant 0 : i32
    return %c0_i32, %c0_i32_0 : i32, i32
  }
  func.func @transform_3(%arg0: i32) -> (i32, i32) {
    %c0_i32 = arith.constant 0 : i32
    %c0_i32_0 = arith.constant 0 : i32
    %c0_i32_1 = arith.constant 0 : i32
    return %c0_i32, %c0_i32_0 : i32, i32
  }
}

module attributes {stable_mosaic.version = 11 : i64} {
  func.func @_gemm_bias_relu_kernel(%arg0: i32, %arg1: memref<162x2048xf32, #tpu.memory_space<vmem>>, %arg2: memref<2048x128xbf16, #tpu.memory_space<vmem>>, %arg3: memref<1x128xf32, #tpu.memory_space<vmem>>, %arg4: memref<162x128xf32, #tpu.memory_space<vmem>>) attributes {dimension_semantics = [#tpu.dimension_semantics<arbitrary>], iteration_bounds = array<i64: 1>, scalar_prefetch = 0 : i64, scratch_operands = 0 : i64, tpu.core_type = #tpu.core_type<tc>, window_params = [{pipeline_mode = #tpu.pipeline_mode<synchronous>, transform_indices = @transform_0, window_bounds = array<i64: 162, 2048>}, {pipeline_mode = #tpu.pipeline_mode<synchronous>, transform_indices = @transform_1, window_bounds = array<i64: 2048, 128>}, {pipeline_mode = #tpu.pipeline_mode<synchronous>, transform_indices = @transform_2, window_bounds = array<i64: 1, 128>}, {pipeline_mode = #tpu.pipeline_mode<synchronous>, transform_indices = @transform_3, window_bounds = array<i64: 162, 128>}]} {
    %c0 = arith.constant 0 : index
    %c0_0 = arith.constant 0 : index
    %0 = vector.load %arg1[%c0, %c0_0] : memref<162x2048xf32, #tpu.memory_space<vmem>>, vector<162x2048xf32>
    %1 = arith.truncf %0 : vector<162x2048xf32> to vector<162x2048xbf16>
    %c0_1 = arith.constant 0 : index
    %c0_2 = arith.constant 0 : index
    %2 = vector.load %arg2[%c0_1, %c0_2] : memref<2048x128xbf16, #tpu.memory_space<vmem>>, vector<2048x128xbf16>
    %cst = arith.constant dense<0.000000e+00> : vector<162x128xf32>
    %3 = tpu.matmul %1, %2, %cst {dimension_numbers = #tpu.dot_dimension_numbers<[1], [0], [0], [1], [0, 0, 1, 1], [], []>} : vector<162x2048xbf16>, vector<2048x128xbf16>, vector<162x128xf32> -> vector<162x128xf32>
    %c0_3 = arith.constant 0 : index
    %c0_4 = arith.constant 0 : index
    %4 = vector.load %arg3[%c0_3, %c0_4] : memref<1x128xf32, #tpu.memory_space<vmem>>, vector<1x128xf32>
    %5 = vector.broadcast %4 : vector<1x128xf32> to vector<162x128xf32>
    %6 = arith.addf %3, %5 : vector<162x128xf32>
    %cst_5 = arith.constant 0.000000e+00 : f32
    %7 = vector.broadcast %cst_5 : f32 to vector<162x128xf32>
    %8 = arith.maximumf %6, %7 : vector<162x128xf32>
    %c0_6 = arith.constant 0 : index
    %c0_7 = arith.constant 0 : index
    %9 = vector.load %arg4[%c0_6, %c0_7] : memref<162x128xf32, #tpu.memory_space<vmem>>, vector<162x128xf32>
    tpu.vector_store %arg4[%c0_6, %c0_7], %8 {strides = array<i32>} : memref<162x128xf32, #tpu.memory_space<vmem>>, vector<162x128xf32>,
    return
  }
  func.func @transform_0(%arg0: i32) -> (i32, i32) {
    %c0_i32 = arith.constant 0 : i32
    %c0_i32_0 = arith.constant 0 : i32
    %c0_i32_1 = arith.constant 0 : i32
    return %c0_i32, %c0_i32_0 : i32, i32
  }
  func.func @transform_1(%arg0: i32) -> (i32, i32) {
    %c0_i32 = arith.constant 0 : i32
    %c0_i32_0 = arith.constant 0 : i32
    %c0_i32_1 = arith.constant 0 : i32
    return %c0_i32, %c0_i32_0 : i32, i32
  }
  func.func @transform_2(%arg0: i32) -> (i32, i32) {
    %c0_i32 = arith.constant 0 : i32
    %c0_i32_0 = arith.constant 0 : i32
    %c0_i32_1 = arith.constant 0 : i32
    return %c0_i32, %c0_i32_0 : i32, i32
  }
  func.func @transform_3(%arg0: i32) -> (i32, i32) {
    %c0_i32 = arith.constant 0 : i32
    %c0_i32_0 = arith.constant 0 : i32
    %c0_i32_1 = arith.constant 0 : i32
    return %c0_i32, %c0_i32_0 : i32, i32
  }
}

module attributes {stable_mosaic.version = 11 : i64} {
  func.func @_gemm_bias_relu_kernel(%arg0: i32, %arg1: memref<98x1152xf32, #tpu.memory_space<vmem>>, %arg2: memref<1152x64xbf16, #tpu.memory_space<vmem>>, %arg3: memref<1x64xf32, #tpu.memory_space<vmem>>, %arg4: memref<98x64xf32, #tpu.memory_space<vmem>>) attributes {dimension_semantics = [#tpu.dimension_semantics<arbitrary>], iteration_bounds = array<i64: 1>, scalar_prefetch = 0 : i64, scratch_operands = 0 : i64, tpu.core_type = #tpu.core_type<tc>, window_params = [{pipeline_mode = #tpu.pipeline_mode<synchronous>, transform_indices = @transform_0, window_bounds = array<i64: 98, 1152>}, {pipeline_mode = #tpu.pipeline_mode<synchronous>, transform_indices = @transform_1, window_bounds = array<i64: 1152, 64>}, {pipeline_mode = #tpu.pipeline_mode<synchronous>, transform_indices = @transform_2, window_bounds = array<i64: 1, 64>}, {pipeline_mode = #tpu.pipeline_mode<synchronous>, transform_indices = @transform_3, window_bounds = array<i64: 98, 64>}]} {
    %c0 = arith.constant 0 : index
    %c0_0 = arith.constant 0 : index
    %0 = vector.load %arg1[%c0, %c0_0] : memref<98x1152xf32, #tpu.memory_space<vmem>>, vector<98x1152xf32>
    %1 = arith.truncf %0 : vector<98x1152xf32> to vector<98x1152xbf16>
    %c0_1 = arith.constant 0 : index
    %c0_2 = arith.constant 0 : index
    %2 = vector.load %arg2[%c0_1, %c0_2] : memref<1152x64xbf16, #tpu.memory_space<vmem>>, vector<1152x64xbf16>
    %cst = arith.constant dense<0.000000e+00> : vector<98x64xf32>
    %3 = tpu.matmul %1, %2, %cst {dimension_numbers = #tpu.dot_dimension_numbers<[1], [0], [0], [1], [0, 0, 1, 1], [], []>} : vector<98x1152xbf16>, vector<1152x64xbf16>, vector<98x64xf32> -> vector<98x64xf32>
    %c0_3 = arith.constant 0 : index
    %c0_4 = arith.constant 0 : index
    %4 = vector.load %arg3[%c0_3, %c0_4] : memref<1x64xf32, #tpu.memory_space<vmem>>, vector<1x64xf32>
    %5 = vector.broadcast %4 : vector<1x64xf32> to vector<98x64xf32>
    %6 = arith.addf %3, %5 : vector<98x64xf32>
    %cst_5 = arith.constant 0.000000e+00 : f32
    %7 = vector.broadcast %cst_5 : f32 to vector<98x64xf32>
    %8 = arith.maximumf %6, %7 : vector<98x64xf32>
    %c0_6 = arith.constant 0 : index
    %c0_7 = arith.constant 0 : index
    %9 = vector.load %arg4[%c0_6, %c0_7] : memref<98x64xf32, #tpu.memory_space<vmem>>, vector<98x64xf32>
    tpu.vector_store %arg4[%c0_6, %c0_7], %8 {strides = array<i32>} : memref<98x64xf32, #tpu.memory_space<vmem>>, vector<98x64xf32>,
    return
  }
  func.func @transform_0(%arg0: i32) -> (i32, i32) {
    %c0_i32 = arith.constant 0 : i32
    %c0_i32_0 = arith.constant 0 : i32
    %c0_i32_1 = arith.constant 0 : i32
    return %c0_i32, %c0_i32_0 : i32, i32
  }
  func.func @transform_1(%arg0: i32) -> (i32, i32) {
    %c0_i32 = arith.constant 0 : i32
    %c0_i32_0 = arith.constant 0 : i32
    %c0_i32_1 = arith.constant 0 : i32
    return %c0_i32, %c0_i32_0 : i32, i32
  }
  func.func @transform_2(%arg0: i32) -> (i32, i32) {
    %c0_i32 = arith.constant 0 : i32
    %c0_i32_0 = arith.constant 0 : i32
    %c0_i32_1 = arith.constant 0 : i32
    return %c0_i32, %c0_i32_0 : i32, i32
  }
  func.func @transform_3(%arg0: i32) -> (i32, i32) {
    %c0_i32 = arith.constant 0 : i32
    %c0_i32_0 = arith.constant 0 : i32
    %c0_i32_1 = arith.constant 0 : i32
    return %c0_i32, %c0_i32_0 : i32, i32
  }
}

module attributes {stable_mosaic.version = 11 : i64} {
  func.func @_fc_dueling_kernel(%arg0: i32, %arg1: memref<8x640xf32, #tpu.memory_space<vmem>>, %arg2: memref<640x1024xbf16, #tpu.memory_space<vmem>>, %arg3: memref<1x1024xf32, #tpu.memory_space<vmem>>, %arg4: memref<1024x128xbf16, #tpu.memory_space<vmem>>, %arg5: memref<1x128xf32, #tpu.memory_space<vmem>>, %arg6: memref<8x128xf32, #tpu.memory_space<vmem>>, %arg7: memref<8x1024xf32, #tpu.memory_space<vmem>>) attributes {dimension_semantics = [#tpu.dimension_semantics<arbitrary>], iteration_bounds = array<i64: 5>, scalar_prefetch = 0 : i64, scratch_operands = 1 : i64, tpu.core_type = #tpu.core_type<tc>, window_params = [{transform_indices = @transform_0, window_bounds = array<i64: 8, 640>}, {transform_indices = @transform_1, window_bounds = array<i64: 640, 1024>}, {pipeline_mode = #tpu.pipeline_mode<synchronous>, transform_indices = @transform_2, window_bounds = array<i64: 1, 1024>}, {pipeline_mode = #tpu.pipeline_mode<synchronous>, transform_indices = @transform_3, window_bounds = array<i64: 1024, 128>}, {pipeline_mode = #tpu.pipeline_mode<synchronous>, transform_indices = @transform_4, window_bounds = array<i64: 1, 128>}, {pipeline_mode = #tpu.pipeline_mode<synchronous>, transform_indices = @transform_5, window_bounds = array<i64: 8, 128>}]} {
    %c0_i32 = arith.constant 0 : i32
    %0 = arith.cmpi eq, %arg0, %c0_i32 : i32
    %1 = arith.extui %0 : i1 to i32
    %c0_i32_0 = arith.constant 0 : i32
    %2 = arith.cmpi ne, %1, %c0_i32_0 : i32
    scf.if %2 {
      %cst_9 = arith.constant 0.000000e+00 : f32
      %13 = vector.broadcast %cst_9 : f32 to vector<8x1024xf32>
      %c0_10 = arith.constant 0 : index
      %c0_11 = arith.constant 0 : index
      %14 = vector.load %arg7[%c0_10, %c0_11] : memref<8x1024xf32, #tpu.memory_space<vmem>>, vector<8x1024xf32>
      tpu.vector_store %arg7[%c0_10, %c0_11], %13 {strides = array<i32>} : memref<8x1024xf32, #tpu.memory_space<vmem>>, vector<8x1024xf32>,
    } else {
    }
    %c0 = arith.constant 0 : index
    %c0_1 = arith.constant 0 : index
    %3 = vector.load %arg7[%c0, %c0_1] : memref<8x1024xf32, #tpu.memory_space<vmem>>, vector<8x1024xf32>
    %c0_2 = arith.constant 0 : index
    %c0_3 = arith.constant 0 : index
    %4 = vector.load %arg1[%c0_2, %c0_3] : memref<8x640xf32, #tpu.memory_space<vmem>>, vector<8x640xf32>
    %5 = arith.truncf %4 : vector<8x640xf32> to vector<8x640xbf16>
    %c0_4 = arith.constant 0 : index
    %c0_5 = arith.constant 0 : index
    %6 = vector.load %arg2[%c0_4, %c0_5] : memref<640x1024xbf16, #tpu.memory_space<vmem>>, vector<640x1024xbf16>
    %cst = arith.constant dense<0.000000e+00> : vector<8x1024xf32>
    %7 = tpu.matmul %5, %6, %cst {dimension_numbers = #tpu.dot_dimension_numbers<[1], [0], [0], [1], [0, 0, 1, 1], [], []>} : vector<8x640xbf16>, vector<640x1024xbf16>, vector<8x1024xf32> -> vector<8x1024xf32>
    %8 = arith.addf %3, %7 : vector<8x1024xf32>
    %c0_6 = arith.constant 0 : index
    %c0_7 = arith.constant 0 : index
    %9 = vector.load %arg7[%c0_6, %c0_7] : memref<8x1024xf32, #tpu.memory_space<vmem>>, vector<8x1024xf32>
    tpu.vector_store %arg7[%c0_6, %c0_7], %8 {strides = array<i32>} : memref<8x1024xf32, #tpu.memory_space<vmem>>, vector<8x1024xf32>,
    %c4_i32 = arith.constant 4 : i32
    %10 = arith.cmpi eq, %arg0, %c4_i32 : i32
    %11 = arith.extui %10 : i1 to i32
    %c0_i32_8 = arith.constant 0 : i32
    %12 = arith.cmpi ne, %11, %c0_i32_8 : i32
    scf.if %12 {
      %c0_9 = arith.constant 0 : index
      %c0_10 = arith.constant 0 : index
      %13 = vector.load %arg7[%c0_9, %c0_10] : memref<8x1024xf32, #tpu.memory_space<vmem>>, vector<8x1024xf32>
      %c0_11 = arith.constant 0 : index
      %c0_12 = arith.constant 0 : index
      %14 = vector.load %arg3[%c0_11, %c0_12] : memref<1x1024xf32, #tpu.memory_space<vmem>>, vector<1x1024xf32>
      %15 = vector.broadcast %14 : vector<1x1024xf32> to vector<8x1024xf32>
      %16 = arith.addf %13, %15 : vector<8x1024xf32>
      %cst_13 = arith.constant 0.000000e+00 : f32
      %17 = vector.broadcast %cst_13 : f32 to vector<8x1024xf32>
      %18 = arith.maximumf %16, %17 : vector<8x1024xf32>
      %19 = arith.truncf %18 : vector<8x1024xf32> to vector<8x1024xbf16>
      %c0_14 = arith.constant 0 : index
      %c0_15 = arith.constant 0 : index
      %20 = vector.load %arg4[%c0_14, %c0_15] : memref<1024x128xbf16, #tpu.memory_space<vmem>>, vector<1024x128xbf16>
      %cst_16 = arith.constant dense<0.000000e+00> : vector<8x128xf32>
      %21 = tpu.matmul %19, %20, %cst_16 {dimension_numbers = #tpu.dot_dimension_numbers<[1], [0], [0], [1], [0, 0, 1, 1], [], []>} : vector<8x1024xbf16>, vector<1024x128xbf16>, vector<8x128xf32> -> vector<8x128xf32>
      %c0_17 = arith.constant 0 : index
      %c0_18 = arith.constant 0 : index
      %22 = vector.load %arg5[%c0_17, %c0_18] : memref<1x128xf32, #tpu.memory_space<vmem>>, vector<1x128xf32>
      %23 = vector.broadcast %22 : vector<1x128xf32> to vector<8x128xf32>
      %24 = arith.addf %21, %23 : vector<8x128xf32>
      %25 = tpu.iota {dimensions = array<i32: 1>} : vector<8x128xi32>
      %c6_i32 = arith.constant 6 : i32
      %26 = vector.broadcast %c6_i32 : i32 to vector<8x128xi32>
      %27 = arith.cmpi slt, %25, %26 : vector<8x128xi32>
      %cst_19 = arith.constant 0.000000e+00 : f32
      %28 = vector.broadcast %cst_19 : f32 to vector<8x128xf32>
      %29 = arith.select %27, %24, %28 : vector<8x128xi1>, vector<8x128xf32>
      %cst_20 = arith.constant dense<0.000000e+00> : vector<8xf32>
      %30 = vector.multi_reduction <add>, %29, %cst_20 [1] : vector<8x128xf32> to vector<8xf32>
      %31 = vector.shape_cast %30 : vector<8xf32> to vector<8x1xf32>
      %c6_i32_21 = arith.constant 6 : i32
      %32 = vector.broadcast %c6_i32_21 : i32 to vector<8x128xi32>
      %33 = arith.cmpi eq, %25, %32 : vector<8x128xi32>
      %cst_22 = arith.constant 0.000000e+00 : f32
      %34 = vector.broadcast %cst_22 : f32 to vector<8x128xf32>
      %35 = arith.select %33, %24, %34 : vector<8x128xi1>, vector<8x128xf32>
      %cst_23 = arith.constant dense<0.000000e+00> : vector<8xf32>
      %36 = vector.multi_reduction <add>, %35, %cst_23 [1] : vector<8x128xf32> to vector<8xf32>
      %37 = vector.shape_cast %36 : vector<8xf32> to vector<8x1xf32>
      %cst_24 = arith.constant 0.166666672 : f32
      %38 = vector.broadcast %cst_24 : f32 to vector<8x1xf32>
      %39 = arith.mulf %31, %38 : vector<8x1xf32>
      %40 = arith.subf %39, %37 : vector<8x1xf32>
      %41 = vector.broadcast %40 : vector<8x1xf32> to vector<8x128xf32>
      %42 = arith.subf %24, %41 : vector<8x128xf32>
      %c0_25 = arith.constant 0 : index
      %c0_26 = arith.constant 0 : index
      %43 = vector.load %arg6[%c0_25, %c0_26] : memref<8x128xf32, #tpu.memory_space<vmem>>, vector<8x128xf32>
      tpu.vector_store %arg6[%c0_25, %c0_26], %42 {strides = array<i32>} : memref<8x128xf32, #tpu.memory_space<vmem>>, vector<8x128xf32>,
    } else {
    }
    return
  }
  func.func @transform_0(%arg0: i32) -> (i32, i32) {
    %c0_i32 = arith.constant 0 : i32
    %c0_i32_0 = arith.constant 0 : i32
    return %c0_i32, %arg0 : i32, i32
  }
  func.func @transform_1(%arg0: i32) -> (i32, i32) {
    %c0_i32 = arith.constant 0 : i32
    %c0_i32_0 = arith.constant 0 : i32
    return %arg0, %c0_i32 : i32, i32
  }
  func.func @transform_2(%arg0: i32) -> (i32, i32) {
    %c0_i32 = arith.constant 0 : i32
    %c0_i32_0 = arith.constant 0 : i32
    %c0_i32_1 = arith.constant 0 : i32
    return %c0_i32, %c0_i32_0 : i32, i32
  }
  func.func @transform_3(%arg0: i32) -> (i32, i32) {
    %c0_i32 = arith.constant 0 : i32
    %c0_i32_0 = arith.constant 0 : i32
    %c0_i32_1 = arith.constant 0 : i32
    return %c0_i32, %c0_i32_0 : i32, i32
  }
  func.func @transform_4(%arg0: i32) -> (i32, i32) {
    %c0_i32 = arith.constant 0 : i32
    %c0_i32_0 = arith.constant 0 : i32
    %c0_i32_1 = arith.constant 0 : i32
    return %c0_i32, %c0_i32_0 : i32, i32
  }
  func.func @transform_5(%arg0: i32) -> (i32, i32) {
    %c0_i32 = arith.constant 0 : i32
    %c0_i32_0 = arith.constant 0 : i32
    %c0_i32_1 = arith.constant 0 : i32
    return %c0_i32, %c0_i32_0 : i32, i32
  }
}

</mosaic_0001>

<bundles_post_ra>
// kernel: dueling_dqn_forward.4
= control target key start
LH: loop header
LB: loop body
LE: loop exit
PB: predicated region body
PF: predicated region fallthrough
CT: control target
= control target key end

     0   :  { %v1153_v0 = vmov 0   ;;  %s2259_s1 = inlined_call_operand.vmem [shape: bf16[256,128], index: 1, kind: input, shape index: {}]   ;;  %s2260_s0 = inlined_call_operand.vmem [shape: f32[800,256], index: 0, kind: input, shape index: {}]   ;;  %s2261_s2 = inlined_call_operand.vmem [shape: f32[1,128], index: 2, kind: input, shape index: {}]   ;;  %s2262_s3 = inlined_call_operand.vmem [shape: f32[800,128], index: 3, kind: output, shape index: {}]  }
   0x1   :  { %450 = vmatprep.subr.bf16.mxu0 %v1153_v0  ;;  %1104 = vmatprep.subr.bf16.mxu1 %v1153_v0  ;;  %v1137_v1 = vld [vmem:[%s2259_s1] sm:$0xff]   ;;  %v1138_v2 = vld [vmem:[%s2259_s1 + $0x8] sm:$0xff]   ;;  %v1139_v3 = vld [vmem:[%s2259_s1 + $0x10] sm:$0xff]  }
   0x2   :  { %451 = vmatpush1.bf16.msra.mxu0 %v1137_v1  ;;  %1120 = vmatpush1.bf16.msra.mxu1 %v1137_v1  ;;  %v1140_v4 = vld [vmem:[%s2259_s1 + $0x18] sm:$0xff]   ;;  %v1141_v5 = vld [vmem:[%s2259_s1 + $0x20] sm:$0xff]   ;;  %v16_v6 = vld [vmem:[%s2260_s0 + $0x8] sm:$0xff] }
   0x3   :  { %452 = vmatprep.subr.bf16.mxu0 %v1153_v0  ;;  %1105 = vmatprep.subr.bf16.mxu1 %v1153_v0  ;;  %v18_v7 = vld [vmem:[%s2260_s0 + $0x18] sm:$0xff]  ;;  %v116_v8 = vld [vmem:[%s2260_s0 + $0x328] sm:$0xff]  ;;  %v1143_v13 = vld [vmem:[%s2259_s1 + $0x30] sm:$0xff]  }
   0x4   :  { %v216_v9 = vpack.c.bf16 %v18_v7, %v16_v6  ;;  %v118_v10 = vld [vmem:[%s2260_s0 + $0x338] sm:$0xff]  ;;  %v1142_v11 = vld [vmem:[%s2259_s1 + $0x28] sm:$0xff]   ;;  %v1145_v15 = vld [vmem:[%s2259_s1 + $0x40] sm:$0xff]  }
   0x5   :  { %v266_v12 = vpack.c.bf16 %v118_v10, %v116_v8  ;;  %v1144_v14 = vld [vmem:[%s2259_s1 + $0x38] sm:$0xff]   ;;  %v1146_v16 = vld [vmem:[%s2259_s1 + $0x48] sm:$0xff]   ;;  %v1147_v17 = vld [vmem:[%s2259_s1 + $0x50] sm:$0xff]  }
   0x6   :  { %453 = vmatpush1.bf16.msra.mxu0 %v1138_v2  ;;  %1121 = vmatpush1.bf16.msra.mxu1 %v1138_v2  ;;  %v1148_v18 = vld [vmem:[%s2259_s1 + $0x58] sm:$0xff]   ;;  %v1149_v19 = vld [vmem:[%s2259_s1 + $0x60] sm:$0xff]   ;;  %v1150_v20 = vld [vmem:[%s2259_s1 + $0x68] sm:$0xff]  }
   0x7   :  { %454 = vmatprep.subr.bf16.mxu0 %v1153_v0  ;;  %1106 = vmatprep.subr.bf16.mxu1 %v1153_v0  ;;  %v1151_v21 = vld [vmem:[%s2259_s1 + $0x70] sm:$0xff]   ;;  %v1152_v22 = vld [vmem:[%s2259_s1 + $0x78] sm:$0xff]   ;;  %v15_v23 = vld [vmem:[%s2260_s0] sm:$0xff] }
   0x8   :  { %482 = vmatprep.mubr.bf16.mxu0 %v216_v9  ;;  %682 = vmatprep.mubr.bf16.mxu1 %v266_v12  ;;  %v17_v24 = vld [vmem:[%s2260_s0 + $0x10] sm:$0xff]  ;;  %v115_v25 = vld [vmem:[%s2260_s0 + $0x320] sm:$0xff]  ;;  %v20_v27 = vld [vmem:[%s2260_s0 + $0x28] sm:$0xff] }
   0x9   :  { %v117_v26 = vld [vmem:[%s2260_s0 + $0x330] sm:$0xff]  ;;  %v22_v28 = vld [vmem:[%s2260_s0 + $0x38] sm:$0xff]  ;;  %v120_v29 = vld [vmem:[%s2260_s0 + $0x348] sm:$0xff]  ;;  %v215_v31 = vpack.c.bf16 %v17_v24, %v15_v23 }
   0xa   :  { %455 = vmatpush1.bf16.msra.mxu0 %v1139_v3  ;;  %1122 = vmatpush1.bf16.msra.mxu1 %v1139_v3  ;;  %v122_v30 = vld [vmem:[%s2260_s0 + $0x358] sm:$0xff]  ;;  %v265_v32 = vpack.c.bf16 %v117_v26, %v115_v25  ;;  %v218_v33 = vpack.c.bf16 %v22_v28, %v20_v27  ;;  %v19_v35 = vld [vmem:[%s2260_s0 + $0x20] sm:$0xff]  ;;  %v21_v36 = vld [vmem:[%s2260_s0 + $0x30] sm:$0xff] }
   0xb   :  { %456 = vmatprep.subr.bf16.mxu0 %v1153_v0  ;;  %1107 = vmatprep.subr.bf16.mxu1 %v1153_v0  ;;  %v268_v34 = vpack.c.bf16 %v122_v30, %v120_v29  ;;  %v119_v37 = vld [vmem:[%s2260_s0 + $0x340] sm:$0xff]  ;;  %v121_v38 = vld [vmem:[%s2260_s0 + $0x350] sm:$0xff]  ;;  %v24_v39 = vld [vmem:[%s2260_s0 + $0x48] sm:$0xff]  ;;  %v217_v43 = vpack.c.bf16 %v21_v36, %v19_v35 }
   0xc   :  { %v26_v40 = vld [vmem:[%s2260_s0 + $0x58] sm:$0xff]  ;;  %v124_v41 = vld [vmem:[%s2260_s0 + $0x368] sm:$0xff]  ;;  %v267_v44 = vpack.c.bf16 %v121_v38, %v119_v37  ;;  %v23_v47 = vld [vmem:[%s2260_s0 + $0x40] sm:$0xff] }
   0xd   :  { %v126_v42 = vld [vmem:[%s2260_s0 + $0x378] sm:$0xff]  ;;  %v220_v45 = vpack.c.bf16 %v26_v40, %v24_v39  ;;  %v25_v48 = vld [vmem:[%s2260_s0 + $0x50] sm:$0xff]  ;;  %v123_v49 = vld [vmem:[%s2260_s0 + $0x360] sm:$0xff] }
   0xe   :  { %457 = vmatpush1.bf16.msra.mxu0 %v1140_v4  ;;  %1123 = vmatpush1.bf16.msra.mxu1 %v1140_v4  ;;  %v270_v46 = vpack.c.bf16 %v126_v42, %v124_v41  ;;  %v125_v50 = vld [vmem:[%s2260_s0 + $0x370] sm:$0xff]  ;;  %v28_v51 = vld [vmem:[%s2260_s0 + $0x68] sm:$0xff]  ;;  %v30_v52 = vld [vmem:[%s2260_s0 + $0x78] sm:$0xff]  ;;  %v219_v55 = vpack.c.bf16 %v25_v48, %v23_v47 }
   0xf   :  { %458 = vmatprep.subr.bf16.mxu0 %v1153_v0  ;;  %1108 = vmatprep.subr.bf16.mxu1 %v1153_v0  ;;  %v128_v53 = vld [vmem:[%s2260_s0 + $0x388] sm:$0xff]  ;;  %v130_v54 = vld [vmem:[%s2260_s0 + $0x398] sm:$0xff]  ;;  %v269_v56 = vpack.c.bf16 %v125_v50, %v123_v49  ;;  %v222_v57 = vpack.c.bf16 %v30_v52, %v28_v51  ;;  %v27_v59 = vld [vmem:[%s2260_s0 + $0x60] sm:$0xff] }
  0x10   :  { %v272_v58 = vpack.c.bf16 %v130_v54, %v128_v53  ;;  %v29_v60 = vld [vmem:[%s2260_s0 + $0x70] sm:$0xff]  ;;  %v127_v61 = vld [vmem:[%s2260_s0 + $0x380] sm:$0xff]  ;;  %v32_v63 = vld [vmem:[%s2260_s0 + $0x88] sm:$0xff] }
  0x11   :  { %v129_v62 = vld [vmem:[%s2260_s0 + $0x390] sm:$0xff]  ;;  %v132_v1 = vld [vmem:[%s2260_s0 + $0x3a8] sm:$0xff]  ;;  %v134_v2 = vld [vmem:[%s2260_s0 + $0x3b8] sm:$0xff]  ;;  %v221_v3 = vpack.c.bf16 %v29_v60, %v27_v59 }
  0x12   :  { %459 = vmatpush1.bf16.msra.mxu0 %v1141_v5  ;;  %1124 = vmatpush1.bf16.msra.mxu1 %v1141_v5  ;;  %v271_v4 = vpack.c.bf16 %v129_v62, %v127_v61  ;;  %v274_v6 = vpack.c.bf16 %v134_v2, %v132_v1  ;;  %v31_v7 = vld [vmem:[%s2260_s0 + $0x80] sm:$0xff]  ;;  %v33_v8 = vld [vmem:[%s2260_s0 + $0x90] sm:$0xff]  ;;  %v38_v12 = vld [vmem:[%s2260_s0 + $0xb8] sm:$0xff] }
  0x13   :  { %460 = vmatprep.subr.bf16.mxu0 %v1153_v0  ;;  %1109 = vmatprep.subr.bf16.mxu1 %v1153_v0  ;;  %v131_v9 = vld [vmem:[%s2260_s0 + $0x3a0] sm:$0xff]  ;;  %v133_v10 = vld [vmem:[%s2260_s0 + $0x3b0] sm:$0xff]  ;;  %v40_v23 = vld [vmem:[%s2260_s0 + $0xc8] sm:$0xff] }
  0x14   :  { %v42_v24 = vld [vmem:[%s2260_s0 + $0xd8] sm:$0xff]  ;;  %v140_v25 = vld [vmem:[%s2260_s0 + $0x3e8] sm:$0xff] }
  0x15   :  { %v142_v26 = vld [vmem:[%s2260_s0 + $0x3f8] sm:$0xff]  ;;  %v228_v29 = vpack.c.bf16 %v42_v24, %v40_v23  ;;  %v44_v35 = vld [vmem:[%s2260_s0 + $0xe8] sm:$0xff] }
  0x16   :  { %461 = vmatpush1.bf16.msra.mxu0 %v1142_v11  ;;  %1125 = vmatpush1.bf16.msra.mxu1 %v1142_v11  ;;  %v36_v11 = vld [vmem:[%s2260_s0 + $0xa8] sm:$0xff]  ;;  %v278_v30 = vpack.c.bf16 %v142_v26, %v140_v25  ;;  %v46_v36 = vld [vmem:[%s2260_s0 + $0xf8] sm:$0xff] }
  0x17   :  { %462 = vmatprep.subr.bf16.mxu0 %v1153_v0  ;;  %1110 = vmatprep.subr.bf16.mxu1 %v1153_v0  ;;  %v144_v37 = vld [vmem:[%s2260_s0 + $0x408] sm:$0xff]  ;;  %v146_v38 = vld [vmem:[%s2260_s0 + $0x418] sm:$0xff]  ;;  %v230_v41 = vpack.c.bf16 %v46_v36, %v44_v35 }
  0x18   :  { %v280_v42 = vpack.c.bf16 %v146_v38, %v144_v37  ;;  %v48_v47 = vld [vmem:[%s2260_s0 + $0x108] sm:$0xff]  ;;  %v50_v48 = vld [vmem:[%s2260_s0 + $0x118] sm:$0xff] }
  0x19   :  { %v148_v49 = vld [vmem:[%s2260_s0 + $0x428] sm:$0xff]  ;;  %v150_v50 = vld [vmem:[%s2260_s0 + $0x438] sm:$0xff]  ;;  %v232_v53 = vpack.c.bf16 %v50_v48, %v48_v47 }
  0x1a   :  { %463 = vmatpush1.bf16.msra.mxu0 %v1143_v13  ;;  %1126 = vmatpush1.bf16.msra.mxu1 %v1143_v13  ;;  %v136_v13 = vld [vmem:[%s2260_s0 + $0x3c8] sm:$0xff]  ;;  %v282_v54 = vpack.c.bf16 %v150_v50, %v148_v49  ;;  %v54_v60 = vld [vmem:[%s2260_s0 + $0x138] sm:$0xff] }
  0x1b   :  { %464 = vmatprep.subr.bf16.mxu0 %v1153_v0  ;;  %1111 = vmatprep.subr.bf16.mxu1 %v1153_v0  ;;  %v52_v59 = vld [vmem:[%s2260_s0 + $0x128] sm:$0xff]  ;;  %v154_v62 = vld [vmem:[%s2260_s0 + $0x458] sm:$0xff] }
  0x1c   :  { %v152_v61 = vld [vmem:[%s2260_s0 + $0x448] sm:$0xff]  ;;  %v234_v1 = vpack.c.bf16 %v54_v60, %v52_v59 }
  0x1d   :  { %v284_v2 = vpack.c.bf16 %v154_v62, %v152_v61 }
  0x1e   :  { %465 = vmatpush1.bf16.msra.mxu0 %v1144_v14  ;;  %1127 = vmatpush1.bf16.msra.mxu1 %v1144_v14  ;;  %v138_v14 = vld [vmem:[%s2260_s0 + $0x3d8] sm:$0xff] }
  0x1f   :  { %466 = vmatprep.subr.bf16.mxu0 %v1153_v0  ;;  %1112 = vmatprep.subr.bf16.mxu1 %v1153_v0 }
  0x22   :  { %467 = vmatpush1.bf16.msra.mxu0 %v1145_v15  ;;  %1128 = vmatpush1.bf16.msra.mxu1 %v1145_v15  ;;  %v223_v15 = vpack.c.bf16 %v33_v8, %v31_v7  ;;  %v56_v7 = vld [vmem:[%s2260_s0 + $0x148] sm:$0xff]  ;;  %v58_v8 = vld [vmem:[%s2260_s0 + $0x158] sm:$0xff] }
  0x23   :  { %468 = vmatprep.subr.bf16.mxu0 %v1153_v0  ;;  %1113 = vmatprep.subr.bf16.mxu1 %v1153_v0 }
  0x26   :  { %469 = vmatpush1.bf16.msra.mxu0 %v1146_v16  ;;  %1129 = vmatpush1.bf16.msra.mxu1 %v1146_v16  ;;  %v273_v16 = vpack.c.bf16 %v133_v10, %v131_v9  ;;  %v156_v9 = vld [vmem:[%s2260_s0 + $0x468] sm:$0xff]  ;;  %v158_v10 = vld [vmem:[%s2260_s0 + $0x478] sm:$0xff] }
  0x27   :  { %470 = vmatprep.subr.bf16.mxu0 %v1153_v0  ;;  %1114 = vmatprep.subr.bf16.mxu1 %v1153_v0 }
  0x2a   :  { %471 = vmatpush1.bf16.msra.mxu0 %v1147_v17  ;;  %1130 = vmatpush1.bf16.msra.mxu1 %v1147_v17  ;;  %v226_v17 = vpack.c.bf16 %v38_v12, %v36_v11 }
  0x2b   :  { %472 = vmatprep.subr.bf16.mxu0 %v1153_v0  ;;  %1115 = vmatprep.subr.bf16.mxu1 %v1153_v0 }
  0x2e   :  { %473 = vmatpush1.bf16.msra.mxu0 %v1148_v18  ;;  %1131 = vmatpush1.bf16.msra.mxu1 %v1148_v18  ;;  %v276_v18 = vpack.c.bf16 %v138_v14, %v136_v13  ;;  %v236_v13 = vpack.c.bf16 %v58_v8, %v56_v7  ;;  %v286_v14 = vpack.c.bf16 %v158_v10, %v156_v9 }
  0x2f   :  { %474 = vmatprep.subr.bf16.mxu0 %v1153_v0  ;;  %1116 = vmatprep.subr.bf16.mxu1 %v1153_v0 }
  0x32   :  { %475 = vmatpush1.bf16.msra.mxu0 %v1149_v19  ;;  %1132 = vmatpush1.bf16.msra.mxu1 %v1149_v19  ;;  %v35_v19 = vld [vmem:[%s2260_s0 + $0xa0] sm:$0xff] }
  0x33   :  { %476 = vmatprep.subr.bf16.mxu0 %v1153_v0  ;;  %1117 = vmatprep.subr.bf16.mxu1 %v1153_v0 }
  0x36   :  { %477 = vmatpush1.bf16.msra.mxu0 %v1150_v20  ;;  %1133 = vmatpush1.bf16.msra.mxu1 %v1150_v20  ;;  %v37_v20 = vld [vmem:[%s2260_s0 + $0xb0] sm:$0xff] }
  0x37   :  { %478 = vmatprep.subr.bf16.mxu0 %v1153_v0  ;;  %1118 = vmatprep.subr.bf16.mxu1 %v1153_v0  ;;  %v225_v27 = vpack.c.bf16 %v37_v20, %v35_v19  ;;  %v60_v19 = vld [vmem:[%s2260_s0 + $0x168] sm:$0xff]  ;;  %v62_v20 = vld [vmem:[%s2260_s0 + $0x178] sm:$0xff] }
  0x38   :  { %v238_v25 = vpack.c.bf16 %v62_v20, %v60_v19 }
  0x3a   :  { %479 = vmatpush1.bf16.msra.mxu0 %v1151_v21  ;;  %1134 = vmatpush1.bf16.msra.mxu1 %v1151_v21  ;;  %v135_v21 = vld [vmem:[%s2260_s0 + $0x3c0] sm:$0xff] }
  0x3b   :  { %480 = vmatprep.subr.bf16.mxu0 %v1153_v0  ;;  %1119 = vmatprep.subr.bf16.mxu1 %v1153_v0  ;;  %v34_v0 = vld [vmem:[%s2260_s0 + $0x98] sm:$0xff] }
  0x3c   :  { %v224_v5 = vpack.c.bf16 %v34_v0, %v32_v63 }
  0x3e   :  { %481 = vmatpush1.bf16.msra.mxu0 %v1152_v22  ;;  %1135 = vmatpush1.bf16.msra.mxu1 %v1152_v22  ;;  %v137_v22 = vld [vmem:[%s2260_s0 + $0x3d0] sm:$0xff] }
  0x3f   :  { %v275_v28 = vpack.c.bf16 %v137_v22, %v135_v21  ;;  %v160_v21 = vld [vmem:[%s2260_s0 + $0x488] sm:$0xff]  ;;  %v162_v22 = vld [vmem:[%s2260_s0 + $0x498] sm:$0xff] }
  0x40   :  { %v288_v26 = vpack.c.bf16 %v162_v22, %v160_v21 }
  0x41   :  { %483 = vmatmul.mubr.bf16.vlgmr.msra.gmra.mrb[0].mxu0 %v215_v31  ;;  %683 = vmatmul.mubr.bf16.vlgmr.msra.gmra.mrb[0].mxu1 %v265_v32  ;;  %v39_v31 = vld [vmem:[%s2260_s0 + $0xc0] sm:$0xff]  ;;  %v41_v32 = vld [vmem:[%s2260_s0 + $0xd0] sm:$0xff] }
  0x42   :  { %490 = vmatprep.mubr.bf16.mxu0 %v218_v33  ;;  %690 = vmatprep.mubr.bf16.mxu1 %v268_v34  ;;  %v139_v33 = vld [vmem:[%s2260_s0 + $0x3e0] sm:$0xff]  ;;  %v141_v34 = vld [vmem:[%s2260_s0 + $0x3f0] sm:$0xff]  ;;  %v227_v39 = vpack.c.bf16 %v41_v32, %v39_v31  ;;  %v64_v31 = vld [vmem:[%s2260_s0 + $0x188] sm:$0xff] }
  0x43   :  { %v277_v40 = vpack.c.bf16 %v141_v34, %v139_v33  ;;  %v66_v32 = vld [vmem:[%s2260_s0 + $0x198] sm:$0xff]  ;;  %v164_v33 = vld [vmem:[%s2260_s0 + $0x4a8] sm:$0xff] }
  0x44   :  { %v166_v34 = vld [vmem:[%s2260_s0 + $0x4b8] sm:$0xff]  ;;  %v240_v37 = vpack.c.bf16 %v66_v32, %v64_v31 }
  0x45   :  { %v290_v38 = vpack.c.bf16 %v166_v34, %v164_v33 }
  0x49   :  { %491 = vmatmul.mubr.bf16.gmra.mrb[4].mxu0 %v217_v43  ;;  %691 = vmatmul.mubr.bf16.gmra.mrb[4].mxu1 %v267_v44  ;;  %v43_v43 = vld [vmem:[%s2260_s0 + $0xe0] sm:$0xff]  ;;  %v45_v44 = vld [vmem:[%s2260_s0 + $0xf0] sm:$0xff] }
  0x4a   :  { %498 = vmatprep.mubr.bf16.mxu0 %v220_v45  ;;  %698 = vmatprep.mubr.bf16.mxu1 %v270_v46  ;;  %v143_v45 = vld [vmem:[%s2260_s0 + $0x400] sm:$0xff]  ;;  %v145_v46 = vld [vmem:[%s2260_s0 + $0x410] sm:$0xff]  ;;  %v229_v51 = vpack.c.bf16 %v45_v44, %v43_v43  ;;  %v68_v43 = vld [vmem:[%s2260_s0 + $0x1a8] sm:$0xff] }
  0x4b   :  { %v279_v52 = vpack.c.bf16 %v145_v46, %v143_v45  ;;  %v70_v44 = vld [vmem:[%s2260_s0 + $0x1b8] sm:$0xff]  ;;  %v168_v45 = vld [vmem:[%s2260_s0 + $0x4c8] sm:$0xff] }
  0x4c   :  { %v170_v46 = vld [vmem:[%s2260_s0 + $0x4d8] sm:$0xff]  ;;  %v242_v49 = vpack.c.bf16 %v70_v44, %v68_v43 }
  0x4d   :  { %v292_v50 = vpack.c.bf16 %v170_v46, %v168_v45 }
  0x51   :  { %499 = vmatmul.mubr.bf16.gmra.mrb[8].mxu0 %v219_v55  ;;  %699 = vmatmul.mubr.bf16.gmra.mrb[8].mxu1 %v269_v56  ;;  %v47_v55 = vld [vmem:[%s2260_s0 + $0x100] sm:$0xff]  ;;  %v49_v56 = vld [vmem:[%s2260_s0 + $0x110] sm:$0xff] }
  0x52   :  { %506 = vmatprep.mubr.bf16.mxu0 %v222_v57  ;;  %706 = vmatprep.mubr.bf16.mxu1 %v272_v58  ;;  %v147_v57 = vld [vmem:[%s2260_s0 + $0x420] sm:$0xff]  ;;  %v149_v58 = vld [vmem:[%s2260_s0 + $0x430] sm:$0xff]  ;;  %v231_v63 = vpack.c.bf16 %v49_v56, %v47_v55  ;;  %v72_v55 = vld [vmem:[%s2260_s0 + $0x1c8] sm:$0xff] }
  0x53   :  { %v281_v0 = vpack.c.bf16 %v149_v58, %v147_v57  ;;  %v74_v56 = vld [vmem:[%s2260_s0 + $0x1d8] sm:$0xff]  ;;  %v172_v57 = vld [vmem:[%s2260_s0 + $0x4e8] sm:$0xff] }
  0x54   :  { %v174_v58 = vld [vmem:[%s2260_s0 + $0x4f8] sm:$0xff]  ;;  %v244_v61 = vpack.c.bf16 %v74_v56, %v72_v55 }
  0x55   :  { %v294_v62 = vpack.c.bf16 %v174_v58, %v172_v57 }
  0x59   :  { %507 = vmatmul.mubr.bf16.gmra.mrb[12].mxu0 %v221_v3  ;;  %707 = vmatmul.mubr.bf16.gmra.mrb[12].mxu1 %v271_v4  ;;  %v51_v3 = vld [vmem:[%s2260_s0 + $0x120] sm:$0xff]  ;;  %v53_v4 = vld [vmem:[%s2260_s0 + $0x130] sm:$0xff] }
  0x5a   :  { %514 = vmatprep.mubr.bf16.mxu0 %v224_v5  ;;  %714 = vmatprep.mubr.bf16.mxu1 %v274_v6  ;;  %v151_v5 = vld [vmem:[%s2260_s0 + $0x440] sm:$0xff]  ;;  %v153_v6 = vld [vmem:[%s2260_s0 + $0x450] sm:$0xff]  ;;  %v233_v11 = vpack.c.bf16 %v53_v4, %v51_v3  ;;  %v76_v3 = vld [vmem:[%s2260_s0 + $0x1e8] sm:$0xff] }
  0x5b   :  { %v283_v12 = vpack.c.bf16 %v153_v6, %v151_v5  ;;  %v78_v4 = vld [vmem:[%s2260_s0 + $0x1f8] sm:$0xff]  ;;  %v176_v5 = vld [vmem:[%s2260_s0 + $0x508] sm:$0xff] }
  0x5c   :  { %v178_v6 = vld [vmem:[%s2260_s0 + $0x518] sm:$0xff]  ;;  %v246_v9 = vpack.c.bf16 %v78_v4, %v76_v3 }
  0x5d   :  { %v296_v10 = vpack.c.bf16 %v178_v6, %v176_v5 }
  0x61   :  { %515 = vmatmul.mubr.bf16.gmra.mrb[16].mxu0 %v223_v15  ;;  %715 = vmatmul.mubr.bf16.gmra.mrb[16].mxu1 %v273_v16  ;;  %v55_v15 = vld [vmem:[%s2260_s0 + $0x140] sm:$0xff]  ;;  %v57_v16 = vld [vmem:[%s2260_s0 + $0x150] sm:$0xff] }
  0x62   :  { %522 = vmatprep.mubr.bf16.mxu0 %v226_v17  ;;  %722 = vmatprep.mubr.bf16.mxu1 %v276_v18  ;;  %v155_v17 = vld [vmem:[%s2260_s0 + $0x460] sm:$0xff]  ;;  %v157_v18 = vld [vmem:[%s2260_s0 + $0x470] sm:$0xff]  ;;  %v235_v23 = vpack.c.bf16 %v57_v16, %v55_v15  ;;  %v80_v15 = vld [vmem:[%s2260_s0 + $0x208] sm:$0xff] }
  0x63   :  { %v285_v24 = vpack.c.bf16 %v157_v18, %v155_v17  ;;  %v82_v16 = vld [vmem:[%s2260_s0 + $0x218] sm:$0xff]  ;;  %v180_v17 = vld [vmem:[%s2260_s0 + $0x528] sm:$0xff] }
  0x64   :  { %v182_v18 = vld [vmem:[%s2260_s0 + $0x538] sm:$0xff]  ;;  %v248_v21 = vpack.c.bf16 %v82_v16, %v80_v15 }
  0x65   :  { %v298_v22 = vpack.c.bf16 %v182_v18, %v180_v17 }
  0x69   :  { %523 = vmatmul.mubr.bf16.gmra.mrb[20].mxu0 %v225_v27  ;;  %723 = vmatmul.mubr.bf16.gmra.mrb[20].mxu1 %v275_v28  ;;  %v59_v27 = vld [vmem:[%s2260_s0 + $0x160] sm:$0xff]  ;;  %v61_v28 = vld [vmem:[%s2260_s0 + $0x170] sm:$0xff] }
  0x6a   :  { %530 = vmatprep.mubr.bf16.mxu0 %v228_v29  ;;  %730 = vmatprep.mubr.bf16.mxu1 %v278_v30  ;;  %v159_v29 = vld [vmem:[%s2260_s0 + $0x480] sm:$0xff]  ;;  %v161_v30 = vld [vmem:[%s2260_s0 + $0x490] sm:$0xff]  ;;  %v237_v35 = vpack.c.bf16 %v61_v28, %v59_v27  ;;  %v84_v27 = vld [vmem:[%s2260_s0 + $0x228] sm:$0xff] }
  0x6b   :  { %v287_v36 = vpack.c.bf16 %v161_v30, %v159_v29  ;;  %v86_v28 = vld [vmem:[%s2260_s0 + $0x238] sm:$0xff]  ;;  %v184_v29 = vld [vmem:[%s2260_s0 + $0x548] sm:$0xff] }
  0x6c   :  { %v186_v30 = vld [vmem:[%s2260_s0 + $0x558] sm:$0xff]  ;;  %v250_v33 = vpack.c.bf16 %v86_v28, %v84_v27 }
  0x6d   :  { %v300_v34 = vpack.c.bf16 %v186_v30, %v184_v29 }
  0x71   :  { %531 = vmatmul.mubr.bf16.gmra.mrb[24].mxu0 %v227_v39  ;;  %731 = vmatmul.mubr.bf16.gmra.mrb[24].mxu1 %v277_v40  ;;  %v63_v39 = vld [vmem:[%s2260_s0 + $0x180] sm:$0xff]  ;;  %v65_v40 = vld [vmem:[%s2260_s0 + $0x190] sm:$0xff] }
  0x72   :  { %538 = vmatprep.mubr.bf16.mxu0 %v230_v41  ;;  %738 = vmatprep.mubr.bf16.mxu1 %v280_v42  ;;  %v163_v41 = vld [vmem:[%s2260_s0 + $0x4a0] sm:$0xff]  ;;  %v165_v42 = vld [vmem:[%s2260_s0 + $0x4b0] sm:$0xff]  ;;  %v239_v47 = vpack.c.bf16 %v65_v40, %v63_v39  ;;  %v88_v39 = vld [vmem:[%s2260_s0 + $0x248] sm:$0xff] }
  0x73   :  { %v289_v48 = vpack.c.bf16 %v165_v42, %v163_v41  ;;  %v90_v40 = vld [vmem:[%s2260_s0 + $0x258] sm:$0xff]  ;;  %v188_v41 = vld [vmem:[%s2260_s0 + $0x568] sm:$0xff] }
  0x74   :  { %v190_v42 = vld [vmem:[%s2260_s0 + $0x578] sm:$0xff]  ;;  %v252_v45 = vpack.c.bf16 %v90_v40, %v88_v39 }
  0x75   :  { %v302_v46 = vpack.c.bf16 %v190_v42, %v188_v41 }
  0x79   :  { %539 = vmatmul.mubr.bf16.gmra.mrb[28].mxu0 %v229_v51  ;;  %739 = vmatmul.mubr.bf16.gmra.mrb[28].mxu1 %v279_v52  ;;  %v67_v51 = vld [vmem:[%s2260_s0 + $0x1a0] sm:$0xff]  ;;  %v69_v52 = vld [vmem:[%s2260_s0 + $0x1b0] sm:$0xff] }
  0x7a   :  { %546 = vmatprep.mubr.bf16.mxu0 %v232_v53  ;;  %746 = vmatprep.mubr.bf16.mxu1 %v282_v54  ;;  %v167_v53 = vld [vmem:[%s2260_s0 + $0x4c0] sm:$0xff]  ;;  %v169_v54 = vld [vmem:[%s2260_s0 + $0x4d0] sm:$0xff]  ;;  %v241_v59 = vpack.c.bf16 %v69_v52, %v67_v51  ;;  %v92_v51 = vld [vmem:[%s2260_s0 + $0x268] sm:$0xff] }
  0x7b   :  { %v291_v60 = vpack.c.bf16 %v169_v54, %v167_v53  ;;  %v94_v52 = vld [vmem:[%s2260_s0 + $0x278] sm:$0xff]  ;;  %v192_v53 = vld [vmem:[%s2260_s0 + $0x588] sm:$0xff] }
  0x7c   :  { %v194_v54 = vld [vmem:[%s2260_s0 + $0x598] sm:$0xff]  ;;  %v254_v57 = vpack.c.bf16 %v94_v52, %v92_v51 }
  0x7d   :  { %v304_v58 = vpack.c.bf16 %v194_v54, %v192_v53 }
  0x81   :  { %547 = vmatmul.mubr.bf16.gmra.mrb[32].mxu0 %v231_v63  ;;  %747 = vmatmul.mubr.bf16.gmra.mrb[32].mxu1 %v281_v0  ;;  %v71_v63 = vld [vmem:[%s2260_s0 + $0x1c0] sm:$0xff]  ;;  %v73_v0 = vld [vmem:[%s2260_s0 + $0x1d0] sm:$0xff] }
  0x82   :  { %554 = vmatprep.mubr.bf16.mxu0 %v234_v1  ;;  %754 = vmatprep.mubr.bf16.mxu1 %v284_v2  ;;  %v171_v1 = vld [vmem:[%s2260_s0 + $0x4e0] sm:$0xff]  ;;  %v173_v2 = vld [vmem:[%s2260_s0 + $0x4f0] sm:$0xff]  ;;  %v243_v7 = vpack.c.bf16 %v73_v0, %v71_v63  ;;  %v96_v63 = vld [vmem:[%s2260_s0 + $0x288] sm:$0xff] }
  0x83   :  { %v293_v8 = vpack.c.bf16 %v173_v2, %v171_v1  ;;  %v98_v0 = vld [vmem:[%s2260_s0 + $0x298] sm:$0xff]  ;;  %v196_v1 = vld [vmem:[%s2260_s0 + $0x5a8] sm:$0xff] }
  0x84   :  { %v198_v2 = vld [vmem:[%s2260_s0 + $0x5b8] sm:$0xff]  ;;  %v256_v5 = vpack.c.bf16 %v98_v0, %v96_v63 }
  0x85   :  { %v306_v6 = vpack.c.bf16 %v198_v2, %v196_v1 }
  0x89   :  { %555 = vmatmul.mubr.bf16.gmra.mrb[36].mxu0 %v233_v11  ;;  %755 = vmatmul.mubr.bf16.gmra.mrb[36].mxu1 %v283_v12  ;;  %v75_v11 = vld [vmem:[%s2260_s0 + $0x1e0] sm:$0xff]  ;;  %v77_v12 = vld [vmem:[%s2260_s0 + $0x1f0] sm:$0xff] }
  0x8a   :  { %562 = vmatprep.mubr.bf16.mxu0 %v236_v13  ;;  %762 = vmatprep.mubr.bf16.mxu1 %v286_v14  ;;  %v175_v13 = vld [vmem:[%s2260_s0 + $0x500] sm:$0xff]  ;;  %v177_v14 = vld [vmem:[%s2260_s0 + $0x510] sm:$0xff]  ;;  %v245_v19 = vpack.c.bf16 %v77_v12, %v75_v11  ;;  %v100_v11 = vld [vmem:[%s2260_s0 + $0x2a8] sm:$0xff] }
  0x8b   :  { %v295_v20 = vpack.c.bf16 %v177_v14, %v175_v13  ;;  %v102_v12 = vld [vmem:[%s2260_s0 + $0x2b8] sm:$0xff]  ;;  %v200_v13 = vld [vmem:[%s2260_s0 + $0x5c8] sm:$0xff] }
  0x8c   :  { %v202_v14 = vld [vmem:[%s2260_s0 + $0x5d8] sm:$0xff]  ;;  %v258_v17 = vpack.c.bf16 %v102_v12, %v100_v11 }
  0x8d   :  { %v308_v18 = vpack.c.bf16 %v202_v14, %v200_v13 }
  0x91   :  { %563 = vmatmul.mubr.bf16.gmra.mrb[40].mxu0 %v235_v23  ;;  %763 = vmatmul.mubr.bf16.gmra.mrb[40].mxu1 %v285_v24  ;;  %v79_v23 = vld [vmem:[%s2260_s0 + $0x200] sm:$0xff]  ;;  %v81_v24 = vld [vmem:[%s2260_s0 + $0x210] sm:$0xff] }
  0x92   :  { %570 = vmatprep.mubr.bf16.mxu0 %v238_v25  ;;  %770 = vmatprep.mubr.bf16.mxu1 %v288_v26  ;;  %v179_v25 = vld [vmem:[%s2260_s0 + $0x520] sm:$0xff]  ;;  %v181_v26 = vld [vmem:[%s2260_s0 + $0x530] sm:$0xff]  ;;  %v247_v31 = vpack.c.bf16 %v81_v24, %v79_v23  ;;  %v104_v23 = vld [vmem:[%s2260_s0 + $0x2c8] sm:$0xff] }
  0x93   :  { %v297_v32 = vpack.c.bf16 %v181_v26, %v179_v25  ;;  %v106_v24 = vld [vmem:[%s2260_s0 + $0x2d8] sm:$0xff]  ;;  %v204_v25 = vld [vmem:[%s2260_s0 + $0x5e8] sm:$0xff] }
  0x94   :  { %v206_v26 = vld [vmem:[%s2260_s0 + $0x5f8] sm:$0xff]  ;;  %v260_v29 = vpack.c.bf16 %v106_v24, %v104_v23 }
  0x95   :  { %v310_v30 = vpack.c.bf16 %v206_v26, %v204_v25 }
  0x99   :  { %571 = vmatmul.mubr.bf16.gmra.mrb[44].mxu0 %v237_v35  ;;  %771 = vmatmul.mubr.bf16.gmra.mrb[44].mxu1 %v287_v36  ;;  %v83_v35 = vld [vmem:[%s2260_s0 + $0x220] sm:$0xff]  ;;  %v85_v36 = vld [vmem:[%s2260_s0 + $0x230] sm:$0xff] }
  0x9a   :  { %578 = vmatprep.mubr.bf16.mxu0 %v240_v37  ;;  %778 = vmatprep.mubr.bf16.mxu1 %v290_v38  ;;  %v183_v37 = vld [vmem:[%s2260_s0 + $0x540] sm:$0xff]  ;;  %v185_v38 = vld [vmem:[%s2260_s0 + $0x550] sm:$0xff]  ;;  %v249_v43 = vpack.c.bf16 %v85_v36, %v83_v35  ;;  %v108_v35 = vld [vmem:[%s2260_s0 + $0x2e8] sm:$0xff] }
  0x9b   :  { %v299_v44 = vpack.c.bf16 %v185_v38, %v183_v37  ;;  %v110_v36 = vld [vmem:[%s2260_s0 + $0x2f8] sm:$0xff]  ;;  %v208_v37 = vld [vmem:[%s2260_s0 + $0x608] sm:$0xff] }
  0x9c   :  { %v210_v38 = vld [vmem:[%s2260_s0 + $0x618] sm:$0xff]  ;;  %v262_v41 = vpack.c.bf16 %v110_v36, %v108_v35 }
  0x9d   :  { %v312_v42 = vpack.c.bf16 %v210_v38, %v208_v37 }
  0xa1   :  { %579 = vmatmul.mubr.bf16.gmra.mrb[48].mxu0 %v239_v47  ;;  %779 = vmatmul.mubr.bf16.gmra.mrb[48].mxu1 %v289_v48  ;;  %v87_v47 = vld [vmem:[%s2260_s0 + $0x240] sm:$0xff]  ;;  %v89_v48 = vld [vmem:[%s2260_s0 + $0x250] sm:$0xff] }
  0xa2   :  { %586 = vmatprep.mubr.bf16.mxu0 %v242_v49  ;;  %786 = vmatprep.mubr.bf16.mxu1 %v292_v50  ;;  %v187_v49 = vld [vmem:[%s2260_s0 + $0x560] sm:$0xff]  ;;  %v189_v50 = vld [vmem:[%s2260_s0 + $0x570] sm:$0xff]  ;;  %v251_v55 = vpack.c.bf16 %v89_v48, %v87_v47  ;;  %v112_v47 = vld [vmem:[%s2260_s0 + $0x308] sm:$0xff] }
  0xa3   :  { %v301_v56 = vpack.c.bf16 %v189_v50, %v187_v49  ;;  %v114_v48 = vld [vmem:[%s2260_s0 + $0x318] sm:$0xff]  ;;  %v212_v49 = vld [vmem:[%s2260_s0 + $0x628] sm:$0xff] }
  0xa4   :  { %v214_v50 = vld [vmem:[%s2260_s0 + $0x638] sm:$0xff]  ;;  %v264_v53 = vpack.c.bf16 %v114_v48, %v112_v47 }
  0xa5   :  { %v314_v54 = vpack.c.bf16 %v214_v50, %v212_v49 }
  0xa9   :  { %587 = vmatmul.mubr.bf16.gmra.mrb[52].mxu0 %v241_v59  ;;  %787 = vmatmul.mubr.bf16.gmra.mrb[52].mxu1 %v291_v60  ;;  %v91_v59 = vld [vmem:[%s2260_s0 + $0x260] sm:$0xff]  ;;  %v93_v60 = vld [vmem:[%s2260_s0 + $0x270] sm:$0xff] }
  0xaa   :  { %594 = vmatprep.mubr.bf16.mxu0 %v244_v61  ;;  %794 = vmatprep.mubr.bf16.mxu1 %v294_v62  ;;  %v191_v61 = vld [vmem:[%s2260_s0 + $0x580] sm:$0xff]  ;;  %v193_v62 = vld [vmem:[%s2260_s0 + $0x590] sm:$0xff]  ;;  %v253_v3 = vpack.c.bf16 %v93_v60, %v91_v59 }
  0xab   :  { %v303_v4 = vpack.c.bf16 %v193_v62, %v191_v61  ;;  %v1857_v61 = vld [vmem:[%s2261_s2] ss:$0 sm:$0xff] }
  0xb1   :  { %595 = vmatmul.mubr.bf16.gmra.mrb[56].mxu0 %v243_v7  ;;  %795 = vmatmul.mubr.bf16.gmra.mrb[56].mxu1 %v293_v8  ;;  %v95_v7 = vld [vmem:[%s2260_s0 + $0x280] sm:$0xff]  ;;  %v97_v8 = vld [vmem:[%s2260_s0 + $0x290] sm:$0xff] }
  0xb2   :  { %602 = vmatprep.mubr.bf16.mxu0 %v246_v9  ;;  %802 = vmatprep.mubr.bf16.mxu1 %v296_v10  ;;  %v195_v9 = vld [vmem:[%s2260_s0 + $0x5a0] sm:$0xff]  ;;  %v197_v10 = vld [vmem:[%s2260_s0 + $0x5b0] sm:$0xff]  ;;  %v255_v15 = vpack.c.bf16 %v97_v8, %v95_v7 }
  0xb3   :  { %v305_v16 = vpack.c.bf16 %v197_v10, %v195_v9 }
  0xb9   :  { %603 = vmatmul.mubr.bf16.gmra.mrb[60].mxu0 %v245_v19  ;;  %803 = vmatmul.mubr.bf16.gmra.mrb[60].mxu1 %v295_v20  ;;  %v99_v19 = vld [vmem:[%s2260_s0 + $0x2a0] sm:$0xff]  ;;  %v101_v20 = vld [vmem:[%s2260_s0 + $0x2b0] sm:$0xff] }
  0xba   :  { %610 = vmatprep.mubr.bf16.mxu0 %v248_v21  ;;  %810 = vmatprep.mubr.bf16.mxu1 %v298_v22  ;;  %v199_v21 = vld [vmem:[%s2260_s0 + $0x5c0] sm:$0xff]  ;;  %v201_v22 = vld [vmem:[%s2260_s0 + $0x5d0] sm:$0xff]  ;;  %v257_v27 = vpack.c.bf16 %v101_v20, %v99_v19 }
  0xbb   :  { %v307_v28 = vpack.c.bf16 %v201_v22, %v199_v21 }
  0xc1   :  { %611 = vmatmul.mubr.bf16.gmra.mrb[64].mxu0 %v247_v31  ;;  %811 = vmatmul.mubr.bf16.gmra.mrb[64].mxu1 %v297_v32  ;;  %v103_v31 = vld [vmem:[%s2260_s0 + $0x2c0] sm:$0xff]  ;;  %v105_v32 = vld [vmem:[%s2260_s0 + $0x2d0] sm:$0xff] }
  0xc2   :  { %618 = vmatprep.mubr.bf16.mxu0 %v250_v33  ;;  %818 = vmatprep.mubr.bf16.mxu1 %v300_v34  ;;  %v203_v33 = vld [vmem:[%s2260_s0 + $0x5e0] sm:$0xff]  ;;  %v205_v34 = vld [vmem:[%s2260_s0 + $0x5f0] sm:$0xff]  ;;  %v259_v39 = vpack.c.bf16 %v105_v32, %v103_v31 }
  0xc3   :  { %v309_v40 = vpack.c.bf16 %v205_v34, %v203_v33 }
  0xc9   :  { %619 = vmatmul.mubr.bf16.gmra.mrb[68].mxu0 %v249_v43  ;;  %819 = vmatmul.mubr.bf16.gmra.mrb[68].mxu1 %v299_v44  ;;  %v107_v43 = vld [vmem:[%s2260_s0 + $0x2e0] sm:$0xff]  ;;  %v109_v44 = vld [vmem:[%s2260_s0 + $0x2f0] sm:$0xff] }
  0xca   :  { %626 = vmatprep.mubr.bf16.mxu0 %v252_v45  ;;  %826 = vmatprep.mubr.bf16.mxu1 %v302_v46  ;;  %v207_v45 = vld [vmem:[%s2260_s0 + $0x600] sm:$0xff]  ;;  %v209_v46 = vld [vmem:[%s2260_s0 + $0x610] sm:$0xff]  ;;  %v261_v51 = vpack.c.bf16 %v109_v44, %v107_v43 }
  0xcb   :  { %v311_v52 = vpack.c.bf16 %v209_v46, %v207_v45 }
  0xd1   :  { %627 = vmatmul.mubr.bf16.gmra.mrb[72].mxu0 %v251_v55  ;;  %827 = vmatmul.mubr.bf16.gmra.mrb[72].mxu1 %v301_v56  ;;  %v111_v55 = vld [vmem:[%s2260_s0 + $0x300] sm:$0xff]  ;;  %v113_v56 = vld [vmem:[%s2260_s0 + $0x310] sm:$0xff] }
  0xd2   :  { %634 = vmatprep.mubr.bf16.mxu0 %v254_v57  ;;  %834 = vmatprep.mubr.bf16.mxu1 %v304_v58  ;;  %v211_v57 = vld [vmem:[%s2260_s0 + $0x620] sm:$0xff]  ;;  %v213_v58 = vld [vmem:[%s2260_s0 + $0x630] sm:$0xff]  ;;  %v263_v59 = vpack.c.bf16 %v113_v56, %v111_v55 }
  0xd3   :  { %v313_v60 = vpack.c.bf16 %v213_v58, %v211_v57 }
  0xd9   :  { %635 = vmatmul.mubr.bf16.gmra.mrb[76].mxu0 %v253_v3  ;;  %835 = vmatmul.mubr.bf16.gmra.mrb[76].mxu1 %v303_v4 }
  0xda   :  { %642 = vmatprep.mubr.bf16.mxu0 %v256_v5  ;;  %842 = vmatprep.mubr.bf16.mxu1 %v306_v6 }
  0xe1   :  { %643 = vmatmul.mubr.bf16.gmra.mrb[80].mxu0 %v255_v15  ;;  %843 = vmatmul.mubr.bf16.gmra.mrb[80].mxu1 %v305_v16 }
  0xe2   :  { %650 = vmatprep.mubr.bf16.mxu0 %v258_v17  ;;  %850 = vmatprep.mubr.bf16.mxu1 %v308_v18 }
  0xe9   :  { %651 = vmatmul.mubr.bf16.gmra.mrb[84].mxu0 %v257_v27  ;;  %851 = vmatmul.mubr.bf16.gmra.mrb[84].mxu1 %v307_v28 }
  0xea   :  { %658 = vmatprep.mubr.bf16.mxu0 %v260_v29  ;;  %858 = vmatprep.mubr.bf16.mxu1 %v310_v30 }
  0xf1   :  { %659 = vmatmul.mubr.bf16.gmra.mrb[88].mxu0 %v259_v39  ;;  %859 = vmatmul.mubr.bf16.gmra.mrb[88].mxu1 %v309_v40 }
  0xf2   :  { %666 = vmatprep.mubr.bf16.mxu0 %v262_v41  ;;  %866 = vmatprep.mubr.bf16.mxu1 %v312_v42 }
  0xf9   :  { %667 = vmatmul.mubr.bf16.gmra.mrb[92].mxu0 %v261_v51  ;;  %867 = vmatmul.mubr.bf16.gmra.mrb[92].mxu1 %v311_v52 }
  0xfa   :  { %674 = vmatprep.mubr.bf16.mxu0 %v264_v53  ;;  %874 = vmatprep.mubr.bf16.mxu1 %v314_v54 }
 0x101   :  { %675 = vmatmul.mubr.bf16.gmra.mrb[96].mxu0 %v263_v59  ;;  %875 = vmatmul.mubr.bf16.gmra.mrb[96].mxu1 %v313_v60 }
 0x114   :  { %v484_v62 = vpop.f32.mrb[0].mxu0  ;;  %v684_v63 = vpop.f32.mrb[0].mxu1 }
 0x115   :  { %v485_v0 = vadd.f32 %v1857_v61, %v484_v62  ;;  %v685_v1 = vadd.f32 %v1857_v61, %v684_v63  ;;  %v486_v2 = vpop.f32.mrb[1].mxu0  ;;  %v686_v3 = vpop.f32.mrb[1].mxu1 }
 0x116   :  { %v487_v4 = vpop.f32.mrb[2].mxu0  ;;  %v687_v5 = vpop.f32.mrb[2].mxu1 }
 0x117   :  { %v883_v6 = vmax.f32 %v485_v0, 0.0  ;;  %v933_v7 = vmax.f32 %v685_v1, 0.0  ;;  %v488_v8 = vadd.f32 %v1857_v61, %v487_v4  ;;  %v688_v9 = vadd.f32 %v1857_v61, %v687_v5  ;;  %v489_v10 = vpop.f32.mrb[3].mxu0  ;;  %v689_v11 = vpop.f32.mrb[3].mxu1 }
 0x119   :  { %983 = vst [vmem:[%s2262_s3] sm:$0xff] %v883_v6  ;;  %1033 = vst [vmem:[%s2262_s3 + $0x190] sm:$0xff] %v933_v7  ;;  %v884_v12 = vmax.f32 %v488_v8, 0.0  ;;  %v934_v13 = vmax.f32 %v688_v9, 0.0 }
 0x11b   :  { %984 = vst [vmem:[%s2262_s3 + $0x8] sm:$0xff] %v884_v12  ;;  %1034 = vst [vmem:[%s2262_s3 + $0x198] sm:$0xff] %v934_v13 }
 0x11c   :  { %v492_v14 = vpop.f32.mrb[4].mxu0  ;;  %v692_v15 = vpop.f32.mrb[4].mxu1 }
 0x11d   :  { %v493_v16 = vadd.f32 %v1857_v61, %v492_v14  ;;  %v693_v17 = vadd.f32 %v1857_v61, %v692_v15  ;;  %v494_v18 = vpop.f32.mrb[5].mxu0  ;;  %v694_v19 = vpop.f32.mrb[5].mxu1 }
 0x11e   :  { %v495_v20 = vpop.f32.mrb[6].mxu0  ;;  %v695_v21 = vpop.f32.mrb[6].mxu1 }
 0x11f   :  { %v885_v22 = vmax.f32 %v493_v16, 0.0  ;;  %v935_v23 = vmax.f32 %v693_v17, 0.0  ;;  %v496_v24 = vadd.f32 %v1857_v61, %v495_v20  ;;  %v696_v25 = vadd.f32 %v1857_v61, %v695_v21  ;;  %v497_v26 = vpop.f32.mrb[7].mxu0  ;;  %v697_v27 = vpop.f32.mrb[7].mxu1 }
 0x121   :  { %985 = vst [vmem:[%s2262_s3 + $0x10] sm:$0xff] %v885_v22  ;;  %1035 = vst [vmem:[%s2262_s3 + $0x1a0] sm:$0xff] %v935_v23  ;;  %v886_v28 = vmax.f32 %v496_v24, 0.0  ;;  %v936_v29 = vmax.f32 %v696_v25, 0.0 }
 0x123   :  { %986 = vst [vmem:[%s2262_s3 + $0x18] sm:$0xff] %v886_v28  ;;  %1036 = vst [vmem:[%s2262_s3 + $0x1a8] sm:$0xff] %v936_v29 }
 0x124   :  { %v500_v30 = vpop.f32.mrb[8].mxu0  ;;  %v700_v31 = vpop.f32.mrb[8].mxu1 }
 0x125   :  { %v501_v32 = vadd.f32 %v1857_v61, %v500_v30  ;;  %v701_v33 = vadd.f32 %v1857_v61, %v700_v31  ;;  %v502_v34 = vpop.f32.mrb[9].mxu0  ;;  %v702_v35 = vpop.f32.mrb[9].mxu1 }
 0x126   :  { %v503_v36 = vpop.f32.mrb[10].mxu0  ;;  %v703_v37 = vpop.f32.mrb[10].mxu1 }
 0x127   :  { %v887_v38 = vmax.f32 %v501_v32, 0.0  ;;  %v937_v39 = vmax.f32 %v701_v33, 0.0  ;;  %v504_v40 = vadd.f32 %v1857_v61, %v503_v36  ;;  %v704_v41 = vadd.f32 %v1857_v61, %v703_v37  ;;  %v505_v42 = vpop.f32.mrb[11].mxu0  ;;  %v705_v43 = vpop.f32.mrb[11].mxu1 }
 0x129   :  { %987 = vst [vmem:[%s2262_s3 + $0x20] sm:$0xff] %v887_v38  ;;  %1037 = vst [vmem:[%s2262_s3 + $0x1b0] sm:$0xff] %v937_v39  ;;  %v888_v44 = vmax.f32 %v504_v40, 0.0  ;;  %v938_v45 = vmax.f32 %v704_v41, 0.0 }
 0x12b   :  { %988 = vst [vmem:[%s2262_s3 + $0x28] sm:$0xff] %v888_v44  ;;  %1038 = vst [vmem:[%s2262_s3 + $0x1b8] sm:$0xff] %v938_v45 }
 0x12c   :  { %v508_v46 = vpop.f32.mrb[12].mxu0  ;;  %v708_v47 = vpop.f32.mrb[12].mxu1 }
 0x12d   :  { %v509_v48 = vadd.f32 %v1857_v61, %v508_v46  ;;  %v709_v49 = vadd.f32 %v1857_v61, %v708_v47  ;;  %v510_v50 = vpop.f32.mrb[13].mxu0  ;;  %v710_v51 = vpop.f32.mrb[13].mxu1 }
 0x12e   :  { %v511_v52 = vpop.f32.mrb[14].mxu0  ;;  %v711_v53 = vpop.f32.mrb[14].mxu1 }
 0x12f   :  { %v889_v54 = vmax.f32 %v509_v48, 0.0  ;;  %v939_v55 = vmax.f32 %v709_v49, 0.0  ;;  %v512_v56 = vadd.f32 %v1857_v61, %v511_v52  ;;  %v712_v57 = vadd.f32 %v1857_v61, %v711_v53  ;;  %v513_v58 = vpop.f32.mrb[15].mxu0  ;;  %v713_v59 = vpop.f32.mrb[15].mxu1 }
 0x131   :  { %989 = vst [vmem:[%s2262_s3 + $0x30] sm:$0xff] %v889_v54  ;;  %1039 = vst [vmem:[%s2262_s3 + $0x1c0] sm:$0xff] %v939_v55  ;;  %v890_v60 = vmax.f32 %v512_v56, 0.0  ;;  %v940_v62 = vmax.f32 %v712_v57, 0.0 }
 0x133   :  { %990 = vst [vmem:[%s2262_s3 + $0x38] sm:$0xff] %v890_v60  ;;  %1040 = vst [vmem:[%s2262_s3 + $0x1c8] sm:$0xff] %v940_v62 }
 0x134   :  { %v516_v63 = vpop.f32.mrb[16].mxu0  ;;  %v716_v0 = vpop.f32.mrb[16].mxu1 }
 0x135   :  { %v517_v1 = vadd.f32 %v1857_v61, %v516_v63  ;;  %v717_v2 = vadd.f32 %v1857_v61, %v716_v0  ;;  %v518_v3 = vpop.f32.mrb[17].mxu0  ;;  %v718_v4 = vpop.f32.mrb[17].mxu1 }
 0x136   :  { %v519_v5 = vpop.f32.mrb[18].mxu0  ;;  %v719_v6 = vpop.f32.mrb[18].mxu1 }
 0x137   :  { %v891_v7 = vmax.f32 %v517_v1, 0.0  ;;  %v941_v8 = vmax.f32 %v717_v2, 0.0  ;;  %v520_v9 = vadd.f32 %v1857_v61, %v519_v5  ;;  %v720_v10 = vadd.f32 %v1857_v61, %v719_v6  ;;  %v521_v11 = vpop.f32.mrb[19].mxu0  ;;  %v721_v12 = vpop.f32.mrb[19].mxu1 }
 0x139   :  { %991 = vst [vmem:[%s2262_s3 + $0x40] sm:$0xff] %v891_v7  ;;  %1041 = vst [vmem:[%s2262_s3 + $0x1d0] sm:$0xff] %v941_v8  ;;  %v892_v13 = vmax.f32 %v520_v9, 0.0  ;;  %v942_v14 = vmax.f32 %v720_v10, 0.0 }
 0x13b   :  { %992 = vst [vmem:[%s2262_s3 + $0x48] sm:$0xff] %v892_v13  ;;  %1042 = vst [vmem:[%s2262_s3 + $0x1d8] sm:$0xff] %v942_v14 }
 0x13c   :  { %v524_v15 = vpop.f32.mrb[20].mxu0  ;;  %v724_v16 = vpop.f32.mrb[20].mxu1 }
 0x13d   :  { %v525_v17 = vadd.f32 %v1857_v61, %v524_v15  ;;  %v725_v18 = vadd.f32 %v1857_v61, %v724_v16  ;;  %v526_v19 = vpop.f32.mrb[21].mxu0  ;;  %v726_v20 = vpop.f32.mrb[21].mxu1 }
 0x13e   :  { %v527_v21 = vpop.f32.mrb[22].mxu0  ;;  %v727_v22 = vpop.f32.mrb[22].mxu1 }
 0x13f   :  { %v893_v23 = vmax.f32 %v525_v17, 0.0  ;;  %v943_v24 = vmax.f32 %v725_v18, 0.0  ;;  %v528_v25 = vadd.f32 %v1857_v61, %v527_v21  ;;  %v728_v26 = vadd.f32 %v1857_v61, %v727_v22  ;;  %v529_v27 = vpop.f32.mrb[23].mxu0  ;;  %v729_v28 = vpop.f32.mrb[23].mxu1 }
 0x141   :  { %993 = vst [vmem:[%s2262_s3 + $0x50] sm:$0xff] %v893_v23  ;;  %1043 = vst [vmem:[%s2262_s3 + $0x1e0] sm:$0xff] %v943_v24  ;;  %v894_v29 = vmax.f32 %v528_v25, 0.0  ;;  %v944_v30 = vmax.f32 %v728_v26, 0.0 }
 0x143   :  { %994 = vst [vmem:[%s2262_s3 + $0x58] sm:$0xff] %v894_v29  ;;  %1044 = vst [vmem:[%s2262_s3 + $0x1e8] sm:$0xff] %v944_v30 }
 0x144   :  { %v532_v31 = vpop.f32.mrb[24].mxu0  ;;  %v732_v32 = vpop.f32.mrb[24].mxu1 }
 0x145   :  { %v533_v33 = vadd.f32 %v1857_v61, %v532_v31  ;;  %v733_v34 = vadd.f32 %v1857_v61, %v732_v32  ;;  %v534_v35 = vpop.f32.mrb[25].mxu0  ;;  %v734_v36 = vpop.f32.mrb[25].mxu1 }
 0x146   :  { %v535_v37 = vpop.f32.mrb[26].mxu0  ;;  %v735_v38 = vpop.f32.mrb[26].mxu1 }
 0x147   :  { %v895_v39 = vmax.f32 %v533_v33, 0.0  ;;  %v945_v40 = vmax.f32 %v733_v34, 0.0  ;;  %v536_v41 = vadd.f32 %v1857_v61, %v535_v37  ;;  %v736_v42 = vadd.f32 %v1857_v61, %v735_v38  ;;  %v537_v43 = vpop.f32.mrb[27].mxu0  ;;  %v737_v44 = vpop.f32.mrb[27].mxu1 }
 0x149   :  { %995 = vst [vmem:[%s2262_s3 + $0x60] sm:$0xff] %v895_v39  ;;  %1045 = vst [vmem:[%s2262_s3 + $0x1f0] sm:$0xff] %v945_v40  ;;  %v896_v45 = vmax.f32 %v536_v41, 0.0  ;;  %v946_v46 = vmax.f32 %v736_v42, 0.0 }
 0x14b   :  { %996 = vst [vmem:[%s2262_s3 + $0x68] sm:$0xff] %v896_v45  ;;  %1046 = vst [vmem:[%s2262_s3 + $0x1f8] sm:$0xff] %v946_v46 }
 0x14c   :  { %v540_v47 = vpop.f32.mrb[28].mxu0  ;;  %v740_v48 = vpop.f32.mrb[28].mxu1 }
 0x14d   :  { %v541_v49 = vadd.f32 %v1857_v61, %v540_v47  ;;  %v741_v50 = vadd.f32 %v1857_v61, %v740_v48  ;;  %v542_v51 = vpop.f32.mrb[29].mxu0  ;;  %v742_v52 = vpop.f32.mrb[29].mxu1 }
 0x14e   :  { %v543_v53 = vpop.f32.mrb[30].mxu0  ;;  %v743_v54 = vpop.f32.mrb[30].mxu1 }
 0x14f   :  { %v897_v55 = vmax.f32 %v541_v49, 0.0  ;;  %v947_v56 = vmax.f32 %v741_v50, 0.0  ;;  %v544_v57 = vadd.f32 %v1857_v61, %v543_v53  ;;  %v744_v58 = vadd.f32 %v1857_v61, %v743_v54  ;;  %v545_v59 = vpop.f32.mrb[31].mxu0  ;;  %v745_v60 = vpop.f32.mrb[31].mxu1 }
 0x151   :  { %997 = vst [vmem:[%s2262_s3 + $0x70] sm:$0xff] %v897_v55  ;;  %1047 = vst [vmem:[%s2262_s3 + $0x200] sm:$0xff] %v947_v56  ;;  %v898_v62 = vmax.f32 %v544_v57, 0.0  ;;  %v948_v63 = vmax.f32 %v744_v58, 0.0 }
 0x153   :  { %998 = vst [vmem:[%s2262_s3 + $0x78] sm:$0xff] %v898_v62  ;;  %1048 = vst [vmem:[%s2262_s3 + $0x208] sm:$0xff] %v948_v63 }
 0x154   :  { %v548_v0 = vpop.f32.mrb[32].mxu0  ;;  %v748_v1 = vpop.f32.mrb[32].mxu1 }
 0x155   :  { %v549_v2 = vadd.f32 %v1857_v61, %v548_v0  ;;  %v749_v3 = vadd.f32 %v1857_v61, %v748_v1  ;;  %v550_v4 = vpop.f32.mrb[33].mxu0  ;;  %v750_v5 = vpop.f32.mrb[33].mxu1 }
 0x156   :  { %v551_v6 = vpop.f32.mrb[34].mxu0  ;;  %v751_v7 = vpop.f32.mrb[34].mxu1 }
 0x157   :  { %v899_v8 = vmax.f32 %v549_v2, 0.0  ;;  %v949_v9 = vmax.f32 %v749_v3, 0.0  ;;  %v552_v10 = vadd.f32 %v1857_v61, %v551_v6  ;;  %v752_v11 = vadd.f32 %v1857_v61, %v751_v7  ;;  %v553_v12 = vpop.f32.mrb[35].mxu0  ;;  %v753_v13 = vpop.f32.mrb[35].mxu1 }
 0x159   :  { %999 = vst [vmem:[%s2262_s3 + $0x80] sm:$0xff] %v899_v8  ;;  %1049 = vst [vmem:[%s2262_s3 + $0x210] sm:$0xff] %v949_v9  ;;  %v900_v14 = vmax.f32 %v552_v10, 0.0  ;;  %v950_v15 = vmax.f32 %v752_v11, 0.0 }
 0x15b   :  { %1000 = vst [vmem:[%s2262_s3 + $0x88] sm:$0xff] %v900_v14  ;;  %1050 = vst [vmem:[%s2262_s3 + $0x218] sm:$0xff] %v950_v15 }
 0x15c   :  { %v556_v16 = vpop.f32.mrb[36].mxu0  ;;  %v756_v17 = vpop.f32.mrb[36].mxu1 }
 0x15d   :  { %v557_v18 = vadd.f32 %v1857_v61, %v556_v16  ;;  %v757_v19 = vadd.f32 %v1857_v61, %v756_v17  ;;  %v558_v20 = vpop.f32.mrb[37].mxu0  ;;  %v758_v21 = vpop.f32.mrb[37].mxu1 }
 0x15e   :  { %v559_v22 = vpop.f32.mrb[38].mxu0  ;;  %v759_v23 = vpop.f32.mrb[38].mxu1 }
 0x15f   :  { %v901_v24 = vmax.f32 %v557_v18, 0.0  ;;  %v951_v25 = vmax.f32 %v757_v19, 0.0  ;;  %v560_v26 = vadd.f32 %v1857_v61, %v559_v22  ;;  %v760_v27 = vadd.f32 %v1857_v61, %v759_v23  ;;  %v561_v28 = vpop.f32.mrb[39].mxu0  ;;  %v761_v29 = vpop.f32.mrb[39].mxu1 }
 0x161   :  { %1001 = vst [vmem:[%s2262_s3 + $0x90] sm:$0xff] %v901_v24  ;;  %1051 = vst [vmem:[%s2262_s3 + $0x220] sm:$0xff] %v951_v25  ;;  %v902_v30 = vmax.f32 %v560_v26, 0.0  ;;  %v952_v31 = vmax.f32 %v760_v27, 0.0 }
 0x163   :  { %1002 = vst [vmem:[%s2262_s3 + $0x98] sm:$0xff] %v902_v30  ;;  %1052 = vst [vmem:[%s2262_s3 + $0x228] sm:$0xff] %v952_v31 }
 0x164   :  { %v564_v32 = vpop.f32.mrb[40].mxu0  ;;  %v764_v33 = vpop.f32.mrb[40].mxu1 }
 0x165   :  { %v565_v34 = vadd.f32 %v1857_v61, %v564_v32  ;;  %v765_v35 = vadd.f32 %v1857_v61, %v764_v33  ;;  %v566_v36 = vpop.f32.mrb[41].mxu0  ;;  %v766_v37 = vpop.f32.mrb[41].mxu1 }
 0x166   :  { %v567_v38 = vpop.f32.mrb[42].mxu0  ;;  %v767_v39 = vpop.f32.mrb[42].mxu1 }
 0x167   :  { %v903_v40 = vmax.f32 %v565_v34, 0.0  ;;  %v953_v41 = vmax.f32 %v765_v35, 0.0  ;;  %v568_v42 = vadd.f32 %v1857_v61, %v567_v38  ;;  %v768_v43 = vadd.f32 %v1857_v61, %v767_v39  ;;  %v569_v44 = vpop.f32.mrb[43].mxu0  ;;  %v769_v45 = vpop.f32.mrb[43].mxu1 }
 0x169   :  { %1003 = vst [vmem:[%s2262_s3 + $0xa0] sm:$0xff] %v903_v40  ;;  %1053 = vst [vmem:[%s2262_s3 + $0x230] sm:$0xff] %v953_v41  ;;  %v904_v46 = vmax.f32 %v568_v42, 0.0  ;;  %v954_v47 = vmax.f32 %v768_v43, 0.0 }
 0x16b   :  { %1004 = vst [vmem:[%s2262_s3 + $0xa8] sm:$0xff] %v904_v46  ;;  %1054 = vst [vmem:[%s2262_s3 + $0x238] sm:$0xff] %v954_v47 }
 0x16c   :  { %v572_v48 = vpop.f32.mrb[44].mxu0  ;;  %v772_v49 = vpop.f32.mrb[44].mxu1 }
 0x16d   :  { %v573_v50 = vadd.f32 %v1857_v61, %v572_v48  ;;  %v773_v51 = vadd.f32 %v1857_v61, %v772_v49  ;;  %v574_v52 = vpop.f32.mrb[45].mxu0  ;;  %v774_v53 = vpop.f32.mrb[45].mxu1 }
 0x16e   :  { %v575_v54 = vpop.f32.mrb[46].mxu0  ;;  %v775_v55 = vpop.f32.mrb[46].mxu1 }
 0x16f   :  { %v905_v56 = vmax.f32 %v573_v50, 0.0  ;;  %v955_v57 = vmax.f32 %v773_v51, 0.0  ;;  %v576_v58 = vadd.f32 %v1857_v61, %v575_v54  ;;  %v776_v59 = vadd.f32 %v1857_v61, %v775_v55  ;;  %v577_v60 = vpop.f32.mrb[47].mxu0  ;;  %v777_v62 = vpop.f32.mrb[47].mxu1 }
 0x171   :  { %1005 = vst [vmem:[%s2262_s3 + $0xb0] sm:$0xff] %v905_v56  ;;  %1055 = vst [vmem:[%s2262_s3 + $0x240] sm:$0xff] %v955_v57  ;;  %v906_v63 = vmax.f32 %v576_v58, 0.0  ;;  %v956_v0 = vmax.f32 %v776_v59, 0.0 }
 0x173   :  { %1006 = vst [vmem:[%s2262_s3 + $0xb8] sm:$0xff] %v906_v63  ;;  %1056 = vst [vmem:[%s2262_s3 + $0x248] sm:$0xff] %v956_v0 }
 0x174   :  { %v580_v1 = vpop.f32.mrb[48].mxu0  ;;  %v780_v2 = vpop.f32.mrb[48].mxu1 }
 0x175   :  { %v581_v3 = vadd.f32 %v1857_v61, %v580_v1  ;;  %v781_v4 = vadd.f32 %v1857_v61, %v780_v2  ;;  %v582_v5 = vpop.f32.mrb[49].mxu0  ;;  %v782_v6 = vpop.f32.mrb[49].mxu1 }
 0x176   :  { %v583_v7 = vpop.f32.mrb[50].mxu0  ;;  %v783_v8 = vpop.f32.mrb[50].mxu1 }
 0x177   :  { %v907_v9 = vmax.f32 %v581_v3, 0.0  ;;  %v957_v10 = vmax.f32 %v781_v4, 0.0  ;;  %v584_v11 = vadd.f32 %v1857_v61, %v583_v7  ;;  %v784_v12 = vadd.f32 %v1857_v61, %v783_v8  ;;  %v585_v13 = vpop.f32.mrb[51].mxu0  ;;  %v785_v14 = vpop.f32.mrb[51].mxu1 }
 0x179   :  { %1007 = vst [vmem:[%s2262_s3 + $0xc0] sm:$0xff] %v907_v9  ;;  %1057 = vst [vmem:[%s2262_s3 + $0x250] sm:$0xff] %v957_v10  ;;  %v908_v15 = vmax.f32 %v584_v11, 0.0  ;;  %v958_v16 = vmax.f32 %v784_v12, 0.0 }
 0x17b   :  { %1008 = vst [vmem:[%s2262_s3 + $0xc8] sm:$0xff] %v908_v15  ;;  %1058 = vst [vmem:[%s2262_s3 + $0x258] sm:$0xff] %v958_v16 }
 0x17c   :  { %v588_v17 = vpop.f32.mrb[52].mxu0  ;;  %v788_v18 = vpop.f32.mrb[52].mxu1 }
 0x17d   :  { %v589_v19 = vadd.f32 %v1857_v61, %v588_v17  ;;  %v789_v20 = vadd.f32 %v1857_v61, %v788_v18  ;;  %v590_v21 = vpop.f32.mrb[53].mxu0  ;;  %v790_v22 = vpop.f32.mrb[53].mxu1 }
 0x17e   :  { %v591_v23 = vpop.f32.mrb[54].mxu0  ;;  %v791_v24 = vpop.f32.mrb[54].mxu1 }
 0x17f   :  { %v909_v25 = vmax.f32 %v589_v19, 0.0  ;;  %v959_v26 = vmax.f32 %v789_v20, 0.0  ;;  %v592_v27 = vadd.f32 %v1857_v61, %v591_v23  ;;  %v792_v28 = vadd.f32 %v1857_v61, %v791_v24  ;;  %v593_v29 = vpop.f32.mrb[55].mxu0  ;;  %v793_v30 = vpop.f32.mrb[55].mxu1 }
 0x181   :  { %1009 = vst [vmem:[%s2262_s3 + $0xd0] sm:$0xff] %v909_v25  ;;  %1059 = vst [vmem:[%s2262_s3 + $0x260] sm:$0xff] %v959_v26  ;;  %v910_v31 = vmax.f32 %v592_v27, 0.0  ;;  %v960_v32 = vmax.f32 %v792_v28, 0.0 }
 0x183   :  { %1010 = vst [vmem:[%s2262_s3 + $0xd8] sm:$0xff] %v910_v31  ;;  %1060 = vst [vmem:[%s2262_s3 + $0x268] sm:$0xff] %v960_v32 }
 0x184   :  { %v596_v33 = vpop.f32.mrb[56].mxu0  ;;  %v796_v34 = vpop.f32.mrb[56].mxu1 }
 0x185   :  { %v597_v35 = vadd.f32 %v1857_v61, %v596_v33  ;;  %v797_v36 = vadd.f32 %v1857_v61, %v796_v34  ;;  %v598_v37 = vpop.f32.mrb[57].mxu0  ;;  %v798_v38 = vpop.f32.mrb[57].mxu1 }
 0x186   :  { %v599_v39 = vpop.f32.mrb[58].mxu0  ;;  %v799_v40 = vpop.f32.mrb[58].mxu1 }
 0x187   :  { %v911_v41 = vmax.f32 %v597_v35, 0.0  ;;  %v961_v42 = vmax.f32 %v797_v36, 0.0  ;;  %v600_v43 = vadd.f32 %v1857_v61, %v599_v39  ;;  %v800_v44 = vadd.f32 %v1857_v61, %v799_v40  ;;  %v601_v45 = vpop.f32.mrb[59].mxu0  ;;  %v801_v46 = vpop.f32.mrb[59].mxu1 }
 0x189   :  { %1011 = vst [vmem:[%s2262_s3 + $0xe0] sm:$0xff] %v911_v41  ;;  %1061 = vst [vmem:[%s2262_s3 + $0x270] sm:$0xff] %v961_v42  ;;  %v912_v47 = vmax.f32 %v600_v43, 0.0  ;;  %v962_v48 = vmax.f32 %v800_v44, 0.0 }
 0x18b   :  { %1012 = vst [vmem:[%s2262_s3 + $0xe8] sm:$0xff] %v912_v47  ;;  %1062 = vst [vmem:[%s2262_s3 + $0x278] sm:$0xff] %v962_v48 }
 0x18c   :  { %v604_v49 = vpop.f32.mrb[60].mxu0  ;;  %v804_v50 = vpop.f32.mrb[60].mxu1 }
 0x18d   :  { %v605_v51 = vadd.f32 %v1857_v61, %v604_v49  ;;  %v805_v52 = vadd.f32 %v1857_v61, %v804_v50  ;;  %v606_v53 = vpop.f32.mrb[61].mxu0  ;;  %v806_v54 = vpop.f32.mrb[61].mxu1 }
 0x18e   :  { %v607_v55 = vpop.f32.mrb[62].mxu0  ;;  %v807_v56 = vpop.f32.mrb[62].mxu1 }
 0x18f   :  { %v913_v57 = vmax.f32 %v605_v51, 0.0  ;;  %v963_v58 = vmax.f32 %v805_v52, 0.0  ;;  %v608_v59 = vadd.f32 %v1857_v61, %v607_v55  ;;  %v808_v60 = vadd.f32 %v1857_v61, %v807_v56  ;;  %v609_v62 = vpop.f32.mrb[63].mxu0  ;;  %v809_v63 = vpop.f32.mrb[63].mxu1 }
 0x191   :  { %1013 = vst [vmem:[%s2262_s3 + $0xf0] sm:$0xff] %v913_v57  ;;  %1063 = vst [vmem:[%s2262_s3 + $0x280] sm:$0xff] %v963_v58  ;;  %v914_v0 = vmax.f32 %v608_v59, 0.0  ;;  %v964_v1 = vmax.f32 %v808_v60, 0.0 }
 0x193   :  { %1014 = vst [vmem:[%s2262_s3 + $0xf8] sm:$0xff] %v914_v0  ;;  %1064 = vst [vmem:[%s2262_s3 + $0x288] sm:$0xff] %v964_v1 }
 0x194   :  { %v612_v2 = vpop.f32.mrb[64].mxu0  ;;  %v812_v3 = vpop.f32.mrb[64].mxu1 }
 0x195   :  { %v613_v4 = vadd.f32 %v1857_v61, %v612_v2  ;;  %v813_v5 = vadd.f32 %v1857_v61, %v812_v3  ;;  %v614_v6 = vpop.f32.mrb[65].mxu0  ;;  %v814_v7 = vpop.f32.mrb[65].mxu1 }
 0x196   :  { %v615_v8 = vpop.f32.mrb[66].mxu0  ;;  %v815_v9 = vpop.f32.mrb[66].mxu1 }
 0x197   :  { %v915_v10 = vmax.f32 %v613_v4, 0.0  ;;  %v965_v11 = vmax.f32 %v813_v5, 0.0  ;;  %v616_v12 = vadd.f32 %v1857_v61, %v615_v8  ;;  %v816_v13 = vadd.f32 %v1857_v61, %v815_v9  ;;  %v617_v14 = vpop.f32.mrb[67].mxu0  ;;  %v817_v15 = vpop.f32.mrb[67].mxu1 }
 0x199   :  { %1015 = vst [vmem:[%s2262_s3 + $0x100] sm:$0xff] %v915_v10  ;;  %1065 = vst [vmem:[%s2262_s3 + $0x290] sm:$0xff] %v965_v11  ;;  %v916_v16 = vmax.f32 %v616_v12, 0.0  ;;  %v966_v17 = vmax.f32 %v816_v13, 0.0 }
 0x19b   :  { %1016 = vst [vmem:[%s2262_s3 + $0x108] sm:$0xff] %v916_v16  ;;  %1066 = vst [vmem:[%s2262_s3 + $0x298] sm:$0xff] %v966_v17 }
 0x19c   :  { %v620_v18 = vpop.f32.mrb[68].mxu0  ;;  %v820_v19 = vpop.f32.mrb[68].mxu1 }
 0x19d   :  { %v621_v20 = vadd.f32 %v1857_v61, %v620_v18  ;;  %v821_v21 = vadd.f32 %v1857_v61, %v820_v19  ;;  %v622_v22 = vpop.f32.mrb[69].mxu0  ;;  %v822_v23 = vpop.f32.mrb[69].mxu1 }
 0x19e   :  { %v623_v24 = vpop.f32.mrb[70].mxu0  ;;  %v823_v25 = vpop.f32.mrb[70].mxu1 }
 0x19f   :  { %v917_v26 = vmax.f32 %v621_v20, 0.0  ;;  %v967_v27 = vmax.f32 %v821_v21, 0.0  ;;  %v624_v28 = vadd.f32 %v1857_v61, %v623_v24  ;;  %v824_v29 = vadd.f32 %v1857_v61, %v823_v25  ;;  %v625_v30 = vpop.f32.mrb[71].mxu0  ;;  %v825_v31 = vpop.f32.mrb[71].mxu1 }
 0x1a1   :  { %1017 = vst [vmem:[%s2262_s3 + $0x110] sm:$0xff] %v917_v26  ;;  %1067 = vst [vmem:[%s2262_s3 + $0x2a0] sm:$0xff] %v967_v27  ;;  %v918_v32 = vmax.f32 %v624_v28, 0.0  ;;  %v968_v33 = vmax.f32 %v824_v29, 0.0 }
 0x1a3   :  { %1018 = vst [vmem:[%s2262_s3 + $0x118] sm:$0xff] %v918_v32  ;;  %1068 = vst [vmem:[%s2262_s3 + $0x2a8] sm:$0xff] %v968_v33 }
 0x1a4   :  { %v628_v34 = vpop.f32.mrb[72].mxu0  ;;  %v828_v35 = vpop.f32.mrb[72].mxu1 }
 0x1a5   :  { %v629_v36 = vadd.f32 %v1857_v61, %v628_v34  ;;  %v829_v37 = vadd.f32 %v1857_v61, %v828_v35  ;;  %v630_v38 = vpop.f32.mrb[73].mxu0  ;;  %v830_v39 = vpop.f32.mrb[73].mxu1 }
 0x1a6   :  { %v631_v40 = vpop.f32.mrb[74].mxu0  ;;  %v831_v41 = vpop.f32.mrb[74].mxu1 }
 0x1a7   :  { %v919_v42 = vmax.f32 %v629_v36, 0.0  ;;  %v969_v43 = vmax.f32 %v829_v37, 0.0  ;;  %v632_v44 = vadd.f32 %v1857_v61, %v631_v40  ;;  %v832_v45 = vadd.f32 %v1857_v61, %v831_v41  ;;  %v633_v46 = vpop.f32.mrb[75].mxu0  ;;  %v833_v47 = vpop.f32.mrb[75].mxu1 }
 0x1a9   :  { %1019 = vst [vmem:[%s2262_s3 + $0x120] sm:$0xff] %v919_v42  ;;  %1069 = vst [vmem:[%s2262_s3 + $0x2b0] sm:$0xff] %v969_v43  ;;  %v920_v48 = vmax.f32 %v632_v44, 0.0  ;;  %v970_v49 = vmax.f32 %v832_v45, 0.0 }
 0x1ab   :  { %1020 = vst [vmem:[%s2262_s3 + $0x128] sm:$0xff] %v920_v48  ;;  %1070 = vst [vmem:[%s2262_s3 + $0x2b8] sm:$0xff] %v970_v49 }
 0x1ac   :  { %v636_v50 = vpop.f32.mrb[76].mxu0  ;;  %v836_v51 = vpop.f32.mrb[76].mxu1 }
 0x1ad   :  { %v637_v52 = vadd.f32 %v1857_v61, %v636_v50  ;;  %v837_v53 = vadd.f32 %v1857_v61, %v836_v51  ;;  %v638_v54 = vpop.f32.mrb[77].mxu0  ;;  %v838_v55 = vpop.f32.mrb[77].mxu1 }
 0x1ae   :  { %v639_v56 = vpop.f32.mrb[78].mxu0  ;;  %v839_v57 = vpop.f32.mrb[78].mxu1 }
 0x1af   :  { %v921_v58 = vmax.f32 %v637_v52, 0.0  ;;  %v971_v59 = vmax.f32 %v837_v53, 0.0  ;;  %v640_v60 = vadd.f32 %v1857_v61, %v639_v56  ;;  %v840_v62 = vadd.f32 %v1857_v61, %v839_v57  ;;  %v641_v63 = vpop.f32.mrb[79].mxu0  ;;  %v841_v0 = vpop.f32.mrb[79].mxu1 }
 0x1b1   :  { %1021 = vst [vmem:[%s2262_s3 + $0x130] sm:$0xff] %v921_v58  ;;  %1071 = vst [vmem:[%s2262_s3 + $0x2c0] sm:$0xff] %v971_v59  ;;  %v922_v1 = vmax.f32 %v640_v60, 0.0  ;;  %v972_v2 = vmax.f32 %v840_v62, 0.0 }
 0x1b3   :  { %1022 = vst [vmem:[%s2262_s3 + $0x138] sm:$0xff] %v922_v1  ;;  %1072 = vst [vmem:[%s2262_s3 + $0x2c8] sm:$0xff] %v972_v2 }
 0x1b4   :  { %v644_v3 = vpop.f32.mrb[80].mxu0  ;;  %v844_v4 = vpop.f32.mrb[80].mxu1 }
 0x1b5   :  { %v645_v5 = vadd.f32 %v1857_v61, %v644_v3  ;;  %v845_v6 = vadd.f32 %v1857_v61, %v844_v4  ;;  %v646_v7 = vpop.f32.mrb[81].mxu0  ;;  %v846_v8 = vpop.f32.mrb[81].mxu1 }
 0x1b6   :  { %v647_v9 = vpop.f32.mrb[82].mxu0  ;;  %v847_v10 = vpop.f32.mrb[82].mxu1 }
 0x1b7   :  { %v923_v11 = vmax.f32 %v645_v5, 0.0  ;;  %v973_v12 = vmax.f32 %v845_v6, 0.0  ;;  %v648_v13 = vadd.f32 %v1857_v61, %v647_v9  ;;  %v848_v14 = vadd.f32 %v1857_v61, %v847_v10  ;;  %v649_v15 = vpop.f32.mrb[83].mxu0  ;;  %v849_v16 = vpop.f32.mrb[83].mxu1 }
 0x1b9   :  { %1023 = vst [vmem:[%s2262_s3 + $0x140] sm:$0xff] %v923_v11  ;;  %1073 = vst [vmem:[%s2262_s3 + $0x2d0] sm:$0xff] %v973_v12  ;;  %v924_v17 = vmax.f32 %v648_v13, 0.0  ;;  %v974_v18 = vmax.f32 %v848_v14, 0.0 }
 0x1bb   :  { %1024 = vst [vmem:[%s2262_s3 + $0x148] sm:$0xff] %v924_v17  ;;  %1074 = vst [vmem:[%s2262_s3 + $0x2d8] sm:$0xff] %v974_v18 }
 0x1bc   :  { %v652_v19 = vpop.f32.mrb[84].mxu0  ;;  %v852_v20 = vpop.f32.mrb[84].mxu1 }
 0x1bd   :  { %v653_v21 = vadd.f32 %v1857_v61, %v652_v19  ;;  %v853_v22 = vadd.f32 %v1857_v61, %v852_v20  ;;  %v654_v23 = vpop.f32.mrb[85].mxu0  ;;  %v854_v24 = vpop.f32.mrb[85].mxu1 }
 0x1be   :  { %v655_v25 = vpop.f32.mrb[86].mxu0  ;;  %v855_v26 = vpop.f32.mrb[86].mxu1 }
 0x1bf   :  { %v925_v27 = vmax.f32 %v653_v21, 0.0  ;;  %v975_v28 = vmax.f32 %v853_v22, 0.0  ;;  %v656_v29 = vadd.f32 %v1857_v61, %v655_v25  ;;  %v856_v30 = vadd.f32 %v1857_v61, %v855_v26  ;;  %v657_v31 = vpop.f32.mrb[87].mxu0  ;;  %v857_v32 = vpop.f32.mrb[87].mxu1 }
 0x1c1   :  { %1025 = vst [vmem:[%s2262_s3 + $0x150] sm:$0xff] %v925_v27  ;;  %1075 = vst [vmem:[%s2262_s3 + $0x2e0] sm:$0xff] %v975_v28  ;;  %v926_v33 = vmax.f32 %v656_v29, 0.0  ;;  %v976_v34 = vmax.f32 %v856_v30, 0.0 }
 0x1c3   :  { %1026 = vst [vmem:[%s2262_s3 + $0x158] sm:$0xff] %v926_v33  ;;  %1076 = vst [vmem:[%s2262_s3 + $0x2e8] sm:$0xff] %v976_v34 }
 0x1c4   :  { %v660_v35 = vpop.f32.mrb[88].mxu0  ;;  %v860_v36 = vpop.f32.mrb[88].mxu1 }
 0x1c5   :  { %v661_v37 = vadd.f32 %v1857_v61, %v660_v35  ;;  %v861_v38 = vadd.f32 %v1857_v61, %v860_v36  ;;  %v662_v39 = vpop.f32.mrb[89].mxu0  ;;  %v862_v40 = vpop.f32.mrb[89].mxu1 }
 0x1c6   :  { %v663_v41 = vpop.f32.mrb[90].mxu0  ;;  %v863_v42 = vpop.f32.mrb[90].mxu1 }
 0x1c7   :  { %v927_v43 = vmax.f32 %v661_v37, 0.0  ;;  %v977_v44 = vmax.f32 %v861_v38, 0.0  ;;  %v664_v45 = vadd.f32 %v1857_v61, %v663_v41  ;;  %v864_v46 = vadd.f32 %v1857_v61, %v863_v42  ;;  %v665_v47 = vpop.f32.mrb[91].mxu0  ;;  %v865_v48 = vpop.f32.mrb[91].mxu1 }
 0x1c9   :  { %1027 = vst [vmem:[%s2262_s3 + $0x160] sm:$0xff] %v927_v43  ;;  %1077 = vst [vmem:[%s2262_s3 + $0x2f0] sm:$0xff] %v977_v44  ;;  %v928_v49 = vmax.f32 %v664_v45, 0.0  ;;  %v978_v50 = vmax.f32 %v864_v46, 0.0 }
 0x1cb   :  { %1028 = vst [vmem:[%s2262_s3 + $0x168] sm:$0xff] %v928_v49  ;;  %1078 = vst [vmem:[%s2262_s3 + $0x2f8] sm:$0xff] %v978_v50 }
 0x1cc   :  { %v668_v51 = vpop.f32.mrb[92].mxu0  ;;  %v868_v52 = vpop.f32.mrb[92].mxu1 }
 0x1cd   :  { %v669_v53 = vadd.f32 %v1857_v61, %v668_v51  ;;  %v869_v54 = vadd.f32 %v1857_v61, %v868_v52  ;;  %v670_v55 = vpop.f32.mrb[93].mxu0  ;;  %v870_v56 = vpop.f32.mrb[93].mxu1 }
 0x1ce   :  { %v671_v57 = vpop.f32.mrb[94].mxu0  ;;  %v871_v58 = vpop.f32.mrb[94].mxu1 }
 0x1cf   :  { %v929_v59 = vmax.f32 %v669_v53, 0.0  ;;  %v979_v60 = vmax.f32 %v869_v54, 0.0  ;;  %v672_v62 = vadd.f32 %v1857_v61, %v671_v57  ;;  %v872_v63 = vadd.f32 %v1857_v61, %v871_v58  ;;  %v673_v0 = vpop.f32.mrb[95].mxu0  ;;  %v873_v1 = vpop.f32.mrb[95].mxu1 }
 0x1d1   :  { %1029 = vst [vmem:[%s2262_s3 + $0x170] sm:$0xff] %v929_v59  ;;  %1079 = vst [vmem:[%s2262_s3 + $0x300] sm:$0xff] %v979_v60  ;;  %v930_v2 = vmax.f32 %v672_v62, 0.0  ;;  %v980_v3 = vmax.f32 %v872_v63, 0.0 }
 0x1d3   :  { %1030 = vst [vmem:[%s2262_s3 + $0x178] sm:$0xff] %v930_v2  ;;  %1080 = vst [vmem:[%s2262_s3 + $0x308] sm:$0xff] %v980_v3 }
 0x1d4   :  { %v676_v4 = vpop.f32.mrb[96].mxu0  ;;  %v876_v5 = vpop.f32.mrb[96].mxu1 }
 0x1d5   :  { %v677_v6 = vadd.f32 %v1857_v61, %v676_v4  ;;  %v877_v7 = vadd.f32 %v1857_v61, %v876_v5  ;;  %v678_v8 = vpop.f32.mrb[97].mxu0  ;;  %v878_v9 = vpop.f32.mrb[97].mxu1 }
 0x1d6   :  { %v679_v10 = vpop.f32.mrb[98].mxu0  ;;  %v879_v11 = vpop.f32.mrb[98].mxu1 }
 0x1d7   :  { %v931_v12 = vmax.f32 %v677_v6, 0.0  ;;  %v981_v13 = vmax.f32 %v877_v7, 0.0  ;;  %v680_v14 = vadd.f32 %v1857_v61, %v679_v10  ;;  %v880_v15 = vadd.f32 %v1857_v61, %v879_v11  ;;  %v681_v16 = vpop.f32.mrb[99].mxu0  ;;  %v881_v17 = vpop.f32.mrb[99].mxu1 }
 0x1d9   :  { %1031 = vst [vmem:[%s2262_s3 + $0x180] sm:$0xff] %v931_v12  ;;  %1081 = vst [vmem:[%s2262_s3 + $0x310] sm:$0xff] %v981_v13  ;;  %v932_v18 = vmax.f32 %v680_v14, 0.0  ;;  %v982_v19 = vmax.f32 %v880_v15, 0.0 }
 0x1db   :  { %1032 = vst [vmem:[%s2262_s3 + $0x188] sm:$0xff] %v932_v18  ;;  %1082 = vst [vmem:[%s2262_s3 + $0x318] sm:$0xff] %v982_v19 }

// kernel: dueling_dqn_forward.5
= control target key start
LH: loop header
LB: loop body
LE: loop exit
PB: predicated region body
PF: predicated region fallthrough
CT: control target
= control target key end

     0   :  { %s5167_s1 = inlined_call_operand.vmem [shape: bf16[2048,128], index: 1, kind: input, shape index: {}]   ;;  %s5168_s0 = inlined_call_operand.vmem [shape: f32[162,2048], index: 0, kind: input, shape index: {}]   ;;  %s5169_s2 = inlined_call_operand.vmem [shape: f32[1,128], index: 2, kind: input, shape index: {}]   ;;  %s5170_s3 = inlined_call_operand.vmem [shape: f32[162,128], index: 3, kind: output, shape index: {}]  }
   0x1   :  { %v3349_v0 = vld [vmem:[%s5167_s1 + $0x40] sm:$0xff]   ;;  %v3353_v4 = vld [vmem:[%s5167_s1 + $0x48] sm:$0xff]   ;;  %v3357_v8 = vld [vmem:[%s5167_s1 + $0x50] sm:$0xff]  }
   0x2   :  { %v3350_v1 = vld [vmem:[%s5167_s1 + $0xc0] sm:$0xff]   ;;  %2693 = vmatprep.subr.bf16.mxu0 %v3349_v0  ;;  %v3354_v5 = vld [vmem:[%s5167_s1 + $0xc8] sm:$0xff]   ;;  %v3358_v9 = vld [vmem:[%s5167_s1 + $0xd0] sm:$0xff]  }
   0x3   :  { %v3351_v2 = vld [vmem:[%s5167_s1] sm:$0xff]   ;;  %2775 = vmatprep.subr.bf16.mxu1 %v3350_v1  ;;  %v3355_v6 = vld [vmem:[%s5167_s1 + $0x8] sm:$0xff]   ;;  %v3359_v10 = vld [vmem:[%s5167_s1 + $0x10] sm:$0xff]  }
   0x4   :  { %v3352_v3 = vld [vmem:[%s5167_s1 + $0x80] sm:$0xff]   ;;  %2694 = vmatpush3.bf16.msra.mxu0 %v3351_v2  ;;  %v3356_v7 = vld [vmem:[%s5167_s1 + $0x88] sm:$0xff]   ;;  %v3360_v11 = vld [vmem:[%s5167_s1 + $0x90] sm:$0xff]  }
   0x5   :  { %2776 = vmatpush3.bf16.msra.mxu1 %v3352_v3  ;;  %2695 = vmatprep.subr.bf16.mxu0 %v3353_v4  ;;  %v3361_v12 = vld [vmem:[%s5167_s1 + $0x58] sm:$0xff]   ;;  %v3365_v16 = vld [vmem:[%s5167_s1 + $0x60] sm:$0xff]   ;;  %v3369_v20 = vld [vmem:[%s5167_s1 + $0x68] sm:$0xff]  }
   0x6   :  { %2777 = vmatprep.subr.bf16.mxu1 %v3354_v5  ;;  %v3362_v13 = vld [vmem:[%s5167_s1 + $0xd8] sm:$0xff]   ;;  %v3366_v17 = vld [vmem:[%s5167_s1 + $0xe0] sm:$0xff]   ;;  %v3370_v21 = vld [vmem:[%s5167_s1 + $0xe8] sm:$0xff]  }
   0x7   :  { %v3363_v14 = vld [vmem:[%s5167_s1 + $0x18] sm:$0xff]   ;;  %v3367_v18 = vld [vmem:[%s5167_s1 + $0x20] sm:$0xff]   ;;  %v3371_v22 = vld [vmem:[%s5167_s1 + $0x28] sm:$0xff]  }
   0x8   :  { %2696 = vmatpush3.bf16.msra.mxu0 %v3355_v6  ;;  %v3364_v15 = vld [vmem:[%s5167_s1 + $0x98] sm:$0xff]   ;;  %v3368_v19 = vld [vmem:[%s5167_s1 + $0xa0] sm:$0xff]   ;;  %v3372_v23 = vld [vmem:[%s5167_s1 + $0xa8] sm:$0xff]  }
   0x9   :  { %2778 = vmatpush3.bf16.msra.mxu1 %v3356_v7  ;;  %2697 = vmatprep.subr.bf16.mxu0 %v3357_v8  ;;  %v3373_v24 = vld [vmem:[%s5167_s1 + $0x70] sm:$0xff]   ;;  %v3377_v28 = vld [vmem:[%s5167_s1 + $0x78] sm:$0xff]   ;;  %v16_v32 = vld [vmem:[%s5168_s0 + $0x8] sm:$0xff] }
   0xa   :  { %2779 = vmatprep.subr.bf16.mxu1 %v3358_v9  ;;  %v3374_v25 = vld [vmem:[%s5167_s1 + $0xf0] sm:$0xff]   ;;  %v3378_v29 = vld [vmem:[%s5167_s1 + $0xf8] sm:$0xff]   ;;  %v32_v33 = vld [vmem:[%s5168_s0 + $0x88] sm:$0xff] }
   0xb   :  { %v3375_v26 = vld [vmem:[%s5167_s1 + $0x30] sm:$0xff]   ;;  %v3379_v30 = vld [vmem:[%s5167_s1 + $0x38] sm:$0xff]   ;;  %v352_v35 = vpack.c.bf16 %v32_v33, %v16_v32  ;;  %v15_v37 = vld [vmem:[%s5168_s0] sm:$0xff] }
   0xc   :  { %2698 = vmatpush3.bf16.msra.mxu0 %v3359_v10  ;;  %v3376_v27 = vld [vmem:[%s5167_s1 + $0xb0] sm:$0xff]   ;;  %v3380_v31 = vld [vmem:[%s5167_s1 + $0xb8] sm:$0xff]   ;;  %v31_v38 = vld [vmem:[%s5168_s0 + $0x80] sm:$0xff] }
   0xd   :  { %2780 = vmatpush3.bf16.msra.mxu1 %v3360_v11  ;;  %2699 = vmatprep.subr.bf16.mxu0 %v3361_v12  ;;  %v18_v34 = vld [vmem:[%s5168_s0 + $0x18] sm:$0xff]  ;;  %v351_v40 = vpack.c.bf16 %v31_v38, %v15_v37  ;;  %v17_v41 = vld [vmem:[%s5168_s0 + $0x10] sm:$0xff]  ;;  %v3381_v44 = vld [vmem:[%s5167_s1 + $0x140] sm:$0xff]  }
   0xe   :  { %2781 = vmatprep.subr.bf16.mxu1 %v3362_v13  ;;  %v34_v36 = vld [vmem:[%s5168_s0 + $0x98] sm:$0xff]  ;;  %v33_v42 = vld [vmem:[%s5168_s0 + $0x90] sm:$0xff]  ;;  %1590 = vmatprep.mubr.bf16.mxu0 %v352_v35  ;;  %v3382_v45 = vld [vmem:[%s5167_s1 + $0x100] sm:$0xff]  }
   0xf   :  { %v354_v39 = vpack.c.bf16 %v34_v36, %v18_v34  ;;  %v353_v43 = vpack.c.bf16 %v33_v42, %v17_v41  ;;  %v3383_v46 = vld [vmem:[%s5167_s1 + $0x1c0] sm:$0xff]   ;;  %v48_v48 = vld [vmem:[%s5168_s0 + $0x108] sm:$0xff]  ;;  %v50_v50 = vld [vmem:[%s5168_s0 + $0x118] sm:$0xff] }
  0x10   :  { %2700 = vmatpush3.bf16.msra.mxu0 %v3363_v14  ;;  %v3384_v47 = vld [vmem:[%s5167_s1 + $0x180] sm:$0xff]   ;;  %v64_v49 = vld [vmem:[%s5168_s0 + $0x188] sm:$0xff]  ;;  %v66_v51 = vld [vmem:[%s5168_s0 + $0x198] sm:$0xff] }
  0x11   :  { %2782 = vmatpush3.bf16.msra.mxu1 %v3364_v15  ;;  %2701 = vmatprep.subr.bf16.mxu0 %v3365_v16  ;;  %v368_v52 = vpack.c.bf16 %v64_v49, %v48_v48  ;;  %v370_v53 = vpack.c.bf16 %v66_v51, %v50_v50  ;;  %v47_v54 = vld [vmem:[%s5168_s0 + $0x100] sm:$0xff]  ;;  %v49_v56 = vld [vmem:[%s5168_s0 + $0x110] sm:$0xff]  ;;  %v3385_v60 = vld [vmem:[%s5167_s1 + $0x148] sm:$0xff]  }
  0x12   :  { %2783 = vmatprep.subr.bf16.mxu1 %v3366_v17  ;;  %1710 = vmatprep.mubr.bf16.mxu1 %v354_v39  ;;  %v63_v55 = vld [vmem:[%s5168_s0 + $0x180] sm:$0xff]  ;;  %v65_v58 = vld [vmem:[%s5168_s0 + $0x190] sm:$0xff]  ;;  %v3386_v61 = vld [vmem:[%s5167_s1 + $0x108] sm:$0xff]  }
  0x13   :  { %v367_v57 = vpack.c.bf16 %v63_v55, %v47_v54  ;;  %v369_v59 = vpack.c.bf16 %v65_v58, %v49_v56  ;;  %v3387_v62 = vld [vmem:[%s5167_s1 + $0x1c8] sm:$0xff]   ;;  %v82_v3 = vld [vmem:[%s5168_s0 + $0x218] sm:$0xff]  ;;  %v79_v5 = vld [vmem:[%s5168_s0 + $0x200] sm:$0xff] }
  0x14   :  { %2702 = vmatpush3.bf16.msra.mxu0 %v3367_v18  ;;  %v3388_v63 = vld [vmem:[%s5167_s1 + $0x188] sm:$0xff]   ;;  %v98_v4 = vld [vmem:[%s5168_s0 + $0x298] sm:$0xff]  ;;  %v95_v7 = vld [vmem:[%s5168_s0 + $0x280] sm:$0xff] }
  0x15   :  { %2784 = vmatpush3.bf16.msra.mxu1 %v3368_v19  ;;  %2703 = vmatprep.subr.bf16.mxu0 %v3369_v20  ;;  %v80_v0 = vld [vmem:[%s5168_s0 + $0x208] sm:$0xff]  ;;  %v386_v6 = vpack.c.bf16 %v98_v4, %v82_v3  ;;  %v81_v8 = vld [vmem:[%s5168_s0 + $0x210] sm:$0xff]  ;;  %v383_v10 = vpack.c.bf16 %v95_v7, %v79_v5  ;;  %v114_v15 = vld [vmem:[%s5168_s0 + $0x318] sm:$0xff] }
  0x16   :  { %2785 = vmatprep.subr.bf16.mxu1 %v3370_v21  ;;  %v96_v1 = vld [vmem:[%s5168_s0 + $0x288] sm:$0xff]  ;;  %v97_v9 = vld [vmem:[%s5168_s0 + $0x290] sm:$0xff]  ;;  %v130_v17 = vld [vmem:[%s5168_s0 + $0x398] sm:$0xff] }
  0x17   :  { %v384_v2 = vpack.c.bf16 %v96_v1, %v80_v0  ;;  %v3389_v11 = vld [vmem:[%s5167_s1 + $0x150] sm:$0xff]   ;;  %v385_v12 = vpack.c.bf16 %v97_v9, %v81_v8  ;;  %v112_v13 = vld [vmem:[%s5168_s0 + $0x308] sm:$0xff]  ;;  %v402_v18 = vpack.c.bf16 %v130_v17, %v114_v15  ;;  %v111_v20 = vld [vmem:[%s5168_s0 + $0x300] sm:$0xff] }
  0x18   :  { %2704 = vmatpush3.bf16.msra.mxu0 %v3371_v22  ;;  %v128_v14 = vld [vmem:[%s5168_s0 + $0x388] sm:$0xff]  ;;  %v3390_v19 = vld [vmem:[%s5167_s1 + $0x110] sm:$0xff]   ;;  %v127_v21 = vld [vmem:[%s5168_s0 + $0x380] sm:$0xff] }
  0x19   :  { %2786 = vmatpush3.bf16.msra.mxu1 %v3372_v23  ;;  %2705 = vmatprep.subr.bf16.mxu0 %v3373_v24  ;;  %v400_v16 = vpack.c.bf16 %v128_v14, %v112_v13  ;;  %v113_v22 = vld [vmem:[%s5168_s0 + $0x310] sm:$0xff]  ;;  %v3393_v34 = vld [vmem:[%s5167_s1 + $0x158] sm:$0xff]   ;;  %v143_v35 = vld [vmem:[%s5168_s0 + $0x400] sm:$0xff] }
  0x1a   :  { %2787 = vmatprep.subr.bf16.mxu1 %v3374_v25  ;;  %v129_v23 = vld [vmem:[%s5168_s0 + $0x390] sm:$0xff]  ;;  %v3394_v36 = vld [vmem:[%s5167_s1 + $0x118] sm:$0xff]   ;;  %v159_v38 = vld [vmem:[%s5168_s0 + $0x480] sm:$0xff] }
  0x1b   :  { %v3391_v24 = vld [vmem:[%s5167_s1 + $0x1d0] sm:$0xff]   ;;  %v3395_v37 = vld [vmem:[%s5167_s1 + $0x1d8] sm:$0xff]   ;;  %v176_v42 = vld [vmem:[%s5168_s0 + $0x508] sm:$0xff] }
  0x1c   :  { %2706 = vmatpush3.bf16.msra.mxu0 %v3375_v26  ;;  %v3392_v25 = vld [vmem:[%s5167_s1 + $0x190] sm:$0xff]   ;;  %v144_v26 = vld [vmem:[%s5168_s0 + $0x408] sm:$0xff]  ;;  %v3398_v50 = vld [vmem:[%s5167_s1 + $0x120] sm:$0xff]  }
  0x1d   :  { %2788 = vmatpush3.bf16.msra.mxu1 %v3376_v27  ;;  %2707 = vmatprep.subr.bf16.mxu0 %v3377_v28  ;;  %v160_v27 = vld [vmem:[%s5168_s0 + $0x488] sm:$0xff]  ;;  %v146_v28 = vld [vmem:[%s5168_s0 + $0x418] sm:$0xff]  ;;  %v145_v39 = vld [vmem:[%s5168_s0 + $0x410] sm:$0xff] }
  0x1e   :  { %2789 = vmatprep.subr.bf16.mxu1 %v3378_v29  ;;  %v162_v29 = vld [vmem:[%s5168_s0 + $0x498] sm:$0xff]  ;;  %v416_v32 = vpack.c.bf16 %v160_v27, %v144_v26  ;;  %v161_v41 = vld [vmem:[%s5168_s0 + $0x490] sm:$0xff]  ;;  %v191_v54 = vld [vmem:[%s5168_s0 + $0x580] sm:$0xff] }
  0x1f   :  { %v418_v33 = vpack.c.bf16 %v162_v29, %v146_v28  ;;  %v417_v48 = vpack.c.bf16 %v161_v41, %v145_v39  ;;  %v177_v55 = vld [vmem:[%s5168_s0 + $0x510] sm:$0xff]  ;;  %v3400_v56 = vld [vmem:[%s5167_s1 + $0x1a0] sm:$0xff]   ;;  %v208_v58 = vld [vmem:[%s5168_s0 + $0x608] sm:$0xff] }
  0x20   :  { %2708 = vmatpush3.bf16.msra.mxu0 %v3379_v30  ;;  %v399_v30 = vpack.c.bf16 %v127_v21, %v111_v20  ;;  %v207_v3 = vld [vmem:[%s5168_s0 + $0x600] sm:$0xff]  ;;  %v3402_v4 = vld [vmem:[%s5167_s1 + $0x128] sm:$0xff]   ;;  %v209_v7 = vld [vmem:[%s5168_s0 + $0x610] sm:$0xff] }
  0x21   :  { %2790 = vmatpush3.bf16.msra.mxu1 %v3380_v31  ;;  %2857 = vmatprep.subr.bf16.mxu0 %v3381_v44  ;;  %v401_v31 = vpack.c.bf16 %v129_v23, %v113_v22  ;;  %v178_v44 = vld [vmem:[%s5168_s0 + $0x518] sm:$0xff]  ;;  %v3403_v5 = vld [vmem:[%s5167_s1 + $0x1e8] sm:$0xff]   ;;  %v225_v9 = vld [vmem:[%s5168_s0 + $0x690] sm:$0xff] }
  0x22   :  { %2939 = vmatprep.subr.bf16.mxu1 %v3383_v46  ;;  %v415_v46 = vpack.c.bf16 %v159_v38, %v143_v35  ;;  %v3404_v8 = vld [vmem:[%s5167_s1 + $0x1a8] sm:$0xff]   ;;  %v258_v13 = vld [vmem:[%s5168_s0 + $0x798] sm:$0xff]  ;;  %v3405_v15 = vld [vmem:[%s5167_s1 + $0x170] sm:$0xff]  }
  0x23   :  { %1591 = vmatmul.mubr.bf16.vlgmr.msra.gmra.mrb[0].mxu0 %v351_v40  ;;  %v3396_v40 = vld [vmem:[%s5167_s1 + $0x198] sm:$0xff]   ;;  %v3407_v20 = vld [vmem:[%s5167_s1 + $0x1f0] sm:$0xff]   ;;  %v239_v22 = vld [vmem:[%s5168_s0 + $0x700] sm:$0xff] }
  0x24   :  { %1711 = vmatmul.mubr.bf16.vlgmr.msra.gmra.mrb[0].mxu1 %v353_v43  ;;  %2858 = vmatpush3.bf16.msra.mxu0 %v3382_v45  ;;  %v192_v43 = vld [vmem:[%s5168_s0 + $0x588] sm:$0xff]  ;;  %v194_v45 = vld [vmem:[%s5168_s0 + $0x598] sm:$0xff]  ;;  %v3408_v21 = vld [vmem:[%s5167_s1 + $0x1b0] sm:$0xff]  }
  0x25   :  { %2940 = vmatpush3.bf16.msra.mxu1 %v3384_v47  ;;  %1598 = vmatprep.mubr.bf16.mxu0 %v368_v52  ;;  %v3397_v47 = vld [vmem:[%s5167_s1 + $0x160] sm:$0xff]   ;;  %v432_v49 = vpack.c.bf16 %v192_v43, %v176_v42  ;;  %v434_v51 = vpack.c.bf16 %v194_v45, %v178_v44  ;;  %v272_v26 = vld [vmem:[%s5168_s0 + $0x808] sm:$0xff]  ;;  %v274_v28 = vld [vmem:[%s5168_s0 + $0x818] sm:$0xff] }
  0x26   :  { %1718 = vmatprep.mubr.bf16.mxu1 %v370_v53  ;;  %2859 = vmatprep.subr.bf16.mxu0 %v3385_v60  ;;  %v3399_v52 = vld [vmem:[%s5167_s1 + $0x1e0] sm:$0xff]   ;;  %v210_v60 = vld [vmem:[%s5168_s0 + $0x618] sm:$0xff]  ;;  %v288_v27 = vld [vmem:[%s5168_s0 + $0x888] sm:$0xff] }
  0x27   :  { %2941 = vmatprep.subr.bf16.mxu1 %v3387_v62  ;;  %v175_v53 = vld [vmem:[%s5168_s0 + $0x500] sm:$0xff]  ;;  %v290_v29 = vld [vmem:[%s5168_s0 + $0x898] sm:$0xff]  ;;  %v289_v41 = vld [vmem:[%s5168_s0 + $0x890] sm:$0xff] }
  0x28   :  { %2860 = vmatpush3.bf16.msra.mxu0 %v3386_v61  ;;  %v226_v61 = vld [vmem:[%s5168_s0 + $0x698] sm:$0xff]  ;;  %v431_v62 = vpack.c.bf16 %v191_v54, %v175_v53  ;;  %v255_v23 = vld [vmem:[%s5168_s0 + $0x780] sm:$0xff]  ;;  %v482_v35 = vpack.c.bf16 %v290_v29, %v274_v28  ;;  %v304_v42 = vld [vmem:[%s5168_s0 + $0x908] sm:$0xff] }
  0x29   :  { %2942 = vmatpush3.bf16.msra.mxu1 %v3388_v63  ;;  %2861 = vmatprep.subr.bf16.mxu0 %v3389_v11  ;;  %v3401_v63 = vld [vmem:[%s5167_s1 + $0x168] sm:$0xff]   ;;  %v271_v38 = vld [vmem:[%s5168_s0 + $0x800] sm:$0xff]  ;;  %v306_v44 = vld [vmem:[%s5168_s0 + $0x918] sm:$0xff] }
  0x2a   :  { %2943 = vmatprep.subr.bf16.mxu1 %v3391_v24  ;;  %v256_v11 = vld [vmem:[%s5168_s0 + $0x788] sm:$0xff]  ;;  %v241_v24 = vld [vmem:[%s5168_s0 + $0x710] sm:$0xff]  ;;  %v287_v39 = vld [vmem:[%s5168_s0 + $0x880] sm:$0xff] }
  0x2b   :  { %1599 = vmatmul.mubr.bf16.gmra.mrb[4].mxu0 %v367_v57  ;;  %v193_v57 = vld [vmem:[%s5168_s0 + $0x590] sm:$0xff]  ;;  %v320_v43 = vld [vmem:[%s5168_s0 + $0x988] sm:$0xff]  ;;  %v322_v45 = vld [vmem:[%s5168_s0 + $0x998] sm:$0xff] }
  0x2c   :  { %1719 = vmatmul.mubr.bf16.gmra.mrb[4].mxu1 %v369_v59  ;;  %1606 = vmatprep.mubr.bf16.mxu0 %v384_v2  ;;  %v224_v59 = vld [vmem:[%s5168_s0 + $0x688] sm:$0xff]  ;;  %v433_v0 = vpack.c.bf16 %v193_v57, %v177_v55  ;;  %v450_v2 = vpack.c.bf16 %v226_v61, %v210_v60  ;;  %v319_v53 = vld [vmem:[%s5168_s0 + $0x980] sm:$0xff]  ;;  %v305_v54 = vld [vmem:[%s5168_s0 + $0x910] sm:$0xff] }
  0x2d   :  { %1726 = vmatprep.mubr.bf16.mxu1 %v386_v6  ;;  %2862 = vmatpush3.bf16.msra.mxu0 %v3390_v19  ;;  %v448_v1 = vpack.c.bf16 %v224_v59, %v208_v58  ;;  %v223_v6 = vld [vmem:[%s5168_s0 + $0x680] sm:$0xff]  ;;  %v321_v55 = vld [vmem:[%s5168_s0 + $0x990] sm:$0xff]  ;;  %v338_v57 = vld [vmem:[%s5168_s0 + $0xa18] sm:$0x3] }
  0x2e   :  { %2944 = vmatpush3.bf16.msra.mxu1 %v3392_v25  ;;  %2863 = vmatprep.subr.bf16.mxu0 %v3393_v34  ;;  %v447_v14 = vpack.c.bf16 %v223_v6, %v207_v3  ;;  %v257_v25 = vld [vmem:[%s5168_s0 + $0x790] sm:$0xff]  ;;  %v480_v34 = vpack.c.bf16 %v288_v27, %v272_v26  ;;  %v497_v59 = vpack.c.bf16 %v321_v55, %v305_v54  ;;  %v38_v3 = vld [vmem:[%s5168_s0 + $0xb8] sm:$0xff]  ;;  %v3419_v26 = vld [vmem:[%s5167_s1 + $0x2c8] sm:$0xff]  }
  0x2f   :  { %2945 = vmatprep.subr.bf16.mxu1 %v3395_v37  ;;  %v3412_v37 = vld [vmem:[%s5167_s1 + $0x1b8] sm:$0xff]   ;;  %v514_v61 = vpack.c.bf16 %v338_v57, %v338_v57  ;;  %v53_v27 = vld [vmem:[%s5168_s0 + $0x130] sm:$0xff]  ;;  %v3420_v29 = vld [vmem:[%s5167_s1 + $0x288] sm:$0xff]  }
  0x30   :  { %v69_v28 = vld [vmem:[%s5168_s0 + $0x1b0] sm:$0xff]  ;;  %v3429_v54 = vld [vmem:[%s5167_s1 + $0x260] sm:$0xff]  }
  0x31   :  { %2864 = vmatpush3.bf16.msra.mxu0 %v3394_v36  ;;  %v3411_v36 = vld [vmem:[%s5167_s1 + $0x1f8] sm:$0xff]  }
  0x32   :  { %2946 = vmatpush3.bf16.msra.mxu1 %v3396_v40  ;;  %2865 = vmatprep.subr.bf16.mxu0 %v3397_v47  ;;  %v273_v40 = vld [vmem:[%s5168_s0 + $0x810] sm:$0xff]  ;;  %v479_v47 = vpack.c.bf16 %v287_v39, %v271_v38 }
  0x33   :  { %1607 = vmatmul.mubr.bf16.gmra.mrb[8].mxu0 %v383_v10  ;;  %2947 = vmatprep.subr.bf16.mxu1 %v3399_v52  ;;  %v240_v10 = vld [vmem:[%s5168_s0 + $0x708] sm:$0xff]  ;;  %v303_v52 = vld [vmem:[%s5168_s0 + $0x900] sm:$0xff] }
  0x34   :  { %1727 = vmatmul.mubr.bf16.gmra.mrb[8].mxu1 %v385_v12  ;;  %1614 = vmatprep.mubr.bf16.mxu0 %v400_v16  ;;  %v242_v12 = vld [vmem:[%s5168_s0 + $0x718] sm:$0xff]  ;;  %v449_v16 = vpack.c.bf16 %v225_v9, %v209_v7  ;;  %v464_v17 = vpack.c.bf16 %v256_v11, %v240_v10  ;;  %v495_v58 = vpack.c.bf16 %v319_v53, %v303_v52  ;;  %v35_v9 = vld [vmem:[%s5168_s0 + $0xa0] sm:$0xff]  ;;  %v21_v10 = vld [vmem:[%s5168_s0 + $0x30] sm:$0xff] }
  0x35   :  { %1734 = vmatprep.mubr.bf16.mxu1 %v402_v18  ;;  %2866 = vmatpush3.bf16.msra.mxu0 %v3398_v50  ;;  %v3406_v18 = vld [vmem:[%s5167_s1 + $0x130] sm:$0xff]   ;;  %v466_v19 = vpack.c.bf16 %v258_v13, %v242_v12  ;;  %v3415_v50 = vld [vmem:[%s5167_s1 + $0x2c0] sm:$0xff]   ;;  %v52_v12 = vld [vmem:[%s5168_s0 + $0x128] sm:$0xff] }
  0x36   :  { %2948 = vmatpush3.bf16.msra.mxu1 %v3400_v56  ;;  %2867 = vmatprep.subr.bf16.mxu0 %v3401_v63  ;;  %v336_v56 = vld [vmem:[%s5168_s0 + $0xa08] sm:$0x3]  ;;  %v337_v63 = vld [vmem:[%s5168_s0 + $0xa10] sm:$0x3]  ;;  %v3426_v52 = vld [vmem:[%s5167_s1 + $0x218] sm:$0xff]  }
  0x37   :  { %2949 = vmatprep.subr.bf16.mxu1 %v3403_v5  ;;  %v512_v60 = vpack.c.bf16 %v336_v56, %v336_v56  ;;  %v513_v5 = vpack.c.bf16 %v337_v63, %v337_v63  ;;  %v37_v11 = vld [vmem:[%s5168_s0 + $0xb0] sm:$0xff]  ;;  %v68_v13 = vld [vmem:[%s5168_s0 + $0x1a8] sm:$0xff]  ;;  %v3428_v53 = vld [vmem:[%s5167_s1 + $0x298] sm:$0xff]  }
  0x38   :  { %v3431_v56 = vld [vmem:[%s5167_s1 + $0x2e0] sm:$0xff]  }
  0x39   :  { %2868 = vmatpush3.bf16.msra.mxu0 %v3402_v4  ;;  %v3432_v63 = vld [vmem:[%s5167_s1 + $0x2a0] sm:$0xff]  }
  0x3a   :  { %2950 = vmatpush3.bf16.msra.mxu1 %v3404_v8  ;;  %2869 = vmatprep.subr.bf16.mxu0 %v3405_v15  ;;  %v19_v8 = vld [vmem:[%s5168_s0 + $0x20] sm:$0xff] }
  0x3b   :  { %1615 = vmatmul.mubr.bf16.gmra.mrb[12].mxu0 %v399_v30  ;;  %2951 = vmatprep.subr.bf16.mxu1 %v3407_v20  ;;  %v3409_v30 = vld [vmem:[%s5167_s1 + $0x178] sm:$0xff]   ;;  %v355_v15 = vpack.c.bf16 %v35_v9, %v19_v8  ;;  %v372_v20 = vpack.c.bf16 %v68_v13, %v52_v12  ;;  %v3434_v8 = vld [vmem:[%s5167_s1 + $0x228] sm:$0xff]   ;;  %v3439_v12 = vld [vmem:[%s5167_s1 + $0x2f0] sm:$0xff]  }
  0x3c   :  { %1735 = vmatmul.mubr.bf16.gmra.mrb[12].mxu1 %v401_v31  ;;  %1622 = vmatprep.mubr.bf16.mxu0 %v416_v32  ;;  %v463_v31 = vpack.c.bf16 %v255_v23, %v239_v22  ;;  %v3410_v32 = vld [vmem:[%s5167_s1 + $0x138] sm:$0xff]   ;;  %v51_v22 = vld [vmem:[%s5168_s0 + $0x120] sm:$0xff]  ;;  %v3436_v9 = vld [vmem:[%s5167_s1 + $0x2a8] sm:$0xff]  }
  0x3d   :  { %1742 = vmatprep.mubr.bf16.mxu1 %v418_v33  ;;  %2870 = vmatpush3.bf16.msra.mxu0 %v3406_v18  ;;  %v465_v33 = vpack.c.bf16 %v257_v25, %v241_v24  ;;  %v3414_v18 = vld [vmem:[%s5167_s1 + $0x200] sm:$0xff]   ;;  %v3417_v24 = vld [vmem:[%s5167_s1 + $0x248] sm:$0xff]  }
  0x3e   :  { %2952 = vmatpush3.bf16.msra.mxu1 %v3408_v21  ;;  %2871 = vmatprep.subr.bf16.mxu0 %v3409_v30  ;;  %v67_v23 = vld [vmem:[%s5168_s0 + $0x1a0] sm:$0xff]  ;;  %v3418_v25 = vld [vmem:[%s5167_s1 + $0x208] sm:$0xff]  }
  0x3f   :  { %2953 = vmatprep.subr.bf16.mxu1 %v3411_v36  ;;  %v84_v30 = vld [vmem:[%s5168_s0 + $0x228] sm:$0xff]  ;;  %v371_v36 = vpack.c.bf16 %v67_v23, %v51_v22  ;;  %v165_v22 = vld [vmem:[%s5168_s0 + $0x4b0] sm:$0xff] }
  0x40   :  { %v180_v23 = vld [vmem:[%s5168_s0 + $0x528] sm:$0xff] }
  0x41   :  { %2872 = vmatpush3.bf16.msra.mxu0 %v3410_v32  ;;  %v3421_v32 = vld [vmem:[%s5167_s1 + $0x250] sm:$0xff]  }
  0x42   :  { %2954 = vmatpush3.bf16.msra.mxu1 %v3412_v37  ;;  %v373_v37 = vpack.c.bf16 %v69_v28, %v53_v27  ;;  %v3442_v27 = vld [vmem:[%s5167_s1 + $0x238] sm:$0xff]  }
  0x43   :  { %1623 = vmatmul.mubr.bf16.gmra.mrb[16].mxu0 %v415_v46  ;;  %v3413_v46 = vld [vmem:[%s5167_s1 + $0x240] sm:$0xff]   ;;  %3103 = vmatprep.subr.bf16.mxu1 %v3415_v50  ;;  %v118_v50 = vld [vmem:[%s5168_s0 + $0x338] sm:$0xff] }
  0x44   :  { %1743 = vmatmul.mubr.bf16.gmra.mrb[16].mxu1 %v417_v48  ;;  %1630 = vmatprep.mubr.bf16.mxu0 %v432_v49  ;;  %v481_v48 = vpack.c.bf16 %v289_v41, %v273_v40  ;;  %v496_v49 = vpack.c.bf16 %v320_v43, %v304_v42  ;;  %v3422_v40 = vld [vmem:[%s5167_s1 + $0x210] sm:$0xff]   ;;  %v83_v41 = vld [vmem:[%s5168_s0 + $0x220] sm:$0xff]  ;;  %v3443_v28 = vld [vmem:[%s5167_s1 + $0x2f8] sm:$0xff]  }
  0x45   :  { %1750 = vmatprep.mubr.bf16.mxu1 %v434_v51  ;;  %3021 = vmatprep.subr.bf16.mxu0 %v3413_v46  ;;  %v498_v51 = vpack.c.bf16 %v322_v45, %v306_v44  ;;  %v99_v42 = vld [vmem:[%s5168_s0 + $0x2a0] sm:$0xff]  ;;  %v3424_v43 = vld [vmem:[%s5167_s1 + $0x290] sm:$0xff]   ;;  %v3425_v44 = vld [vmem:[%s5167_s1 + $0x258] sm:$0xff]  }
  0x46   :  { %v85_v45 = vld [vmem:[%s5168_s0 + $0x230] sm:$0xff]  ;;  %v387_v55 = vpack.c.bf16 %v99_v42, %v83_v41  ;;  %v228_v41 = vld [vmem:[%s5168_s0 + $0x6a8] sm:$0xff]  ;;  %v214_v42 = vld [vmem:[%s5168_s0 + $0x638] sm:$0xff] }
  0x47   :  { %v101_v46 = vld [vmem:[%s5168_s0 + $0x2b0] sm:$0xff] }
  0x48   :  { %v389_v57 = vpack.c.bf16 %v101_v46, %v85_v45 }
  0x4b   :  { %1631 = vmatmul.mubr.bf16.gmra.mrb[20].mxu0 %v431_v62  ;;  %v335_v62 = vld [vmem:[%s5168_s0 + $0xa00] sm:$0x3] }
  0x4c   :  { %1751 = vmatmul.mubr.bf16.gmra.mrb[20].mxu1 %v433_v0  ;;  %1638 = vmatprep.mubr.bf16.mxu0 %v448_v1  ;;  %v20_v0 = vld [vmem:[%s5168_s0 + $0x28] sm:$0xff]  ;;  %v511_v4 = vpack.c.bf16 %v335_v62, %v335_v62  ;;  %v131_v62 = vld [vmem:[%s5168_s0 + $0x3a0] sm:$0xff] }
  0x4d   :  { %1758 = vmatprep.mubr.bf16.mxu1 %v450_v2  ;;  %v36_v1 = vld [vmem:[%s5168_s0 + $0xa8] sm:$0xff]  ;;  %v22_v2 = vld [vmem:[%s5168_s0 + $0x38] sm:$0xff] }
  0x4e   :  { %v356_v6 = vpack.c.bf16 %v36_v1, %v20_v0  ;;  %v358_v7 = vpack.c.bf16 %v38_v3, %v22_v2  ;;  %v3433_v0 = vld [vmem:[%s5167_s1 + $0x268] sm:$0xff]   ;;  %v117_v1 = vld [vmem:[%s5168_s0 + $0x330] sm:$0xff] }
  0x4f   :  { %v133_v2 = vld [vmem:[%s5168_s0 + $0x3b0] sm:$0xff]  ;;  %v148_v3 = vld [vmem:[%s5168_s0 + $0x428] sm:$0xff] }
  0x50   :  { %v405_v13 = vpack.c.bf16 %v133_v2, %v117_v1  ;;  %v292_v1 = vld [vmem:[%s5168_s0 + $0x8a8] sm:$0xff]  ;;  %v278_v2 = vld [vmem:[%s5168_s0 + $0x838] sm:$0xff] }
  0x53   :  { %1639 = vmatmul.mubr.bf16.gmra.mrb[24].mxu0 %v447_v14  ;;  %v54_v14 = vld [vmem:[%s5168_s0 + $0x138] sm:$0xff] }
  0x54   :  { %1759 = vmatmul.mubr.bf16.gmra.mrb[24].mxu1 %v449_v16  ;;  %1646 = vmatprep.mubr.bf16.mxu0 %v464_v17  ;;  %v70_v16 = vld [vmem:[%s5168_s0 + $0x1b8] sm:$0xff]  ;;  %v357_v17 = vpack.c.bf16 %v37_v11, %v21_v10  ;;  %v3437_v10 = vld [vmem:[%s5167_s1 + $0x270] sm:$0xff]  }
  0x55   :  { %1766 = vmatprep.mubr.bf16.mxu1 %v466_v19  ;;  %v3416_v19 = vld [vmem:[%s5167_s1 + $0x280] sm:$0xff]   ;;  %v374_v21 = vpack.c.bf16 %v70_v16, %v54_v14  ;;  %v3438_v16 = vld [vmem:[%s5167_s1 + $0x230] sm:$0xff]  }
  0x5b   :  { %1647 = vmatmul.mubr.bf16.gmra.mrb[28].mxu0 %v463_v31  ;;  %v100_v31 = vld [vmem:[%s5168_s0 + $0x2a8] sm:$0xff] }
  0x5c   :  { %1767 = vmatmul.mubr.bf16.gmra.mrb[28].mxu1 %v465_v33  ;;  %1654 = vmatprep.mubr.bf16.mxu0 %v480_v34  ;;  %v86_v33 = vld [vmem:[%s5168_s0 + $0x238] sm:$0xff]  ;;  %v388_v38 = vpack.c.bf16 %v100_v31, %v84_v30 }
  0x5d   :  { %1774 = vmatprep.mubr.bf16.mxu1 %v482_v35  ;;  %v102_v34 = vld [vmem:[%s5168_s0 + $0x2b8] sm:$0xff]  ;;  %v3423_v35 = vld [vmem:[%s5167_s1 + $0x2d0] sm:$0xff]  }
  0x5e   :  { %v390_v39 = vpack.c.bf16 %v102_v34, %v86_v33  ;;  %v179_v34 = vld [vmem:[%s5168_s0 + $0x520] sm:$0xff] }
  0x63   :  { %1655 = vmatmul.mubr.bf16.gmra.mrb[32].mxu0 %v479_v47  ;;  %v116_v47 = vld [vmem:[%s5168_s0 + $0x328] sm:$0xff] }
  0x64   :  { %1775 = vmatmul.mubr.bf16.gmra.mrb[32].mxu1 %v481_v48  ;;  %1662 = vmatprep.mubr.bf16.mxu0 %v496_v49  ;;  %v132_v48 = vld [vmem:[%s5168_s0 + $0x3a8] sm:$0xff]  ;;  %v3427_v49 = vld [vmem:[%s5167_s1 + $0x2d8] sm:$0xff]  }
  0x65   :  { %1782 = vmatprep.mubr.bf16.mxu1 %v498_v51  ;;  %v134_v51 = vld [vmem:[%s5168_s0 + $0x3b8] sm:$0xff] }
  0x6b   :  { %1663 = vmatmul.mubr.bf16.gmra.mrb[36].mxu0 %v495_v58  ;;  %v404_v58 = vpack.c.bf16 %v132_v48, %v116_v47  ;;  %v211_v48 = vld [vmem:[%s5168_s0 + $0x620] sm:$0xff] }
  0x6c   :  { %1783 = vmatmul.mubr.bf16.gmra.mrb[36].mxu1 %v497_v59  ;;  %1670 = vmatprep.mubr.bf16.mxu0 %v512_v60  ;;  %v406_v59 = vpack.c.bf16 %v134_v51, %v118_v50  ;;  %v3430_v60 = vld [vmem:[%s5167_s1 + $0x220] sm:$0xff]   ;;  %v213_v50 = vld [vmem:[%s5168_s0 + $0x630] sm:$0xff] }
  0x6d   :  { %1790 = vmatprep.mubr.bf16.mxu1 %v514_v61  ;;  %v115_v61 = vld [vmem:[%s5168_s0 + $0x320] sm:$0xff]  ;;  %v229_v51 = vld [vmem:[%s5168_s0 + $0x6b0] sm:$0xff] }
  0x6e   :  { %v403_v11 = vpack.c.bf16 %v131_v62, %v115_v61  ;;  %v259_v61 = vld [vmem:[%s5168_s0 + $0x7a0] sm:$0xff]  ;;  %v245_v62 = vld [vmem:[%s5168_s0 + $0x730] sm:$0xff] }
  0x73   :  { %1671 = vmatmul.mubr.bf16.gmra.mrb[40].mxu0 %v511_v4  ;;  %v164_v4 = vld [vmem:[%s5168_s0 + $0x4a8] sm:$0xff] }
  0x74   :  { %1791 = vmatmul.mubr.bf16.gmra.mrb[40].mxu1 %v513_v5  ;;  %1830 = vmatprep.mubr.bf16.mxu0 %v356_v6  ;;  %v3435_v5 = vld [vmem:[%s5167_s1 + $0x2e8] sm:$0xff]   ;;  %v150_v6 = vld [vmem:[%s5168_s0 + $0x438] sm:$0xff]  ;;  %v420_v14 = vpack.c.bf16 %v164_v4, %v148_v3 }
  0x75   :  { %1950 = vmatprep.mubr.bf16.mxu1 %v358_v7  ;;  %v166_v7 = vld [vmem:[%s5168_s0 + $0x4b8] sm:$0xff] }
  0x76   :  { %v294_v3 = vld [vmem:[%s5168_s0 + $0x8b8] sm:$0xff] }
  0x7b   :  { %1831 = vmatmul.mubr.bf16.vlgmr.msra.gmra.mrb[44].mxu0 %v355_v15  ;;  %v422_v15 = vpack.c.bf16 %v166_v7, %v150_v6  ;;  %v486_v7 = vpack.c.bf16 %v294_v3, %v278_v2  ;;  %v106_v2 = vld [vmem:[%s5168_s0 + $0x2d8] sm:$0xff]  ;;  %v3455_v3 = vld [vmem:[%s5167_s1 + $0x3d0] sm:$0xff]  }
  0x7c   :  { %1951 = vmatmul.mubr.bf16.vlgmr.msra.gmra.mrb[44].mxu1 %v357_v17  ;;  %3022 = vmatpush3.bf16.msra.mxu0 %v3414_v18  ;;  %v3440_v17 = vld [vmem:[%s5167_s1 + $0x2b0] sm:$0xff]   ;;  %v147_v18 = vld [vmem:[%s5168_s0 + $0x420] sm:$0xff] }
  0x7d   :  { %3104 = vmatpush3.bf16.msra.mxu1 %v3416_v19  ;;  %1838 = vmatprep.mubr.bf16.mxu0 %v372_v20  ;;  %v163_v19 = vld [vmem:[%s5168_s0 + $0x4a0] sm:$0xff]  ;;  %v3441_v20 = vld [vmem:[%s5167_s1 + $0x278] sm:$0xff]  }
  0x7e   :  { %1958 = vmatprep.mubr.bf16.mxu1 %v374_v21  ;;  %3023 = vmatprep.subr.bf16.mxu0 %v3417_v24  ;;  %v149_v21 = vld [vmem:[%s5168_s0 + $0x430] sm:$0xff]  ;;  %v196_v24 = vld [vmem:[%s5168_s0 + $0x5a8] sm:$0xff]  ;;  %v419_v30 = vpack.c.bf16 %v163_v19, %v147_v18 }
  0x7f   :  { %3105 = vmatprep.subr.bf16.mxu1 %v3419_v26  ;;  %v198_v26 = vld [vmem:[%s5168_s0 + $0x5b8] sm:$0xff]  ;;  %v421_v31 = vpack.c.bf16 %v165_v22, %v149_v21  ;;  %v323_v21 = vld [vmem:[%s5168_s0 + $0x9a0] sm:$0xff]  ;;  %v309_v22 = vld [vmem:[%s5168_s0 + $0x930] sm:$0xff] }
  0x80   :  { %3024 = vmatpush3.bf16.msra.mxu0 %v3418_v25  ;;  %v182_v25 = vld [vmem:[%s5168_s0 + $0x538] sm:$0xff] }
  0x81   :  { %3106 = vmatpush3.bf16.msra.mxu1 %v3420_v29  ;;  %3025 = vmatprep.subr.bf16.mxu0 %v3421_v32  ;;  %v3444_v29 = vld [vmem:[%s5167_s1 + $0x2b8] sm:$0xff]   ;;  %v436_v32 = vpack.c.bf16 %v196_v24, %v180_v23  ;;  %v438_v33 = vpack.c.bf16 %v198_v26, %v182_v25  ;;  %v325_v23 = vld [vmem:[%s5168_s0 + $0x9b0] sm:$0xff]  ;;  %v340_v24 = vld [vmem:[%s5168_s0 + $0xa28] sm:$0x3] }
  0x82   :  { %3107 = vmatprep.subr.bf16.mxu1 %v3423_v35  ;;  %v195_v35 = vld [vmem:[%s5168_s0 + $0x5a0] sm:$0xff]  ;;  %v342_v25 = vld [vmem:[%s5168_s0 + $0xa38] sm:$0x3] }
  0x83   :  { %1839 = vmatmul.mubr.bf16.gmra.mrb[48].mxu0 %v371_v36  ;;  %v3445_v36 = vld [vmem:[%s5167_s1 + $0x340] sm:$0xff]  }
  0x84   :  { %1959 = vmatmul.mubr.bf16.gmra.mrb[48].mxu1 %v373_v37  ;;  %1846 = vmatprep.mubr.bf16.mxu0 %v388_v38  ;;  %v181_v37 = vld [vmem:[%s5168_s0 + $0x530] sm:$0xff] }
  0x85   :  { %1966 = vmatprep.mubr.bf16.mxu1 %v390_v39  ;;  %3026 = vmatpush3.bf16.msra.mxu0 %v3422_v40  ;;  %v197_v38 = vld [vmem:[%s5168_s0 + $0x5b0] sm:$0xff]  ;;  %v3447_v39 = vld [vmem:[%s5167_s1 + $0x3c0] sm:$0xff]   ;;  %v212_v40 = vld [vmem:[%s5168_s0 + $0x628] sm:$0xff] }
  0x86   :  { %3108 = vmatpush3.bf16.msra.mxu1 %v3424_v43  ;;  %3027 = vmatprep.subr.bf16.mxu0 %v3425_v44  ;;  %v230_v43 = vld [vmem:[%s5168_s0 + $0x6b8] sm:$0xff]  ;;  %v435_v44 = vpack.c.bf16 %v195_v35, %v179_v34  ;;  %v437_v45 = vpack.c.bf16 %v197_v38, %v181_v37  ;;  %v452_v46 = vpack.c.bf16 %v228_v41, %v212_v40  ;;  %v23_v40 = vld [vmem:[%s5168_s0 + $0x40] sm:$0xff] }
  0x87   :  { %3109 = vmatprep.subr.bf16.mxu1 %v3427_v49  ;;  %v454_v47 = vpack.c.bf16 %v230_v43, %v214_v42  ;;  %v227_v49 = vld [vmem:[%s5168_s0 + $0x6a0] sm:$0xff]  ;;  %v26_v34 = vld [vmem:[%s5168_s0 + $0x58] sm:$0xff]  ;;  %v25_v42 = vld [vmem:[%s5168_s0 + $0x50] sm:$0xff] }
  0x88   :  { %v42_v35 = vld [vmem:[%s5168_s0 + $0xd8] sm:$0xff]  ;;  %v39_v41 = vld [vmem:[%s5168_s0 + $0xc0] sm:$0xff]  ;;  %v41_v43 = vld [vmem:[%s5168_s0 + $0xd0] sm:$0xff] }
  0x89   :  { %3028 = vmatpush3.bf16.msra.mxu0 %v3426_v52  ;;  %v244_v52 = vld [vmem:[%s5168_s0 + $0x728] sm:$0xff] }
  0x8a   :  { %3110 = vmatpush3.bf16.msra.mxu1 %v3428_v53  ;;  %3029 = vmatprep.subr.bf16.mxu0 %v3429_v54  ;;  %v260_v53 = vld [vmem:[%s5168_s0 + $0x7a8] sm:$0xff]  ;;  %v246_v54 = vld [vmem:[%s5168_s0 + $0x738] sm:$0xff] }
  0x8b   :  { %1847 = vmatmul.mubr.bf16.gmra.mrb[52].mxu0 %v387_v55  ;;  %3111 = vmatprep.subr.bf16.mxu1 %v3431_v56  ;;  %v262_v55 = vld [vmem:[%s5168_s0 + $0x7b8] sm:$0xff]  ;;  %v451_v56 = vpack.c.bf16 %v227_v49, %v211_v48  ;;  %v361_v49 = vpack.c.bf16 %v41_v43, %v25_v42  ;;  %v3469_v42 = vld [vmem:[%s5167_s1 + $0x370] sm:$0xff]  }
  0x8c   :  { %1967 = vmatmul.mubr.bf16.gmra.mrb[52].mxu1 %v389_v57  ;;  %1854 = vmatprep.mubr.bf16.mxu0 %v404_v58  ;;  %v453_v57 = vpack.c.bf16 %v229_v51, %v213_v50  ;;  %v468_v58 = vpack.c.bf16 %v260_v53, %v244_v52  ;;  %v74_v48 = vld [vmem:[%s5168_s0 + $0x1d8] sm:$0xff]  ;;  %v3446_v50 = vld [vmem:[%s5167_s1 + $0x300] sm:$0xff]  }
  0x8d   :  { %1974 = vmatprep.mubr.bf16.mxu1 %v406_v59  ;;  %3030 = vmatpush3.bf16.msra.mxu0 %v3430_v60  ;;  %v470_v59 = vpack.c.bf16 %v262_v55, %v246_v54  ;;  %v243_v60 = vld [vmem:[%s5168_s0 + $0x720] sm:$0xff]  ;;  %v3449_v55 = vld [vmem:[%s5167_s1 + $0x348] sm:$0xff]  }
  0x8e   :  { %3112 = vmatpush3.bf16.msra.mxu1 %v3432_v63  ;;  %3031 = vmatprep.subr.bf16.mxu0 %v3433_v0  ;;  %v261_v63 = vld [vmem:[%s5168_s0 + $0x7b0] sm:$0xff]  ;;  %v276_v0 = vld [vmem:[%s5168_s0 + $0x828] sm:$0xff]  ;;  %v467_v4 = vpack.c.bf16 %v259_v61, %v243_v60  ;;  %v3448_v51 = vld [vmem:[%s5167_s1 + $0x380] sm:$0xff]  }
  0x8f   :  { %3113 = vmatprep.subr.bf16.mxu1 %v3435_v5  ;;  %v469_v5 = vpack.c.bf16 %v261_v63, %v245_v62  ;;  %v484_v6 = vpack.c.bf16 %v292_v1, %v276_v0  ;;  %v55_v54 = vld [vmem:[%s5168_s0 + $0x140] sm:$0xff]  ;;  %v3450_v60 = vld [vmem:[%s5167_s1 + $0x308] sm:$0xff]   ;;  %v3453_v0 = vld [vmem:[%s5167_s1 + $0x350] sm:$0xff]  }
  0x90   :  { %v3452_v61 = vld [vmem:[%s5167_s1 + $0x388] sm:$0xff]   ;;  %v90_v1 = vld [vmem:[%s5168_s0 + $0x258] sm:$0xff] }
  0x91   :  { %3032 = vmatpush3.bf16.msra.mxu0 %v3434_v8  ;;  %v275_v8 = vld [vmem:[%s5168_s0 + $0x820] sm:$0xff]  ;;  %v88_v62 = vld [vmem:[%s5168_s0 + $0x248] sm:$0xff] }
  0x92   :  { %3114 = vmatpush3.bf16.msra.mxu1 %v3436_v9  ;;  %3033 = vmatprep.subr.bf16.mxu0 %v3437_v10  ;;  %v291_v9 = vld [vmem:[%s5168_s0 + $0x8a0] sm:$0xff]  ;;  %v277_v10 = vld [vmem:[%s5168_s0 + $0x830] sm:$0xff]  ;;  %v104_v63 = vld [vmem:[%s5168_s0 + $0x2c8] sm:$0xff] }
  0x93   :  { %1855 = vmatmul.mubr.bf16.gmra.mrb[56].mxu0 %v403_v11  ;;  %3115 = vmatprep.subr.bf16.mxu1 %v3439_v12  ;;  %v293_v11 = vld [vmem:[%s5168_s0 + $0x8b0] sm:$0xff]  ;;  %v308_v12 = vld [vmem:[%s5168_s0 + $0x928] sm:$0xff] }
  0x94   :  { %1975 = vmatmul.mubr.bf16.gmra.mrb[56].mxu1 %v405_v13  ;;  %1862 = vmatprep.mubr.bf16.mxu0 %v420_v14  ;;  %v324_v13 = vld [vmem:[%s5168_s0 + $0x9a8] sm:$0xff]  ;;  %v310_v14 = vld [vmem:[%s5168_s0 + $0x938] sm:$0xff] }
  0x95   :  { %1982 = vmatprep.mubr.bf16.mxu1 %v422_v15  ;;  %3034 = vmatpush3.bf16.msra.mxu0 %v3438_v16  ;;  %v326_v15 = vld [vmem:[%s5168_s0 + $0x9b8] sm:$0xff]  ;;  %v483_v16 = vpack.c.bf16 %v291_v9, %v275_v8  ;;  %v500_v18 = vpack.c.bf16 %v324_v13, %v308_v12  ;;  %v3454_v8 = vld [vmem:[%s5167_s1 + $0x310] sm:$0xff]   ;;  %v103_v12 = vld [vmem:[%s5168_s0 + $0x2c0] sm:$0xff] }
  0x96   :  { %3116 = vmatpush3.bf16.msra.mxu1 %v3440_v17  ;;  %3035 = vmatprep.subr.bf16.mxu0 %v3441_v20  ;;  %v485_v17 = vpack.c.bf16 %v293_v11, %v277_v10  ;;  %v502_v19 = vpack.c.bf16 %v326_v15, %v310_v14  ;;  %v307_v20 = vld [vmem:[%s5168_s0 + $0x920] sm:$0xff]  ;;  %v3456_v9 = vld [vmem:[%s5167_s1 + $0x390] sm:$0xff]   ;;  %v3457_v10 = vld [vmem:[%s5167_s1 + $0x358] sm:$0xff]  }
  0x97   :  { %3117 = vmatprep.subr.bf16.mxu1 %v3443_v28  ;;  %v499_v26 = vpack.c.bf16 %v323_v21, %v307_v20  ;;  %v516_v28 = vpack.c.bf16 %v340_v24, %v340_v24  ;;  %v87_v11 = vld [vmem:[%s5168_s0 + $0x240] sm:$0xff]  ;;  %v3459_v13 = vld [vmem:[%s5167_s1 + $0x3d8] sm:$0xff]   ;;  %v89_v14 = vld [vmem:[%s5168_s0 + $0x250] sm:$0xff] }
  0x98   :  { %v105_v15 = vld [vmem:[%s5168_s0 + $0x2d0] sm:$0xff]  ;;  %v138_v20 = vld [vmem:[%s5168_s0 + $0x3d8] sm:$0xff]  ;;  %v3463_v24 = vld [vmem:[%s5167_s1 + $0x3e0] sm:$0xff]  }
  0x99   :  { %3036 = vmatpush3.bf16.msra.mxu0 %v3442_v27  ;;  %v501_v27 = vpack.c.bf16 %v325_v23, %v309_v22  ;;  %v3460_v21 = vld [vmem:[%s5167_s1 + $0x398] sm:$0xff]   ;;  %v3461_v22 = vld [vmem:[%s5167_s1 + $0x360] sm:$0xff]   ;;  %v391_v23 = vpack.c.bf16 %v103_v12, %v87_v11 }
  0x9a   :  { %3118 = vmatpush3.bf16.msra.mxu1 %v3444_v29  ;;  %3185 = vmatprep.subr.bf16.mxu0 %v3445_v36  ;;  %v518_v29 = vpack.c.bf16 %v342_v25, %v342_v25  ;;  %v393_v25 = vpack.c.bf16 %v105_v15, %v89_v14  ;;  %v4544_v12 = vld [vmem:[%s5169_s2] ss:$0 sm:$0xff] }
  0x9b   :  { %1863 = vmatmul.mubr.bf16.gmra.mrb[60].mxu0 %v419_v30  ;;  %3267 = vmatprep.subr.bf16.mxu1 %v3447_v39  ;;  %v339_v30 = vld [vmem:[%s5168_s0 + $0xa20] sm:$0x3]  ;;  %v362_v39 = vpack.c.bf16 %v42_v35, %v26_v34  ;;  %v121_v34 = vld [vmem:[%s5168_s0 + $0x350] sm:$0xff] }
  0x9c   :  { %1983 = vmatmul.mubr.bf16.gmra.mrb[60].mxu1 %v421_v31  ;;  %1870 = vmatprep.mubr.bf16.mxu0 %v436_v32  ;;  %v341_v31 = vld [vmem:[%s5168_s0 + $0xa30] sm:$0x3]  ;;  %v24_v32 = vld [vmem:[%s5168_s0 + $0x48] sm:$0xff]  ;;  %v515_v36 = vpack.c.bf16 %v339_v30, %v339_v30 }
  0x9d   :  { %1990 = vmatprep.mubr.bf16.mxu1 %v438_v33  ;;  %v40_v33 = vld [vmem:[%s5168_s0 + $0xc8] sm:$0xff]  ;;  %v517_v37 = vpack.c.bf16 %v341_v31, %v341_v31  ;;  %v119_v31 = vld [vmem:[%s5168_s0 + $0x340] sm:$0xff]  ;;  %v137_v35 = vld [vmem:[%s5168_s0 + $0x3d0] sm:$0xff] }
  0x9e   :  { %v360_v38 = vpack.c.bf16 %v40_v33, %v24_v32  ;;  %v3465_v30 = vld [vmem:[%s5167_s1 + $0x368] sm:$0xff]   ;;  %v135_v32 = vld [vmem:[%s5168_s0 + $0x3c0] sm:$0xff] }
  0x9f   :  { %v3467_v33 = vld [vmem:[%s5167_s1 + $0x3e8] sm:$0xff]   ;;  %v407_v43 = vpack.c.bf16 %v135_v32, %v119_v31  ;;  %v231_v31 = vld [vmem:[%s5168_s0 + $0x6c0] sm:$0xff]  ;;  %v217_v32 = vld [vmem:[%s5168_s0 + $0x650] sm:$0xff] }
  0xa3   :  { %1871 = vmatmul.mubr.bf16.gmra.mrb[64].mxu0 %v435_v44  ;;  %v56_v44 = vld [vmem:[%s5168_s0 + $0x148] sm:$0xff] }
  0xa4   :  { %1991 = vmatmul.mubr.bf16.gmra.mrb[64].mxu1 %v437_v45  ;;  %1878 = vmatprep.mubr.bf16.mxu0 %v452_v46  ;;  %v72_v45 = vld [vmem:[%s5168_s0 + $0x1c8] sm:$0xff]  ;;  %v58_v46 = vld [vmem:[%s5168_s0 + $0x158] sm:$0xff] }
  0xa5   :  { %1998 = vmatprep.mubr.bf16.mxu1 %v454_v47  ;;  %v359_v47 = vpack.c.bf16 %v39_v41, %v23_v40  ;;  %v376_v52 = vpack.c.bf16 %v72_v45, %v56_v44  ;;  %v378_v53 = vpack.c.bf16 %v74_v48, %v58_v46  ;;  %v170_v40 = vld [vmem:[%s5168_s0 + $0x4d8] sm:$0xff]  ;;  %v3468_v41 = vld [vmem:[%s5167_s1 + $0x3a8] sm:$0xff]   ;;  %v3471_v44 = vld [vmem:[%s5167_s1 + $0x3f0] sm:$0xff]   ;;  %v409_v45 = vpack.c.bf16 %v137_v35, %v121_v34 }
  0xa6   :  { %v3470_v48 = vld [vmem:[%s5167_s1 + $0x330] sm:$0xff]   ;;  %v248_v34 = vld [vmem:[%s5168_s0 + $0x748] sm:$0xff] }
  0xa7   :  { %v264_v35 = vld [vmem:[%s5168_s0 + $0x7c8] sm:$0xff] }
  0xab   :  { %1879 = vmatmul.mubr.bf16.gmra.mrb[68].mxu0 %v451_v56  ;;  %v71_v56 = vld [vmem:[%s5168_s0 + $0x1c0] sm:$0xff] }
  0xac   :  { %1999 = vmatmul.mubr.bf16.gmra.mrb[68].mxu1 %v453_v57  ;;  %1886 = vmatprep.mubr.bf16.mxu0 %v468_v58  ;;  %v57_v57 = vld [vmem:[%s5168_s0 + $0x150] sm:$0xff]  ;;  %v3451_v58 = vld [vmem:[%s5167_s1 + $0x3c8] sm:$0xff]  }
  0xad   :  { %2006 = vmatprep.mubr.bf16.mxu1 %v470_v59  ;;  %v73_v59 = vld [vmem:[%s5168_s0 + $0x1d0] sm:$0xff] }
  0xb3   :  { %1887 = vmatmul.mubr.bf16.gmra.mrb[72].mxu0 %v467_v4  ;;  %v375_v4 = vpack.c.bf16 %v71_v56, %v55_v54  ;;  %v153_v54 = vld [vmem:[%s5168_s0 + $0x450] sm:$0xff]  ;;  %v184_v56 = vld [vmem:[%s5168_s0 + $0x548] sm:$0xff] }
  0xb4   :  { %2007 = vmatmul.mubr.bf16.gmra.mrb[72].mxu1 %v469_v5  ;;  %1894 = vmatprep.mubr.bf16.mxu0 %v484_v6  ;;  %v377_v5 = vpack.c.bf16 %v73_v59, %v57_v57  ;;  %v392_v6 = vpack.c.bf16 %v104_v63, %v88_v62  ;;  %v200_v57 = vld [vmem:[%s5168_s0 + $0x5c8] sm:$0xff]  ;;  %v186_v59 = vld [vmem:[%s5168_s0 + $0x558] sm:$0xff] }
  0xb5   :  { %2014 = vmatprep.mubr.bf16.mxu1 %v486_v7  ;;  %v394_v7 = vpack.c.bf16 %v106_v2, %v90_v1  ;;  %v183_v2 = vld [vmem:[%s5168_s0 + $0x540] sm:$0xff] }
  0xbb   :  { %1895 = vmatmul.mubr.bf16.gmra.mrb[76].mxu0 %v483_v16  ;;  %v120_v16 = vld [vmem:[%s5168_s0 + $0x348] sm:$0xff] }
  0xbc   :  { %2015 = vmatmul.mubr.bf16.gmra.mrb[76].mxu1 %v485_v17  ;;  %1902 = vmatprep.mubr.bf16.mxu0 %v500_v18  ;;  %v136_v17 = vld [vmem:[%s5168_s0 + $0x3c8] sm:$0xff]  ;;  %v122_v18 = vld [vmem:[%s5168_s0 + $0x358] sm:$0xff] }
  0xbd   :  { %2022 = vmatprep.mubr.bf16.mxu1 %v502_v19  ;;  %v3458_v19 = vld [vmem:[%s5167_s1 + $0x318] sm:$0xff]  }
  0xc3   :  { %1903 = vmatmul.mubr.bf16.gmra.mrb[80].mxu0 %v499_v26  ;;  %v408_v26 = vpack.c.bf16 %v136_v17, %v120_v16 }
  0xc4   :  { %2023 = vmatmul.mubr.bf16.gmra.mrb[80].mxu1 %v501_v27  ;;  %1910 = vmatprep.mubr.bf16.mxu0 %v516_v28  ;;  %v410_v27 = vpack.c.bf16 %v138_v20, %v122_v18  ;;  %v3462_v28 = vld [vmem:[%s5167_s1 + $0x320] sm:$0xff]  }
  0xc5   :  { %2030 = vmatprep.mubr.bf16.mxu1 %v518_v29  ;;  %v3464_v29 = vld [vmem:[%s5167_s1 + $0x3a0] sm:$0xff]  }
  0xcb   :  { %1911 = vmatmul.mubr.bf16.gmra.mrb[84].mxu0 %v515_v36  ;;  %v152_v36 = vld [vmem:[%s5168_s0 + $0x448] sm:$0xff] }
  0xcc   :  { %2031 = vmatmul.mubr.bf16.gmra.mrb[84].mxu1 %v517_v37  ;;  %2070 = vmatprep.mubr.bf16.mxu0 %v360_v38  ;;  %v168_v37 = vld [vmem:[%s5168_s0 + $0x4c8] sm:$0xff]  ;;  %v154_v38 = vld [vmem:[%s5168_s0 + $0x458] sm:$0xff] }
  0xcd   :  { %2190 = vmatprep.mubr.bf16.mxu1 %v362_v39  ;;  %v3466_v39 = vld [vmem:[%s5167_s1 + $0x328] sm:$0xff]   ;;  %v424_v46 = vpack.c.bf16 %v168_v37, %v152_v36 }
  0xd3   :  { %2071 = vmatmul.mubr.bf16.vlgmr.msra.gmra.mrb[88].mxu0 %v359_v47  ;;  %v426_v47 = vpack.c.bf16 %v170_v40, %v154_v38  ;;  %v250_v38 = vld [vmem:[%s5168_s0 + $0x758] sm:$0xff] }
  0xd4   :  { %2191 = vmatmul.mubr.bf16.vlgmr.msra.gmra.mrb[88].mxu1 %v361_v49  ;;  %3186 = vmatpush3.bf16.msra.mxu0 %v3446_v50  ;;  %v3472_v49 = vld [vmem:[%s5167_s1 + $0x3b0] sm:$0xff]   ;;  %v3473_v50 = vld [vmem:[%s5167_s1 + $0x378] sm:$0xff]  }
  0xd5   :  { %3268 = vmatpush3.bf16.msra.mxu1 %v3448_v51  ;;  %2078 = vmatprep.mubr.bf16.mxu0 %v376_v52  ;;  %v151_v51 = vld [vmem:[%s5168_s0 + $0x440] sm:$0xff]  ;;  %v3475_v52 = vld [vmem:[%s5167_s1 + $0x3f8] sm:$0xff]  }
  0xd6   :  { %2198 = vmatprep.mubr.bf16.mxu1 %v378_v53  ;;  %3187 = vmatprep.subr.bf16.mxu0 %v3449_v55  ;;  %v167_v53 = vld [vmem:[%s5168_s0 + $0x4c0] sm:$0xff]  ;;  %v169_v55 = vld [vmem:[%s5168_s0 + $0x4d0] sm:$0xff] }
  0xd7   :  { %3269 = vmatprep.subr.bf16.mxu1 %v3451_v58  ;;  %v3474_v58 = vld [vmem:[%s5167_s1 + $0x338] sm:$0xff]   ;;  %v423_v62 = vpack.c.bf16 %v167_v53, %v151_v51  ;;  %v425_v63 = vpack.c.bf16 %v169_v55, %v153_v54 }
  0xd8   :  { %3188 = vmatpush3.bf16.msra.mxu0 %v3450_v60  ;;  %v202_v60 = vld [vmem:[%s5168_s0 + $0x5d8] sm:$0xff] }
  0xd9   :  { %3270 = vmatpush3.bf16.msra.mxu1 %v3452_v61  ;;  %3189 = vmatprep.subr.bf16.mxu0 %v3453_v0  ;;  %v3476_v61 = vld [vmem:[%s5167_s1 + $0x3b8] sm:$0xff]   ;;  %v440_v0 = vpack.c.bf16 %v200_v57, %v184_v56  ;;  %v442_v1 = vpack.c.bf16 %v202_v60, %v186_v59  ;;  %v263_v59 = vld [vmem:[%s5168_s0 + $0x7c0] sm:$0xff]  ;;  %v249_v60 = vld [vmem:[%s5168_s0 + $0x750] sm:$0xff] }
  0xda   :  { %3271 = vmatprep.subr.bf16.mxu1 %v3455_v3  ;;  %v199_v3 = vld [vmem:[%s5168_s0 + $0x5c0] sm:$0xff] }
  0xdb   :  { %2079 = vmatmul.mubr.bf16.gmra.mrb[92].mxu0 %v375_v4  ;;  %v185_v4 = vld [vmem:[%s5168_s0 + $0x550] sm:$0xff]  ;;  %v439_v14 = vpack.c.bf16 %v199_v3, %v183_v2  ;;  %v282_v2 = vld [vmem:[%s5168_s0 + $0x858] sm:$0xff] }
  0xdc   :  { %2199 = vmatmul.mubr.bf16.gmra.mrb[92].mxu1 %v377_v5  ;;  %2086 = vmatprep.mubr.bf16.mxu0 %v392_v6  ;;  %v201_v5 = vld [vmem:[%s5168_s0 + $0x5d0] sm:$0xff]  ;;  %v216_v6 = vld [vmem:[%s5168_s0 + $0x648] sm:$0xff]  ;;  %v298_v3 = vld [vmem:[%s5168_s0 + $0x8d8] sm:$0xff] }
  0xdd   :  { %2206 = vmatprep.mubr.bf16.mxu1 %v394_v7  ;;  %3190 = vmatpush3.bf16.msra.mxu0 %v3454_v8  ;;  %v232_v7 = vld [vmem:[%s5168_s0 + $0x6c8] sm:$0xff]  ;;  %v441_v18 = vpack.c.bf16 %v201_v5, %v185_v4 }
  0xde   :  { %3272 = vmatpush3.bf16.msra.mxu1 %v3456_v9  ;;  %3191 = vmatprep.subr.bf16.mxu0 %v3457_v10  ;;  %v218_v9 = vld [vmem:[%s5168_s0 + $0x658] sm:$0xff] }
  0xdf   :  { %3273 = vmatprep.subr.bf16.mxu1 %v3459_v13  ;;  %v234_v10 = vld [vmem:[%s5168_s0 + $0x6d8] sm:$0xff] }
  0xe1   :  { %3192 = vmatpush3.bf16.msra.mxu0 %v3458_v19  ;;  %v456_v19 = vpack.c.bf16 %v232_v7, %v216_v6 }
  0xe2   :  { %3274 = vmatpush3.bf16.msra.mxu1 %v3460_v21  ;;  %3193 = vmatprep.subr.bf16.mxu0 %v3461_v22 }
  0xe3   :  { %2087 = vmatmul.mubr.bf16.gmra.mrb[96].mxu0 %v391_v23  ;;  %3275 = vmatprep.subr.bf16.mxu1 %v3463_v24  ;;  %v458_v23 = vpack.c.bf16 %v234_v10, %v218_v9 }
  0xe4   :  { %2207 = vmatmul.mubr.bf16.gmra.mrb[96].mxu1 %v393_v25  ;;  %2094 = vmatprep.mubr.bf16.mxu0 %v408_v26 }
  0xe5   :  { %2214 = vmatprep.mubr.bf16.mxu1 %v410_v27  ;;  %3194 = vmatpush3.bf16.msra.mxu0 %v3462_v28 }
  0xe6   :  { %3276 = vmatpush3.bf16.msra.mxu1 %v3464_v29  ;;  %3195 = vmatprep.subr.bf16.mxu0 %v3465_v30  ;;  %v215_v30 = vld [vmem:[%s5168_s0 + $0x640] sm:$0xff] }
  0xe7   :  { %3277 = vmatprep.subr.bf16.mxu1 %v3467_v33  ;;  %v233_v33 = vld [vmem:[%s5168_s0 + $0x6d0] sm:$0xff] }
  0xe9   :  { %3196 = vmatpush3.bf16.msra.mxu0 %v3466_v39  ;;  %v266_v39 = vld [vmem:[%s5168_s0 + $0x7d8] sm:$0xff] }
  0xea   :  { %3278 = vmatpush3.bf16.msra.mxu1 %v3468_v41  ;;  %3197 = vmatprep.subr.bf16.mxu0 %v3469_v42  ;;  %v455_v42 = vpack.c.bf16 %v231_v31, %v215_v30  ;;  %v474_v51 = vpack.c.bf16 %v266_v39, %v250_v38 }
  0xeb   :  { %2095 = vmatmul.mubr.bf16.gmra.mrb[100].mxu0 %v407_v43  ;;  %3279 = vmatprep.subr.bf16.mxu1 %v3471_v44 }
  0xec   :  { %2215 = vmatmul.mubr.bf16.gmra.mrb[100].mxu1 %v409_v45  ;;  %2102 = vmatprep.mubr.bf16.mxu0 %v424_v46  ;;  %v457_v46 = vpack.c.bf16 %v233_v33, %v217_v32  ;;  %v314_v32 = vld [vmem:[%s5168_s0 + $0x958] sm:$0xff] }
  0xed   :  { %2222 = vmatprep.mubr.bf16.mxu1 %v426_v47  ;;  %3198 = vmatpush3.bf16.msra.mxu0 %v3470_v48  ;;  %v472_v47 = vpack.c.bf16 %v264_v35, %v248_v34  ;;  %v330_v33 = vld [vmem:[%s5168_s0 + $0x9d8] sm:$0xff] }
  0xee   :  { %3280 = vmatpush3.bf16.msra.mxu1 %v3472_v49  ;;  %3199 = vmatprep.subr.bf16.mxu0 %v3473_v50 }
  0xef   :  { %3281 = vmatprep.subr.bf16.mxu1 %v3475_v52 }
  0xf1   :  { %3200 = vmatpush3.bf16.msra.mxu0 %v3474_v58  ;;  %v247_v58 = vld [vmem:[%s5168_s0 + $0x740] sm:$0xff] }
  0xf2   :  { %3282 = vmatpush3.bf16.msra.mxu1 %v3476_v61  ;;  %v265_v61 = vld [vmem:[%s5168_s0 + $0x7d0] sm:$0xff]  ;;  %v471_v6 = vpack.c.bf16 %v263_v59, %v247_v58  ;;  %v344_v58 = vld [vmem:[%s5168_s0 + $0xa48] sm:$0x3] }
  0xf3   :  { %2103 = vmatmul.mubr.bf16.gmra.mrb[104].mxu0 %v423_v62  ;;  %v280_v62 = vld [vmem:[%s5168_s0 + $0x848] sm:$0xff]  ;;  %v473_v10 = vpack.c.bf16 %v265_v61, %v249_v60  ;;  %v346_v61 = vld [vmem:[%s5168_s0 + $0xa58] sm:$0x3] }
  0xf4   :  { %2223 = vmatmul.mubr.bf16.gmra.mrb[104].mxu1 %v425_v63  ;;  %2110 = vmatprep.mubr.bf16.mxu0 %v440_v0  ;;  %v296_v63 = vld [vmem:[%s5168_s0 + $0x8c8] sm:$0xff] }
  0xf5   :  { %2230 = vmatprep.mubr.bf16.mxu1 %v442_v1 }
  0xf6   :  { %v2709_v8 = vpop.f32.mrb[0].mxu0 }
  0xf7   :  { %v2791_v11 = vpop.f32.mrb[0].mxu1  ;;  %v2710_v13 = vpop.f32.mrb[1].mxu0 }
  0xf8   :  { %v2711_v15 = vadd.f32 %v2710_v13, %v2709_v8  ;;  %v2792_v16 = vpop.f32.mrb[1].mxu1  ;;  %v2712_v17 = vpop.f32.mrb[2].mxu0 }
  0xf9   :  { %v2793_v20 = vadd.f32 %v2792_v16, %v2791_v11  ;;  %v2794_v21 = vpop.f32.mrb[2].mxu1  ;;  %v2713_v22 = vpop.f32.mrb[3].mxu0  ;;  %v488_v11 = vpack.c.bf16 %v296_v63, %v280_v62  ;;  %v490_v16 = vpack.c.bf16 %v298_v3, %v282_v2 }
  0xfa   :  { %v1593_v24 = vadd.f32 %v2711_v15, %v4544_v12  ;;  %v2714_v25 = vadd.f32 %v2713_v22, %v2712_v17  ;;  %v2795_v26 = vpop.f32.mrb[3].mxu1 }
  0xfb   :  { %v2796_v27 = vadd.f32 %v2795_v26, %v2794_v21  ;;  %2111 = vmatmul.mubr.bf16.gmra.mrb[108].mxu0 %v439_v14  ;;  %v297_v26 = vld [vmem:[%s5168_s0 + $0x8d0] sm:$0xff] }
  0xfc   :  { %v4547_v28 = vadd.f32 %v2793_v20, %v1593_v24  ;;  %v1596_v29 = vadd.f32 %v2714_v25, %v4544_v12  ;;  %2231 = vmatmul.mubr.bf16.gmra.mrb[108].mxu1 %v441_v18  ;;  %2118 = vmatprep.mubr.bf16.mxu0 %v456_v19  ;;  %v295_v24 = vld [vmem:[%s5168_s0 + $0x8c0] sm:$0xff]  ;;  %v281_v25 = vld [vmem:[%s5168_s0 + $0x850] sm:$0xff] }
  0xfd   :  { %2238 = vmatprep.mubr.bf16.mxu1 %v458_v23  ;;  %v279_v23 = vld [vmem:[%s5168_s0 + $0x840] sm:$0xff] }
  0xfe   :  { %v4568_v36 = vadd.f32 %v2796_v27, %v1596_v29  ;;  %v2715_v37 = vpop.f32.mrb[4].mxu0  ;;  %v312_v27 = vld [vmem:[%s5168_s0 + $0x948] sm:$0xff] }
  0xff   :  { %v2797_v40 = vpop.f32.mrb[4].mxu1  ;;  %v2716_v41 = vpop.f32.mrb[5].mxu0  ;;  %v328_v29 = vld [vmem:[%s5168_s0 + $0x9c8] sm:$0xff] }
 0x100   :  { %v2717_v43 = vadd.f32 %v2716_v41, %v2715_v37  ;;  %v2798_v44 = vpop.f32.mrb[5].mxu1  ;;  %v2718_v45 = vpop.f32.mrb[6].mxu0  ;;  %v487_v37 = vpack.c.bf16 %v295_v24, %v279_v23  ;;  %v489_v41 = vpack.c.bf16 %v297_v26, %v281_v25  ;;  %v30_v25 = vld [vmem:[%s5168_s0 + $0x78] sm:$0xff] }
 0x101   :  { %v2799_v48 = vadd.f32 %v2798_v44, %v2797_v40  ;;  %v2800_v49 = vpop.f32.mrb[6].mxu1  ;;  %v2719_v50 = vpop.f32.mrb[7].mxu0  ;;  %v46_v26 = vld [vmem:[%s5168_s0 + $0xf8] sm:$0xff] }
 0x102   :  { %v1601_v52 = vadd.f32 %v2717_v43, %v4544_v12  ;;  %v2720_v53 = vadd.f32 %v2719_v50, %v2718_v45  ;;  %v2801_v54 = vpop.f32.mrb[7].mxu1 }
 0x103   :  { %v2802_v55 = vadd.f32 %v2801_v54, %v2800_v49  ;;  %2119 = vmatmul.mubr.bf16.gmra.mrb[112].mxu0 %v455_v42  ;;  %v504_v42 = vpack.c.bf16 %v328_v29, %v312_v27  ;;  %v327_v54 = vld [vmem:[%s5168_s0 + $0x9c0] sm:$0xff] }
 0x104   :  { %v4577_v56 = vadd.f32 %v2799_v48, %v1601_v52  ;;  %v1604_v57 = vadd.f32 %v2720_v53, %v4544_v12  ;;  %2239 = vmatmul.mubr.bf16.gmra.mrb[112].mxu1 %v457_v46  ;;  %2126 = vmatprep.mubr.bf16.mxu0 %v472_v47  ;;  %v506_v46 = vpack.c.bf16 %v330_v33, %v314_v32  ;;  %v311_v53 = vld [vmem:[%s5168_s0 + $0x940] sm:$0xff] }
 0x105   :  { %2246 = vmatprep.mubr.bf16.mxu1 %v474_v51 }
 0x106   :  { %v4598_v0 = vadd.f32 %v2802_v55, %v1604_v57  ;;  %v2721_v1 = vpop.f32.mrb[8].mxu0  ;;  %v313_v55 = vld [vmem:[%s5168_s0 + $0x950] sm:$0xff] }
 0x107   :  { %v2803_v4 = vpop.f32.mrb[8].mxu1  ;;  %v2722_v5 = vpop.f32.mrb[9].mxu0  ;;  %v329_v57 = vld [vmem:[%s5168_s0 + $0x9d0] sm:$0xff] }
 0x108   :  { %v2723_v7 = vadd.f32 %v2722_v5, %v2721_v1  ;;  %v2804_v8 = vpop.f32.mrb[9].mxu1  ;;  %v2724_v9 = vpop.f32.mrb[10].mxu0  ;;  %v503_v1 = vpack.c.bf16 %v327_v54, %v311_v53  ;;  %v505_v5 = vpack.c.bf16 %v329_v57, %v313_v55  ;;  %v60_v53 = vld [vmem:[%s5168_s0 + $0x168] sm:$0xff] }
 0x109   :  { %v2805_v13 = vadd.f32 %v2804_v8, %v2803_v4  ;;  %v2806_v14 = vpop.f32.mrb[10].mxu1  ;;  %v2725_v15 = vpop.f32.mrb[11].mxu0  ;;  %v76_v54 = vld [vmem:[%s5168_s0 + $0x1e8] sm:$0xff] }
 0x10a   :  { %v1609_v17 = vadd.f32 %v2723_v7, %v4544_v12  ;;  %v2726_v18 = vadd.f32 %v2725_v15, %v2724_v9  ;;  %v2807_v19 = vpop.f32.mrb[11].mxu1 }
 0x10b   :  { %v2808_v20 = vadd.f32 %v2807_v19, %v2806_v14  ;;  %2127 = vmatmul.mubr.bf16.gmra.mrb[116].mxu0 %v471_v6  ;;  %v520_v6 = vpack.c.bf16 %v344_v58, %v344_v58  ;;  %v345_v19 = vld [vmem:[%s5168_s0 + $0xa50] sm:$0x3]  ;;  %v62_v58 = vld [vmem:[%s5168_s0 + $0x178] sm:$0xff] }
 0x10c   :  { %v4607_v21 = vadd.f32 %v2805_v13, %v1609_v17  ;;  %v1612_v22 = vadd.f32 %v2726_v18, %v4544_v12  ;;  %2247 = vmatmul.mubr.bf16.gmra.mrb[116].mxu1 %v473_v10  ;;  %2134 = vmatprep.mubr.bf16.mxu0 %v488_v11  ;;  %v522_v10 = vpack.c.bf16 %v346_v61, %v346_v61  ;;  %v343_v18 = vld [vmem:[%s5168_s0 + $0xa40] sm:$0x3] }
 0x10d   :  { %2254 = vmatprep.mubr.bf16.mxu1 %v490_v16 }
 0x10e   :  { %v4628_v30 = vadd.f32 %v2808_v20, %v1612_v22  ;;  %v2727_v31 = vpop.f32.mrb[12].mxu0  ;;  %v28_v20 = vld [vmem:[%s5168_s0 + $0x68] sm:$0xff] }
 0x10f   :  { %v2809_v34 = vpop.f32.mrb[12].mxu1  ;;  %v2728_v35 = vpop.f32.mrb[13].mxu0  ;;  %v44_v22 = vld [vmem:[%s5168_s0 + $0xe8] sm:$0xff] }
 0x110   :  { %v2729_v38 = vadd.f32 %v2728_v35, %v2727_v31  ;;  %v2810_v39 = vpop.f32.mrb[13].mxu1  ;;  %v2730_v40 = vpop.f32.mrb[14].mxu0  ;;  %v519_v31 = vpack.c.bf16 %v343_v18, %v343_v18  ;;  %v521_v35 = vpack.c.bf16 %v345_v19, %v345_v19  ;;  %v59_v18 = vld [vmem:[%s5168_s0 + $0x160] sm:$0xff] }
 0x111   :  { %v2811_v43 = vadd.f32 %v2810_v39, %v2809_v34  ;;  %v2812_v44 = vpop.f32.mrb[14].mxu1  ;;  %v2731_v45 = vpop.f32.mrb[15].mxu0  ;;  %v75_v19 = vld [vmem:[%s5168_s0 + $0x1e0] sm:$0xff] }
 0x112   :  { %v1617_v47 = vadd.f32 %v2729_v38, %v4544_v12  ;;  %v2732_v48 = vadd.f32 %v2731_v45, %v2730_v40  ;;  %v2813_v49 = vpop.f32.mrb[15].mxu1 }
 0x113   :  { %v2814_v50 = vadd.f32 %v2813_v49, %v2812_v44  ;;  %2135 = vmatmul.mubr.bf16.gmra.mrb[120].mxu0 %v487_v37  ;;  %v364_v37 = vpack.c.bf16 %v44_v22, %v28_v20  ;;  %v43_v49 = vld [vmem:[%s5168_s0 + $0xe0] sm:$0xff]  ;;  %v61_v20 = vld [vmem:[%s5168_s0 + $0x170] sm:$0xff] }
 0x114   :  { %v4637_v51 = vadd.f32 %v2811_v43, %v1617_v47  ;;  %v1620_v52 = vadd.f32 %v2732_v48, %v4544_v12  ;;  %2255 = vmatmul.mubr.bf16.gmra.mrb[120].mxu1 %v489_v41  ;;  %2142 = vmatprep.mubr.bf16.mxu0 %v504_v42  ;;  %v366_v41 = vpack.c.bf16 %v46_v26, %v30_v25  ;;  %v27_v48 = vld [vmem:[%s5168_s0 + $0x60] sm:$0xff]  ;;  %v77_v22 = vld [vmem:[%s5168_s0 + $0x1f0] sm:$0xff]  ;;  %v108_v25 = vld [vmem:[%s5168_s0 + $0x2e8] sm:$0xff] }
 0x115   :  { %2262 = vmatprep.mubr.bf16.mxu1 %v506_v46 }
 0x116   :  { %v4655_v59 = vadd.f32 %v2814_v50, %v1620_v52  ;;  %v2733_v60 = vpop.f32.mrb[16].mxu0  ;;  %v29_v50 = vld [vmem:[%s5168_s0 + $0x70] sm:$0xff] }
 0x117   :  { %v2815_v62 = vpop.f32.mrb[16].mxu1  ;;  %v2734_v63 = vpop.f32.mrb[17].mxu0  ;;  %v45_v52 = vld [vmem:[%s5168_s0 + $0xf0] sm:$0xff] }
 0x118   :  { %v2735_v2 = vadd.f32 %v2734_v63, %v2733_v60  ;;  %v2816_v3 = vpop.f32.mrb[17].mxu1  ;;  %v2736_v4 = vpop.f32.mrb[18].mxu0  ;;  %v78_v60 = vld [vmem:[%s5168_s0 + $0x1f8] sm:$0xff]  ;;  %v363_v63 = vpack.c.bf16 %v43_v49, %v27_v48 }
 0x119   :  { %v2817_v7 = vadd.f32 %v2816_v3, %v2815_v62  ;;  %v2818_v8 = vpop.f32.mrb[18].mxu1  ;;  %v2737_v9 = vpop.f32.mrb[19].mxu0 }
 0x11a   :  { %v1625_v11 = vadd.f32 %v2735_v2, %v4544_v12  ;;  %v2738_v13 = vadd.f32 %v2737_v9, %v2736_v4  ;;  %v2819_v14 = vpop.f32.mrb[19].mxu1  ;;  %v365_v4 = vpack.c.bf16 %v45_v52, %v29_v50  ;;  %v382_v9 = vpack.c.bf16 %v78_v60, %v62_v58  ;;  %v109_v58 = vld [vmem:[%s5168_s0 + $0x2f0] sm:$0xff]  ;;  %v124_v60 = vld [vmem:[%s5168_s0 + $0x368] sm:$0xff] }
 0x11b   :  { %v2820_v15 = vadd.f32 %v2819_v14, %v2818_v8  ;;  %2143 = vmatmul.mubr.bf16.gmra.mrb[124].mxu0 %v503_v1 }
 0x11c   :  { %v4661_v16 = vadd.f32 %v2817_v7, %v1625_v11  ;;  %v1628_v17 = vadd.f32 %v2738_v13, %v4544_v12  ;;  %2263 = vmatmul.mubr.bf16.gmra.mrb[124].mxu1 %v505_v5  ;;  %2150 = vmatprep.mubr.bf16.mxu0 %v520_v6  ;;  %v380_v5 = vpack.c.bf16 %v76_v54, %v60_v53  ;;  %v91_v53 = vld [vmem:[%s5168_s0 + $0x260] sm:$0xff] }
 0x11d   :  { %2270 = vmatprep.mubr.bf16.mxu1 %v522_v10  ;;  %v107_v54 = vld [vmem:[%s5168_s0 + $0x2e0] sm:$0xff] }
 0x11e   :  { %v4676_v23 = vadd.f32 %v2820_v15, %v1628_v17  ;;  %v2739_v24 = vpop.f32.mrb[20].mxu0 }
 0x11f   :  { %v2821_v27 = vpop.f32.mrb[20].mxu1  ;;  %v2740_v29 = vpop.f32.mrb[21].mxu0 }
 0x120   :  { %v2741_v32 = vadd.f32 %v2740_v29, %v2739_v24  ;;  %v2822_v33 = vpop.f32.mrb[21].mxu1  ;;  %v2742_v34 = vpop.f32.mrb[22].mxu0  ;;  %v92_v24 = vld [vmem:[%s5168_s0 + $0x268] sm:$0xff]  ;;  %v94_v29 = vld [vmem:[%s5168_s0 + $0x278] sm:$0xff] }
 0x121   :  { %v2823_v38 = vadd.f32 %v2822_v33, %v2821_v27  ;;  %v2824_v39 = vpop.f32.mrb[22].mxu1  ;;  %v2743_v40 = vpop.f32.mrb[23].mxu0 }
 0x122   :  { %v1633_v42 = vadd.f32 %v2741_v32, %v4544_v12  ;;  %v2744_v43 = vadd.f32 %v2743_v40, %v2742_v34  ;;  %v2825_v44 = vpop.f32.mrb[23].mxu1  ;;  %v379_v34 = vpack.c.bf16 %v75_v19, %v59_v18  ;;  %v396_v40 = vpack.c.bf16 %v108_v25, %v92_v24 }
 0x123   :  { %v2826_v45 = vadd.f32 %v2825_v44, %v2824_v39  ;;  %2151 = vmatmul.mubr.bf16.gmra.mrb[128].mxu0 %v519_v31  ;;  %v110_v31 = vld [vmem:[%s5168_s0 + $0x2f8] sm:$0xff]  ;;  %v381_v39 = vpack.c.bf16 %v77_v22, %v61_v20 }
 0x124   :  { %v4685_v46 = vadd.f32 %v2823_v38, %v1633_v42  ;;  %v1636_v47 = vadd.f32 %v2744_v43, %v4544_v12  ;;  %2271 = vmatmul.mubr.bf16.gmra.mrb[128].mxu1 %v521_v35  ;;  %2310 = vmatprep.mubr.bf16.mxu0 %v364_v37  ;;  %v398_v44 = vpack.c.bf16 %v110_v31, %v94_v29  ;;  %v139_v29 = vld [vmem:[%s5168_s0 + $0x3e0] sm:$0xff]  ;;  %v125_v31 = vld [vmem:[%s5168_s0 + $0x370] sm:$0xff] }
 0x125   :  { %2430 = vmatprep.mubr.bf16.mxu1 %v366_v41 }
 0x126   :  { %v4706_v55 = vadd.f32 %v2826_v45, %v1636_v47  ;;  %v2745_v57 = vpop.f32.mrb[24].mxu0 }
 0x127   :  { %v2827_v61 = vpop.f32.mrb[24].mxu1  ;;  %v2746_v62 = vpop.f32.mrb[25].mxu0 }
 0x128   :  { %v2747_v1 = vadd.f32 %v2746_v62, %v2745_v57  ;;  %v2828_v2 = vpop.f32.mrb[25].mxu1  ;;  %v2748_v3 = vpop.f32.mrb[26].mxu0  ;;  %v93_v57 = vld [vmem:[%s5168_s0 + $0x270] sm:$0xff] }
 0x129   :  { %v2829_v6 = vadd.f32 %v2828_v2, %v2827_v61  ;;  %v2830_v7 = vpop.f32.mrb[26].mxu1  ;;  %v2749_v8 = vpop.f32.mrb[27].mxu0  ;;  %v140_v61 = vld [vmem:[%s5168_s0 + $0x3e8] sm:$0xff]  ;;  %v142_v2 = vld [vmem:[%s5168_s0 + $0x3f8] sm:$0xff] }
 0x12a   :  { %v1641_v10 = vadd.f32 %v2747_v1, %v4544_v12  ;;  %v2750_v11 = vadd.f32 %v2749_v8, %v2748_v3  ;;  %v2831_v13 = vpop.f32.mrb[27].mxu1  ;;  %v126_v1 = vld [vmem:[%s5168_s0 + $0x378] sm:$0xff] }
 0x12b   :  { %v2832_v14 = vadd.f32 %v2831_v13, %v2830_v7  ;;  %2311 = vmatmul.mubr.bf16.vlgmr.msra.gmra.mrb[132].mxu0 %v363_v63 }
 0x12c   :  { %v4715_v15 = vadd.f32 %v2829_v6, %v1641_v10  ;;  %v1644_v17 = vadd.f32 %v2750_v11, %v4544_v12  ;;  %2431 = vmatmul.mubr.bf16.vlgmr.msra.gmra.mrb[132].mxu1 %v365_v4  ;;  %2318 = vmatprep.mubr.bf16.mxu0 %v380_v5  ;;  %v395_v5 = vpack.c.bf16 %v107_v54, %v91_v53 }
 0x12d   :  { %2438 = vmatprep.mubr.bf16.mxu1 %v382_v9  ;;  %v397_v9 = vpack.c.bf16 %v109_v58, %v93_v57  ;;  %v412_v10 = vpack.c.bf16 %v140_v61, %v124_v60 }
 0x12e   :  { %v4736_v26 = vadd.f32 %v2832_v14, %v1644_v17  ;;  %v2751_v27 = vpop.f32.mrb[28].mxu0  ;;  %v414_v17 = vpack.c.bf16 %v142_v2, %v126_v1  ;;  %v155_v2 = vld [vmem:[%s5168_s0 + $0x460] sm:$0xff] }
 0x12f   :  { %v2833_v32 = vpop.f32.mrb[28].mxu1  ;;  %v2752_v33 = vpop.f32.mrb[29].mxu0 }
 0x130   :  { %v2753_v35 = vadd.f32 %v2752_v33, %v2751_v27  ;;  %v2834_v37 = vpop.f32.mrb[29].mxu1  ;;  %v2754_v38 = vpop.f32.mrb[30].mxu0  ;;  %v123_v27 = vld [vmem:[%s5168_s0 + $0x360] sm:$0xff]  ;;  %v156_v33 = vld [vmem:[%s5168_s0 + $0x468] sm:$0xff] }
 0x131   :  { %v2835_v41 = vadd.f32 %v2834_v37, %v2833_v32  ;;  %v2836_v42 = vpop.f32.mrb[30].mxu1  ;;  %v2755_v43 = vpop.f32.mrb[31].mxu0  ;;  %v141_v32 = vld [vmem:[%s5168_s0 + $0x3f0] sm:$0xff] }
 0x132   :  { %v1649_v45 = vadd.f32 %v2753_v35, %v4544_v12  ;;  %v2756_v47 = vadd.f32 %v2755_v43, %v2754_v38  ;;  %v2837_v48 = vpop.f32.mrb[31].mxu1  ;;  %v158_v38 = vld [vmem:[%s5168_s0 + $0x478] sm:$0xff] }
 0x133   :  { %v2838_v49 = vadd.f32 %v2837_v48, %v2836_v42  ;;  %2319 = vmatmul.mubr.bf16.gmra.mrb[136].mxu0 %v379_v34  ;;  %v172_v34 = vld [vmem:[%s5168_s0 + $0x4e8] sm:$0xff]  ;;  %v411_v42 = vpack.c.bf16 %v139_v29, %v123_v27 }
 0x134   :  { %v4745_v50 = vadd.f32 %v2835_v41, %v1649_v45  ;;  %v1652_v52 = vadd.f32 %v2756_v47, %v4544_v12  ;;  %2439 = vmatmul.mubr.bf16.gmra.mrb[136].mxu1 %v381_v39  ;;  %2326 = vmatprep.mubr.bf16.mxu0 %v396_v40  ;;  %v174_v39 = vld [vmem:[%s5168_s0 + $0x4f8] sm:$0xff]  ;;  %v413_v47 = vpack.c.bf16 %v141_v32, %v125_v31 }
 0x135   :  { %2446 = vmatprep.mubr.bf16.mxu1 %v398_v44  ;;  %v428_v48 = vpack.c.bf16 %v172_v34, %v156_v33  ;;  %v430_v54 = vpack.c.bf16 %v174_v39, %v158_v38  ;;  %v187_v38 = vld [vmem:[%s5168_s0 + $0x560] sm:$0xff] }
 0x136   :  { %v4766_v62 = vadd.f32 %v2838_v49, %v1652_v52  ;;  %v2757_v63 = vpop.f32.mrb[32].mxu0  ;;  %v203_v39 = vld [vmem:[%s5168_s0 + $0x5e0] sm:$0xff] }
 0x137   :  { %v2839_v3 = vpop.f32.mrb[32].mxu1  ;;  %v2758_v4 = vpop.f32.mrb[33].mxu0 }
 0x138   :  { %v2759_v6 = vadd.f32 %v2758_v4, %v2757_v63  ;;  %v2840_v7 = vpop.f32.mrb[33].mxu1  ;;  %v2760_v8 = vpop.f32.mrb[34].mxu0  ;;  %v157_v4 = vld [vmem:[%s5168_s0 + $0x470] sm:$0xff] }
 0x139   :  { %v2841_v11 = vadd.f32 %v2840_v7, %v2839_v3  ;;  %v2842_v13 = vpop.f32.mrb[34].mxu1  ;;  %v2761_v14 = vpop.f32.mrb[35].mxu0  ;;  %v171_v3 = vld [vmem:[%s5168_s0 + $0x4e0] sm:$0xff]  ;;  %v204_v7 = vld [vmem:[%s5168_s0 + $0x5e8] sm:$0xff] }
 0x13a   :  { %v1657_v18 = vadd.f32 %v2759_v6, %v4544_v12  ;;  %v2762_v19 = vadd.f32 %v2761_v14, %v2760_v8  ;;  %v2843_v20 = vpop.f32.mrb[35].mxu1  ;;  %v188_v6 = vld [vmem:[%s5168_s0 + $0x568] sm:$0xff] }
 0x13b   :  { %v2844_v22 = vadd.f32 %v2843_v20, %v2842_v13  ;;  %2327 = vmatmul.mubr.bf16.gmra.mrb[140].mxu0 %v395_v5  ;;  %v173_v5 = vld [vmem:[%s5168_s0 + $0x4f0] sm:$0xff] }
 0x13c   :  { %v4775_v24 = vadd.f32 %v2841_v11, %v1657_v18  ;;  %v1660_v25 = vadd.f32 %v2762_v19, %v4544_v12  ;;  %2447 = vmatmul.mubr.bf16.gmra.mrb[140].mxu1 %v397_v9  ;;  %2334 = vmatprep.mubr.bf16.mxu0 %v412_v10  ;;  %v190_v10 = vld [vmem:[%s5168_s0 + $0x578] sm:$0xff] }
 0x13d   :  { %2454 = vmatprep.mubr.bf16.mxu1 %v414_v17  ;;  %v206_v11 = vld [vmem:[%s5168_s0 + $0x5f8] sm:$0xff]  ;;  %v427_v17 = vpack.c.bf16 %v171_v3, %v155_v2 }
 0x13e   :  { %v4796_v35 = vadd.f32 %v2844_v22, %v1660_v25  ;;  %v2763_v37 = vpop.f32.mrb[36].mxu0  ;;  %v429_v22 = vpack.c.bf16 %v173_v5, %v157_v4  ;;  %v444_v25 = vpack.c.bf16 %v204_v7, %v188_v6  ;;  %v446_v32 = vpack.c.bf16 %v206_v11, %v190_v10  ;;  %v219_v10 = vld [vmem:[%s5168_s0 + $0x660] sm:$0xff] }
 0x13f   :  { %v2845_v40 = vpop.f32.mrb[36].mxu1  ;;  %v2764_v41 = vpop.f32.mrb[37].mxu0  ;;  %v235_v11 = vld [vmem:[%s5168_s0 + $0x6e0] sm:$0xff] }
 0x140   :  { %v2765_v43 = vadd.f32 %v2764_v41, %v2763_v37  ;;  %v2846_v44 = vpop.f32.mrb[37].mxu1  ;;  %v2766_v45 = vpop.f32.mrb[38].mxu0  ;;  %v220_v41 = vld [vmem:[%s5168_s0 + $0x668] sm:$0xff] }
 0x141   :  { %v2847_v49 = vadd.f32 %v2846_v44, %v2845_v40  ;;  %v2848_v52 = vpop.f32.mrb[38].mxu1  ;;  %v2767_v53 = vpop.f32.mrb[39].mxu0  ;;  %v189_v40 = vld [vmem:[%s5168_s0 + $0x570] sm:$0xff]  ;;  %v222_v44 = vld [vmem:[%s5168_s0 + $0x678] sm:$0xff] }
 0x142   :  { %v1665_v57 = vadd.f32 %v2765_v43, %v4544_v12  ;;  %v2768_v58 = vadd.f32 %v2767_v53, %v2766_v45  ;;  %v2849_v60 = vpop.f32.mrb[39].mxu1  ;;  %v238_v45 = vld [vmem:[%s5168_s0 + $0x6f8] sm:$0xff] }
 0x143   :  { %v2850_v61 = vadd.f32 %v2849_v60, %v2848_v52  ;;  %2335 = vmatmul.mubr.bf16.gmra.mrb[144].mxu0 %v411_v42  ;;  %v236_v42 = vld [vmem:[%s5168_s0 + $0x6e8] sm:$0xff]  ;;  %v462_v2 = vpack.c.bf16 %v238_v45, %v222_v44 }
 0x144   :  { %v4805_v63 = vadd.f32 %v2847_v49, %v1665_v57  ;;  %v1668_v1 = vadd.f32 %v2768_v58, %v4544_v12  ;;  %2455 = vmatmul.mubr.bf16.gmra.mrb[144].mxu1 %v413_v47  ;;  %2342 = vmatprep.mubr.bf16.mxu0 %v428_v48  ;;  %v443_v49 = vpack.c.bf16 %v203_v39, %v187_v38 }
 0x145   :  { %2462 = vmatprep.mubr.bf16.mxu1 %v430_v54  ;;  %v460_v58 = vpack.c.bf16 %v236_v42, %v220_v41 }
 0x146   :  { %v4826_v8 = vadd.f32 %v2850_v61, %v1668_v1  ;;  %v2769_v9 = vpop.f32.mrb[40].mxu0 }
 0x147   :  { %v2851_v13 = vpop.f32.mrb[40].mxu1  ;;  %v2770_v14 = vpop.f32.mrb[41].mxu0 }
 0x148   :  { %v2771_v18 = vadd.f32 %v2770_v14, %v2769_v9  ;;  %v2852_v19 = vpop.f32.mrb[41].mxu1  ;;  %v2772_v20 = vpop.f32.mrb[42].mxu0  ;;  %v268_v14 = vld [vmem:[%s5168_s0 + $0x7e8] sm:$0xff] }
 0x149   :  { %v2853_v27 = vadd.f32 %v2852_v19, %v2851_v13  ;;  %v2854_v29 = vpop.f32.mrb[42].mxu1  ;;  %v2773_v31 = vpop.f32.mrb[43].mxu0  ;;  %v237_v13 = vld [vmem:[%s5168_s0 + $0x6f0] sm:$0xff]  ;;  %v254_v19 = vld [vmem:[%s5168_s0 + $0x778] sm:$0xff] }
 0x14a   :  { %v1673_v33 = vadd.f32 %v2771_v18, %v4544_v12  ;;  %v2855_v34 = vpop.f32.mrb[43].mxu1  ;;  %v205_v12 = vld [vmem:[%s5168_s0 + $0x5f0] sm:$0xff]  ;;  %v270_v20 = vld [vmem:[%s5168_s0 + $0x7f8] sm:$0xff] }
 0x14b   :  { %2343 = vmatmul.mubr.bf16.gmra.mrb[148].mxu0 %v427_v17  ;;  %v445_v57 = vpack.c.bf16 %v205_v12, %v189_v40  ;;  %v478_v12 = vpack.c.bf16 %v270_v20, %v254_v19 }
 0x14c   :  { %v4835_v37 = vadd.f32 %v2853_v27, %v1673_v33  ;;  %2463 = vmatmul.mubr.bf16.gmra.mrb[148].mxu1 %v429_v22  ;;  %2350 = vmatprep.mubr.bf16.mxu0 %v444_v25  ;;  %v459_v27 = vpack.c.bf16 %v235_v11, %v219_v10 }
 0x14d   :  { %2470 = vmatprep.mubr.bf16.mxu1 %v446_v32 }
 0x14e   :  { %v2873_v43 = vpop.f32.mrb[44].mxu0 }
 0x14f   :  { %v2955_v47 = vpop.f32.mrb[44].mxu1  ;;  %v2874_v48 = vpop.f32.mrb[45].mxu0 }
 0x150   :  { %v2875_v52 = vadd.f32 %v2874_v48, %v2873_v43  ;;  %v2956_v53 = vpop.f32.mrb[45].mxu1  ;;  %v2876_v54 = vpop.f32.mrb[46].mxu0  ;;  %v251_v48 = vld [vmem:[%s5168_s0 + $0x760] sm:$0xff] }
 0x151   :  { %v2957_v60 = vadd.f32 %v2956_v53, %v2955_v47  ;;  %v2958_v61 = vpop.f32.mrb[46].mxu1  ;;  %v2877_v1 = vpop.f32.mrb[47].mxu0  ;;  %v300_v53 = vld [vmem:[%s5168_s0 + $0x8e8] sm:$0xff] }
 0x152   :  { %v1833_v3 = vadd.f32 %v2875_v52, %v4547_v28  ;;  %v2878_v4 = vadd.f32 %v2877_v1, %v2876_v54  ;;  %v2959_v5 = vpop.f32.mrb[47].mxu1  ;;  %v221_v28 = vld [vmem:[%s5168_s0 + $0x670] sm:$0xff] }
 0x153   :  { %v2960_v6 = vadd.f32 %v2959_v5, %v2958_v61  ;;  %2351 = vmatmul.mubr.bf16.gmra.mrb[152].mxu0 %v443_v49  ;;  %v461_v33 = vpack.c.bf16 %v237_v13, %v221_v28  ;;  %v267_v49 = vld [vmem:[%s5168_s0 + $0x7e0] sm:$0xff]  ;;  %v269_v52 = vld [vmem:[%s5168_s0 + $0x7f0] sm:$0xff] }
 0x154   :  { %v4862_v7 = vadd.f32 %v2957_v60, %v1833_v3  ;;  %v1836_v9 = vadd.f32 %v2878_v4, %v4568_v36  ;;  %2471 = vmatmul.mubr.bf16.gmra.mrb[152].mxu1 %v445_v57  ;;  %2358 = vmatprep.mubr.bf16.mxu0 %v460_v58  ;;  %v252_v36 = vld [vmem:[%s5168_s0 + $0x768] sm:$0xff]  ;;  %v286_v58 = vld [vmem:[%s5168_s0 + $0x878] sm:$0xff] }
 0x155   :  { %2478 = vmatprep.mubr.bf16.mxu1 %v462_v2  ;;  %v476_v34 = vpack.c.bf16 %v268_v14, %v252_v36  ;;  %v302_v60 = vld [vmem:[%s5168_s0 + $0x8f8] sm:$0xff]  ;;  %v475_v2 = vpack.c.bf16 %v267_v49, %v251_v48 }
 0x156   :  { %v4883_v17 = vadd.f32 %v2960_v6, %v1836_v9  ;;  %v2879_v18 = vpop.f32.mrb[48].mxu0  ;;  %v494_v13 = vpack.c.bf16 %v302_v60, %v286_v58 }
 0x157   :  { %v2961_v22 = vpop.f32.mrb[48].mxu1  ;;  %v2880_v25 = vpop.f32.mrb[49].mxu0 }
 0x158   :  { %v2881_v29 = vadd.f32 %v2880_v25, %v2879_v18  ;;  %v2962_v31 = vpop.f32.mrb[49].mxu1  ;;  %v2882_v32 = vpop.f32.mrb[50].mxu0  ;;  %v283_v25 = vld [vmem:[%s5168_s0 + $0x860] sm:$0xff] }
 0x159   :  { %v2963_v38 = vadd.f32 %v2962_v31, %v2961_v22  ;;  %v2964_v39 = vpop.f32.mrb[50].mxu1  ;;  %v2883_v40 = vpop.f32.mrb[51].mxu0  ;;  %v332_v31 = vld [vmem:[%s5168_s0 + $0x9e8] sm:$0xff] }
 0x15a   :  { %v1841_v41 = vadd.f32 %v2881_v29, %v4577_v56  ;;  %v2884_v42 = vadd.f32 %v2883_v40, %v2882_v32  ;;  %v2965_v43 = vpop.f32.mrb[51].mxu1  ;;  %v253_v56 = vld [vmem:[%s5168_s0 + $0x770] sm:$0xff] }
 0x15b   :  { %v2966_v44 = vadd.f32 %v2965_v43, %v2964_v39  ;;  %2359 = vmatmul.mubr.bf16.gmra.mrb[156].mxu0 %v459_v27  ;;  %v477_v6 = vpack.c.bf16 %v269_v52, %v253_v56  ;;  %v299_v27 = vld [vmem:[%s5168_s0 + $0x8e0] sm:$0xff]  ;;  %v301_v29 = vld [vmem:[%s5168_s0 + $0x8f0] sm:$0xff] }
 0x15c   :  { %v4892_v45 = vadd.f32 %v2963_v38, %v1841_v41  ;;  %v1844_v47 = vadd.f32 %v2884_v42, %v4598_v0  ;;  %2479 = vmatmul.mubr.bf16.gmra.mrb[156].mxu1 %v461_v33  ;;  %2366 = vmatprep.mubr.bf16.mxu0 %v476_v34  ;;  %v284_v0 = vld [vmem:[%s5168_s0 + $0x868] sm:$0xff]  ;;  %v318_v34 = vld [vmem:[%s5168_s0 + $0x978] sm:$0xff] }
 0x15d   :  { %2486 = vmatprep.mubr.bf16.mxu1 %v478_v12  ;;  %v492_v9 = vpack.c.bf16 %v300_v53, %v284_v0  ;;  %v334_v38 = vld [vmem:[%s5168_s0 + $0x9f8] sm:$0xff]  ;;  %v491_v12 = vpack.c.bf16 %v299_v27, %v283_v25 }
 0x15e   :  { %v4913_v54 = vadd.f32 %v2966_v44, %v1844_v47  ;;  %v2885_v57 = vpop.f32.mrb[52].mxu0  ;;  %v510_v52 = vpack.c.bf16 %v334_v38, %v318_v34  ;;  %v347_v38 = vld [vmem:[%s5168_s0 + $0xa60] sm:$0x3] }
 0x15f   :  { %v2967_v61 = vpop.f32.mrb[52].mxu1  ;;  %v2886_v1 = vpop.f32.mrb[53].mxu0 }
 0x160   :  { %v2887_v3 = vadd.f32 %v2886_v1, %v2885_v57  ;;  %v2968_v4 = vpop.f32.mrb[53].mxu1  ;;  %v2888_v5 = vpop.f32.mrb[54].mxu0  ;;  %v315_v1 = vld [vmem:[%s5168_s0 + $0x960] sm:$0xff] }
 0x161   :  { %v2969_v10 = vadd.f32 %v2968_v4, %v2967_v61  ;;  %v2970_v11 = vpop.f32.mrb[54].mxu1  ;;  %v2889_v28 = vpop.f32.mrb[55].mxu0 }
 0x162   :  { %v1849_v36 = vadd.f32 %v2887_v3, %v4607_v21  ;;  %v2890_v14 = vadd.f32 %v2889_v28, %v2888_v5  ;;  %v2971_v18 = vpop.f32.mrb[55].mxu1  ;;  %v285_v21 = vld [vmem:[%s5168_s0 + $0x870] sm:$0xff] }
 0x163   :  { %v2972_v19 = vadd.f32 %v2971_v18, %v2970_v11  ;;  %2367 = vmatmul.mubr.bf16.gmra.mrb[160].mxu0 %v475_v2  ;;  %v493_v44 = vpack.c.bf16 %v301_v29, %v285_v21  ;;  %v331_v2 = vld [vmem:[%s5168_s0 + $0x9e0] sm:$0xff]  ;;  %v333_v3 = vld [vmem:[%s5168_s0 + $0x9f0] sm:$0xff] }
 0x164   :  { %v4922_v20 = vadd.f32 %v2969_v10, %v1849_v36  ;;  %v1852_v22 = vadd.f32 %v2890_v14, %v4628_v30  ;;  %2487 = vmatmul.mubr.bf16.gmra.mrb[160].mxu1 %v477_v6  ;;  %2374 = vmatprep.mubr.bf16.mxu0 %v492_v9  ;;  %v316_v30 = vld [vmem:[%s5168_s0 + $0x968] sm:$0xff]  ;;  %v350_v6 = vld [vmem:[%s5168_s0 + $0xa78] sm:$0x3]  ;;  %v507_v11 = vpack.c.bf16 %v331_v2, %v315_v1 }
 0x165   :  { %2494 = vmatprep.mubr.bf16.mxu1 %v494_v13  ;;  %v508_v47 = vpack.c.bf16 %v332_v31, %v316_v30  ;;  %v526_v27 = vpack.c.bf16 %v350_v6, %v350_v6 }
 0x166   :  { %v4943_v32 = vadd.f32 %v2972_v19, %v1852_v22  ;;  %v2891_v33 = vpop.f32.mrb[56].mxu0 }
 0x167   :  { %v2973_v39 = vpop.f32.mrb[56].mxu1  ;;  %v2892_v40 = vpop.f32.mrb[57].mxu0 }
 0x168   :  { %v2893_v41 = vadd.f32 %v2892_v40, %v2891_v33  ;;  %v2974_v42 = vpop.f32.mrb[57].mxu1  ;;  %v2894_v43 = vpop.f32.mrb[58].mxu0 }
 0x169   :  { %v2975_v48 = vadd.f32 %v2974_v42, %v2973_v39  ;;  %v2976_v49 = vpop.f32.mrb[58].mxu1  ;;  %v2895_v56 = vpop.f32.mrb[59].mxu0  ;;  %v349_v39 = vld [vmem:[%s5168_s0 + $0xa70] sm:$0x3]  ;;  %v523_v42 = vpack.c.bf16 %v347_v38, %v347_v38 }
 0x16a   :  { %v1857_v0 = vadd.f32 %v2893_v41, %v4637_v51  ;;  %v2896_v53 = vadd.f32 %v2895_v56, %v2894_v43  ;;  %v2977_v57 = vpop.f32.mrb[59].mxu1  ;;  %v317_v51 = vld [vmem:[%s5168_s0 + $0x970] sm:$0xff] }
 0x16b   :  { %v2978_v58 = vadd.f32 %v2977_v57, %v2976_v49  ;;  %2375 = vmatmul.mubr.bf16.gmra.mrb[164].mxu0 %v491_v12  ;;  %v509_v14 = vpack.c.bf16 %v333_v3, %v317_v51 }
 0x16c   :  { %v4952_v60 = vadd.f32 %v2975_v48, %v1857_v0  ;;  %v1860_v61 = vadd.f32 %v2896_v53, %v4655_v59  ;;  %2495 = vmatmul.mubr.bf16.gmra.mrb[164].mxu1 %v493_v44  ;;  %2382 = vmatprep.mubr.bf16.mxu0 %v508_v47  ;;  %v348_v59 = vld [vmem:[%s5168_s0 + $0xa68] sm:$0x3]  ;;  %v525_v47 = vpack.c.bf16 %v349_v39, %v349_v39 }
 0x16d   :  { %2502 = vmatprep.mubr.bf16.mxu1 %v510_v52  ;;  %v524_v18 = vpack.c.bf16 %v348_v59, %v348_v59 }
 0x16e   :  { %v4970_v4 = vadd.f32 %v2978_v58, %v1860_v61  ;;  %v2897_v5 = vpop.f32.mrb[60].mxu0 }
 0x16f   :  { %v2979_v9 = vpop.f32.mrb[60].mxu1  ;;  %v2898_v10 = vpop.f32.mrb[61].mxu0 }
 0x170   :  { %v2899_v28 = vadd.f32 %v2898_v10, %v2897_v5  ;;  %v2980_v13 = vpop.f32.mrb[61].mxu1  ;;  %v2900_v36 = vpop.f32.mrb[62].mxu0 }
 0x171   :  { %v2981_v19 = vadd.f32 %v2980_v13, %v2979_v9  ;;  %v2982_v22 = vpop.f32.mrb[62].mxu1  ;;  %v2901_v25 = vpop.f32.mrb[63].mxu0 }
 0x172   :  { %v1865_v21 = vadd.f32 %v2899_v28, %v4661_v16  ;;  %v2902_v29 = vadd.f32 %v2901_v25, %v2900_v36  ;;  %v2983_v30 = vpop.f32.mrb[63].mxu1 }
 0x173   :  { %v2984_v31 = vadd.f32 %v2983_v30, %v2982_v22  ;;  %2383 = vmatmul.mubr.bf16.gmra.mrb[168].mxu0 %v507_v11 }
 0x174   :  { %v4976_v33 = vadd.f32 %v2981_v19, %v1865_v21  ;;  %v1868_v34 = vadd.f32 %v2902_v29, %v4676_v23  ;;  %2503 = vmatmul.mubr.bf16.gmra.mrb[168].mxu1 %v509_v14  ;;  %2390 = vmatprep.mubr.bf16.mxu0 %v524_v18 }
 0x175   :  { %2510 = vmatprep.mubr.bf16.mxu1 %v526_v27 }
 0x176   :  { %v4985_v16 = vadd.f32 %v2984_v31, %v1868_v34  ;;  %v2903_v40 = vpop.f32.mrb[64].mxu0 }
 0x177   :  { %v2985_v12 = vpop.f32.mrb[64].mxu1  ;;  %v2904_v41 = vpop.f32.mrb[65].mxu0 }
 0x178   :  { %v2905_v43 = vadd.f32 %v2904_v41, %v2903_v40  ;;  %v2986_v44 = vpop.f32.mrb[65].mxu1  ;;  %v2906_v23 = vpop.f32.mrb[66].mxu0 }
 0x179   :  { %v2987_v48 = vadd.f32 %v2986_v44, %v2985_v12  ;;  %v2988_v49 = vpop.f32.mrb[66].mxu1  ;;  %v2907_v56 = vpop.f32.mrb[67].mxu0 }
 0x17a   :  { %v1873_v52 = vadd.f32 %v2905_v43, %v4685_v46  ;;  %v2908_v0 = vadd.f32 %v2907_v56, %v2906_v23  ;;  %v2989_v53 = vpop.f32.mrb[67].mxu1 }
 0x17b   :  { %v2990_v57 = vadd.f32 %v2989_v53, %v2988_v49  ;;  %2391 = vmatmul.mubr.bf16.gmra.mrb[172].mxu0 %v523_v42 }
 0x17c   :  { %v4988_v58 = vadd.f32 %v2987_v48, %v1873_v52  ;;  %v1876_v61 = vadd.f32 %v2908_v0, %v4706_v55  ;;  %2511 = vmatmul.mubr.bf16.gmra.mrb[172].mxu1 %v525_v47 }
 0x17e   :  { %v4991_v1 = vadd.f32 %v2990_v57, %v1876_v61  ;;  %v2909_v2 = vpop.f32.mrb[68].mxu0 }
 0x17f   :  { %v2991_v51 = vpop.f32.mrb[68].mxu1  ;;  %v2910_v3 = vpop.f32.mrb[69].mxu0 }
 0x180   :  { %v2911_v59 = vadd.f32 %v2910_v3, %v2909_v2  ;;  %v2992_v5 = vpop.f32.mrb[69].mxu1  ;;  %v2912_v6 = vpop.f32.mrb[70].mxu0 }
 0x181   :  { %v2993_v9 = vadd.f32 %v2992_v5, %v2991_v51  ;;  %v2994_v10 = vpop.f32.mrb[70].mxu1  ;;  %v2913_v46 = vpop.f32.mrb[71].mxu0 }
 0x182   :  { %v1881_v11 = vadd.f32 %v2911_v59, %v4715_v15  ;;  %v2914_v28 = vadd.f32 %v2913_v46, %v2912_v6  ;;  %v2995_v13 = vpop.f32.mrb[71].mxu1 }
 0x183   :  { %v2996_v36 = vadd.f32 %v2995_v13, %v2994_v10 }
 0x184   :  { %v4994_v14 = vadd.f32 %v2993_v9, %v1881_v11  ;;  %v1884_v55 = vadd.f32 %v2914_v28, %v4736_v26 }
 0x186   :  { %v4997_v18 = vadd.f32 %v2996_v36, %v1884_v55  ;;  %v2915_v19 = vpop.f32.mrb[72].mxu0 }
 0x187   :  { %v2997_v22 = vpop.f32.mrb[72].mxu1  ;;  %v2916_v25 = vpop.f32.mrb[73].mxu0 }
 0x188   :  { %v2917_v27 = vadd.f32 %v2916_v25, %v2915_v19  ;;  %v2998_v21 = vpop.f32.mrb[73].mxu1  ;;  %v2918_v29 = vpop.f32.mrb[74].mxu0 }
 0x189   :  { %v2999_v30 = vadd.f32 %v2998_v21, %v2997_v22  ;;  %v3000_v31 = vpop.f32.mrb[74].mxu1  ;;  %v2919_v34 = vpop.f32.mrb[75].mxu0 }
 0x18a   :  { %v1889_v15 = vadd.f32 %v2917_v27, %v4745_v50  ;;  %v2920_v38 = vadd.f32 %v2919_v34, %v2918_v29  ;;  %v3001_v39 = vpop.f32.mrb[75].mxu1 }
 0x18b   :  { %v3002_v40 = vadd.f32 %v3001_v39, %v3000_v31 }
 0x18c   :  { %v5000_v12 = vadd.f32 %v2999_v30, %v1889_v15  ;;  %v1892_v26 = vadd.f32 %v2920_v38, %v4766_v62 }
 0x18e   :  { %v5003_v41 = vadd.f32 %v3002_v40, %v1892_v26  ;;  %v2921_v42 = vpop.f32.mrb[76].mxu0 }
 0x18f   :  { %v3003_v43 = vpop.f32.mrb[76].mxu1  ;;  %v2922_v44 = vpop.f32.mrb[77].mxu0 }
 0x190   :  { %v2923_v23 = vadd.f32 %v2922_v44, %v2921_v42  ;;  %v3004_v47 = vpop.f32.mrb[77].mxu1  ;;  %v2924_v48 = vpop.f32.mrb[78].mxu0 }
 0x191   :  { %v3005_v49 = vadd.f32 %v3004_v47, %v3003_v43  ;;  %v3006_v56 = vpop.f32.mrb[78].mxu1  ;;  %v2925_v52 = vpop.f32.mrb[79].mxu0 }
 0x192   :  { %v1897_v50 = vadd.f32 %v2923_v23, %v4775_v24  ;;  %v2926_v0 = vadd.f32 %v2925_v52, %v2924_v48  ;;  %v3007_v53 = vpop.f32.mrb[79].mxu1 }
 0x193   :  { %v3008_v57 = vadd.f32 %v3007_v53, %v3006_v56 }
 0x194   :  { %v5006_v61 = vadd.f32 %v3005_v49, %v1897_v50  ;;  %v1900_v62 = vadd.f32 %v2926_v0, %v4796_v35 }
 0x196   :  { %v5009_v2 = vadd.f32 %v3008_v57, %v1900_v62  ;;  %v2927_v51 = vpop.f32.mrb[80].mxu0 }
 0x197   :  { %v3009_v3 = vpop.f32.mrb[80].mxu1  ;;  %v2928_v59 = vpop.f32.mrb[81].mxu0 }
 0x198   :  { %v2929_v5 = vadd.f32 %v2928_v59, %v2927_v51  ;;  %v3010_v6 = vpop.f32.mrb[81].mxu1  ;;  %v2930_v9 = vpop.f32.mrb[82].mxu0 }
 0x199   :  { %v3011_v10 = vadd.f32 %v3010_v6, %v3009_v3  ;;  %v3012_v46 = vpop.f32.mrb[82].mxu1  ;;  %v2931_v11 = vpop.f32.mrb[83].mxu0 }
 0x19a   :  { %v1905_v24 = vadd.f32 %v2929_v5, %v4805_v63  ;;  %v2932_v28 = vadd.f32 %v2931_v11, %v2930_v9  ;;  %v3013_v13 = vpop.f32.mrb[83].mxu1 }
 0x19b   :  { %v3014_v36 = vadd.f32 %v3013_v13, %v3012_v46 }
 0x19c   :  { %v5012_v55 = vadd.f32 %v3011_v10, %v1905_v24  ;;  %v1908_v35 = vadd.f32 %v2932_v28, %v4826_v8 }
 0x19e   :  { %v5015_v19 = vadd.f32 %v3014_v36, %v1908_v35  ;;  %v2933_v22 = vpop.f32.mrb[84].mxu0 }
 0x19f   :  { %v3015_v25 = vpop.f32.mrb[84].mxu1  ;;  %v2934_v27 = vpop.f32.mrb[85].mxu0 }
 0x1a0   :  { %v2935_v21 = vadd.f32 %v2934_v27, %v2933_v22  ;;  %v3016_v29 = vpop.f32.mrb[85].mxu1  ;;  %v2936_v30 = vpop.f32.mrb[86].mxu0 }
 0x1a1   :  { %v3017_v31 = vadd.f32 %v3016_v29, %v3015_v25  ;;  %v3018_v34 = vpop.f32.mrb[86].mxu1  ;;  %v2937_v15 = vpop.f32.mrb[87].mxu0 }
 0x1a2   :  { %v1913_v63 = vadd.f32 %v2935_v21, %v4835_v37  ;;  %v3019_v38 = vpop.f32.mrb[87].mxu1 }
 0x1a4   :  { %v5018_v39 = vadd.f32 %v3017_v31, %v1913_v63 }
 0x1a6   :  { %v3037_v40 = vpop.f32.mrb[88].mxu0 }
 0x1a7   :  { %v3119_v26 = vpop.f32.mrb[88].mxu1  ;;  %v3038_v42 = vpop.f32.mrb[89].mxu0 }
 0x1a8   :  { %v3039_v8 = vadd.f32 %v3038_v42, %v3037_v40  ;;  %v3120_v43 = vpop.f32.mrb[89].mxu1  ;;  %v3040_v44 = vpop.f32.mrb[90].mxu0 }
 0x1a9   :  { %v3121_v23 = vadd.f32 %v3120_v43, %v3119_v26  ;;  %v3122_v47 = vpop.f32.mrb[90].mxu1  ;;  %v3041_v48 = vpop.f32.mrb[91].mxu0 }
 0x1aa   :  { %v2073_v49 = vadd.f32 %v3039_v8, %v4862_v7  ;;  %v3042_v56 = vadd.f32 %v3041_v48, %v3040_v44  ;;  %v3123_v52 = vpop.f32.mrb[91].mxu1 }
 0x1ab   :  { %v3124_v50 = vadd.f32 %v3123_v52, %v3122_v47 }
 0x1ac   :  { %v5021_v0 = vadd.f32 %v3121_v23, %v2073_v49  ;;  %v2076_v37 = vadd.f32 %v3042_v56, %v4883_v17 }
 0x1ae   :  { %v5024_v53 = vadd.f32 %v3124_v50, %v2076_v37  ;;  %v3043_v57 = vpop.f32.mrb[92].mxu0 }
 0x1af   :  { %v3125_v62 = vpop.f32.mrb[92].mxu1  ;;  %v3044_v51 = vpop.f32.mrb[93].mxu0 }
 0x1b0   :  { %v3045_v3 = vadd.f32 %v3044_v51, %v3043_v57  ;;  %v3126_v59 = vpop.f32.mrb[93].mxu1  ;;  %v3046_v5 = vpop.f32.mrb[94].mxu0 }
 0x1b1   :  { %v3127_v6 = vadd.f32 %v3126_v59, %v3125_v62  ;;  %v3128_v9 = vpop.f32.mrb[94].mxu1  ;;  %v3047_v10 = vpop.f32.mrb[95].mxu0 }
 0x1b2   :  { %v2081_v7 = vadd.f32 %v3045_v3, %v4892_v45  ;;  %v3048_v46 = vadd.f32 %v3047_v10, %v3046_v5  ;;  %v3129_v11 = vpop.f32.mrb[95].mxu1 }
 0x1b3   :  { %v3130_v24 = vadd.f32 %v3129_v11, %v3128_v9 }
 0x1b4   :  { %v5027_v28 = vadd.f32 %v3127_v6, %v2081_v7  ;;  %v2084_v17 = vadd.f32 %v3048_v46, %v4913_v54 }
 0x1b6   :  { %v5030_v13 = vadd.f32 %v3130_v24, %v2084_v17  ;;  %v3049_v36 = vpop.f32.mrb[96].mxu0 }
 0x1b7   :  { %v3131_v35 = vpop.f32.mrb[96].mxu1  ;;  %v3050_v22 = vpop.f32.mrb[97].mxu0 }
 0x1b8   :  { %v3051_v25 = vadd.f32 %v3050_v22, %v3049_v36  ;;  %v3132_v27 = vpop.f32.mrb[97].mxu1  ;;  %v3052_v21 = vpop.f32.mrb[98].mxu0 }
 0x1b9   :  { %v3133_v29 = vadd.f32 %v3132_v27, %v3131_v35  ;;  %v3134_v30 = vpop.f32.mrb[98].mxu1  ;;  %v3053_v31 = vpop.f32.mrb[99].mxu0 }
 0x1ba   :  { %v2089_v45 = vadd.f32 %v3051_v25, %v4922_v20  ;;  %v3054_v34 = vadd.f32 %v3053_v31, %v3052_v21  ;;  %v3135_v15 = vpop.f32.mrb[99].mxu1 }
 0x1bb   :  { %v3136_v63 = vadd.f32 %v3135_v15, %v3134_v30 }
 0x1bc   :  { %v5033_v38 = vadd.f32 %v3133_v29, %v2089_v45  ;;  %v2092_v54 = vadd.f32 %v3054_v34, %v4943_v32 }
 0x1be   :  { %v5036_v40 = vadd.f32 %v3136_v63, %v2092_v54  ;;  %v3055_v26 = vpop.f32.mrb[100].mxu0 }
 0x1bf   :  { %v3137_v42 = vpop.f32.mrb[100].mxu1  ;;  %v3056_v8 = vpop.f32.mrb[101].mxu0 }
 0x1c0   :  { %v3057_v43 = vadd.f32 %v3056_v8, %v3055_v26  ;;  %v3138_v44 = vpop.f32.mrb[101].mxu1  ;;  %v3058_v23 = vpop.f32.mrb[102].mxu0 }
 0x1c1   :  { %v3139_v47 = vadd.f32 %v3138_v44, %v3137_v42  ;;  %v3140_v48 = vpop.f32.mrb[102].mxu1  ;;  %v3059_v49 = vpop.f32.mrb[103].mxu0 }
 0x1c2   :  { %v2097_v20 = vadd.f32 %v3057_v43, %v4952_v60  ;;  %v3060_v56 = vadd.f32 %v3059_v49, %v3058_v23  ;;  %v3141_v52 = vpop.f32.mrb[103].mxu1 }
 0x1c3   :  { %v3142_v50 = vadd.f32 %v3141_v52, %v3140_v48 }
 0x1c4   :  { %v5039_v37 = vadd.f32 %v3139_v47, %v2097_v20  ;;  %v2100_v32 = vadd.f32 %v3060_v56, %v4970_v4 }
 0x1c6   :  { %v5042_v57 = vadd.f32 %v3142_v50, %v2100_v32  ;;  %v3061_v62 = vpop.f32.mrb[104].mxu0 }
 0x1c7   :  { %v3143_v51 = vpop.f32.mrb[104].mxu1  ;;  %v3062_v3 = vpop.f32.mrb[105].mxu0 }
 0x1c8   :  { %v3063_v59 = vadd.f32 %v3062_v3, %v3061_v62  ;;  %v3144_v5 = vpop.f32.mrb[105].mxu1  ;;  %v3064_v6 = vpop.f32.mrb[106].mxu0 }
 0x1c9   :  { %v3145_v9 = vadd.f32 %v3144_v5, %v3143_v51  ;;  %v3146_v10 = vpop.f32.mrb[106].mxu1  ;;  %v3065_v7 = vpop.f32.mrb[107].mxu0 }
 0x1ca   :  { %v2105_v60 = vadd.f32 %v3063_v59, %v4976_v33  ;;  %v3066_v46 = vadd.f32 %v3065_v7, %v3064_v6  ;;  %v3147_v11 = vpop.f32.mrb[107].mxu1 }
 0x1cb   :  { %v3148_v24 = vadd.f32 %v3147_v11, %v3146_v10 }
 0x1cc   :  { %v5045_v17 = vadd.f32 %v3145_v9, %v2105_v60  ;;  %v2108_v4 = vadd.f32 %v3066_v46, %v4985_v16 }
 0x1ce   :  { %v5048_v36 = vadd.f32 %v3148_v24, %v2108_v4  ;;  %v3067_v35 = vpop.f32.mrb[108].mxu0 }
 0x1cf   :  { %v3149_v22 = vpop.f32.mrb[108].mxu1  ;;  %v3068_v25 = vpop.f32.mrb[109].mxu0 }
 0x1d0   :  { %v3069_v27 = vadd.f32 %v3068_v25, %v3067_v35  ;;  %v3150_v21 = vpop.f32.mrb[109].mxu1  ;;  %v3070_v29 = vpop.f32.mrb[110].mxu0 }
 0x1d1   :  { %v3151_v30 = vadd.f32 %v3150_v21, %v3149_v22  ;;  %v3152_v31 = vpop.f32.mrb[110].mxu1  ;;  %v3071_v45 = vpop.f32.mrb[111].mxu0 }
 0x1d2   :  { %v2113_v33 = vadd.f32 %v3069_v27, %v4988_v58  ;;  %v3072_v34 = vadd.f32 %v3071_v45, %v3070_v29  ;;  %v3153_v15 = vpop.f32.mrb[111].mxu1 }
 0x1d3   :  { %v3154_v63 = vadd.f32 %v3153_v15, %v3152_v31 }
 0x1d4   :  { %v5051_v54 = vadd.f32 %v3151_v30, %v2113_v33  ;;  %v2116_v16 = vadd.f32 %v3072_v34, %v4991_v1 }
 0x1d6   :  { %v5054_v26 = vadd.f32 %v3154_v63, %v2116_v16  ;;  %v3073_v42 = vpop.f32.mrb[112].mxu0 }
 0x1d7   :  { %v3155_v8 = vpop.f32.mrb[112].mxu1  ;;  %v3074_v43 = vpop.f32.mrb[113].mxu0 }
 0x1d8   :  { %v3075_v44 = vadd.f32 %v3074_v43, %v3073_v42  ;;  %v3156_v23 = vpop.f32.mrb[113].mxu1  ;;  %v3076_v47 = vpop.f32.mrb[114].mxu0 }
 0x1d9   :  { %v3157_v48 = vadd.f32 %v3156_v23, %v3155_v8  ;;  %v3158_v49 = vpop.f32.mrb[114].mxu1  ;;  %v3077_v20 = vpop.f32.mrb[115].mxu0 }
 0x1da   :  { %v2121_v58 = vadd.f32 %v3075_v44, %v4994_v14  ;;  %v3078_v56 = vadd.f32 %v3077_v20, %v3076_v47  ;;  %v3159_v52 = vpop.f32.mrb[115].mxu1 }
 0x1db   :  { %v3160_v50 = vadd.f32 %v3159_v52, %v3158_v49 }
 0x1dc   :  { %v5057_v32 = vadd.f32 %v3157_v48, %v2121_v58  ;;  %v2124_v1 = vadd.f32 %v3078_v56, %v4997_v18 }
 0x1de   :  { %v5060_v62 = vadd.f32 %v3160_v50, %v2124_v1  ;;  %v3079_v51 = vpop.f32.mrb[116].mxu0 }
 0x1df   :  { %v3161_v3 = vpop.f32.mrb[116].mxu1  ;;  %v3080_v59 = vpop.f32.mrb[117].mxu0 }
 0x1e0   :  { %v3081_v5 = vadd.f32 %v3080_v59, %v3079_v51  ;;  %v3162_v6 = vpop.f32.mrb[117].mxu1  ;;  %v3082_v9 = vpop.f32.mrb[118].mxu0 }
 0x1e1   :  { %v3163_v10 = vadd.f32 %v3162_v6, %v3161_v3  ;;  %v3164_v7 = vpop.f32.mrb[118].mxu1  ;;  %v3083_v60 = vpop.f32.mrb[119].mxu0 }
 0x1e2   :  { %v2129_v14 = vadd.f32 %v3081_v5, %v5000_v12  ;;  %v3084_v46 = vadd.f32 %v3083_v60, %v3082_v9  ;;  %v3165_v11 = vpop.f32.mrb[119].mxu1 }
 0x1e3   :  { %v3166_v24 = vadd.f32 %v3165_v11, %v3164_v7 }
 0x1e4   :  { %v5063_v4 = vadd.f32 %v3163_v10, %v2129_v14  ;;  %v2132_v18 = vadd.f32 %v3084_v46, %v5003_v41 }
 0x1e6   :  { %v5066_v35 = vadd.f32 %v3166_v24, %v2132_v18  ;;  %v3085_v22 = vpop.f32.mrb[120].mxu0 }
 0x1e7   :  { %v3167_v25 = vpop.f32.mrb[120].mxu1  ;;  %v3086_v27 = vpop.f32.mrb[121].mxu0 }
 0x1e8   :  { %v3087_v21 = vadd.f32 %v3086_v27, %v3085_v22  ;;  %v3168_v29 = vpop.f32.mrb[121].mxu1  ;;  %v3088_v30 = vpop.f32.mrb[122].mxu0 }
 0x1e9   :  { %v3169_v31 = vadd.f32 %v3168_v29, %v3167_v25  ;;  %v3170_v45 = vpop.f32.mrb[122].mxu1  ;;  %v3089_v33 = vpop.f32.mrb[123].mxu0 }
 0x1ea   :  { %v2137_v12 = vadd.f32 %v3087_v21, %v5006_v61  ;;  %v3090_v34 = vadd.f32 %v3089_v33, %v3088_v30  ;;  %v3171_v15 = vpop.f32.mrb[123].mxu1 }
 0x1eb   :  { %v3172_v63 = vadd.f32 %v3171_v15, %v3170_v45 }
 0x1ec   :  { %v5069_v16 = vadd.f32 %v3169_v31, %v2137_v12  ;;  %v2140_v41 = vadd.f32 %v3090_v34, %v5009_v2 }
 0x1ee   :  { %v5072_v42 = vadd.f32 %v3172_v63, %v2140_v41  ;;  %v3091_v8 = vpop.f32.mrb[124].mxu0 }
 0x1ef   :  { %v3173_v43 = vpop.f32.mrb[124].mxu1  ;;  %v3092_v44 = vpop.f32.mrb[125].mxu0 }
 0x1f0   :  { %v3093_v23 = vadd.f32 %v3092_v44, %v3091_v8  ;;  %v3174_v47 = vpop.f32.mrb[125].mxu1  ;;  %v3094_v48 = vpop.f32.mrb[126].mxu0 }
 0x1f1   :  { %v3175_v49 = vadd.f32 %v3174_v47, %v3173_v43  ;;  %v3176_v20 = vpop.f32.mrb[126].mxu1  ;;  %v3095_v58 = vpop.f32.mrb[127].mxu0 }
 0x1f2   :  { %v2145_v61 = vadd.f32 %v3093_v23, %v5012_v55  ;;  %v3096_v56 = vadd.f32 %v3095_v58, %v3094_v48  ;;  %v3177_v52 = vpop.f32.mrb[127].mxu1 }
 0x1f3   :  { %v3178_v50 = vadd.f32 %v3177_v52, %v3176_v20 }
 0x1f4   :  { %v5075_v1 = vadd.f32 %v3175_v49, %v2145_v61  ;;  %v2148_v2 = vadd.f32 %v3096_v56, %v5015_v19 }
 0x1f6   :  { %v5078_v51 = vadd.f32 %v3178_v50, %v2148_v2  ;;  %v3097_v3 = vpop.f32.mrb[128].mxu0 }
 0x1f7   :  { %v3179_v59 = vpop.f32.mrb[128].mxu1  ;;  %v3098_v5 = vpop.f32.mrb[129].mxu0 }
 0x1f8   :  { %v3099_v6 = vadd.f32 %v3098_v5, %v3097_v3  ;;  %v3180_v9 = vpop.f32.mrb[129].mxu1  ;;  %v3100_v10 = vpop.f32.mrb[130].mxu0 }
 0x1f9   :  { %v3181_v7 = vadd.f32 %v3180_v9, %v3179_v59  ;;  %v3182_v60 = vpop.f32.mrb[130].mxu1  ;;  %v3101_v14 = vpop.f32.mrb[131].mxu0 }
 0x1fa   :  { %v2153_v55 = vadd.f32 %v3099_v6, %v5018_v39  ;;  %v3183_v46 = vpop.f32.mrb[131].mxu1 }
 0x1fc   :  { %v5081_v11 = vadd.f32 %v3181_v7, %v2153_v55 }
 0x1fe   :  { %v3201_v24 = vpop.f32.mrb[132].mxu0 }
 0x1ff   :  { %v3283_v18 = vpop.f32.mrb[132].mxu1  ;;  %v3202_v22 = vpop.f32.mrb[133].mxu0 }
 0x200   :  { %v3203_v19 = vadd.f32 %v3202_v22, %v3201_v24  ;;  %v3284_v25 = vpop.f32.mrb[133].mxu1  ;;  %v3204_v27 = vpop.f32.mrb[134].mxu0 }
 0x201   :  { %v3285_v21 = vadd.f32 %v3284_v25, %v3283_v18  ;;  %v3286_v29 = vpop.f32.mrb[134].mxu1  ;;  %v3205_v30 = vpop.f32.mrb[135].mxu0 }
 0x202   :  { %v2313_v31 = vadd.f32 %v3203_v19, %v5021_v0  ;;  %v3206_v45 = vadd.f32 %v3205_v30, %v3204_v27  ;;  %v3287_v33 = vpop.f32.mrb[135].mxu1 }
 0x203   :  { %v3288_v12 = vadd.f32 %v3287_v33, %v3286_v29 }
 0x204   :  { %v2433_v34 = vadd.f32 %v3285_v21, %v2313_v31  ;;  %v2316_v39 = vadd.f32 %v3206_v45, %v5024_v53 }
 0x206   :  { %v2518_v15 = vmax.f32 %v2433_v34, 0.0  ;;  %v2436_v63 = vadd.f32 %v3288_v12, %v2316_v39  ;;  %v3207_v41 = vpop.f32.mrb[136].mxu0 }
 0x207   :  { %v3289_v8 = vpop.f32.mrb[136].mxu1  ;;  %v3208_v43 = vpop.f32.mrb[137].mxu0 }
 0x208   :  { %2539 = vst [vmem:[%s5170_s3] sm:$0xff] %v2518_v15  ;;  %v2519_v44 = vmax.f32 %v2436_v63, 0.0  ;;  %v3209_v23 = vadd.f32 %v3208_v43, %v3207_v41  ;;  %v3290_v47 = vpop.f32.mrb[137].mxu1  ;;  %v3210_v48 = vpop.f32.mrb[138].mxu0 }
 0x209   :  { %v3291_v0 = vadd.f32 %v3290_v47, %v3289_v8  ;;  %v3292_v49 = vpop.f32.mrb[138].mxu1  ;;  %v3211_v20 = vpop.f32.mrb[139].mxu0 }
 0x20a   :  { %2540 = vst [vmem:[%s5170_s3 + $0x8] sm:$0xff] %v2519_v44  ;;  %v2321_v53 = vadd.f32 %v3209_v23, %v5027_v28  ;;  %v3212_v58 = vadd.f32 %v3211_v20, %v3210_v48  ;;  %v3293_v61 = vpop.f32.mrb[139].mxu1 }
 0x20b   :  { %v3294_v56 = vadd.f32 %v3293_v61, %v3292_v49 }
 0x20c   :  { %v2441_v52 = vadd.f32 %v3291_v0, %v2321_v53  ;;  %v2324_v50 = vadd.f32 %v3212_v58, %v5030_v13 }
 0x20e   :  { %v2520_v2 = vmax.f32 %v2441_v52, 0.0  ;;  %v2444_v3 = vadd.f32 %v3294_v56, %v2324_v50  ;;  %v3213_v59 = vpop.f32.mrb[140].mxu0 }
 0x20f   :  { %v3295_v5 = vpop.f32.mrb[140].mxu1  ;;  %v3214_v6 = vpop.f32.mrb[141].mxu0 }
 0x210   :  { %2541 = vst [vmem:[%s5170_s3 + $0x10] sm:$0xff] %v2520_v2  ;;  %v2521_v9 = vmax.f32 %v2444_v3, 0.0  ;;  %v3215_v10 = vadd.f32 %v3214_v6, %v3213_v59  ;;  %v3296_v7 = vpop.f32.mrb[141].mxu1  ;;  %v3216_v60 = vpop.f32.mrb[142].mxu0 }
 0x211   :  { %v3297_v28 = vadd.f32 %v3296_v7, %v3295_v5  ;;  %v3298_v14 = vpop.f32.mrb[142].mxu1  ;;  %v3217_v55 = vpop.f32.mrb[143].mxu0 }
 0x212   :  { %2542 = vst [vmem:[%s5170_s3 + $0x18] sm:$0xff] %v2521_v9  ;;  %v2329_v13 = vadd.f32 %v3215_v10, %v5033_v38  ;;  %v3218_v46 = vadd.f32 %v3217_v55, %v3216_v60  ;;  %v3299_v24 = vpop.f32.mrb[143].mxu1 }
 0x213   :  { %v3300_v18 = vadd.f32 %v3299_v24, %v3298_v14 }
 0x214   :  { %v2449_v22 = vadd.f32 %v3297_v28, %v2329_v13  ;;  %v2332_v19 = vadd.f32 %v3218_v46, %v5036_v40 }
 0x216   :  { %v2522_v25 = vmax.f32 %v2449_v22, 0.0  ;;  %v2452_v27 = vadd.f32 %v3300_v18, %v2332_v19  ;;  %v3219_v21 = vpop.f32.mrb[144].mxu0 }
 0x217   :  { %v3301_v29 = vpop.f32.mrb[144].mxu1  ;;  %v3220_v30 = vpop.f32.mrb[145].mxu0 }
 0x218   :  { %2543 = vst [vmem:[%s5170_s3 + $0x20] sm:$0xff] %v2522_v25  ;;  %v2523_v31 = vmax.f32 %v2452_v27, 0.0  ;;  %v3221_v45 = vadd.f32 %v3220_v30, %v3219_v21  ;;  %v3302_v33 = vpop.f32.mrb[145].mxu1  ;;  %v3222_v12 = vpop.f32.mrb[146].mxu0 }
 0x219   :  { %v3303_v38 = vadd.f32 %v3302_v33, %v3301_v29  ;;  %v3304_v34 = vpop.f32.mrb[146].mxu1  ;;  %v3223_v39 = vpop.f32.mrb[147].mxu0 }
 0x21a   :  { %2544 = vst [vmem:[%s5170_s3 + $0x28] sm:$0xff] %v2523_v31  ;;  %v2337_v40 = vadd.f32 %v3221_v45, %v5039_v37  ;;  %v3224_v15 = vadd.f32 %v3223_v39, %v3222_v12  ;;  %v3305_v63 = vpop.f32.mrb[147].mxu1 }
 0x21b   :  { %v3306_v41 = vadd.f32 %v3305_v63, %v3304_v34 }
 0x21c   :  { %v2457_v8 = vadd.f32 %v3303_v38, %v2337_v40  ;;  %v2340_v43 = vadd.f32 %v3224_v15, %v5042_v57 }
 0x21e   :  { %v2524_v44 = vmax.f32 %v2457_v8, 0.0  ;;  %v2460_v23 = vadd.f32 %v3306_v41, %v2340_v43  ;;  %v3225_v47 = vpop.f32.mrb[148].mxu0 }
 0x21f   :  { %v3307_v48 = vpop.f32.mrb[148].mxu1  ;;  %v3226_v0 = vpop.f32.mrb[149].mxu0 }
 0x220   :  { %2545 = vst [vmem:[%s5170_s3 + $0x30] sm:$0xff] %v2524_v44  ;;  %v2525_v49 = vmax.f32 %v2460_v23, 0.0  ;;  %v3227_v20 = vadd.f32 %v3226_v0, %v3225_v47  ;;  %v3308_v53 = vpop.f32.mrb[149].mxu1  ;;  %v3228_v58 = vpop.f32.mrb[150].mxu0 }
 0x221   :  { %v3309_v37 = vadd.f32 %v3308_v53, %v3307_v48  ;;  %v3310_v61 = vpop.f32.mrb[150].mxu1  ;;  %v3229_v56 = vpop.f32.mrb[151].mxu0 }
 0x222   :  { %2546 = vst [vmem:[%s5170_s3 + $0x38] sm:$0xff] %v2525_v49  ;;  %v2345_v57 = vadd.f32 %v3227_v20, %v5045_v17  ;;  %v3230_v52 = vadd.f32 %v3229_v56, %v3228_v58  ;;  %v3311_v50 = vpop.f32.mrb[151].mxu1 }
 0x223   :  { %v3312_v2 = vadd.f32 %v3311_v50, %v3310_v61 }
 0x224   :  { %v2465_v3 = vadd.f32 %v3309_v37, %v2345_v57  ;;  %v2348_v59 = vadd.f32 %v3230_v52, %v5048_v36 }
 0x226   :  { %v2526_v5 = vmax.f32 %v2465_v3, 0.0  ;;  %v2468_v6 = vadd.f32 %v3312_v2, %v2348_v59  ;;  %v3231_v9 = vpop.f32.mrb[152].mxu0 }
 0x227   :  { %v3313_v10 = vpop.f32.mrb[152].mxu1  ;;  %v3232_v7 = vpop.f32.mrb[153].mxu0 }
 0x228   :  { %2547 = vst [vmem:[%s5170_s3 + $0x40] sm:$0xff] %v2526_v5  ;;  %v2527_v60 = vmax.f32 %v2468_v6, 0.0  ;;  %v3233_v28 = vadd.f32 %v3232_v7, %v3231_v9  ;;  %v3314_v14 = vpop.f32.mrb[153].mxu1  ;;  %v3234_v55 = vpop.f32.mrb[154].mxu0 }
 0x229   :  { %v3315_v17 = vadd.f32 %v3314_v14, %v3313_v10  ;;  %v3316_v13 = vpop.f32.mrb[154].mxu1  ;;  %v3235_v46 = vpop.f32.mrb[155].mxu0 }
 0x22a   :  { %2548 = vst [vmem:[%s5170_s3 + $0x48] sm:$0xff] %v2527_v60  ;;  %v2353_v36 = vadd.f32 %v3233_v28, %v5051_v54  ;;  %v3236_v24 = vadd.f32 %v3235_v46, %v3234_v55  ;;  %v3317_v18 = vpop.f32.mrb[155].mxu1 }
 0x22b   :  { %v3318_v22 = vadd.f32 %v3317_v18, %v3316_v13 }
 0x22c   :  { %v2473_v19 = vadd.f32 %v3315_v17, %v2353_v36  ;;  %v2356_v25 = vadd.f32 %v3236_v24, %v5054_v26 }
 0x22e   :  { %v2528_v27 = vmax.f32 %v2473_v19, 0.0  ;;  %v2476_v21 = vadd.f32 %v3318_v22, %v2356_v25  ;;  %v3237_v29 = vpop.f32.mrb[156].mxu0 }
 0x22f   :  { %v3319_v30 = vpop.f32.mrb[156].mxu1  ;;  %v3238_v31 = vpop.f32.mrb[157].mxu0 }
 0x230   :  { %2549 = vst [vmem:[%s5170_s3 + $0x50] sm:$0xff] %v2528_v27  ;;  %v2529_v45 = vmax.f32 %v2476_v21, 0.0  ;;  %v3239_v33 = vadd.f32 %v3238_v31, %v3237_v29  ;;  %v3320_v12 = vpop.f32.mrb[157].mxu1  ;;  %v3240_v38 = vpop.f32.mrb[158].mxu0 }
 0x231   :  { %v3321_v54 = vadd.f32 %v3320_v12, %v3319_v30  ;;  %v3322_v34 = vpop.f32.mrb[158].mxu1  ;;  %v3241_v39 = vpop.f32.mrb[159].mxu0 }
 0x232   :  { %2550 = vst [vmem:[%s5170_s3 + $0x58] sm:$0xff] %v2529_v45  ;;  %v2361_v26 = vadd.f32 %v3239_v33, %v5057_v32  ;;  %v3242_v40 = vadd.f32 %v3241_v39, %v3240_v38  ;;  %v3323_v15 = vpop.f32.mrb[159].mxu1 }
 0x233   :  { %v3324_v63 = vadd.f32 %v3323_v15, %v3322_v34 }
 0x234   :  { %v2481_v41 = vadd.f32 %v3321_v54, %v2361_v26  ;;  %v2364_v8 = vadd.f32 %v3242_v40, %v5060_v62 }
 0x236   :  { %v2530_v43 = vmax.f32 %v2481_v41, 0.0  ;;  %v2484_v44 = vadd.f32 %v3324_v63, %v2364_v8  ;;  %v3243_v23 = vpop.f32.mrb[160].mxu0 }
 0x237   :  { %v3325_v47 = vpop.f32.mrb[160].mxu1  ;;  %v3244_v48 = vpop.f32.mrb[161].mxu0 }
 0x238   :  { %2551 = vst [vmem:[%s5170_s3 + $0x60] sm:$0xff] %v2530_v43  ;;  %v2531_v0 = vmax.f32 %v2484_v44, 0.0  ;;  %v3245_v49 = vadd.f32 %v3244_v48, %v3243_v23  ;;  %v3326_v20 = vpop.f32.mrb[161].mxu1  ;;  %v3246_v53 = vpop.f32.mrb[162].mxu0 }
 0x239   :  { %v3327_v32 = vadd.f32 %v3326_v20, %v3325_v47  ;;  %v3328_v58 = vpop.f32.mrb[162].mxu1  ;;  %v3247_v37 = vpop.f32.mrb[163].mxu0 }
 0x23a   :  { %2552 = vst [vmem:[%s5170_s3 + $0x68] sm:$0xff] %v2531_v0  ;;  %v2369_v62 = vadd.f32 %v3245_v49, %v5063_v4  ;;  %v3248_v61 = vadd.f32 %v3247_v37, %v3246_v53  ;;  %v3329_v56 = vpop.f32.mrb[163].mxu1 }
 0x23b   :  { %v3330_v57 = vadd.f32 %v3329_v56, %v3328_v58 }
 0x23c   :  { %v2489_v52 = vadd.f32 %v3327_v32, %v2369_v62  ;;  %v2372_v50 = vadd.f32 %v3248_v61, %v5066_v35 }
 0x23e   :  { %v2532_v2 = vmax.f32 %v2489_v52, 0.0  ;;  %v2492_v3 = vadd.f32 %v3330_v57, %v2372_v50  ;;  %v3249_v59 = vpop.f32.mrb[164].mxu0 }
 0x23f   :  { %v3331_v5 = vpop.f32.mrb[164].mxu1  ;;  %v3250_v6 = vpop.f32.mrb[165].mxu0 }
 0x240   :  { %2553 = vst [vmem:[%s5170_s3 + $0x70] sm:$0xff] %v2532_v2  ;;  %v2533_v9 = vmax.f32 %v2492_v3, 0.0  ;;  %v3251_v10 = vadd.f32 %v3250_v6, %v3249_v59  ;;  %v3332_v7 = vpop.f32.mrb[165].mxu1  ;;  %v3252_v60 = vpop.f32.mrb[166].mxu0 }
 0x241   :  { %v3333_v4 = vadd.f32 %v3332_v7, %v3331_v5  ;;  %v3334_v28 = vpop.f32.mrb[166].mxu1  ;;  %v3253_v14 = vpop.f32.mrb[167].mxu0 }
 0x242   :  { %2554 = vst [vmem:[%s5170_s3 + $0x78] sm:$0xff] %v2533_v9  ;;  %v2377_v35 = vadd.f32 %v3251_v10, %v5069_v16  ;;  %v3254_v55 = vadd.f32 %v3253_v14, %v3252_v60  ;;  %v3335_v17 = vpop.f32.mrb[167].mxu1 }
 0x243   :  { %v3336_v13 = vadd.f32 %v3335_v17, %v3334_v28 }
 0x244   :  { %v2497_v46 = vadd.f32 %v3333_v4, %v2377_v35  ;;  %v2380_v36 = vadd.f32 %v3254_v55, %v5072_v42 }
 0x246   :  { %v2534_v24 = vmax.f32 %v2497_v46, 0.0  ;;  %v2500_v18 = vadd.f32 %v3336_v13, %v2380_v36  ;;  %v3255_v22 = vpop.f32.mrb[168].mxu0 }
 0x247   :  { %v3337_v19 = vpop.f32.mrb[168].mxu1  ;;  %v3256_v25 = vpop.f32.mrb[169].mxu0 }
 0x248   :  { %2555 = vst [vmem:[%s5170_s3 + $0x80] sm:$0xff] %v2534_v24  ;;  %v2535_v27 = vmax.f32 %v2500_v18, 0.0  ;;  %v3257_v21 = vadd.f32 %v3256_v25, %v3255_v22  ;;  %v3338_v29 = vpop.f32.mrb[169].mxu1  ;;  %v3258_v30 = vpop.f32.mrb[170].mxu0 }
 0x249   :  { %v3339_v16 = vadd.f32 %v3338_v29, %v3337_v19  ;;  %v3340_v31 = vpop.f32.mrb[170].mxu1  ;;  %v3259_v45 = vpop.f32.mrb[171].mxu0 }
 0x24a   :  { %2556 = vst [vmem:[%s5170_s3 + $0x88] sm:$0xff] %v2535_v27  ;;  %v2385_v42 = vadd.f32 %v3257_v21, %v5075_v1  ;;  %v3260_v33 = vadd.f32 %v3259_v45, %v3258_v30  ;;  %v3341_v12 = vpop.f32.mrb[171].mxu1 }
 0x24b   :  { %v3342_v38 = vadd.f32 %v3341_v12, %v3340_v31 }
 0x24c   :  { %v2505_v54 = vadd.f32 %v3339_v16, %v2385_v42  ;;  %v2388_v34 = vadd.f32 %v3260_v33, %v5078_v51 }
 0x24e   :  { %v2536_v39 = vmax.f32 %v2505_v54, 0.0  ;;  %v2508_v26 = vadd.f32 %v3342_v38, %v2388_v34  ;;  %v3261_v40 = vpop.f32.mrb[172].mxu0 }
 0x24f   :  { %v3343_v15 = vpop.f32.mrb[172].mxu1  ;;  %v3262_v63 = vpop.f32.mrb[173].mxu0 }
 0x250   :  { %2557 = vst [vmem:[%s5170_s3 + $0x90] sm:$0xff] %v2536_v39  ;;  %v2537_v41 = vmax.f32 %v2508_v26, 0.0  ;;  %v3263_v8 = vadd.f32 %v3262_v63, %v3261_v40  ;;  %v3344_v43 = vpop.f32.mrb[173].mxu1  ;;  %v3264_v44 = vpop.f32.mrb[174].mxu0 }
 0x251   :  { %v3345_v1 = vadd.f32 %v3344_v43, %v3343_v15  ;;  %v3346_v23 = vpop.f32.mrb[174].mxu1  ;;  %v3265_v47 = vpop.f32.mrb[175].mxu0 }
 0x252   :  { %2558 = vst [vmem:[%s5170_s3 + $0x98] sm:$0xff] %v2537_v41  ;;  %v2393_v51 = vadd.f32 %v3263_v8, %v5081_v11  ;;  %v3347_v48 = vpop.f32.mrb[175].mxu1 }
 0x254   :  { %v2513_v0 = vadd.f32 %v3345_v1, %v2393_v51 }
 0x256   :  { %v2538_v49 = vmax.f32 %v2513_v0, 0.0 }
 0x258   :  { %2559 = vst [vmem:[%s5170_s3 + $0xa0] sm:$0x3] %v2538_v49 }

// kernel: dueling_dqn_forward.6
= control target key start
LH: loop header
LB: loop body
LE: loop exit
PB: predicated region body
PF: predicated region fallthrough
CT: control target
= control target key end

     0   :  { %vm1705_vm0 = vmmov 0   ;;  %vm1231_vm1 = vcmask 523264   ;;  %vm1244_vm2 = vcmask 517120   ;;  %s2444_s1 = inlined_call_operand.vmem [shape: bf16[1152,64], index: 1, kind: input, shape index: {}]   ;;  %s2445_s0 = inlined_call_operand.vmem [shape: f32[98,1152], index: 0, kind: input, shape index: {}]   ;;  %s2446_s2 = inlined_call_operand.vmem [shape: f32[1,64], index: 2, kind: input, shape index: {}]   ;;  %s2447_s3 = inlined_call_operand.vmem [shape: f32[98,64], index: 3, kind: output, shape index: {}]  }
   0x1   :  { %v1632_v0 = vld [vmem:[%s2444_s1 + $0x40] sm:$0xff]   ;;  %v1634_v2 = vld [vmem:[%s2444_s1 + $0x48] sm:$0xff]   ;;  %v1636_v4 = vld [vmem:[%s2444_s1 + $0x50] sm:$0xff]  }
   0x2   :  { %v1633_v1 = vld [vmem:[%s2444_s1] sm:$0xff]   ;;  %1614 = vmatprep.subr.bf16.mxu1 %v1632_v0  ;;  %1323 = vmatprep.subr.bf16.mxu0 %v1632_v0  ;;  %v1635_v3 = vld [vmem:[%s2444_s1 + $0x8] sm:$0xff]   ;;  %v1637_v5 = vld [vmem:[%s2444_s1 + $0x10] sm:$0xff]  }
   0x3   :  { %1622 = vmatpush3.bf16.msra.mxu1 %v1633_v1  ;;  %1324 = vmatpush3.bf16.msra.mxu0 %v1633_v1  ;;  %v1638_v6 = vld [vmem:[%s2444_s1 + $0x58] sm:$0xff]   ;;  %v1640_v8 = vld [vmem:[%s2444_s1 + $0x60] sm:$0xff]   ;;  %v1642_v10 = vld [vmem:[%s2444_s1 + $0x68] sm:$0xff]  }
   0x4   :  { %1615 = vmatprep.subr.bf16.mxu1 %v1634_v2  ;;  %1325 = vmatprep.subr.bf16.mxu0 %v1634_v2  ;;  %v1639_v7 = vld [vmem:[%s2444_s1 + $0x18] sm:$0xff]   ;;  %v1641_v9 = vld [vmem:[%s2444_s1 + $0x20] sm:$0xff]   ;;  %v88_v11 = vld [vmem:[%s2445_s0 + $0x248] sm:$0xff] }
   0x5   :  { %v97_v12 = vld [vmem:[%s2445_s0 + $0x290] sm:$0xff]  ;;  %v16_v14 = vld [vmem:[%s2445_s0 + $0x8] sm:$0xff]  ;;  %v1646_v20 = vld [vmem:[%s2444_s1 + $0x78] sm:$0xff]  }
   0x6   :  { %v169_v13 = vpack.c.bf16 %v97_v12, %v88_v11  ;;  %v25_v15 = vld [vmem:[%s2445_s0 + $0x50] sm:$0xff]  ;;  %v1643_v16 = vld [vmem:[%s2444_s1 + $0x28] sm:$0xff]   ;;  %v1647_v21 = vld [vmem:[%s2444_s1 + $0x38] sm:$0xff]  }
   0x7   :  { %1623 = vmatpush3.bf16.msra.mxu1 %v1635_v3  ;;  %1326 = vmatpush3.bf16.msra.mxu0 %v1635_v3  ;;  %v133_v17 = vpack.c.bf16 %v25_v15, %v16_v14  ;;  %v1644_v18 = vld [vmem:[%s2444_s1 + $0x70] sm:$0xff]   ;;  %v87_v22 = vld [vmem:[%s2445_s0 + $0x240] sm:$0xff]  ;;  %v96_v23 = vld [vmem:[%s2445_s0 + $0x288] sm:$0xff] }
   0x8   :  { %1616 = vmatprep.subr.bf16.mxu1 %v1636_v4  ;;  %1327 = vmatprep.subr.bf16.mxu0 %v1636_v4  ;;  %v1645_v19 = vld [vmem:[%s2444_s1 + $0x30] sm:$0xff]   ;;  %v1648_v24 = vld [vmem:[%s2444_s1 + $0xc0] sm:$0xff]   ;;  %v24_v26 = vld [vmem:[%s2445_s0 + $0x48] sm:$0xff]  ;;  %v168_v31 = vpack.c.bf16 %v96_v23, %v87_v22 }
   0x9   :  { %842 = vmatprep.mubr.bf16.mxu1 %v169_v13  ;;  %810 = vmatprep.mubr.bf16.mxu0 %v133_v17  ;;  %v15_v25 = vld [vmem:[%s2445_s0] sm:$0xff]  ;;  %v34_v30 = vld [vmem:[%s2445_s0 + $0x98] sm:$0xff]  ;;  %v1652_v34 = vld [vmem:[%s2444_s1 + $0xc8] sm:$0xff]  }
   0xa   :  { %v1650_v27 = vld [vmem:[%s2444_s1 + $0x140] sm:$0xff]   ;;  %v132_v32 = vpack.c.bf16 %v24_v26, %v15_v25  ;;  %v1654_v35 = vld [vmem:[%s2444_s1 + $0x148] sm:$0xff]   ;;  %v33_v39 = vld [vmem:[%s2445_s0 + $0x90] sm:$0xff] }
   0xb   :  { %1624 = vmatpush3.bf16.msra.mxu1 %v1637_v5  ;;  %1328 = vmatpush3.bf16.msra.mxu0 %v1637_v5  ;;  %v1649_v28 = vld [vmem:[%s2444_s1 + $0x80] sm:$0xff]   ;;  %v1653_v36 = vld [vmem:[%s2444_s1 + $0x88] sm:$0xff]   ;;  %v106_v40 = vld [vmem:[%s2445_s0 + $0x2d8] sm:$0xff] }
   0xc   :  { %1617 = vmatprep.subr.bf16.mxu1 %v1638_v6  ;;  %1329 = vmatprep.subr.bf16.mxu0 %v1638_v6  ;;  %v1651_v29 = vld [vmem:[%s2444_s1 + $0x100] sm:$0xff]   ;;  %v1655_v37 = vld [vmem:[%s2444_s1 + $0x108] sm:$0xff]   ;;  %v1656_v42 = vld [vmem:[%s2444_s1 + $0xd0] sm:$0xff]  }
   0xd   :  { %v43_v33 = vld [vmem:[%s2445_s0 + $0xe0] sm:$0xff]  ;;  %v42_v43 = vld [vmem:[%s2445_s0 + $0xd8] sm:$0xff]  ;;  %v105_v45 = vld [vmem:[%s2445_s0 + $0x2d0] sm:$0xff] }
   0xe   :  { %v142_v38 = vpack.c.bf16 %v43_v33, %v34_v30  ;;  %v115_v41 = vld [vmem:[%s2445_s0 + $0x320] sm:$0xff]  ;;  %v114_v46 = vld [vmem:[%s2445_s0 + $0x318] sm:$0xff]  ;;  %v1658_v47 = vld [vmem:[%s2444_s1 + $0x150] sm:$0xff]   ;;  %v141_v49 = vpack.c.bf16 %v42_v43, %v33_v39 }
   0xf   :  { %1625 = vmatpush3.bf16.msra.mxu1 %v1639_v7  ;;  %1330 = vmatpush3.bf16.msra.mxu0 %v1639_v7  ;;  %v178_v44 = vpack.c.bf16 %v115_v41, %v106_v40  ;;  %v1657_v48 = vld [vmem:[%s2444_s1 + $0x90] sm:$0xff]   ;;  %v177_v50 = vpack.c.bf16 %v114_v46, %v105_v45  ;;  %v52_v51 = vld [vmem:[%s2445_s0 + $0x128] sm:$0xff]  ;;  %v1660_v54 = vld [vmem:[%s2444_s1 + $0xd8] sm:$0xff]   ;;  %v1704_v41 = vmov 0.0  }
  0x10   :  { %1618 = vmatprep.subr.bf16.mxu1 %v1640_v8  ;;  %1331 = vmatprep.subr.bf16.mxu0 %v1640_v8  ;;  %v61_v52 = vld [vmem:[%s2445_s0 + $0x170] sm:$0xff]  ;;  %v1662_v55 = vld [vmem:[%s2444_s1 + $0x158] sm:$0xff]   ;;  %v1664_v59 = vld [vmem:[%s2444_s1 + $0xe0] sm:$0xff]  }
  0x11   :  { %v1659_v53 = vld [vmem:[%s2444_s1 + $0x110] sm:$0xff]   ;;  %v1661_v56 = vld [vmem:[%s2444_s1 + $0x98] sm:$0xff]   ;;  %v151_v58 = vpack.c.bf16 %v61_v52, %v52_v51  ;;  %v51_v60 = vld [vmem:[%s2445_s0 + $0x120] sm:$0xff] }
  0x12   :  { %v1663_v57 = vld [vmem:[%s2444_s1 + $0x118] sm:$0xff]   ;;  %v60_v61 = vld [vmem:[%s2445_s0 + $0x168] sm:$0xff]  ;;  %v1666_v63 = vld [vmem:[%s2444_s1 + $0x160] sm:$0xff]  }
  0x13   :  { %1626 = vmatpush3.bf16.msra.mxu1 %v1641_v9  ;;  %1332 = vmatpush3.bf16.msra.mxu0 %v1641_v9  ;;  %v124_v62 = vld [vmem:[%s2445_s0 + $0x368] sm:$0x3]  ;;  %v1665_v1 = vld [vmem:[%s2444_s1 + $0xa0] sm:$0xff]   ;;  %v150_v3 = vpack.c.bf16 %v60_v61, %v51_v60  ;;  %v70_v8 = vld [vmem:[%s2445_s0 + $0x1b8] sm:$0xff] }
  0x14   :  { %1619 = vmatprep.subr.bf16.mxu1 %v1642_v10  ;;  %1333 = vmatprep.subr.bf16.mxu0 %v1642_v10  ;;  %v187_v0 = vpack.c.bf16 %v124_v62, %v124_v62  ;;  %v123_v2 = vld [vmem:[%s2445_s0 + $0x360] sm:$0x3]  ;;  %v1668_v6 = vld [vmem:[%s2444_s1 + $0xe8] sm:$0xff]   ;;  %v1672_v13 = vld [vmem:[%s2444_s1 + $0xf0] sm:$0xff]  }
  0x15   :  { %v1667_v4 = vld [vmem:[%s2444_s1 + $0x120] sm:$0xff]   ;;  %v186_v5 = vpack.c.bf16 %v123_v2, %v123_v2  ;;  %v1670_v7 = vld [vmem:[%s2444_s1 + $0x168] sm:$0xff]   ;;  %v69_v14 = vld [vmem:[%s2445_s0 + $0x1b0] sm:$0xff] }
  0x16   :  { %v79_v9 = vld [vmem:[%s2445_s0 + $0x200] sm:$0xff]  ;;  %v1669_v10 = vld [vmem:[%s2444_s1 + $0xa8] sm:$0xff]   ;;  %v78_v15 = vld [vmem:[%s2445_s0 + $0x1f8] sm:$0xff] }
  0x17   :  { %1627 = vmatpush3.bf16.msra.mxu1 %v1643_v16  ;;  %1334 = vmatpush3.bf16.msra.mxu0 %v1643_v16  ;;  %v1671_v11 = vld [vmem:[%s2444_s1 + $0x128] sm:$0xff]   ;;  %v160_v12 = vpack.c.bf16 %v79_v9, %v70_v8  ;;  %v1674_v16 = vld [vmem:[%s2444_s1 + $0x170] sm:$0xff]   ;;  %v18_v22 = vld [vmem:[%s2445_s0 + $0x18] sm:$0xff] }
  0x18   :  { %1620 = vmatprep.subr.bf16.mxu1 %v1644_v18  ;;  %1335 = vmatprep.subr.bf16.mxu0 %v1644_v18  ;;  %v1673_v17 = vld [vmem:[%s2444_s1 + $0xb0] sm:$0xff]   ;;  %v27_v23 = vld [vmem:[%s2445_s0 + $0x60] sm:$0xff]  ;;  %v1679_v26 = vld [vmem:[%s2444_s1 + $0x138] sm:$0xff]  }
  0x19   :  { %v1675_v18 = vld [vmem:[%s2444_s1 + $0x130] sm:$0xff]   ;;  %v135_v25 = vpack.c.bf16 %v27_v23, %v18_v22  ;;  %v19_v33 = vld [vmem:[%s2445_s0 + $0x20] sm:$0xff]  ;;  %v1683_v43 = vld [vmem:[%s2444_s1 + $0x1c8] sm:$0xff]  }
  0x1a   :  { %v29_v30 = vld [vmem:[%s2445_s0 + $0x70] sm:$0xff]  ;;  %v1682_v40 = vld [vmem:[%s2444_s1 + $0x200] sm:$0xff]   ;;  %v44_v45 = vld [vmem:[%s2445_s0 + $0xe8] sm:$0xff] }
  0x1b   :  { %1628 = vmatpush3.bf16.msra.mxu1 %v1645_v19  ;;  %1336 = vmatpush3.bf16.msra.mxu0 %v1645_v19  ;;  %v159_v19 = vpack.c.bf16 %v78_v15, %v69_v14  ;;  %v45_v39 = vld [vmem:[%s2445_s0 + $0xf0] sm:$0xff]  ;;  %v1684_v46 = vld [vmem:[%s2444_s1 + $0x188] sm:$0xff]   ;;  %v74_v8 = vld [vmem:[%s2445_s0 + $0x1d8] sm:$0xff] }
  0x1c   :  { %1621 = vmatprep.subr.bf16.mxu1 %v1646_v20  ;;  %1337 = vmatprep.subr.bf16.mxu0 %v1646_v20  ;;  %v1676_v20 = vld [vmem:[%s2444_s1 + $0xf8] sm:$0xff]   ;;  %v1685_v52 = vld [vmem:[%s2444_s1 + $0x208] sm:$0xff]   ;;  %v65_v61 = vld [vmem:[%s2445_s0 + $0x190] sm:$0xff] }
  0x1d   :  { %v56_v60 = vld [vmem:[%s2445_s0 + $0x148] sm:$0xff]  ;;  %v1688_v2 = vld [vmem:[%s2444_s1 + $0x210] sm:$0xff]   ;;  %v83_v9 = vld [vmem:[%s2445_s0 + $0x220] sm:$0xff] }
  0x1e   :  { %v155_v62 = vpack.c.bf16 %v65_v61, %v56_v60  ;;  %v1691_v14 = vld [vmem:[%s2444_s1 + $0x218] sm:$0xff]   ;;  %v1692_v15 = vld [vmem:[%s2444_s1 + $0x1e0] sm:$0xff]   ;;  %v92_v23 = vld [vmem:[%s2445_s0 + $0x268] sm:$0xff] }
  0x1f   :  { %1629 = vmatpush3.bf16.msra.mxu1 %v1647_v21  ;;  %1338 = vmatpush3.bf16.msra.mxu0 %v1647_v21  ;;  %v1678_v21 = vld [vmem:[%s2444_s1 + $0x178] sm:$0xff]   ;;  %v99_v22 = vld [vmem:[%s2445_s0 + $0x2a0] sm:$0xff] }
  0x20   :  { %1381 = vmatprep.subr.bf16.mxu1 %v1648_v24  ;;  %1439 = vmatprep.subr.bf16.mxu0 %v1650_v27  ;;  %v1677_v24 = vld [vmem:[%s2444_s1 + $0xb8] sm:$0xff]   ;;  %v17_v27 = vld [vmem:[%s2445_s0 + $0x10] sm:$0xff] }
  0x22   :  { %843 = vmatmul.mubr.bf16.vlgmr.msra.gmra.mrb[0].mxu1 %v168_v31  ;;  %811 = vmatmul.mubr.bf16.vlgmr.msra.gmra.mrb[0].mxu0 %v132_v32  ;;  %v1680_v31 = vld [vmem:[%s2444_s1 + $0x1c0] sm:$0xff]  }
  0x23   :  { %1382 = vmatpush3.bf16.msra.mxu1 %v1649_v28  ;;  %1440 = vmatpush3.bf16.msra.mxu0 %v1651_v29  ;;  %v26_v28 = vld [vmem:[%s2445_s0 + $0x58] sm:$0xff]  ;;  %v20_v29 = vld [vmem:[%s2445_s0 + $0x28] sm:$0xff] }
  0x24   :  { %1383 = vmatprep.subr.bf16.mxu1 %v1652_v34  ;;  %1441 = vmatprep.subr.bf16.mxu0 %v1654_v35  ;;  %v137_v32 = vpack.c.bf16 %v29_v30, %v20_v29  ;;  %v28_v34 = vld [vmem:[%s2445_s0 + $0x68] sm:$0xff]  ;;  %v134_v35 = vpack.c.bf16 %v26_v28, %v17_v27 }
  0x25   :  { %818 = vmatprep.mubr.bf16.mxu0 %v142_v38  ;;  %850 = vmatprep.mubr.bf16.mxu1 %v178_v44  ;;  %v36_v38 = vld [vmem:[%s2445_s0 + $0xa8] sm:$0xff]  ;;  %v35_v44 = vld [vmem:[%s2445_s0 + $0xa0] sm:$0xff] }
  0x26   :  { %v1696_v29 = vld [vmem:[%s2444_s1 + $0x1a8] sm:$0xff]  }
  0x27   :  { %1384 = vmatpush3.bf16.msra.mxu1 %v1653_v36  ;;  %1442 = vmatpush3.bf16.msra.mxu0 %v1655_v37  ;;  %v1681_v36 = vld [vmem:[%s2444_s1 + $0x180] sm:$0xff]   ;;  %v136_v37 = vpack.c.bf16 %v28_v34, %v19_v33  ;;  %v98_v33 = vld [vmem:[%s2445_s0 + $0x298] sm:$0xff] }
  0x28   :  { %1385 = vmatprep.subr.bf16.mxu1 %v1656_v42  ;;  %1443 = vmatprep.subr.bf16.mxu0 %v1658_v47  ;;  %v144_v42 = vpack.c.bf16 %v45_v39, %v36_v38  ;;  %v38_v47 = vld [vmem:[%s2445_s0 + $0xb8] sm:$0xff]  ;;  %v91_v34 = vld [vmem:[%s2445_s0 + $0x260] sm:$0xff]  ;;  %v117_v38 = vld [vmem:[%s2445_s0 + $0x330] sm:$0xff] }
  0x29   :  { %v110_v39 = vld [vmem:[%s2445_s0 + $0x2f8] sm:$0xff] }
  0x2a   :  { %819 = vmatmul.mubr.bf16.gmra.mrb[4].mxu0 %v141_v49  ;;  %851 = vmatmul.mubr.bf16.gmra.mrb[4].mxu1 %v177_v50  ;;  %v37_v49 = vld [vmem:[%s2445_s0 + $0xb0] sm:$0xff]  ;;  %v46_v50 = vld [vmem:[%s2445_s0 + $0xf8] sm:$0xff] }
  0x2b   :  { %1386 = vmatpush3.bf16.msra.mxu1 %v1657_v48  ;;  %1444 = vmatpush3.bf16.msra.mxu0 %v1659_v53  ;;  %v47_v48 = vld [vmem:[%s2445_s0 + $0x100] sm:$0xff]  ;;  %v1686_v53 = vld [vmem:[%s2444_s1 + $0x1d0] sm:$0xff]  }
  0x2c   :  { %1387 = vmatprep.subr.bf16.mxu1 %v1660_v54  ;;  %1445 = vmatprep.subr.bf16.mxu0 %v1662_v55  ;;  %v146_v51 = vpack.c.bf16 %v47_v48, %v38_v47  ;;  %v54_v54 = vld [vmem:[%s2445_s0 + $0x138] sm:$0xff]  ;;  %v63_v55 = vld [vmem:[%s2445_s0 + $0x180] sm:$0xff] }
  0x2d   :  { %826 = vmatprep.mubr.bf16.mxu0 %v151_v58  ;;  %858 = vmatprep.mubr.bf16.mxu1 %v187_v0  ;;  %v153_v58 = vpack.c.bf16 %v63_v55, %v54_v54  ;;  %v62_v0 = vld [vmem:[%s2445_s0 + $0x178] sm:$0xff]  ;;  %v109_v54 = vld [vmem:[%s2445_s0 + $0x2f0] sm:$0xff] }
  0x2e   :  { %v118_v55 = vld [vmem:[%s2445_s0 + $0x338] sm:$0xff] }
  0x2f   :  { %1388 = vmatpush3.bf16.msra.mxu1 %v1661_v56  ;;  %1446 = vmatpush3.bf16.msra.mxu0 %v1663_v57  ;;  %v143_v56 = vpack.c.bf16 %v44_v45, %v35_v44  ;;  %v145_v57 = vpack.c.bf16 %v46_v50, %v37_v49  ;;  %v1701_v49 = vld [vmem:[%s2444_s1 + $0x1f8] sm:$0xff]  }
  0x30   :  { %1389 = vmatprep.subr.bf16.mxu1 %v1664_v59  ;;  %1447 = vmatprep.subr.bf16.mxu0 %v1666_v63  ;;  %v1687_v59 = vld [vmem:[%s2444_s1 + $0x190] sm:$0xff]   ;;  %v1702_v50 = vld [vmem:[%s2444_s1 + $0x1b8] sm:$0xff]  }
  0x31   :  { %v53_v63 = vld [vmem:[%s2445_s0 + $0x130] sm:$0xff] }
  0x32   :  { %827 = vmatmul.mubr.bf16.gmra.mrb[8].mxu0 %v150_v3  ;;  %859 = vmatmul.mubr.bf16.gmra.mrb[8].mxu1 %v186_v5  ;;  %v1689_v3 = vld [vmem:[%s2444_s1 + $0x1d8] sm:$0xff]  }
  0x33   :  { %1390 = vmatpush3.bf16.msra.mxu1 %v1665_v1  ;;  %1448 = vmatpush3.bf16.msra.mxu0 %v1667_v4  ;;  %v55_v1 = vld [vmem:[%s2445_s0 + $0x140] sm:$0xff]  ;;  %v64_v4 = vld [vmem:[%s2445_s0 + $0x188] sm:$0xff]  ;;  %v1690_v5 = vld [vmem:[%s2444_s1 + $0x198] sm:$0xff]  }
  0x34   :  { %1391 = vmatprep.subr.bf16.mxu1 %v1668_v6  ;;  %1449 = vmatprep.subr.bf16.mxu0 %v1670_v7  ;;  %v72_v6 = vld [vmem:[%s2445_s0 + $0x1c8] sm:$0xff]  ;;  %v81_v7 = vld [vmem:[%s2445_s0 + $0x210] sm:$0xff] }
  0x35   :  { %834 = vmatprep.mubr.bf16.mxu0 %v160_v12  ;;  %898 = vmatprep.mubr.bf16.mxu1 %v135_v25  ;;  %v162_v12 = vpack.c.bf16 %v81_v7, %v72_v6  ;;  %v1694_v25 = vld [vmem:[%s2444_s1 + $0x220] sm:$0xff]   ;;  %v30_v6 = vld [vmem:[%s2445_s0 + $0x78] sm:$0xff] }
  0x36   :  { %v23_v7 = vld [vmem:[%s2445_s0 + $0x40] sm:$0xff] }
  0x37   :  { %1392 = vmatpush3.bf16.msra.mxu1 %v1669_v10  ;;  %1450 = vmatpush3.bf16.msra.mxu0 %v1671_v11  ;;  %v152_v10 = vpack.c.bf16 %v62_v0, %v53_v63  ;;  %v154_v11 = vpack.c.bf16 %v64_v4, %v55_v1  ;;  %v127_v63 = vld [vmem:[%s2445_s0 + $0x380] sm:$0x3]  ;;  %v22_v0 = vld [vmem:[%s2445_s0 + $0x38] sm:$0xff] }
  0x38   :  { %1393 = vmatprep.subr.bf16.mxu1 %v1672_v13  ;;  %1451 = vmatprep.subr.bf16.mxu0 %v1674_v16  ;;  %v164_v13 = vpack.c.bf16 %v83_v9, %v74_v8  ;;  %v71_v16 = vld [vmem:[%s2445_s0 + $0x1c0] sm:$0xff]  ;;  %v32_v8 = vld [vmem:[%s2445_s0 + $0x88] sm:$0xff] }
  0x39   :  { %v31_v1 = vld [vmem:[%s2445_s0 + $0x80] sm:$0xff]  ;;  %v40_v9 = vld [vmem:[%s2445_s0 + $0xc8] sm:$0xff] }
  0x3a   :  { %835 = vmatmul.mubr.bf16.gmra.mrb[12].mxu0 %v159_v19  ;;  %v73_v19 = vld [vmem:[%s2445_s0 + $0x1d0] sm:$0xff]  ;;  %v139_v4 = vpack.c.bf16 %v31_v1, %v22_v0 }
  0x3b   :  { %1394 = vmatpush3.bf16.msra.mxu1 %v1673_v17  ;;  %1452 = vmatpush3.bf16.msra.mxu0 %v1675_v18  ;;  %v80_v17 = vld [vmem:[%s2445_s0 + $0x208] sm:$0xff]  ;;  %v1693_v18 = vld [vmem:[%s2444_s1 + $0x1a0] sm:$0xff]  }
  0x3c   :  { %1395 = vmatprep.subr.bf16.mxu1 %v1676_v20  ;;  %1453 = vmatprep.subr.bf16.mxu0 %v1678_v21  ;;  %v82_v20 = vld [vmem:[%s2445_s0 + $0x218] sm:$0xff]  ;;  %v161_v27 = vpack.c.bf16 %v80_v17, %v71_v16  ;;  %v41_v16 = vld [vmem:[%s2445_s0 + $0xd0] sm:$0xff] }
  0x3d   :  { %986 = vmatprep.mubr.bf16.mxu0 %v137_v32  ;;  %v90_v21 = vld [vmem:[%s2445_s0 + $0x258] sm:$0xff]  ;;  %v163_v28 = vpack.c.bf16 %v82_v20, %v73_v19  ;;  %v89_v32 = vld [vmem:[%s2445_s0 + $0x250] sm:$0xff]  ;;  %v67_v19 = vld [vmem:[%s2445_s0 + $0x1a0] sm:$0xff] }
  0x3e   :  { %v171_v30 = vpack.c.bf16 %v99_v22, %v90_v21  ;;  %v170_v44 = vpack.c.bf16 %v98_v33, %v89_v32  ;;  %v50_v17 = vld [vmem:[%s2445_s0 + $0x118] sm:$0xff]  ;;  %v75_v32 = vld [vmem:[%s2445_s0 + $0x1e0] sm:$0xff]  ;;  %v84_v33 = vld [vmem:[%s2445_s0 + $0x228] sm:$0xff] }
  0x3f   :  { %1396 = vmatpush3.bf16.msra.mxu1 %v1677_v24  ;;  %1454 = vmatpush3.bf16.msra.mxu0 %v1679_v26  ;;  %v101_v24 = vld [vmem:[%s2445_s0 + $0x2b0] sm:$0xff]  ;;  %v1695_v26 = vld [vmem:[%s2444_s1 + $0x1e8] sm:$0xff]   ;;  %v149_v21 = vpack.c.bf16 %v50_v17, %v41_v16 }
  0x40   :  { %1497 = vmatprep.subr.bf16.mxu1 %v1680_v31  ;;  %1570 = vmatprep.subr.bf16.mxu0 %v1704_v41  ;;  %v173_v31 = vpack.c.bf16 %v101_v24, %v92_v23  ;;  %v57_v23 = vld [vmem:[%s2445_s0 + $0x150] sm:$0xff]  ;;  %v66_v24 = vld [vmem:[%s2445_s0 + $0x198] sm:$0xff] }
  0x42   :  { %899 = vmatmul.mubr.bf16.vlgmr.msra.gmra.mrb[12].mxu1 %v134_v35  ;;  %987 = vmatmul.mubr.bf16.vlgmr.msra.gmra.mrb[16].mxu0 %v136_v37  ;;  %v100_v35 = vld [vmem:[%s2445_s0 + $0x2a8] sm:$0xff] }
  0x43   :  { %1498 = vmatpush3.bf16.msra.mxu1 %v1681_v36  ;;  %1571 = vmatpush3.bf16.msra.mxu0 %v1682_v40  ;;  %v1697_v36 = vld [vmem:[%s2444_s1 + $0x228] sm:$0xff]   ;;  %v1698_v40 = vld [vmem:[%s2444_s1 + $0x1f0] sm:$0xff]   ;;  %v172_v45 = vpack.c.bf16 %v100_v35, %v91_v34  ;;  %v86_v35 = vld [vmem:[%s2445_s0 + $0x238] sm:$0xff] }
  0x44   :  { %906 = vmatprep.mubr.bf16.mxu1 %v144_v42  ;;  %1499 = vmatprep.subr.bf16.mxu1 %v1683_v43  ;;  %v108_v37 = vld [vmem:[%s2445_s0 + $0x2e8] sm:$0xff]  ;;  %v119_v42 = vld [vmem:[%s2445_s0 + $0x340] sm:$0xff]  ;;  %v1699_v43 = vld [vmem:[%s2444_s1 + $0x1b0] sm:$0xff]  }
  0x45   :  { %994 = vmatprep.mubr.bf16.mxu0 %v146_v51  ;;  %1572 = vmatprep.subr.bf16.mxu0 %v1704_v41  ;;  %v180_v47 = vpack.c.bf16 %v117_v38, %v108_v37  ;;  %v182_v48 = vpack.c.bf16 %v119_v42, %v110_v39  ;;  %v107_v51 = vld [vmem:[%s2445_s0 + $0x2e0] sm:$0xff]  ;;  %v77_v34 = vld [vmem:[%s2445_s0 + $0x1f0] sm:$0xff]  ;;  %v165_v38 = vpack.c.bf16 %v84_v33, %v75_v32 }
  0x46   :  { %v103_v37 = vld [vmem:[%s2445_s0 + $0x2c0] sm:$0xff]  ;;  %v167_v39 = vpack.c.bf16 %v86_v35, %v77_v34  ;;  %v93_v42 = vld [vmem:[%s2445_s0 + $0x270] sm:$0xff] }
  0x47   :  { %1500 = vmatpush3.bf16.msra.mxu1 %v1684_v46  ;;  %1573 = vmatpush3.bf16.msra.mxu0 %v1685_v52  ;;  %v1700_v46 = vld [vmem:[%s2444_s1 + $0x230] sm:$0xff]   ;;  %v1703_v52 = vld [vmem:[%s2444_s1 + $0x238] sm:$0xff]  }
  0x48   :  { %1501 = vmatprep.subr.bf16.mxu1 %v1686_v53  ;;  %1574 = vmatprep.subr.bf16.mxu0 %v1704_v41  ;;  %v116_v53 = vld [vmem:[%s2445_s0 + $0x328] sm:$0xff] }
  0x4a   :  { %907 = vmatmul.mubr.bf16.gmra.mrb[16].mxu1 %v143_v56  ;;  %995 = vmatmul.mubr.bf16.gmra.mrb[20].mxu0 %v145_v57  ;;  %v126_v56 = vld [vmem:[%s2445_s0 + $0x378] sm:$0x3]  ;;  %v128_v57 = vld [vmem:[%s2445_s0 + $0x388] sm:$0x3] }
  0x4b   :  { %914 = vmatprep.mubr.bf16.mxu1 %v153_v58  ;;  %1502 = vmatpush3.bf16.msra.mxu1 %v1687_v59  ;;  %v179_v58 = vpack.c.bf16 %v116_v53, %v107_v51  ;;  %v181_v59 = vpack.c.bf16 %v118_v55, %v109_v54  ;;  %v189_v60 = vpack.c.bf16 %v126_v56, %v126_v56  ;;  %v111_v51 = vld [vmem:[%s2445_s0 + $0x300] sm:$0xff]  ;;  %v113_v53 = vld [vmem:[%s2445_s0 + $0x310] sm:$0xff]  ;;  %v122_v54 = vld [vmem:[%s2445_s0 + $0x358] sm:$0xff] }
  0x4c   :  { %1002 = vmatprep.mubr.bf16.mxu0 %v155_v62  ;;  %1575 = vmatpush3.bf16.msra.mxu0 %v1688_v2  ;;  %v191_v61 = vpack.c.bf16 %v128_v57, %v128_v57  ;;  %v125_v62 = vld [vmem:[%s2445_s0 + $0x370] sm:$0x3]  ;;  %v130_v55 = vld [vmem:[%s2445_s0 + $0x398] sm:$0x3]  ;;  %v185_v57 = vpack.c.bf16 %v122_v54, %v113_v53 }
  0x4d   :  { %1503 = vmatprep.subr.bf16.mxu1 %v1689_v3  ;;  %1576 = vmatprep.subr.bf16.mxu0 %v1704_v41  ;;  %v188_v2 = vpack.c.bf16 %v125_v62, %v125_v62  ;;  %v190_v3 = vpack.c.bf16 %v127_v63, %v127_v63 }
  0x4f   :  { %1504 = vmatpush3.bf16.msra.mxu1 %v1690_v5  ;;  %v21_v5 = vld [vmem:[%s2445_s0 + $0x30] sm:$0xff] }
  0x50   :  { %1577 = vmatpush3.bf16.msra.mxu0 %v1691_v14  ;;  %1505 = vmatprep.subr.bf16.mxu1 %v1692_v15  ;;  %v39_v14 = vld [vmem:[%s2445_s0 + $0xc0] sm:$0xff]  ;;  %v48_v15 = vld [vmem:[%s2445_s0 + $0x108] sm:$0xff] }
  0x51   :  { %1578 = vmatprep.subr.bf16.mxu0 %v1704_v41  ;;  %v147_v20 = vpack.c.bf16 %v48_v15, %v39_v14 }
  0x52   :  { %915 = vmatmul.mubr.bf16.gmra.mrb[20].mxu1 %v152_v10  ;;  %1003 = vmatmul.mubr.bf16.gmra.mrb[24].mxu0 %v154_v11  ;;  %v49_v10 = vld [vmem:[%s2445_s0 + $0x110] sm:$0xff]  ;;  %v138_v11 = vpack.c.bf16 %v30_v6, %v21_v5 }
  0x53   :  { %922 = vmatprep.mubr.bf16.mxu1 %v162_v12  ;;  %1010 = vmatprep.mubr.bf16.mxu0 %v164_v13  ;;  %v140_v12 = vpack.c.bf16 %v32_v8, %v23_v7  ;;  %v148_v13 = vpack.c.bf16 %v49_v10, %v40_v9 }
  0x54   :  { %1506 = vmatpush3.bf16.msra.mxu1 %v1693_v18  ;;  %1579 = vmatpush3.bf16.msra.mxu0 %v1694_v25  ;;  %v58_v18 = vld [vmem:[%s2445_s0 + $0x158] sm:$0xff]  ;;  %v59_v25 = vld [vmem:[%s2445_s0 + $0x160] sm:$0xff] }
  0x55   :  { %1507 = vmatprep.subr.bf16.mxu1 %v1695_v26  ;;  %1580 = vmatprep.subr.bf16.mxu0 %v1704_v41  ;;  %v157_v22 = vpack.c.bf16 %v67_v19, %v58_v18  ;;  %v68_v26 = vld [vmem:[%s2445_s0 + $0x1a8] sm:$0xff] }
  0x58   :  { %1508 = vmatpush3.bf16.msra.mxu1 %v1696_v29  ;;  %1581 = vmatpush3.bf16.msra.mxu0 %v1697_v36  ;;  %v156_v29 = vpack.c.bf16 %v66_v24, %v57_v23  ;;  %v94_v36 = vld [vmem:[%s2445_s0 + $0x278] sm:$0xff] }
  0x59   :  { %1509 = vmatprep.subr.bf16.mxu1 %v1698_v40  ;;  %1582 = vmatprep.subr.bf16.mxu0 %v1704_v41  ;;  %v175_v40 = vpack.c.bf16 %v103_v37, %v94_v36 }
  0x5a   :  { %923 = vmatmul.mubr.bf16.gmra.mrb[24].mxu1 %v161_v27  ;;  %1011 = vmatmul.mubr.bf16.gmra.mrb[28].mxu0 %v163_v28  ;;  %v76_v27 = vld [vmem:[%s2445_s0 + $0x1e8] sm:$0xff]  ;;  %v85_v28 = vld [vmem:[%s2445_s0 + $0x230] sm:$0xff] }
  0x5b   :  { %930 = vmatprep.mubr.bf16.mxu1 %v171_v30  ;;  %1018 = vmatprep.mubr.bf16.mxu0 %v173_v31  ;;  %v158_v30 = vpack.c.bf16 %v68_v26, %v59_v25  ;;  %v166_v31 = vpack.c.bf16 %v85_v28, %v76_v27 }
  0x5c   :  { %1510 = vmatpush3.bf16.msra.mxu1 %v1699_v43  ;;  %1583 = vmatpush3.bf16.msra.mxu0 %v1700_v46  ;;  %v102_v43 = vld [vmem:[%s2445_s0 + $0x2b8] sm:$0xff]  ;;  %v112_v46 = vld [vmem:[%s2445_s0 + $0x308] sm:$0xff] }
  0x5d   :  { %1511 = vmatprep.subr.bf16.mxu1 %v1701_v49  ;;  %1584 = vmatprep.subr.bf16.mxu0 %v1704_v41 }
  0x60   :  { %1512 = vmatpush3.bf16.msra.mxu1 %v1702_v50  ;;  %1585 = vmatpush3.bf16.msra.mxu0 %v1703_v52  ;;  %v120_v52 = vld [vmem:[%s2445_s0 + $0x348] sm:$0xff] }
  0x61   :  { %v183_v56 = vpack.c.bf16 %v120_v52, %v111_v51 }
  0x62   :  { %931 = vmatmul.mubr.bf16.gmra.mrb[28].mxu1 %v170_v44  ;;  %1019 = vmatmul.mubr.bf16.gmra.mrb[32].mxu0 %v172_v45  ;;  %v95_v44 = vld [vmem:[%s2445_s0 + $0x280] sm:$0xff]  ;;  %v104_v45 = vld [vmem:[%s2445_s0 + $0x2c8] sm:$0xff] }
  0x63   :  { %938 = vmatprep.mubr.bf16.mxu1 %v180_v47  ;;  %1026 = vmatprep.mubr.bf16.mxu0 %v182_v48  ;;  %v121_v47 = vld [vmem:[%s2445_s0 + $0x350] sm:$0xff]  ;;  %v174_v48 = vpack.c.bf16 %v102_v43, %v93_v42  ;;  %v176_v49 = vpack.c.bf16 %v104_v45, %v95_v44  ;;  %v2332_v42 = vld [vmem:[%s2446_s2] ss:$0 sm:$0xff] }
  0x64   :  { %v184_v50 = vpack.c.bf16 %v121_v47, %v112_v46 }
  0x6a   :  { %939 = vmatmul.mubr.bf16.gmra.mrb[32].mxu1 %v179_v58  ;;  %1027 = vmatmul.mubr.bf16.gmra.mrb[36].mxu0 %v181_v59  ;;  %v193_v58 = vpack.c.bf16 %v130_v55, %v130_v55  ;;  %v129_v59 = vld [vmem:[%s2445_s0 + $0x390] sm:$0x3] }
  0x6b   :  { %946 = vmatprep.mubr.bf16.mxu1 %v189_v60  ;;  %1034 = vmatprep.mubr.bf16.mxu0 %v191_v61  ;;  %v131_v60 = vld [vmem:[%s2445_s0 + $0x3a0] sm:$0x3]  ;;  %v192_v61 = vpack.c.bf16 %v129_v59, %v129_v59 }
  0x6c   :  { %v194_v62 = vpack.c.bf16 %v131_v60, %v131_v60 }
  0x72   :  { %947 = vmatmul.mubr.bf16.gmra.mrb[36].mxu1 %v188_v2  ;;  %1035 = vmatmul.mubr.bf16.gmra.mrb[40].mxu0 %v190_v3 }
  0x73   :  { %1074 = vmatprep.mubr.bf16.mxu1 %v139_v4  ;;  %1586 = vmatprep.mubr.msk.bf16.mxu0 %vm1705_vm0, %v1704_v41 }
  0x7a   :  { %1075 = vmatmul.mubr.bf16.vlgmr.msra.gmra.mrb[40].mxu1 %v138_v11  ;;  %1587 = vmatmul.mubr.bf16.vlgmr.msra.gmra.mrb[44].mxu0 %v140_v12 }
  0x7b   :  { %1082 = vmatprep.mubr.bf16.mxu1 %v148_v13  ;;  %1590 = vmatprep.mubr.msk.bf16.mxu0 %vm1705_vm0, %v1704_v41 }
  0x82   :  { %1083 = vmatmul.mubr.bf16.gmra.mrb[44].mxu1 %v147_v20  ;;  %1591 = vmatmul.mubr.bf16.gmra.mrb[48].mxu0 %v149_v21 }
  0x83   :  { %1090 = vmatprep.mubr.bf16.mxu1 %v157_v22  ;;  %1594 = vmatprep.mubr.msk.bf16.mxu0 %vm1705_vm0, %v1704_v41 }
  0x8a   :  { %1091 = vmatmul.mubr.bf16.gmra.mrb[48].mxu1 %v156_v29  ;;  %1595 = vmatmul.mubr.bf16.gmra.mrb[52].mxu0 %v158_v30 }
  0x8b   :  { %1098 = vmatprep.mubr.bf16.mxu1 %v166_v31  ;;  %1598 = vmatprep.mubr.msk.bf16.mxu0 %vm1705_vm0, %v1704_v41 }
  0x92   :  { %1099 = vmatmul.mubr.bf16.gmra.mrb[52].mxu1 %v165_v38  ;;  %1599 = vmatmul.mubr.bf16.gmra.mrb[56].mxu0 %v167_v39 }
  0x93   :  { %1106 = vmatprep.mubr.bf16.mxu1 %v175_v40  ;;  %1602 = vmatprep.mubr.msk.bf16.mxu0 %vm1705_vm0, %v1704_v41 }
  0x9a   :  { %1107 = vmatmul.mubr.bf16.gmra.mrb[56].mxu1 %v174_v48  ;;  %1603 = vmatmul.mubr.bf16.gmra.mrb[60].mxu0 %v176_v49 }
  0x9b   :  { %1114 = vmatprep.mubr.bf16.mxu1 %v184_v50  ;;  %1606 = vmatprep.mubr.msk.bf16.mxu0 %vm1705_vm0, %v1704_v41 }
  0xa2   :  { %1115 = vmatmul.mubr.bf16.gmra.mrb[60].mxu1 %v183_v56  ;;  %1607 = vmatmul.mubr.bf16.gmra.mrb[64].mxu0 %v185_v57 }
  0xa3   :  { %1122 = vmatprep.mubr.bf16.mxu1 %v193_v58  ;;  %1610 = vmatprep.mubr.msk.bf16.mxu0 %vm1705_vm0, %v1704_v41 }
  0xaa   :  { %1123 = vmatmul.mubr.bf16.gmra.mrb[64].mxu1 %v192_v61  ;;  %1611 = vmatmul.mubr.bf16.gmra.mrb[68].mxu0 %v194_v62 }
  0xf5   :  { %v1363_v63 = vpop.f32.mrb[0].mxu1  ;;  %v1339_v0 = vpop.f32.mrb[0].mxu0 }
  0xf6   :  { %v1364_v1 = vpop.f32.mrb[1].mxu1  ;;  %v1340_v2 = vpop.f32.mrb[1].mxu0 }
  0xf7   :  { %v2315_v3 = vadd.f32 %v1364_v1, %v1363_v63  ;;  %v1366_v4 = vpop.f32.mrb[2].mxu1  ;;  %v1341_v5 = vadd.f32 %v1340_v2, %v1339_v0  ;;  %v1342_v6 = vpop.f32.mrb[2].mxu0 }
  0xf8   :  { %v1367_v7 = vpop.f32.mrb[3].mxu1  ;;  %v1343_v8 = vpop.f32.mrb[3].mxu0 }
  0xf9   :  { %v2317_v41 = vadd.f32 %v1367_v7, %v1366_v4  ;;  %v1344_v9 = vadd.f32 %v1343_v8, %v1342_v6  ;;  %v813_v45 = vadd.f32 %v1341_v5, %v2332_v42 }
  0xfb   :  { %v816_v52 = vadd.f32 %v1344_v9, %v2332_v42 }
  0xfd   :  { %v1345_v10 = vpop.f32.mrb[4].mxu0  ;;  %v1369_v11 = vpop.f32.mrb[4].mxu1 }
  0xfe   :  { %v1346_v12 = vpop.f32.mrb[5].mxu0  ;;  %v1370_v13 = vpop.f32.mrb[5].mxu1 }
  0xff   :  { %v1347_v14 = vadd.f32 %v1346_v12, %v1345_v10  ;;  %v1348_v15 = vpop.f32.mrb[6].mxu0  ;;  %v2319_v16 = vadd.f32 %v1370_v13, %v1369_v11  ;;  %v1372_v17 = vpop.f32.mrb[6].mxu1 }
 0x100   :  { %v1349_v18 = vpop.f32.mrb[7].mxu0  ;;  %v1373_v19 = vpop.f32.mrb[7].mxu1 }
 0x101   :  { %v1350_v20 = vadd.f32 %v1349_v18, %v1348_v15  ;;  %v2321_v21 = vadd.f32 %v1373_v19, %v1372_v17  ;;  %v821_v63 = vadd.f32 %v1347_v14, %v2332_v42 }
 0x103   :  { %v824_v7 = vadd.f32 %v1350_v20, %v2332_v42 }
 0x105   :  { %v1351_v22 = vpop.f32.mrb[8].mxu0  ;;  %v1375_v23 = vpop.f32.mrb[8].mxu1 }
 0x106   :  { %v1352_v24 = vpop.f32.mrb[9].mxu0  ;;  %v1376_v25 = vpop.f32.mrb[9].mxu1 }
 0x107   :  { %v1353_v26 = vadd.f32 %v1352_v24, %v1351_v22  ;;  %v1354_v27 = vpop.f32.mrb[10].mxu0  ;;  %v2323_v28 = vadd.f32 %v1376_v25, %v1375_v23  ;;  %v1378_v29 = vpop.f32.mrb[10].mxu1 }
 0x108   :  { %v1355_v30 = vpop.f32.mrb[11].mxu0  ;;  %v1379_v31 = vpop.f32.mrb[11].mxu1 }
 0x109   :  { %v1356_v32 = vadd.f32 %v1355_v30, %v1354_v27  ;;  %v829_v19 = vadd.f32 %v1353_v26, %v2332_v42 }
 0x10b   :  { %v832_v29 = vadd.f32 %v1356_v32, %v2332_v42 }
 0x10d   :  { %v1357_v33 = vpop.f32.mrb[12].mxu0 }
 0x10e   :  { %v1358_v34 = vpop.f32.mrb[13].mxu0 }
 0x10f   :  { %v2325_v35 = vadd.f32 %v1358_v34, %v1357_v33  ;;  %v1360_v36 = vpop.f32.mrb[14].mxu0 }
 0x110   :  { %v1361_v37 = vpop.f32.mrb[15].mxu0 }
 0x111   :  { %v2327_v38 = vadd.f32 %v1361_v37, %v1360_v36 }
 0x115   :  { %v1397_v39 = vpop.f32.mrb[12].mxu1  ;;  %v1455_v40 = vpop.f32.mrb[16].mxu0 }
 0x116   :  { %v1398_v43 = vpop.f32.mrb[13].mxu1  ;;  %v1456_v44 = vpop.f32.mrb[17].mxu0 }
 0x117   :  { %v1399_v46 = vadd.f32 %v1398_v43, %v1397_v39  ;;  %v1400_v47 = vpop.f32.mrb[14].mxu1  ;;  %v1457_v48 = vadd.f32 %v1456_v44, %v1455_v40  ;;  %v1458_v49 = vpop.f32.mrb[18].mxu0  ;;  %v837_v44 = vadd.f32 %v2325_v35, %v2332_v42 }
 0x118   :  { %v1401_v50 = vpop.f32.mrb[15].mxu1  ;;  %v1459_v51 = vpop.f32.mrb[19].mxu0 }
 0x119   :  { %v901_v53 = vadd.f32 %v1399_v46, %v813_v45  ;;  %v1402_v54 = vadd.f32 %v1401_v50, %v1400_v47  ;;  %v1460_v55 = vadd.f32 %v1459_v51, %v1458_v49  ;;  %v840_v50 = vadd.f32 %v2327_v38, %v2332_v42 }
 0x11b   :  { %v904_v56 = vadd.f32 %v1402_v54, %v816_v52  ;;  %v2336_v57 = vadd.f32 %v1457_v48, %v901_v53 }
 0x11d   :  { %v2338_v58 = vadd.f32 %v1460_v55, %v904_v56  ;;  %v1403_v59 = vpop.f32.mrb[16].mxu1  ;;  %v1461_v60 = vpop.f32.mrb[20].mxu0 }
 0x11e   :  { %v1404_v61 = vpop.f32.mrb[17].mxu1  ;;  %v1462_v62 = vpop.f32.mrb[21].mxu0 }
 0x11f   :  { %v1405_v0 = vadd.f32 %v1404_v61, %v1403_v59  ;;  %v1406_v1 = vpop.f32.mrb[18].mxu1  ;;  %v1463_v2 = vadd.f32 %v1462_v62, %v1461_v60  ;;  %v1464_v4 = vpop.f32.mrb[22].mxu0  ;;  %v845_v62 = vadd.f32 %v2315_v3, %v2332_v42 }
 0x120   :  { %v1407_v5 = vpop.f32.mrb[19].mxu1  ;;  %v1465_v6 = vpop.f32.mrb[23].mxu0 }
 0x121   :  { %v909_v8 = vadd.f32 %v1405_v0, %v821_v63  ;;  %v1408_v9 = vadd.f32 %v1407_v5, %v1406_v1  ;;  %v1466_v10 = vadd.f32 %v1465_v6, %v1464_v4  ;;  %v848_v5 = vadd.f32 %v2317_v41, %v2332_v42 }
 0x123   :  { %v912_v11 = vadd.f32 %v1408_v9, %v824_v7  ;;  %v2342_v12 = vadd.f32 %v1463_v2, %v909_v8 }
 0x125   :  { %v2344_v13 = vadd.f32 %v1466_v10, %v912_v11  ;;  %v1409_v15 = vpop.f32.mrb[20].mxu1  ;;  %v1467_v17 = vpop.f32.mrb[24].mxu0 }
 0x126   :  { %v1410_v18 = vpop.f32.mrb[21].mxu1  ;;  %v1468_v14 = vpop.f32.mrb[25].mxu0 }
 0x127   :  { %v1411_v22 = vadd.f32 %v1410_v18, %v1409_v15  ;;  %v1412_v23 = vpop.f32.mrb[22].mxu1  ;;  %v1469_v24 = vadd.f32 %v1468_v14, %v1467_v17  ;;  %v1470_v25 = vpop.f32.mrb[26].mxu0  ;;  %v853_v14 = vadd.f32 %v2319_v16, %v2332_v42 }
 0x128   :  { %v1413_v27 = vpop.f32.mrb[23].mxu1  ;;  %v1471_v20 = vpop.f32.mrb[27].mxu0 }
 0x129   :  { %v917_v30 = vadd.f32 %v1411_v22, %v829_v19  ;;  %v1414_v31 = vadd.f32 %v1413_v27, %v1412_v23  ;;  %v1472_v33 = vadd.f32 %v1471_v20, %v1470_v25  ;;  %v856_v27 = vadd.f32 %v2321_v21, %v2332_v42 }
 0x12b   :  { %v920_v34 = vadd.f32 %v1414_v31, %v832_v29  ;;  %v2348_v36 = vadd.f32 %v1469_v24, %v917_v30 }
 0x12d   :  { %v2350_v37 = vadd.f32 %v1472_v33, %v920_v34  ;;  %v1415_v39 = vpop.f32.mrb[24].mxu1  ;;  %v1473_v40 = vpop.f32.mrb[28].mxu0 }
 0x12e   :  { %v1416_v43 = vpop.f32.mrb[25].mxu1  ;;  %v1474_v26 = vpop.f32.mrb[29].mxu0 }
 0x12f   :  { %v1417_v45 = vadd.f32 %v1416_v43, %v1415_v39  ;;  %v1418_v46 = vpop.f32.mrb[26].mxu1  ;;  %v1475_v47 = vadd.f32 %v1474_v26, %v1473_v40  ;;  %v1476_v48 = vpop.f32.mrb[30].mxu0  ;;  %v861_v26 = vadd.f32 %v2323_v28, %v2332_v42 }
 0x130   :  { %v1419_v32 = vpop.f32.mrb[27].mxu1  ;;  %v1477_v49 = vpop.f32.mrb[31].mxu0 }
 0x131   :  { %v925_v51 = vadd.f32 %v1417_v45, %v837_v44  ;;  %v1420_v52 = vadd.f32 %v1419_v32, %v1418_v46  ;;  %v1478_v53 = vadd.f32 %v1477_v49, %v1476_v48 }
 0x133   :  { %v928_v54 = vadd.f32 %v1420_v52, %v840_v50  ;;  %v2356_v55 = vadd.f32 %v1475_v47, %v925_v51 }
 0x135   :  { %v2358_v56 = vadd.f32 %v1478_v53, %v928_v54  ;;  %v1421_v59 = vpop.f32.mrb[28].mxu1  ;;  %v1479_v60 = vpop.f32.mrb[32].mxu0 }
 0x136   :  { %v1422_v35 = vpop.f32.mrb[29].mxu1  ;;  %v1480_v61 = vpop.f32.mrb[33].mxu0 }
 0x137   :  { %v1423_v63 = vadd.f32 %v1422_v35, %v1421_v59  ;;  %v1424_v0 = vpop.f32.mrb[30].mxu1  ;;  %v1481_v1 = vadd.f32 %v1480_v61, %v1479_v60  ;;  %v1482_v2 = vpop.f32.mrb[34].mxu0 }
 0x138   :  { %v1425_v38 = vpop.f32.mrb[31].mxu1  ;;  %v1483_v4 = vpop.f32.mrb[35].mxu0 }
 0x139   :  { %v933_v6 = vadd.f32 %v1423_v63, %v845_v62  ;;  %v1426_v7 = vadd.f32 %v1425_v38, %v1424_v0  ;;  %v1484_v8 = vadd.f32 %v1483_v4, %v1482_v2 }
 0x13b   :  { %v936_v9 = vadd.f32 %v1426_v7, %v848_v5  ;;  %v2364_v10 = vadd.f32 %v1481_v1, %v933_v6 }
 0x13d   :  { %v2366_v11 = vadd.f32 %v1484_v8, %v936_v9  ;;  %v1427_v15 = vpop.f32.mrb[32].mxu1  ;;  %v1485_v17 = vpop.f32.mrb[36].mxu0 }
 0x13e   :  { %v1428_v3 = vpop.f32.mrb[33].mxu1  ;;  %v1486_v18 = vpop.f32.mrb[37].mxu0 }
 0x13f   :  { %v1429_v19 = vadd.f32 %v1428_v3, %v1427_v15  ;;  %v1430_v22 = vpop.f32.mrb[34].mxu1  ;;  %v1487_v23 = vadd.f32 %v1486_v18, %v1485_v17  ;;  %v1488_v24 = vpop.f32.mrb[38].mxu0 }
 0x140   :  { %v1431_v41 = vpop.f32.mrb[35].mxu1  ;;  %v1489_v25 = vpop.f32.mrb[39].mxu0 }
 0x141   :  { %v941_v20 = vadd.f32 %v1429_v19, %v853_v14  ;;  %v1432_v29 = vadd.f32 %v1431_v41, %v1430_v22  ;;  %v1490_v30 = vadd.f32 %v1489_v25, %v1488_v24 }
 0x143   :  { %v944_v31 = vadd.f32 %v1432_v29, %v856_v27  ;;  %v2372_v33 = vadd.f32 %v1487_v23, %v941_v20 }
 0x145   :  { %v2374_v34 = vadd.f32 %v1490_v30, %v944_v31  ;;  %v1433_v39 = vpop.f32.mrb[36].mxu1  ;;  %v1491_v40 = vpop.f32.mrb[40].mxu0 }
 0x146   :  { %v1434_v16 = vpop.f32.mrb[37].mxu1  ;;  %v1492_v43 = vpop.f32.mrb[41].mxu0 }
 0x147   :  { %v1435_v44 = vadd.f32 %v1434_v16, %v1433_v39  ;;  %v1436_v45 = vpop.f32.mrb[38].mxu1  ;;  %v1493_v46 = vadd.f32 %v1492_v43, %v1491_v40  ;;  %v1494_v47 = vpop.f32.mrb[42].mxu0 }
 0x148   :  { %v1437_v21 = vpop.f32.mrb[39].mxu1  ;;  %v1495_v48 = vpop.f32.mrb[43].mxu0 }
 0x149   :  { %v949_v32 = vadd.f32 %v1435_v44, %v861_v26 }
 0x14b   :  { %v2378_v49 = vadd.f32 %v1493_v46, %v949_v32 }
 0x14d   :  { %v1513_v50 = vpop.f32.mrb[40].mxu1  ;;  %v1164_v51 = vpop.f32.mrb[44].mxu0 }
 0x14e   :  { %v1514_v52 = vpop.f32.mrb[41].mxu1  ;;  %v1588_v53 = vpop.f32.mrb[45].mxu0 }
 0x14f   :  { %v1515_v54 = vadd.f32 %v1514_v52, %v1513_v50  ;;  %v1516_v59 = vpop.f32.mrb[42].mxu1  ;;  %v1167_v60 = vpop.f32.mrb[46].mxu0 }
 0x150   :  { %v1517_v35 = vpop.f32.mrb[43].mxu1  ;;  %v1589_v61 = vpop.f32.mrb[47].mxu0 }
 0x151   :  { %v1518_v62 = vadd.f32 %v1517_v35, %v1516_v59  ;;  %v1077_v28 = vadd.f32 %v1515_v54, %v2336_v57 }
 0x153   :  { %v1165_v42 = vadd.f32 %v1164_v51, %v1077_v28  ;;  %v1080_v63 = vadd.f32 %v1518_v62, %v2338_v58 }
 0x155   :  { %v1218_v0 = vmax.f32 %v1165_v42, 0.0  ;;  %v1168_v1 = vadd.f32 %v1167_v60, %v1080_v63  ;;  %v1519_v2 = vpop.f32.mrb[44].mxu1  ;;  %v1172_v38 = vpop.f32.mrb[48].mxu0 }
 0x156   :  { %v1520_v4 = vpop.f32.mrb[45].mxu1  ;;  %v1592_v5 = vpop.f32.mrb[49].mxu0 }
 0x157   :  { %1232 = vst.msk [vmem:[%s2447_s3] sm:$0xff] %vm1231_vm1, %v1218_v0  ;;  %v1219_v6 = vmax.f32 %v1168_v1, 0.0  ;;  %v1521_v7 = vadd.f32 %v1520_v4, %v1519_v2  ;;  %v1522_v8 = vpop.f32.mrb[46].mxu1  ;;  %v1175_v9 = vpop.f32.mrb[50].mxu0 }
 0x158   :  { %v1523_v57 = vpop.f32.mrb[47].mxu1  ;;  %v1593_v15 = vpop.f32.mrb[51].mxu0 }
 0x159   :  { %1233 = vst.msk [vmem:[%s2447_s3 + $0x8] sm:$0xff] %vm1231_vm1, %v1219_v6  ;;  %v1524_v58 = vadd.f32 %v1523_v57, %v1522_v8  ;;  %v1085_v17 = vadd.f32 %v1521_v7, %v2342_v12 }
 0x15b   :  { %v1173_v3 = vadd.f32 %v1172_v38, %v1085_v17  ;;  %v1088_v18 = vadd.f32 %v1524_v58, %v2344_v13 }
 0x15d   :  { %v1220_v14 = vmax.f32 %v1173_v3, 0.0  ;;  %v1176_v19 = vadd.f32 %v1175_v9, %v1088_v18  ;;  %v1525_v22 = vpop.f32.mrb[48].mxu1  ;;  %v1180_v23 = vpop.f32.mrb[52].mxu0 }
 0x15e   :  { %v1526_v24 = vpop.f32.mrb[49].mxu1  ;;  %v1596_v41 = vpop.f32.mrb[53].mxu0 }
 0x15f   :  { %1234 = vst.msk [vmem:[%s2447_s3 + $0x10] sm:$0xff] %vm1231_vm1, %v1220_v14  ;;  %v1221_v25 = vmax.f32 %v1176_v19, 0.0  ;;  %v1527_v27 = vadd.f32 %v1526_v24, %v1525_v22  ;;  %v1528_v20 = vpop.f32.mrb[50].mxu1  ;;  %v1183_v29 = vpop.f32.mrb[54].mxu0 }
 0x160   :  { %v1529_v30 = vpop.f32.mrb[51].mxu1  ;;  %v1597_v12 = vpop.f32.mrb[55].mxu0 }
 0x161   :  { %1235 = vst.msk [vmem:[%s2447_s3 + $0x18] sm:$0xff] %vm1231_vm1, %v1221_v25  ;;  %v1530_v13 = vadd.f32 %v1529_v30, %v1528_v20  ;;  %v1093_v31 = vadd.f32 %v1527_v27, %v2348_v36 }
 0x163   :  { %v1181_v39 = vadd.f32 %v1180_v23, %v1093_v31  ;;  %v1096_v40 = vadd.f32 %v1530_v13, %v2350_v37 }
 0x165   :  { %v1222_v16 = vmax.f32 %v1181_v39, 0.0  ;;  %v1184_v43 = vadd.f32 %v1183_v29, %v1096_v40  ;;  %v1531_v26 = vpop.f32.mrb[52].mxu1  ;;  %v1188_v44 = vpop.f32.mrb[56].mxu0 }
 0x166   :  { %v1532_v45 = vpop.f32.mrb[53].mxu1  ;;  %v1600_v46 = vpop.f32.mrb[57].mxu0 }
 0x167   :  { %1236 = vst.msk [vmem:[%s2447_s3 + $0x20] sm:$0xff] %vm1231_vm1, %v1222_v16  ;;  %v1223_v47 = vmax.f32 %v1184_v43, 0.0  ;;  %v1533_v21 = vadd.f32 %v1532_v45, %v1531_v26  ;;  %v1534_v48 = vpop.f32.mrb[54].mxu1  ;;  %v1191_v32 = vpop.f32.mrb[58].mxu0 }
 0x168   :  { %v1535_v50 = vpop.f32.mrb[55].mxu1  ;;  %v1601_v36 = vpop.f32.mrb[59].mxu0 }
 0x169   :  { %1237 = vst.msk [vmem:[%s2447_s3 + $0x28] sm:$0xff] %vm1231_vm1, %v1223_v47  ;;  %v1536_v37 = vadd.f32 %v1535_v50, %v1534_v48  ;;  %v1101_v51 = vadd.f32 %v1533_v21, %v2356_v55 }
 0x16b   :  { %v1189_v52 = vadd.f32 %v1188_v44, %v1101_v51  ;;  %v1104_v53 = vadd.f32 %v1536_v37, %v2358_v56 }
 0x16d   :  { %v1224_v54 = vmax.f32 %v1189_v52, 0.0  ;;  %v1192_v59 = vadd.f32 %v1191_v32, %v1104_v53  ;;  %v1537_v60 = vpop.f32.mrb[56].mxu1  ;;  %v1196_v35 = vpop.f32.mrb[60].mxu0 }
 0x16e   :  { %v1538_v61 = vpop.f32.mrb[57].mxu1  ;;  %v1604_v62 = vpop.f32.mrb[61].mxu0 }
 0x16f   :  { %1238 = vst.msk [vmem:[%s2447_s3 + $0x30] sm:$0xff] %vm1231_vm1, %v1224_v54  ;;  %v1225_v28 = vmax.f32 %v1192_v59, 0.0  ;;  %v1539_v42 = vadd.f32 %v1538_v61, %v1537_v60  ;;  %v1540_v63 = vpop.f32.mrb[58].mxu1  ;;  %v1199_v0 = vpop.f32.mrb[62].mxu0 }
 0x170   :  { %v1541_v1 = vpop.f32.mrb[59].mxu1  ;;  %v1605_v55 = vpop.f32.mrb[63].mxu0 }
 0x171   :  { %1239 = vst.msk [vmem:[%s2447_s3 + $0x38] sm:$0xff] %vm1231_vm1, %v1225_v28  ;;  %v1542_v56 = vadd.f32 %v1541_v1, %v1540_v63  ;;  %v1109_v2 = vadd.f32 %v1539_v42, %v2364_v10 }
 0x173   :  { %v1197_v38 = vadd.f32 %v1196_v35, %v1109_v2  ;;  %v1112_v4 = vadd.f32 %v1542_v56, %v2366_v11 }
 0x175   :  { %v1226_v5 = vmax.f32 %v1197_v38, 0.0  ;;  %v1200_v6 = vadd.f32 %v1199_v0, %v1112_v4  ;;  %v1543_v7 = vpop.f32.mrb[60].mxu1  ;;  %v1204_v8 = vpop.f32.mrb[64].mxu0 }
 0x176   :  { %v1544_v9 = vpop.f32.mrb[61].mxu1  ;;  %v1608_v57 = vpop.f32.mrb[65].mxu0 }
 0x177   :  { %1240 = vst.msk [vmem:[%s2447_s3 + $0x40] sm:$0xff] %vm1231_vm1, %v1226_v5  ;;  %v1227_v15 = vmax.f32 %v1200_v6, 0.0  ;;  %v1545_v58 = vadd.f32 %v1544_v9, %v1543_v7  ;;  %v1546_v17 = vpop.f32.mrb[62].mxu1  ;;  %v1207_v3 = vpop.f32.mrb[66].mxu0 }
 0x178   :  { %v1547_v18 = vpop.f32.mrb[63].mxu1  ;;  %v1609_v10 = vpop.f32.mrb[67].mxu0 }
 0x179   :  { %1241 = vst.msk [vmem:[%s2447_s3 + $0x48] sm:$0xff] %vm1231_vm1, %v1227_v15  ;;  %v1548_v11 = vadd.f32 %v1547_v18, %v1546_v17  ;;  %v1117_v14 = vadd.f32 %v1545_v58, %v2372_v33 }
 0x17b   :  { %v1205_v19 = vadd.f32 %v1204_v8, %v1117_v14  ;;  %v1120_v22 = vadd.f32 %v1548_v11, %v2374_v34 }
 0x17d   :  { %v1228_v23 = vmax.f32 %v1205_v19, 0.0  ;;  %v1208_v24 = vadd.f32 %v1207_v3, %v1120_v22  ;;  %v1549_v41 = vpop.f32.mrb[64].mxu1  ;;  %v1212_v25 = vpop.f32.mrb[68].mxu0 }
 0x17e   :  { %v1550_v27 = vpop.f32.mrb[65].mxu1  ;;  %v1612_v20 = vpop.f32.mrb[69].mxu0 }
 0x17f   :  { %1242 = vst.msk [vmem:[%s2447_s3 + $0x50] sm:$0xff] %vm1231_vm1, %v1228_v23  ;;  %v1229_v29 = vmax.f32 %v1208_v24, 0.0  ;;  %v1551_v30 = vadd.f32 %v1550_v27, %v1549_v41  ;;  %v1552_v12 = vpop.f32.mrb[66].mxu1  ;;  %v1215_v13 = vpop.f32.mrb[70].mxu0 }
 0x180   :  { %v1553_v31 = vpop.f32.mrb[67].mxu1  ;;  %v1613_v33 = vpop.f32.mrb[71].mxu0 }
 0x181   :  { %1243 = vst.msk [vmem:[%s2447_s3 + $0x58] sm:$0xff] %vm1231_vm1, %v1229_v29  ;;  %v1125_v34 = vadd.f32 %v1551_v30, %v2378_v49 }
 0x183   :  { %v1213_v39 = vadd.f32 %v1212_v25, %v1125_v34 }
 0x185   :  { %v1230_v40 = vmax.f32 %v1213_v39, 0.0 }
 0x187   :  { %1245 = vst.msk [vmem:[%s2447_s3 + $0x60] sm:$0x3] %vm1244_vm2, %v1230_v40 }

// kernel: dueling_dqn_forward.7
= control target key start
LH: loop header
LB: loop body
LE: loop exit
PB: predicated region body
PF: predicated region fallthrough
CT: control target
= control target key end

     0   :  { %s4106_s18 = smov 0   ;;  %s4721_s0 = inlined_call_operand.vmem [shape: f32[8,3200], index: 0, kind: input, shape index: {}]   ;;  %s4722_s1 = inlined_call_operand.vmem [shape: bf16[3200,1024], index: 1, kind: input, shape index: {}]   ;;  %s4723_s2 = inlined_call_operand.vmem [shape: f32[1,1024], index: 2, kind: input, shape index: {}]   ;;  %s4724_s3 = inlined_call_operand.vmem [shape: bf16[1024,128], index: 3, kind: input, shape index: {}]   ;;  %s4725_s4 = inlined_call_operand.vmem [shape: f32[1,128], index: 4, kind: input, shape index: {}]   ;;  %s4726_s5 = inlined_call_operand.vmem [shape: f32[8,128], index: 5, kind: output, shape index: {}]  }
   0x1 LB: > { %s4112_s19 = sadd.s32 4294967295, %s4072_s18   ;;  %p3510_p0 = scmp.ge.s32.totalorder %s4072_s18, 1  ;;  %s4072_s18 = sphi %s4106_s18, %s15_s18  }
   0x2   : > { %p195_p1 = scmp.lt.s32.totalorder %s4072_s18, 6 }
   0x4   : > { %p196_p2 = pnand %p3510_p0, %p195_p1 }
   0x5   : > { %s224_s20 = smul.u32 (!%p196_p2), 5, %s4112_s19  ;;  %p3514_p5 = scmp.ne.s32.totalorder (!%p196_p2), %s4112_s19, 0 }
   0x6   : > { %199 = sbr.rel (%p196_p2) target bundleno = 971 (0x3cb), region = 40 }
   0x7   : > { %s230_s21 = smul.u32 (!%p196_p2), 80, %s4112_s19  ;;  %p225_p3 = scmp.lt.s32.totalorder (!%p196_p2), %s224_s20, 24 }
   0x9   : > { %p231_p4 = scmp.lt.s32.totalorder (!%p196_p2), %s230_s21, 399 }
   0xd   : > { %s4728_s20 = smov (!%p225_p3, %s224_s20), 24  ;;  %s4730_s21 = smov (!%p231_p4, %s230_s21), 399 }
   0xe   : > { %s3511_s22 = sshll.u32 %s4728_s20, 3  ;;  %s3903_s26 = sshll.u32 %s4730_s21, 5  ;;  %v4074_v0 = vmov (!%p3514_p5), 0.0  }
   0xf   : > { %s4121_s25 = scalar_lea.vmem %s4721_s0, %s3511_s22  ;;  %s4126_s29 = scalar_lea.vmem %s4722_s1, %s3903_s26  ;;  %242 = vst [vmem:[#allocation2] sm:$0xff] (!%p3514_p5), %v4074_v0  ;;  %243 = vst [vmem:[#allocation2 + $0x8] sm:$0xff] (!%p3514_p5), %v4074_v0 }
  0x10   : > { %241 = sbr.rel (%p3514_p5) target bundleno = 23 (0x17), region = 44  ;;  %244 = vst [vmem:[#allocation2 + $0x10] sm:$0xff] (!%p3514_p5), %v4074_v0  ;;  %245 = vst [vmem:[#allocation2 + $0x18] sm:$0xff] (!%p3514_p5), %v4074_v0 }
  0x11   : > { %246 = vst [vmem:[#allocation2 + $0x20] sm:$0xff] (!%p3514_p5), %v4074_v0  ;;  %247 = vst [vmem:[#allocation2 + $0x28] sm:$0xff] (!%p3514_p5), %v4074_v0 }
  0x12   : > { %248 = vst [vmem:[#allocation2 + $0x30] sm:$0xff] (!%p3514_p5), %v4074_v0  ;;  %249 = vst [vmem:[#allocation2 + $0x38] sm:$0xff] (!%p3514_p5), %v4074_v0 }
  0x17 PF: > { %v268_v1 = vld [vmem:[%s4126_s29] sm:$0xff]  ;;  %v259_v54 = vld [vmem:[%s4121_s25 + $0x8] sm:$0xff]  ;;  %v261_v55 = vld [vmem:[%s4121_s25 + $0x18] sm:$0xff]  ;;  %p3835_p6 = scmp.ne.s32.totalorder %s4112_s19, 4 }
  0x18   : > { %v272_v2 = vld [vmem:[%s4126_s29 + $0x20] sm:$0xff]  ;;  %v4161_v59 = vpack.c.bf16 %v259_v54, %v259_v54  ;;  %v4163_v60 = vpack.c.bf16 %v261_v55, %v261_v55 }
  0x19   : > { %v396_v3 = vld [vmem:[%s4126_s29 + $0x400] sm:$0xff]  ;;  %v3516_v4 = vcombine.high %v268_v1, %v272_v2  ;;  %v3515_v6 = vcombine.low %v268_v1, %v272_v2 }
  0x1a   : > { %v400_v5 = vld [vmem:[%s4126_s29 + $0x420] sm:$0xff]  ;;  %2220 = vmatprep.mubr.bf16.mxu0 %v4161_v59  ;;  %2261 = vmatprep.mubr.bf16.mxu1 %v4163_v60 }
  0x1b   : > { %v276_v7 = vld [vmem:[%s4126_s29 + $0x40] sm:$0xff]  ;;  %v3644_v9 = vcombine.high %v396_v3, %v400_v5  ;;  %v3643_v10 = vcombine.low %v396_v3, %v400_v5  ;;  %2188 = vmatprep.subr.bf16.mxu0 %v3516_v4 }
  0x1c   : > { %v280_v8 = vld [vmem:[%s4126_s29 + $0x60] sm:$0xff]  ;;  %2189 = vmatpush1.bf16.msra.mxu0 %v3515_v6 }
  0x1d   : > { %v3524_v11 = vcombine.high %v276_v7, %v280_v8  ;;  %v404_v12 = vld [vmem:[%s4126_s29 + $0x440] sm:$0xff]  ;;  %2229 = vmatprep.subr.bf16.mxu1 %v3644_v9  ;;  %v3523_v19 = vcombine.low %v276_v7, %v280_v8 }
  0x1e   : > { %v408_v13 = vld [vmem:[%s4126_s29 + $0x460] sm:$0xff]  ;;  %2230 = vmatpush1.bf16.msra.mxu1 %v3643_v10 }
  0x1f   : > { %v284_v14 = vld [vmem:[%s4126_s29 + $0x80] sm:$0xff]  ;;  %v3652_v15 = vcombine.high %v404_v12, %v408_v13  ;;  %2190 = vmatprep.subr.bf16.mxu0 %v3524_v11  ;;  %v3651_v20 = vcombine.low %v404_v12, %v408_v13 }
  0x20   : > { %v288_v16 = vld [vmem:[%s4126_s29 + $0xa0] sm:$0xff]  ;;  %2191 = vmatpush1.bf16.msra.mxu0 %v3523_v19 }
  0x21   : > { %v412_v17 = vld [vmem:[%s4126_s29 + $0x480] sm:$0xff]  ;;  %v3532_v21 = vcombine.high %v284_v14, %v288_v16  ;;  %2231 = vmatprep.subr.bf16.mxu1 %v3652_v15  ;;  %v3531_v27 = vcombine.low %v284_v14, %v288_v16 }
  0x22   : > { %v416_v18 = vld [vmem:[%s4126_s29 + $0x4a0] sm:$0xff]  ;;  %2232 = vmatpush1.bf16.msra.mxu1 %v3651_v20 }
  0x23   : > { %v3660_v22 = vcombine.high %v412_v17, %v416_v18  ;;  %v292_v23 = vld [vmem:[%s4126_s29 + $0xc0] sm:$0xff]  ;;  %2192 = vmatprep.subr.bf16.mxu0 %v3532_v21  ;;  %v3659_v28 = vcombine.low %v412_v17, %v416_v18 }
  0x24   : > { %v296_v24 = vld [vmem:[%s4126_s29 + $0xe0] sm:$0xff]  ;;  %2193 = vmatpush1.bf16.msra.mxu0 %v3531_v27 }
  0x25   : > { %v420_v25 = vld [vmem:[%s4126_s29 + $0x4c0] sm:$0xff]  ;;  %v3540_v29 = vcombine.high %v292_v23, %v296_v24  ;;  %2233 = vmatprep.subr.bf16.mxu1 %v3660_v22  ;;  %v3539_v35 = vcombine.low %v292_v23, %v296_v24 }
  0x26   : > { %v424_v26 = vld [vmem:[%s4126_s29 + $0x4e0] sm:$0xff]  ;;  %2234 = vmatpush1.bf16.msra.mxu1 %v3659_v28 }
  0x27   : > { %v3668_v30 = vcombine.high %v420_v25, %v424_v26  ;;  %v300_v31 = vld [vmem:[%s4126_s29 + $0x100] sm:$0xff]  ;;  %2194 = vmatprep.subr.bf16.mxu0 %v3540_v29  ;;  %v3667_v36 = vcombine.low %v420_v25, %v424_v26 }
  0x28   : > { %v304_v32 = vld [vmem:[%s4126_s29 + $0x120] sm:$0xff]  ;;  %2195 = vmatpush1.bf16.msra.mxu0 %v3539_v35 }
  0x29   : > { %v428_v33 = vld [vmem:[%s4126_s29 + $0x500] sm:$0xff]  ;;  %v3548_v37 = vcombine.high %v300_v31, %v304_v32  ;;  %2235 = vmatprep.subr.bf16.mxu1 %v3668_v30  ;;  %v3547_v43 = vcombine.low %v300_v31, %v304_v32 }
  0x2a   : > { %v432_v34 = vld [vmem:[%s4126_s29 + $0x520] sm:$0xff]  ;;  %2236 = vmatpush1.bf16.msra.mxu1 %v3667_v36 }
  0x2b   : > { %v3676_v38 = vcombine.high %v428_v33, %v432_v34  ;;  %v308_v39 = vld [vmem:[%s4126_s29 + $0x140] sm:$0xff]  ;;  %2196 = vmatprep.subr.bf16.mxu0 %v3548_v37  ;;  %v3675_v44 = vcombine.low %v428_v33, %v432_v34 }
  0x2c   : > { %v312_v40 = vld [vmem:[%s4126_s29 + $0x160] sm:$0xff]  ;;  %2197 = vmatpush1.bf16.msra.mxu0 %v3547_v43 }
  0x2d   : > { %v436_v41 = vld [vmem:[%s4126_s29 + $0x540] sm:$0xff]  ;;  %v3556_v45 = vcombine.high %v308_v39, %v312_v40  ;;  %2237 = vmatprep.subr.bf16.mxu1 %v3676_v38  ;;  %v3555_v51 = vcombine.low %v308_v39, %v312_v40 }
  0x2e   : > { %v440_v42 = vld [vmem:[%s4126_s29 + $0x560] sm:$0xff]  ;;  %2238 = vmatpush1.bf16.msra.mxu1 %v3675_v44 }
  0x2f   : > { %v3684_v46 = vcombine.high %v436_v41, %v440_v42  ;;  %v316_v47 = vld [vmem:[%s4126_s29 + $0x180] sm:$0xff]  ;;  %2198 = vmatprep.subr.bf16.mxu0 %v3556_v45  ;;  %v3683_v52 = vcombine.low %v436_v41, %v440_v42 }
  0x30   : > { %v320_v48 = vld [vmem:[%s4126_s29 + $0x1a0] sm:$0xff]  ;;  %2199 = vmatpush1.bf16.msra.mxu0 %v3555_v51 }
  0x31   : > { %v444_v49 = vld [vmem:[%s4126_s29 + $0x580] sm:$0xff]  ;;  %v3564_v53 = vcombine.high %v316_v47, %v320_v48  ;;  %2239 = vmatprep.subr.bf16.mxu1 %v3684_v46  ;;  %v3563_v63 = vcombine.low %v316_v47, %v320_v48 }
  0x32   : > { %v448_v50 = vld [vmem:[%s4126_s29 + $0x5a0] sm:$0xff]  ;;  %2240 = vmatpush1.bf16.msra.mxu1 %v3683_v52 }
  0x33   : > { %v3692_v56 = vcombine.high %v444_v49, %v448_v50  ;;  %v324_v57 = vld [vmem:[%s4126_s29 + $0x1c0] sm:$0xff]  ;;  %2200 = vmatprep.subr.bf16.mxu0 %v3564_v53  ;;  %v3691_v0 = vcombine.low %v444_v49, %v448_v50 }
  0x34   : > { %v328_v58 = vld [vmem:[%s4126_s29 + $0x1e0] sm:$0xff]  ;;  %2201 = vmatpush1.bf16.msra.mxu0 %v3563_v63 }
  0x35   : > { %v452_v61 = vld [vmem:[%s4126_s29 + $0x5c0] sm:$0xff]  ;;  %v3572_v1 = vcombine.high %v324_v57, %v328_v58  ;;  %2241 = vmatprep.subr.bf16.mxu1 %v3692_v56  ;;  %v3571_v7 = vcombine.low %v324_v57, %v328_v58 }
  0x36   : > { %v456_v62 = vld [vmem:[%s4126_s29 + $0x5e0] sm:$0xff]  ;;  %2242 = vmatpush1.bf16.msra.mxu1 %v3691_v0 }
  0x37   : > { %v3700_v2 = vcombine.high %v452_v61, %v456_v62  ;;  %v332_v3 = vld [vmem:[%s4126_s29 + $0x200] sm:$0xff]  ;;  %2202 = vmatprep.subr.bf16.mxu0 %v3572_v1  ;;  %v3699_v8 = vcombine.low %v452_v61, %v456_v62 }
  0x38   : > { %v336_v4 = vld [vmem:[%s4126_s29 + $0x220] sm:$0xff]  ;;  %2203 = vmatpush1.bf16.msra.mxu0 %v3571_v7  ;;  %v269_v7 = vld [vmem:[%s4126_s29 + $0x8] sm:$0xff] }
  0x39   : > { %v460_v5 = vld [vmem:[%s4126_s29 + $0x600] sm:$0xff]  ;;  %v3580_v9 = vcombine.high %v332_v3, %v336_v4  ;;  %2243 = vmatprep.subr.bf16.mxu1 %v3700_v2  ;;  %v3579_v15 = vcombine.low %v332_v3, %v336_v4 }
  0x3a   : > { %v464_v6 = vld [vmem:[%s4126_s29 + $0x620] sm:$0xff]  ;;  %2244 = vmatpush1.bf16.msra.mxu1 %v3699_v8  ;;  %v273_v8 = vld [vmem:[%s4126_s29 + $0x28] sm:$0xff] }
  0x3b   : > { %v3708_v10 = vcombine.high %v460_v5, %v464_v6  ;;  %v340_v11 = vld [vmem:[%s4126_s29 + $0x240] sm:$0xff]  ;;  %2204 = vmatprep.subr.bf16.mxu0 %v3580_v9  ;;  %v3707_v16 = vcombine.low %v460_v5, %v464_v6 }
  0x3c   : > { %v344_v12 = vld [vmem:[%s4126_s29 + $0x260] sm:$0xff]  ;;  %2205 = vmatpush1.bf16.msra.mxu0 %v3579_v15 }
  0x3d   : > { %v468_v13 = vld [vmem:[%s4126_s29 + $0x640] sm:$0xff]  ;;  %v3588_v17 = vcombine.high %v340_v11, %v344_v12  ;;  %2245 = vmatprep.subr.bf16.mxu1 %v3708_v10  ;;  %v3587_v23 = vcombine.low %v340_v11, %v344_v12  ;;  %v260_v12 = vld [vmem:[%s4121_s25 + $0x10] sm:$0xff] }
  0x3e   : > { %v472_v14 = vld [vmem:[%s4126_s29 + $0x660] sm:$0xff]  ;;  %2246 = vmatpush1.bf16.msra.mxu1 %v3707_v16 }
  0x3f   : > { %v3716_v18 = vcombine.high %v468_v13, %v472_v14  ;;  %v348_v19 = vld [vmem:[%s4126_s29 + $0x280] sm:$0xff]  ;;  %2206 = vmatprep.subr.bf16.mxu0 %v3588_v17  ;;  %v3715_v24 = vcombine.low %v468_v13, %v472_v14  ;;  %v3518_v14 = vcombine.high %v269_v7, %v273_v8 }
  0x40   : > { %v352_v20 = vld [vmem:[%s4126_s29 + $0x2a0] sm:$0xff]  ;;  %2207 = vmatpush1.bf16.msra.mxu0 %v3587_v23 }
  0x41   : > { %v476_v21 = vld [vmem:[%s4126_s29 + $0x680] sm:$0xff]  ;;  %v3596_v25 = vcombine.high %v348_v19, %v352_v20  ;;  %2247 = vmatprep.subr.bf16.mxu1 %v3716_v18  ;;  %v3595_v31 = vcombine.low %v348_v19, %v352_v20  ;;  %v277_v18 = vld [vmem:[%s4126_s29 + $0x48] sm:$0xff]  ;;  %v4213_v20 = vpack.c.bf16 %v260_v12, %v260_v12 }
  0x42   : > { %v480_v22 = vld [vmem:[%s4126_s29 + $0x6a0] sm:$0xff]  ;;  %2248 = vmatpush1.bf16.msra.mxu1 %v3715_v24  ;;  %v281_v19 = vld [vmem:[%s4126_s29 + $0x68] sm:$0xff] }
  0x43   : > { %v3724_v26 = vcombine.high %v476_v21, %v480_v22  ;;  %v356_v27 = vld [vmem:[%s4126_s29 + $0x2c0] sm:$0xff]  ;;  %2208 = vmatprep.subr.bf16.mxu0 %v3596_v25  ;;  %v3723_v32 = vcombine.low %v476_v21, %v480_v22  ;;  %v3517_v22 = vcombine.low %v269_v7, %v273_v8  ;;  %v3526_v24 = vcombine.high %v277_v18, %v281_v19  ;;  %v329_v7 = vld [vmem:[%s4126_s29 + $0x1e8] sm:$0xff] }
  0x44   : > { %v360_v28 = vld [vmem:[%s4126_s29 + $0x2e0] sm:$0xff]  ;;  %2209 = vmatpush1.bf16.msra.mxu0 %v3595_v31  ;;  %v397_v12 = vld [vmem:[%s4126_s29 + $0x408] sm:$0xff] }
  0x45   : > { %v484_v29 = vld [vmem:[%s4126_s29 + $0x6c0] sm:$0xff]  ;;  %v3604_v33 = vcombine.high %v356_v27, %v360_v28  ;;  %2249 = vmatprep.subr.bf16.mxu1 %v3724_v26  ;;  %v3603_v39 = vcombine.low %v356_v27, %v360_v28  ;;  %v285_v27 = vld [vmem:[%s4126_s29 + $0x88] sm:$0xff] }
  0x46   : > { %v488_v30 = vld [vmem:[%s4126_s29 + $0x6e0] sm:$0xff]  ;;  %2250 = vmatpush1.bf16.msra.mxu1 %v3723_v32  ;;  %v289_v28 = vld [vmem:[%s4126_s29 + $0xa8] sm:$0xff] }
  0x47   : > { %v3732_v34 = vcombine.high %v484_v29, %v488_v30  ;;  %v364_v35 = vld [vmem:[%s4126_s29 + $0x300] sm:$0xff]  ;;  %2210 = vmatprep.subr.bf16.mxu0 %v3604_v33  ;;  %v3731_v40 = vcombine.low %v484_v29, %v488_v30  ;;  %v3525_v30 = vcombine.low %v277_v18, %v281_v19  ;;  %v3534_v32 = vcombine.high %v285_v27, %v289_v28 }
  0x48   : > { %v368_v36 = vld [vmem:[%s4126_s29 + $0x320] sm:$0xff]  ;;  %2211 = vmatpush1.bf16.msra.mxu0 %v3603_v39  ;;  %v3533_v39 = vcombine.low %v285_v27, %v289_v28  ;;  %v345_v27 = vld [vmem:[%s4126_s29 + $0x268] sm:$0xff] }
  0x49   : > { %v492_v37 = vld [vmem:[%s4126_s29 + $0x700] sm:$0xff]  ;;  %v3612_v41 = vcombine.high %v364_v35, %v368_v36  ;;  %2251 = vmatprep.subr.bf16.mxu1 %v3732_v34  ;;  %v3611_v47 = vcombine.low %v364_v35, %v368_v36  ;;  %v4075_v35 = vmov 0   ;;  %v293_v36 = vld [vmem:[%s4126_s29 + $0xc8] sm:$0xff] }
  0x4a   : > { %v496_v38 = vld [vmem:[%s4126_s29 + $0x720] sm:$0xff]  ;;  %2252 = vmatpush1.bf16.msra.mxu1 %v3731_v40 }
  0x4b   : > { %v3740_v42 = vcombine.high %v492_v37, %v496_v38  ;;  %v372_v43 = vld [vmem:[%s4126_s29 + $0x340] sm:$0xff]  ;;  %2212 = vmatprep.subr.bf16.mxu0 %v3612_v41  ;;  %v3739_v48 = vcombine.low %v492_v37, %v496_v38  ;;  %v297_v37 = vld [vmem:[%s4126_s29 + $0xe8] sm:$0xff] }
  0x4c   : > { %v376_v44 = vld [vmem:[%s4126_s29 + $0x360] sm:$0xff]  ;;  %2213 = vmatpush1.bf16.msra.mxu0 %v3611_v47  ;;  %v3542_v41 = vcombine.high %v293_v36, %v297_v37  ;;  %v3541_v47 = vcombine.low %v293_v36, %v297_v37  ;;  %v353_v36 = vld [vmem:[%s4126_s29 + $0x2a8] sm:$0xff] }
  0x4d   : > { %v500_v45 = vld [vmem:[%s4126_s29 + $0x740] sm:$0xff]  ;;  %v3620_v49 = vcombine.high %v372_v43, %v376_v44  ;;  %2253 = vmatprep.subr.bf16.mxu1 %v3740_v42  ;;  %v3619_v55 = vcombine.low %v372_v43, %v376_v44  ;;  %v301_v44 = vld [vmem:[%s4126_s29 + $0x108] sm:$0xff] }
  0x4e   : > { %v504_v46 = vld [vmem:[%s4126_s29 + $0x760] sm:$0xff]  ;;  %2254 = vmatpush1.bf16.msra.mxu1 %v3739_v48 }
  0x4f   : > { %v3748_v50 = vcombine.high %v500_v45, %v504_v46  ;;  %v380_v51 = vld [vmem:[%s4126_s29 + $0x380] sm:$0xff]  ;;  %2214 = vmatprep.subr.bf16.mxu0 %v3620_v49  ;;  %v3747_v56 = vcombine.low %v500_v45, %v504_v46  ;;  %v305_v45 = vld [vmem:[%s4126_s29 + $0x128] sm:$0xff] }
  0x50   : > { %v384_v52 = vld [vmem:[%s4126_s29 + $0x3a0] sm:$0xff]  ;;  %2215 = vmatpush1.bf16.msra.mxu0 %v3619_v55  ;;  %v3550_v49 = vcombine.high %v301_v44, %v305_v45  ;;  %v3549_v55 = vcombine.low %v301_v44, %v305_v45  ;;  %v361_v44 = vld [vmem:[%s4126_s29 + $0x2e8] sm:$0xff] }
  0x51   : > { %v508_v53 = vld [vmem:[%s4126_s29 + $0x780] sm:$0xff]  ;;  %v3628_v57 = vcombine.high %v380_v51, %v384_v52  ;;  %2255 = vmatprep.subr.bf16.mxu1 %v3748_v50  ;;  %v3627_v1 = vcombine.low %v380_v51, %v384_v52  ;;  %v309_v52 = vld [vmem:[%s4126_s29 + $0x148] sm:$0xff] }
  0x52   : > { %v512_v54 = vld [vmem:[%s4126_s29 + $0x7a0] sm:$0xff]  ;;  %2256 = vmatpush1.bf16.msra.mxu1 %v3747_v56 }
  0x53   : > { %v3756_v58 = vcombine.high %v508_v53, %v512_v54  ;;  %v388_v61 = vld [vmem:[%s4126_s29 + $0x3c0] sm:$0xff]  ;;  %2216 = vmatprep.subr.bf16.mxu0 %v3628_v57  ;;  %v3755_v2 = vcombine.low %v508_v53, %v512_v54  ;;  %v313_v53 = vld [vmem:[%s4126_s29 + $0x168] sm:$0xff] }
  0x54   : > { %v392_v62 = vld [vmem:[%s4126_s29 + $0x3e0] sm:$0xff]  ;;  %2217 = vmatpush1.bf16.msra.mxu0 %v3627_v1  ;;  %v3558_v57 = vcombine.high %v309_v52, %v313_v53  ;;  %v3557_v1 = vcombine.low %v309_v52, %v313_v53  ;;  %v369_v52 = vld [vmem:[%s4126_s29 + $0x328] sm:$0xff] }
  0x55   : > { %v516_v63 = vld [vmem:[%s4126_s29 + $0x7c0] sm:$0xff]  ;;  %v3636_v3 = vcombine.high %v388_v61, %v392_v62  ;;  %2257 = vmatprep.subr.bf16.mxu1 %v3756_v58  ;;  %v3635_v9 = vcombine.low %v388_v61, %v392_v62  ;;  %v317_v62 = vld [vmem:[%s4126_s29 + $0x188] sm:$0xff] }
  0x56   : > { %v520_v0 = vld [vmem:[%s4126_s29 + $0x7e0] sm:$0xff]  ;;  %2258 = vmatpush1.bf16.msra.mxu1 %v3755_v2 }
  0x57   : > { %v3764_v4 = vcombine.high %v516_v63, %v520_v0  ;;  %v524_v5 = vld [vmem:[%s4126_s29 + $0x800] sm:$0xff]  ;;  %2218 = vmatprep.subr.bf16.mxu0 %v3636_v3  ;;  %v3763_v11 = vcombine.low %v516_v63, %v520_v0  ;;  %v321_v63 = vld [vmem:[%s4126_s29 + $0x1a8] sm:$0xff] }
  0x58   : > { %v528_v6 = vld [vmem:[%s4126_s29 + $0x820] sm:$0xff]  ;;  %2219 = vmatpush1.bf16.msra.mxu0 %v3635_v9  ;;  %v3566_v3 = vcombine.high %v317_v62, %v321_v63  ;;  %v3565_v9 = vcombine.low %v317_v62, %v321_v63  ;;  %v377_v62 = vld [vmem:[%s4126_s29 + $0x368] sm:$0xff] }
  0x59   : > { %v258_v10 = vld [vmem:[%s4121_s25] sm:$0xff]  ;;  %v3772_v13 = vcombine.high %v524_v5, %v528_v6  ;;  %2259 = vmatprep.subr.bf16.mxu1 %v3764_v4  ;;  %v3771_v21 = vcombine.low %v524_v5, %v528_v6  ;;  %v325_v6 = vld [vmem:[%s4126_s29 + $0x1c8] sm:$0xff] }
  0x5a   : > { %v532_v15 = vld [vmem:[%s4126_s29 + $0x840] sm:$0xff]  ;;  %v4209_v17 = vpack.c.bf16 %v258_v10, %v258_v10  ;;  %2260 = vmatpush1.bf16.msra.mxu1 %v3763_v11  ;;  %v3574_v11 = vcombine.high %v325_v6, %v329_v7  ;;  %v3573_v19 = vcombine.low %v325_v6, %v329_v7  ;;  %v385_v6 = vld [vmem:[%s4126_s29 + $0x3a8] sm:$0xff] }
  0x5b   : > { %v536_v16 = vld [vmem:[%s4126_s29 + $0x860] sm:$0xff]  ;;  %2270 = vmatprep.subr.bf16.mxu0 %v3772_v13  ;;  %2311 = vmatprep.subr.bf16.mxu1 %v3518_v14  ;;  %v401_v13 = vld [vmem:[%s4126_s29 + $0x428] sm:$0xff] }
  0x5c   : > { %v3780_v23 = vcombine.high %v532_v15, %v536_v16  ;;  %v540_v25 = vld [vmem:[%s4126_s29 + $0x880] sm:$0xff]  ;;  %2221 = vmatmul.mubr.bf16.vlgmr.msra.gmra.mrb[0].mxu0 %v4209_v17  ;;  %v3779_v29 = vcombine.low %v532_v15, %v536_v16  ;;  %v333_v14 = vld [vmem:[%s4126_s29 + $0x208] sm:$0xff]  ;;  %v3645_v28 = vcombine.low %v397_v12, %v401_v13 }
  0x5d   : > { %v544_v26 = vld [vmem:[%s4126_s29 + $0x8a0] sm:$0xff]  ;;  %2262 = vmatmul.mubr.bf16.vlgmr.msra.gmra.mrb[0].mxu1 %v4213_v20  ;;  %2271 = vmatpush1.bf16.msra.mxu0 %v3771_v21  ;;  %v337_v15 = vld [vmem:[%s4126_s29 + $0x228] sm:$0xff]  ;;  %v3646_v21 = vcombine.high %v397_v12, %v401_v13 }
  0x5e   : > { %2312 = vmatpush1.bf16.msra.mxu1 %v3517_v22  ;;  %2272 = vmatprep.subr.bf16.mxu0 %v3780_v23  ;;  %v3788_v31 = vcombine.high %v540_v25, %v544_v26  ;;  %v548_v33 = vld [vmem:[%s4126_s29 + $0x8c0] sm:$0xff]  ;;  %v3787_v38 = vcombine.low %v540_v25, %v544_v26  ;;  %v3582_v22 = vcombine.high %v333_v14, %v337_v15  ;;  %v405_v23 = vld [vmem:[%s4126_s29 + $0x448] sm:$0xff] }
  0x5f   : > { %2313 = vmatprep.subr.bf16.mxu1 %v3526_v24  ;;  %v552_v34 = vld [vmem:[%s4126_s29 + $0x8e0] sm:$0xff]  ;;  %2302 = vmatprep.mubr.bf16.mxu0 %v4075_v35  ;;  %v409_v24 = vld [vmem:[%s4126_s29 + $0x468] sm:$0xff] }
  0x60   : > { %2343 = vmatprep.mubr.bf16.mxu1 %v4161_v59  ;;  %v3796_v40 = vcombine.high %v548_v33, %v552_v34  ;;  %v556_v42 = vld [vmem:[%s4126_s29 + $0x900] sm:$0xff]  ;;  %v3795_v46 = vcombine.low %v548_v33, %v552_v34  ;;  %v341_v26 = vld [vmem:[%s4126_s29 + $0x248] sm:$0xff]  ;;  %v3653_v37 = vcombine.low %v405_v23, %v409_v24 }
  0x61   : > { %2273 = vmatpush1.bf16.msra.mxu0 %v3779_v29  ;;  %v560_v43 = vld [vmem:[%s4126_s29 + $0x920] sm:$0xff]  ;;  %v3581_v29 = vcombine.low %v333_v14, %v337_v15  ;;  %v417_v33 = vld [vmem:[%s4126_s29 + $0x4a8] sm:$0xff] }
  0x62   : > { %2314 = vmatpush1.bf16.msra.mxu1 %v3525_v30  ;;  %2274 = vmatprep.subr.bf16.mxu0 %v3788_v31  ;;  %v3804_v48 = vcombine.high %v556_v42, %v560_v43  ;;  %v564_v50 = vld [vmem:[%s4126_s29 + $0x940] sm:$0xff]  ;;  %v3803_v54 = vcombine.low %v556_v42, %v560_v43  ;;  %v3654_v30 = vcombine.high %v405_v23, %v409_v24  ;;  %v349_v34 = vld [vmem:[%s4126_s29 + $0x288] sm:$0xff] }
  0x63   : > { %2315 = vmatprep.subr.bf16.mxu1 %v3534_v32  ;;  %v568_v51 = vld [vmem:[%s4126_s29 + $0x960] sm:$0xff]  ;;  %v3590_v31 = vcombine.high %v341_v26, %v345_v27  ;;  %v413_v32 = vld [vmem:[%s4126_s29 + $0x488] sm:$0xff] }
  0x64   : > { %v3812_v56 = vcombine.high %v564_v50, %v568_v51  ;;  %v572_v58 = vld [vmem:[%s4126_s29 + $0x980] sm:$0xff]  ;;  %v3811_v0 = vcombine.low %v564_v50, %v568_v51  ;;  %v425_v42 = vld [vmem:[%s4126_s29 + $0x4e8] sm:$0xff]  ;;  %v3661_v45 = vcombine.low %v413_v32, %v417_v33 }
  0x65   : > { %2275 = vmatpush1.bf16.msra.mxu0 %v3787_v38  ;;  %v576_v61 = vld [vmem:[%s4126_s29 + $0x9a0] sm:$0xff]  ;;  %v3589_v38 = vcombine.low %v341_v26, %v345_v27  ;;  %v357_v43 = vld [vmem:[%s4126_s29 + $0x2c8] sm:$0xff] }
  0x66   : > { %2316 = vmatpush1.bf16.msra.mxu1 %v3533_v39  ;;  %2276 = vmatprep.subr.bf16.mxu0 %v3796_v40  ;;  %v3820_v2 = vcombine.high %v572_v58, %v576_v61  ;;  %v580_v4 = vld [vmem:[%s4126_s29 + $0x9c0] sm:$0xff]  ;;  %v3819_v8 = vcombine.low %v572_v58, %v576_v61  ;;  %v3662_v39 = vcombine.high %v413_v32, %v417_v33  ;;  %v433_v50 = vld [vmem:[%s4126_s29 + $0x528] sm:$0xff] }
  0x67   : > { %2317 = vmatprep.subr.bf16.mxu1 %v3542_v41  ;;  %v584_v5 = vld [vmem:[%s4126_s29 + $0x9e0] sm:$0xff]  ;;  %v3598_v40 = vcombine.high %v349_v34, %v353_v36  ;;  %v421_v41 = vld [vmem:[%s4126_s29 + $0x4c8] sm:$0xff] }
  0x68   : > { %v3828_v10 = vcombine.high %v580_v4, %v584_v5  ;;  %v3827_v16 = vcombine.low %v580_v4, %v584_v5  ;;  %v262_v18 = vld [vmem:[%s4121_s25 + $0x20] sm:$0xff]  ;;  %v365_v51 = vld [vmem:[%s4126_s29 + $0x308] sm:$0xff]  ;;  %v3669_v53 = vcombine.low %v421_v41, %v425_v42 }
  0x69   : > { %2277 = vmatpush1.bf16.msra.mxu0 %v3795_v46  ;;  %v4250_v25 = vpack.c.bf16 %v262_v18, %v262_v18  ;;  %v3597_v46 = vcombine.low %v349_v34, %v353_v36  ;;  %v441_v58 = vld [vmem:[%s4126_s29 + $0x568] sm:$0xff] }
  0x6a   : > { %2318 = vmatpush1.bf16.msra.mxu1 %v3541_v47  ;;  %2278 = vmatprep.subr.bf16.mxu0 %v3804_v48  ;;  %v3670_v47 = vcombine.high %v421_v41, %v425_v42  ;;  %v3606_v48 = vcombine.high %v357_v43, %v361_v44  ;;  %v373_v61 = vld [vmem:[%s4126_s29 + $0x348] sm:$0xff] }
  0x6b   : > { %2319 = vmatprep.subr.bf16.mxu1 %v3550_v49  ;;  %v429_v49 = vld [vmem:[%s4126_s29 + $0x508] sm:$0xff] }
  0x6c   : > { %v3677_v63 = vcombine.low %v429_v49, %v433_v50  ;;  %v449_v4 = vld [vmem:[%s4126_s29 + $0x5a8] sm:$0xff] }
  0x6d   : > { %2279 = vmatpush1.bf16.msra.mxu0 %v3803_v54  ;;  %v3605_v54 = vcombine.low %v357_v43, %v361_v44  ;;  %v381_v5 = vld [vmem:[%s4126_s29 + $0x388] sm:$0xff] }
  0x6e   : > { %2320 = vmatpush1.bf16.msra.mxu1 %v3549_v55  ;;  %2280 = vmatprep.subr.bf16.mxu0 %v3812_v56  ;;  %v3678_v55 = vcombine.high %v429_v49, %v433_v50  ;;  %v3614_v56 = vcombine.high %v365_v51, %v369_v52  ;;  %v457_v12 = vld [vmem:[%s4126_s29 + $0x5e8] sm:$0xff] }
  0x6f   : > { %2321 = vmatprep.subr.bf16.mxu1 %v3558_v57  ;;  %v437_v57 = vld [vmem:[%s4126_s29 + $0x548] sm:$0xff] }
  0x70   : > { %v3685_v7 = vcombine.low %v437_v57, %v441_v58  ;;  %v389_v13 = vld [vmem:[%s4126_s29 + $0x3c8] sm:$0xff] }
  0x71   : > { %2281 = vmatpush1.bf16.msra.mxu0 %v3811_v0  ;;  %v3613_v0 = vcombine.low %v365_v51, %v369_v52  ;;  %v393_v14 = vld [vmem:[%s4126_s29 + $0x3e8] sm:$0xff] }
  0x72   : > { %2322 = vmatpush1.bf16.msra.mxu1 %v3557_v1  ;;  %2282 = vmatprep.subr.bf16.mxu0 %v3820_v2  ;;  %v3686_v1 = vcombine.high %v437_v57, %v441_v58  ;;  %v3622_v2 = vcombine.high %v373_v61, %v377_v62  ;;  %v525_v23 = vld [vmem:[%s4126_s29 + $0x808] sm:$0xff]  ;;  %v3637_v27 = vcombine.low %v389_v13, %v393_v14 }
  0x73   : > { %2323 = vmatprep.subr.bf16.mxu1 %v3566_v3  ;;  %v445_v3 = vld [vmem:[%s4126_s29 + $0x588] sm:$0xff] }
  0x74   : > { %v3693_v15 = vcombine.low %v445_v3, %v449_v4  ;;  %v529_v24 = vld [vmem:[%s4126_s29 + $0x828] sm:$0xff] }
  0x75   : > { %2283 = vmatpush1.bf16.msra.mxu0 %v3819_v8  ;;  %v3621_v8 = vcombine.low %v373_v61, %v377_v62  ;;  %v533_v32 = vld [vmem:[%s4126_s29 + $0x848] sm:$0xff]  ;;  %v3773_v36 = vcombine.low %v525_v23, %v529_v24 }
  0x76   : > { %2324 = vmatpush1.bf16.msra.mxu1 %v3565_v9  ;;  %2284 = vmatprep.subr.bf16.mxu0 %v3828_v10  ;;  %v3694_v9 = vcombine.high %v445_v3, %v449_v4  ;;  %v3630_v10 = vcombine.high %v381_v5, %v385_v6  ;;  %v537_v33 = vld [vmem:[%s4126_s29 + $0x868] sm:$0xff] }
  0x77   : > { %2325 = vmatprep.subr.bf16.mxu1 %v3574_v11  ;;  %v453_v11 = vld [vmem:[%s4126_s29 + $0x5c8] sm:$0xff]  ;;  %v3781_v44 = vcombine.low %v533_v32, %v537_v33 }
  0x78   : > { %v3702_v18 = vcombine.high %v453_v11, %v457_v12  ;;  %v3701_v26 = vcombine.low %v453_v11, %v457_v12  ;;  %v541_v41 = vld [vmem:[%s4126_s29 + $0x888] sm:$0xff] }
  0x79   : > { %2285 = vmatpush1.bf16.msra.mxu0 %v3827_v16  ;;  %v3629_v16 = vcombine.low %v381_v5, %v385_v6  ;;  %v545_v42 = vld [vmem:[%s4126_s29 + $0x8a8] sm:$0xff] }
  0x7a   : > { %2326 = vmatpush1.bf16.msra.mxu1 %v3573_v19  ;;  %2352 = vmatprep.subr.bf16.mxu0 %v3646_v21  ;;  %v3638_v19 = vcombine.high %v389_v13, %v393_v14  ;;  %v461_v21 = vld [vmem:[%s4126_s29 + $0x608] sm:$0xff]  ;;  %v3789_v52 = vcombine.low %v541_v41, %v545_v42 }
  0x7b   : > { %2327 = vmatprep.subr.bf16.mxu1 %v3582_v22  ;;  %v465_v22 = vld [vmem:[%s4126_s29 + $0x628] sm:$0xff] }
  0x7c   : > { %2303 = vmatmul.mubr.bf16.vlgmr.msra.gmra.mrb[4].mxu0 %v4250_v25  ;;  %v3709_v34 = vcombine.low %v461_v21, %v465_v22  ;;  %v549_v49 = vld [vmem:[%s4126_s29 + $0x8c8] sm:$0xff] }
  0x7d   : > { %2353 = vmatpush1.bf16.msra.mxu0 %v3645_v28  ;;  %2384 = vmatprep.mubr.bf16.mxu0 %v4163_v60  ;;  %v3710_v28 = vcombine.high %v461_v21, %v465_v22  ;;  %v553_v50 = vld [vmem:[%s4126_s29 + $0x8e8] sm:$0xff] }
  0x7e   : > { %2328 = vmatpush1.bf16.msra.mxu1 %v3581_v29  ;;  %2354 = vmatprep.subr.bf16.mxu0 %v3654_v30  ;;  %v3774_v29 = vcombine.high %v525_v23, %v529_v24  ;;  %v469_v30 = vld [vmem:[%s4126_s29 + $0x648] sm:$0xff]  ;;  %v3797_v62 = vcombine.low %v549_v49, %v553_v50 }
  0x7f   : > { %2329 = vmatprep.subr.bf16.mxu1 %v3590_v31  ;;  %v473_v31 = vld [vmem:[%s4126_s29 + $0x668] sm:$0xff] }
  0x80   : > { %v3717_v43 = vcombine.low %v469_v30, %v473_v31  ;;  %v557_v57 = vld [vmem:[%s4126_s29 + $0x908] sm:$0xff] }
  0x81   : > { %2355 = vmatpush1.bf16.msra.mxu0 %v3653_v37  ;;  %v3718_v37 = vcombine.high %v469_v30, %v473_v31  ;;  %v561_v58 = vld [vmem:[%s4126_s29 + $0x928] sm:$0xff]  ;;  %v398_v30 = vld [vmem:[%s4126_s29 + $0x410] sm:$0xff] }
  0x82   : > { %2330 = vmatpush1.bf16.msra.mxu1 %v3589_v38  ;;  %2356 = vmatprep.subr.bf16.mxu0 %v3662_v39  ;;  %v3782_v38 = vcombine.high %v533_v32, %v537_v33  ;;  %v477_v39 = vld [vmem:[%s4126_s29 + $0x688] sm:$0xff]  ;;  %v3805_v6 = vcombine.low %v557_v57, %v561_v58  ;;  %v402_v31 = vld [vmem:[%s4126_s29 + $0x430] sm:$0xff] }
  0x83   : > { %2331 = vmatprep.subr.bf16.mxu1 %v3598_v40  ;;  %v481_v40 = vld [vmem:[%s4126_s29 + $0x6a8] sm:$0xff] }
  0x84   : > { %v3725_v51 = vcombine.low %v477_v39, %v481_v40  ;;  %v565_v3 = vld [vmem:[%s4126_s29 + $0x948] sm:$0xff] }
  0x85   : > { %2357 = vmatpush1.bf16.msra.mxu0 %v3661_v45  ;;  %v3726_v45 = vcombine.high %v477_v39, %v481_v40  ;;  %v569_v4 = vld [vmem:[%s4126_s29 + $0x968] sm:$0xff]  ;;  %v406_v39 = vld [vmem:[%s4126_s29 + $0x450] sm:$0xff] }
  0x86   : > { %2332 = vmatpush1.bf16.msra.mxu1 %v3597_v46  ;;  %2358 = vmatprep.subr.bf16.mxu0 %v3670_v47  ;;  %v3790_v46 = vcombine.high %v541_v41, %v545_v42  ;;  %v485_v47 = vld [vmem:[%s4126_s29 + $0x6c8] sm:$0xff]  ;;  %v3813_v14 = vcombine.low %v565_v3, %v569_v4  ;;  %v410_v40 = vld [vmem:[%s4126_s29 + $0x470] sm:$0xff]  ;;  %v3647_v42 = vcombine.low %v398_v30, %v402_v31 }
  0x87   : > { %2333 = vmatprep.subr.bf16.mxu1 %v3606_v48  ;;  %v489_v48 = vld [vmem:[%s4126_s29 + $0x6e8] sm:$0xff] }
  0x88   : > { %v3733_v61 = vcombine.low %v485_v47, %v489_v48  ;;  %v573_v11 = vld [vmem:[%s4126_s29 + $0x988] sm:$0xff] }
  0x89   : > { %2359 = vmatpush1.bf16.msra.mxu0 %v3669_v53  ;;  %v3734_v53 = vcombine.high %v485_v47, %v489_v48  ;;  %v577_v12 = vld [vmem:[%s4126_s29 + $0x9a8] sm:$0xff]  ;;  %v414_v47 = vld [vmem:[%s4126_s29 + $0x490] sm:$0xff] }
  0x8a   : > { %2334 = vmatpush1.bf16.msra.mxu1 %v3605_v54  ;;  %2360 = vmatprep.subr.bf16.mxu0 %v3678_v55  ;;  %v3798_v54 = vcombine.high %v549_v49, %v553_v50  ;;  %v493_v55 = vld [vmem:[%s4126_s29 + $0x708] sm:$0xff]  ;;  %v3821_v24 = vcombine.low %v573_v11, %v577_v12  ;;  %v418_v48 = vld [vmem:[%s4126_s29 + $0x4b0] sm:$0xff]  ;;  %v3655_v50 = vcombine.low %v406_v39, %v410_v40 }
  0x8b   : > { %2335 = vmatprep.subr.bf16.mxu1 %v3614_v56  ;;  %v497_v56 = vld [vmem:[%s4126_s29 + $0x728] sm:$0xff] }
  0x8c   : > { %v3741_v5 = vcombine.low %v493_v55, %v497_v56  ;;  %v581_v21 = vld [vmem:[%s4126_s29 + $0x9c8] sm:$0xff] }
  0x8d   : > { %2361 = vmatpush1.bf16.msra.mxu0 %v3677_v63  ;;  %v3742_v63 = vcombine.high %v493_v55, %v497_v56  ;;  %v585_v22 = vld [vmem:[%s4126_s29 + $0x9e8] sm:$0xff]  ;;  %v422_v55 = vld [vmem:[%s4126_s29 + $0x4d0] sm:$0xff] }
  0x8e   : > { %2336 = vmatpush1.bf16.msra.mxu1 %v3613_v0  ;;  %2362 = vmatprep.subr.bf16.mxu0 %v3686_v1  ;;  %v3806_v0 = vcombine.high %v557_v57, %v561_v58  ;;  %v501_v1 = vld [vmem:[%s4126_s29 + $0x748] sm:$0xff]  ;;  %v3829_v33 = vcombine.low %v581_v21, %v585_v22  ;;  %v426_v56 = vld [vmem:[%s4126_s29 + $0x4f0] sm:$0xff]  ;;  %v3663_v58 = vcombine.low %v414_v47, %v418_v48 }
  0x8f   : > { %2337 = vmatprep.subr.bf16.mxu1 %v3622_v2  ;;  %v505_v2 = vld [vmem:[%s4126_s29 + $0x768] sm:$0xff] }
  0x90   : > { %v3749_v13 = vcombine.low %v501_v1, %v505_v2 }
  0x91   : > { %2363 = vmatpush1.bf16.msra.mxu0 %v3685_v7  ;;  %v3750_v7 = vcombine.high %v501_v1, %v505_v2  ;;  %v430_v1 = vld [vmem:[%s4126_s29 + $0x510] sm:$0xff] }
  0x92   : > { %2338 = vmatpush1.bf16.msra.mxu1 %v3621_v8  ;;  %2364 = vmatprep.subr.bf16.mxu0 %v3694_v9  ;;  %v3814_v8 = vcombine.high %v565_v3, %v569_v4  ;;  %v509_v9 = vld [vmem:[%s4126_s29 + $0x788] sm:$0xff]  ;;  %v434_v2 = vld [vmem:[%s4126_s29 + $0x530] sm:$0xff]  ;;  %v3671_v4 = vcombine.low %v422_v55, %v426_v56 }
  0x93   : > { %2339 = vmatprep.subr.bf16.mxu1 %v3630_v10  ;;  %v513_v10 = vld [vmem:[%s4126_s29 + $0x7a8] sm:$0xff] }
  0x94   : > { %v3757_v23 = vcombine.low %v509_v9, %v513_v10 }
  0x95   : > { %2365 = vmatpush1.bf16.msra.mxu0 %v3693_v15  ;;  %v3758_v15 = vcombine.high %v509_v9, %v513_v10  ;;  %v438_v9 = vld [vmem:[%s4126_s29 + $0x550] sm:$0xff] }
  0x96   : > { %2340 = vmatpush1.bf16.msra.mxu1 %v3629_v16  ;;  %2366 = vmatprep.subr.bf16.mxu0 %v3702_v18  ;;  %v3822_v16 = vcombine.high %v573_v11, %v577_v12  ;;  %v517_v18 = vld [vmem:[%s4126_s29 + $0x7c8] sm:$0xff]  ;;  %v442_v10 = vld [vmem:[%s4126_s29 + $0x570] sm:$0xff]  ;;  %v3679_v12 = vcombine.low %v430_v1, %v434_v2 }
  0x97   : > { %2341 = vmatprep.subr.bf16.mxu1 %v3638_v19  ;;  %v521_v19 = vld [vmem:[%s4126_s29 + $0x7e8] sm:$0xff] }
  0x98   : > { %v3765_v32 = vcombine.low %v517_v18, %v521_v19 }
  0x99   : > { %2367 = vmatpush1.bf16.msra.mxu0 %v3701_v26  ;;  %v3766_v26 = vcombine.high %v517_v18, %v521_v19  ;;  %v446_v18 = vld [vmem:[%s4126_s29 + $0x590] sm:$0xff] }
  0x9a   : > { %2342 = vmatpush1.bf16.msra.mxu1 %v3637_v27  ;;  %2368 = vmatprep.subr.bf16.mxu0 %v3710_v28  ;;  %v3830_v27 = vcombine.high %v581_v21, %v585_v22  ;;  %v270_v28 = vld [vmem:[%s4126_s29 + $0x10] sm:$0xff]  ;;  %v3687_v22 = vcombine.low %v438_v9, %v442_v10 }
  0x9b   : > { %2393 = vmatprep.subr.bf16.mxu1 %v3774_v29  ;;  %v274_v29 = vld [vmem:[%s4126_s29 + $0x30] sm:$0xff] }
  0x9c   : > { %v3519_v41 = vcombine.low %v270_v28, %v274_v29  ;;  %v450_v19 = vld [vmem:[%s4126_s29 + $0x5b0] sm:$0xff] }
  0x9d   : > { %2344 = vmatmul.mubr.bf16.vlgmr.msra.gmra.mrb[4].mxu1 %v4209_v17  ;;  %2369 = vmatpush1.bf16.msra.mxu0 %v3709_v34  ;;  %v3520_v34 = vcombine.high %v270_v28, %v274_v29  ;;  %v454_v28 = vld [vmem:[%s4126_s29 + $0x5d0] sm:$0xff] }
  0x9e   : > { %2394 = vmatpush1.bf16.msra.mxu1 %v3773_v36  ;;  %2370 = vmatprep.subr.bf16.mxu0 %v3718_v37  ;;  %v3648_v36 = vcombine.high %v398_v30, %v402_v31  ;;  %v278_v37 = vld [vmem:[%s4126_s29 + $0x50] sm:$0xff]  ;;  %v3695_v31 = vcombine.low %v446_v18, %v450_v19 }
  0x9f   : > { %2395 = vmatprep.subr.bf16.mxu1 %v3782_v38  ;;  %2425 = vmatprep.mubr.bf16.mxu1 %v4075_v35  ;;  %v282_v38 = vld [vmem:[%s4126_s29 + $0x70] sm:$0xff] }
  0xa0   : > { %v3527_v49 = vcombine.low %v278_v37, %v282_v38  ;;  %v458_v29 = vld [vmem:[%s4126_s29 + $0x5f0] sm:$0xff] }
  0xa1   : > { %2371 = vmatpush1.bf16.msra.mxu0 %v3717_v43  ;;  %v3528_v43 = vcombine.high %v278_v37, %v282_v38  ;;  %v462_v37 = vld [vmem:[%s4126_s29 + $0x610] sm:$0xff] }
  0xa2   : > { %2396 = vmatpush1.bf16.msra.mxu1 %v3781_v44  ;;  %2372 = vmatprep.subr.bf16.mxu0 %v3726_v45  ;;  %v3656_v44 = vcombine.high %v406_v39, %v410_v40  ;;  %v286_v45 = vld [vmem:[%s4126_s29 + $0x90] sm:$0xff]  ;;  %v3703_v40 = vcombine.low %v454_v28, %v458_v29 }
  0xa3   : > { %2397 = vmatprep.subr.bf16.mxu1 %v3790_v46  ;;  %v290_v46 = vld [vmem:[%s4126_s29 + $0xb0] sm:$0xff] }
  0xa4   : > { %v3535_v57 = vcombine.low %v286_v45, %v290_v46  ;;  %v466_v38 = vld [vmem:[%s4126_s29 + $0x630] sm:$0xff] }
  0xa5   : > { %2373 = vmatpush1.bf16.msra.mxu0 %v3725_v51  ;;  %v3536_v51 = vcombine.high %v286_v45, %v290_v46  ;;  %v470_v45 = vld [vmem:[%s4126_s29 + $0x650] sm:$0xff] }
  0xa6   : > { %2398 = vmatpush1.bf16.msra.mxu1 %v3789_v52  ;;  %2374 = vmatprep.subr.bf16.mxu0 %v3734_v53  ;;  %v3664_v52 = vcombine.high %v414_v47, %v418_v48  ;;  %v294_v53 = vld [vmem:[%s4126_s29 + $0xd0] sm:$0xff]  ;;  %v3711_v48 = vcombine.low %v462_v37, %v466_v38 }
  0xa7   : > { %2399 = vmatprep.subr.bf16.mxu1 %v3798_v54  ;;  %v298_v54 = vld [vmem:[%s4126_s29 + $0xf0] sm:$0xff] }
  0xa8   : > { %v3543_v3 = vcombine.low %v294_v53, %v298_v54  ;;  %v474_v46 = vld [vmem:[%s4126_s29 + $0x670] sm:$0xff] }
  0xa9   : > { %2375 = vmatpush1.bf16.msra.mxu0 %v3733_v61  ;;  %v3544_v61 = vcombine.high %v294_v53, %v298_v54  ;;  %v478_v53 = vld [vmem:[%s4126_s29 + $0x690] sm:$0xff] }
  0xaa   : > { %2400 = vmatpush1.bf16.msra.mxu1 %v3797_v62  ;;  %2376 = vmatprep.subr.bf16.mxu0 %v3742_v63  ;;  %v3672_v62 = vcombine.high %v422_v55, %v426_v56  ;;  %v302_v63 = vld [vmem:[%s4126_s29 + $0x110] sm:$0xff]  ;;  %v3719_v56 = vcombine.low %v470_v45, %v474_v46 }
  0xab   : > { %2401 = vmatprep.subr.bf16.mxu1 %v3806_v0  ;;  %v306_v0 = vld [vmem:[%s4126_s29 + $0x130] sm:$0xff] }
  0xac   : > { %v3551_v11 = vcombine.low %v302_v63, %v306_v0  ;;  %v482_v54 = vld [vmem:[%s4126_s29 + $0x6b0] sm:$0xff] }
  0xad   : > { %2377 = vmatpush1.bf16.msra.mxu0 %v3741_v5  ;;  %v3552_v5 = vcombine.high %v302_v63, %v306_v0  ;;  %v486_v63 = vld [vmem:[%s4126_s29 + $0x6d0] sm:$0xff] }
  0xae   : > { %2402 = vmatpush1.bf16.msra.mxu1 %v3805_v6  ;;  %2378 = vmatprep.subr.bf16.mxu0 %v3750_v7  ;;  %v3680_v6 = vcombine.high %v430_v1, %v434_v2  ;;  %v310_v7 = vld [vmem:[%s4126_s29 + $0x150] sm:$0xff]  ;;  %v3727_v2 = vcombine.low %v478_v53, %v482_v54 }
  0xaf   : > { %2403 = vmatprep.subr.bf16.mxu1 %v3814_v8  ;;  %v314_v8 = vld [vmem:[%s4126_s29 + $0x170] sm:$0xff] }
  0xb0   : > { %v3559_v21 = vcombine.low %v310_v7, %v314_v8  ;;  %v490_v0 = vld [vmem:[%s4126_s29 + $0x6f0] sm:$0xff] }
  0xb1   : > { %2379 = vmatpush1.bf16.msra.mxu0 %v3749_v13  ;;  %v3560_v13 = vcombine.high %v310_v7, %v314_v8  ;;  %v494_v7 = vld [vmem:[%s4126_s29 + $0x710] sm:$0xff] }
  0xb2   : > { %2404 = vmatpush1.bf16.msra.mxu1 %v3813_v14  ;;  %2380 = vmatprep.subr.bf16.mxu0 %v3758_v15  ;;  %v3688_v14 = vcombine.high %v438_v9, %v442_v10  ;;  %v318_v15 = vld [vmem:[%s4126_s29 + $0x190] sm:$0xff]  ;;  %v3735_v10 = vcombine.low %v486_v63, %v490_v0 }
  0xb3   : > { %2405 = vmatprep.subr.bf16.mxu1 %v3822_v16  ;;  %v322_v16 = vld [vmem:[%s4126_s29 + $0x1b0] sm:$0xff] }
  0xb4   : > { %v3567_v30 = vcombine.low %v318_v15, %v322_v16  ;;  %v498_v8 = vld [vmem:[%s4126_s29 + $0x730] sm:$0xff] }
  0xb5   : > { %2381 = vmatpush1.bf16.msra.mxu0 %v3757_v23  ;;  %v3568_v23 = vcombine.high %v318_v15, %v322_v16  ;;  %v502_v15 = vld [vmem:[%s4126_s29 + $0x750] sm:$0xff] }
  0xb6   : > { %2406 = vmatpush1.bf16.msra.mxu1 %v3821_v24  ;;  %2382 = vmatprep.subr.bf16.mxu0 %v3766_v26  ;;  %v3696_v24 = vcombine.high %v446_v18, %v450_v19  ;;  %v326_v26 = vld [vmem:[%s4126_s29 + $0x1d0] sm:$0xff]  ;;  %v3743_v19 = vcombine.low %v494_v7, %v498_v8 }
  0xb7   : > { %2407 = vmatprep.subr.bf16.mxu1 %v3830_v27  ;;  %v330_v27 = vld [vmem:[%s4126_s29 + $0x1f0] sm:$0xff] }
  0xb8   : > { %v3575_v39 = vcombine.low %v326_v26, %v330_v27  ;;  %v506_v16 = vld [vmem:[%s4126_s29 + $0x770] sm:$0xff] }
  0xb9   : > { %2383 = vmatpush1.bf16.msra.mxu0 %v3765_v32  ;;  %v3576_v32 = vcombine.high %v326_v26, %v330_v27  ;;  %v510_v26 = vld [vmem:[%s4126_s29 + $0x790] sm:$0xff] }
  0xba   : > { %2408 = vmatpush1.bf16.msra.mxu1 %v3829_v33  ;;  %2434 = vmatprep.subr.bf16.mxu0 %v3520_v34  ;;  %v3704_v33 = vcombine.high %v454_v28, %v458_v29  ;;  %v334_v34 = vld [vmem:[%s4126_s29 + $0x210] sm:$0xff]  ;;  %v3751_v29 = vcombine.low %v502_v15, %v506_v16 }
  0xbb   : > { %2475 = vmatprep.subr.bf16.mxu1 %v3648_v36  ;;  %v338_v36 = vld [vmem:[%s4126_s29 + $0x230] sm:$0xff] }
  0xbc   : > { %2385 = vmatmul.mubr.bf16.vlgmr.msra.gmra.mrb[8].mxu0 %v4213_v20  ;;  %v3583_v47 = vcombine.low %v334_v34, %v338_v36  ;;  %v514_v27 = vld [vmem:[%s4126_s29 + $0x7b0] sm:$0xff] }
  0xbd   : > { %2426 = vmatmul.mubr.bf16.vlgmr.msra.gmra.mrb[8].mxu1 %v4250_v25  ;;  %2435 = vmatpush1.bf16.msra.mxu0 %v3519_v41  ;;  %v3584_v41 = vcombine.high %v334_v34, %v338_v36  ;;  %v518_v34 = vld [vmem:[%s4126_s29 + $0x7d0] sm:$0xff] }
  0xbe   : > { %2476 = vmatpush1.bf16.msra.mxu1 %v3647_v42  ;;  %2436 = vmatprep.subr.bf16.mxu0 %v3528_v43  ;;  %v3712_v42 = vcombine.high %v462_v37, %v466_v38  ;;  %v342_v43 = vld [vmem:[%s4126_s29 + $0x250] sm:$0xff]  ;;  %v3759_v38 = vcombine.low %v510_v26, %v514_v27 }
  0xbf   : > { %2477 = vmatprep.subr.bf16.mxu1 %v3656_v44  ;;  %2466 = vmatprep.mubr.bf16.mxu0 %v4161_v59  ;;  %v346_v44 = vld [vmem:[%s4126_s29 + $0x270] sm:$0xff] }
  0xc0   : > { %2507 = vmatprep.mubr.bf16.mxu1 %v4163_v60  ;;  %v3591_v55 = vcombine.low %v342_v43, %v346_v44  ;;  %v522_v36 = vld [vmem:[%s4126_s29 + $0x7f0] sm:$0xff] }
  0xc1   : > { %2437 = vmatpush1.bf16.msra.mxu0 %v3527_v49  ;;  %v3592_v49 = vcombine.high %v342_v43, %v346_v44  ;;  %v271_v43 = vld [vmem:[%s4126_s29 + $0x18] sm:$0xff] }
  0xc2   : > { %2478 = vmatpush1.bf16.msra.mxu1 %v3655_v50  ;;  %2438 = vmatprep.subr.bf16.mxu0 %v3536_v51  ;;  %v3720_v50 = vcombine.high %v470_v45, %v474_v46  ;;  %v350_v51 = vld [vmem:[%s4126_s29 + $0x290] sm:$0xff]  ;;  %v275_v44 = vld [vmem:[%s4126_s29 + $0x38] sm:$0xff]  ;;  %v3767_v46 = vcombine.low %v518_v34, %v522_v36 }
  0xc3   : > { %2479 = vmatprep.subr.bf16.mxu1 %v3664_v52  ;;  %v354_v52 = vld [vmem:[%s4126_s29 + $0x2b0] sm:$0xff] }
  0xc4   : > { %v3599_v1 = vcombine.low %v350_v51, %v354_v52 }
  0xc5   : > { %2439 = vmatpush1.bf16.msra.mxu0 %v3535_v57  ;;  %v3600_v57 = vcombine.high %v350_v51, %v354_v52  ;;  %v279_v51 = vld [vmem:[%s4126_s29 + $0x58] sm:$0xff] }
  0xc6   : > { %2480 = vmatpush1.bf16.msra.mxu1 %v3663_v58  ;;  %2440 = vmatprep.subr.bf16.mxu0 %v3544_v61  ;;  %v3728_v58 = vcombine.high %v478_v53, %v482_v54  ;;  %v358_v61 = vld [vmem:[%s4126_s29 + $0x2d0] sm:$0xff]  ;;  %v283_v52 = vld [vmem:[%s4126_s29 + $0x78] sm:$0xff]  ;;  %v3521_v54 = vcombine.low %v271_v43, %v275_v44 }
  0xc7   : > { %2481 = vmatprep.subr.bf16.mxu1 %v3672_v62  ;;  %v362_v62 = vld [vmem:[%s4126_s29 + $0x2f0] sm:$0xff] }
  0xc8   : > { %v3607_v9 = vcombine.low %v358_v61, %v362_v62 }
  0xc9   : > { %2441 = vmatpush1.bf16.msra.mxu0 %v3543_v3  ;;  %v3608_v3 = vcombine.high %v358_v61, %v362_v62  ;;  %v287_v61 = vld [vmem:[%s4126_s29 + $0x98] sm:$0xff] }
  0xca   : > { %2482 = vmatpush1.bf16.msra.mxu1 %v3671_v4  ;;  %2442 = vmatprep.subr.bf16.mxu0 %v3552_v5  ;;  %v3736_v4 = vcombine.high %v486_v63, %v490_v0  ;;  %v366_v5 = vld [vmem:[%s4126_s29 + $0x310] sm:$0xff]  ;;  %v291_v62 = vld [vmem:[%s4126_s29 + $0xb8] sm:$0xff]  ;;  %v3529_v0 = vcombine.low %v279_v51, %v283_v52 }
  0xcb   : > { %2483 = vmatprep.subr.bf16.mxu1 %v3680_v6  ;;  %v370_v6 = vld [vmem:[%s4126_s29 + $0x330] sm:$0xff] }
  0xcc   : > { %v3615_v18 = vcombine.low %v366_v5, %v370_v6 }
  0xcd   : > { %2443 = vmatpush1.bf16.msra.mxu0 %v3551_v11  ;;  %v3616_v11 = vcombine.high %v366_v5, %v370_v6  ;;  %v295_v5 = vld [vmem:[%s4126_s29 + $0xd8] sm:$0xff] }
  0xce   : > { %2484 = vmatpush1.bf16.msra.mxu1 %v3679_v12  ;;  %2444 = vmatprep.subr.bf16.mxu0 %v3560_v13  ;;  %v3744_v12 = vcombine.high %v494_v7, %v498_v8  ;;  %v374_v13 = vld [vmem:[%s4126_s29 + $0x350] sm:$0xff]  ;;  %v299_v6 = vld [vmem:[%s4126_s29 + $0xf8] sm:$0xff]  ;;  %v3537_v8 = vcombine.low %v287_v61, %v291_v62 }
  0xcf   : > { %2485 = vmatprep.subr.bf16.mxu1 %v3688_v14  ;;  %v378_v14 = vld [vmem:[%s4126_s29 + $0x370] sm:$0xff] }
  0xd0   : > { %v3623_v28 = vcombine.low %v374_v13, %v378_v14 }
  0xd1   : > { %2445 = vmatpush1.bf16.msra.mxu0 %v3559_v21  ;;  %v3624_v21 = vcombine.high %v374_v13, %v378_v14  ;;  %v303_v13 = vld [vmem:[%s4126_s29 + $0x118] sm:$0xff] }
  0xd2   : > { %2486 = vmatpush1.bf16.msra.mxu1 %v3687_v22  ;;  %2446 = vmatprep.subr.bf16.mxu0 %v3568_v23  ;;  %v3752_v22 = vcombine.high %v502_v15, %v506_v16  ;;  %v382_v23 = vld [vmem:[%s4126_s29 + $0x390] sm:$0xff]  ;;  %v307_v14 = vld [vmem:[%s4126_s29 + $0x138] sm:$0xff] }
  0xd3   : > { %2487 = vmatprep.subr.bf16.mxu1 %v3696_v24  ;;  %v386_v24 = vld [vmem:[%s4126_s29 + $0x3b0] sm:$0xff] }
  0xd4   : > { %v3631_v37 = vcombine.low %v382_v23, %v386_v24 }
  0xd5   : > { %2447 = vmatpush1.bf16.msra.mxu0 %v3567_v30  ;;  %v3632_v30 = vcombine.high %v382_v23, %v386_v24  ;;  %v315_v23 = vld [vmem:[%s4126_s29 + $0x178] sm:$0xff] }
  0xd6   : > { %2488 = vmatpush1.bf16.msra.mxu1 %v3695_v31  ;;  %2448 = vmatprep.subr.bf16.mxu0 %v3576_v32  ;;  %v3760_v31 = vcombine.high %v510_v26, %v514_v27  ;;  %v390_v32 = vld [vmem:[%s4126_s29 + $0x3d0] sm:$0xff]  ;;  %v3553_v26 = vcombine.low %v303_v13, %v307_v14 }
  0xd7   : > { %2489 = vmatprep.subr.bf16.mxu1 %v3704_v33  ;;  %v394_v33 = vld [vmem:[%s4126_s29 + $0x3f0] sm:$0xff] }
  0xd8   : > { %v3639_v45 = vcombine.low %v390_v32, %v394_v33 }
  0xd9   : > { %2449 = vmatpush1.bf16.msra.mxu0 %v3575_v39  ;;  %v3640_v39 = vcombine.high %v390_v32, %v394_v33  ;;  %v323_v32 = vld [vmem:[%s4126_s29 + $0x1b8] sm:$0xff] }
  0xda   : > { %2490 = vmatpush1.bf16.msra.mxu1 %v3703_v40  ;;  %2450 = vmatprep.subr.bf16.mxu0 %v3584_v41  ;;  %v3768_v40 = vcombine.high %v518_v34, %v522_v36  ;;  %v526_v41 = vld [vmem:[%s4126_s29 + $0x810] sm:$0xff] }
  0xdb   : > { %2491 = vmatprep.subr.bf16.mxu1 %v3712_v42  ;;  %v530_v42 = vld [vmem:[%s4126_s29 + $0x830] sm:$0xff] }
  0xdc   : > { %v3775_v53 = vcombine.low %v526_v41, %v530_v42 }
  0xdd   : > { %2451 = vmatpush1.bf16.msra.mxu0 %v3583_v47  ;;  %v3776_v47 = vcombine.high %v526_v41, %v530_v42  ;;  %v331_v41 = vld [vmem:[%s4126_s29 + $0x1f8] sm:$0xff] }
  0xde   : > { %2492 = vmatpush1.bf16.msra.mxu1 %v3711_v48  ;;  %2452 = vmatprep.subr.bf16.mxu0 %v3592_v49  ;;  %v3522_v48 = vcombine.high %v271_v43, %v275_v44  ;;  %v534_v49 = vld [vmem:[%s4126_s29 + $0x850] sm:$0xff] }
  0xdf   : > { %2493 = vmatprep.subr.bf16.mxu1 %v3720_v50  ;;  %v538_v50 = vld [vmem:[%s4126_s29 + $0x870] sm:$0xff] }
  0xe0   : > { %v3783_v63 = vcombine.low %v534_v49, %v538_v50 }
  0xe1   : > { %2453 = vmatpush1.bf16.msra.mxu0 %v3591_v55  ;;  %v3784_v55 = vcombine.high %v534_v49, %v538_v50  ;;  %v339_v49 = vld [vmem:[%s4126_s29 + $0x238] sm:$0xff] }
  0xe2   : > { %2494 = vmatpush1.bf16.msra.mxu1 %v3719_v56  ;;  %2454 = vmatprep.subr.bf16.mxu0 %v3600_v57  ;;  %v3530_v56 = vcombine.high %v279_v51, %v283_v52  ;;  %v542_v57 = vld [vmem:[%s4126_s29 + $0x890] sm:$0xff] }
  0xe3   : > { %2495 = vmatprep.subr.bf16.mxu1 %v3728_v58  ;;  %v546_v58 = vld [vmem:[%s4126_s29 + $0x8b0] sm:$0xff] }
  0xe4   : > { %v3791_v7 = vcombine.low %v542_v57, %v546_v58 }
  0xe5   : > { %2455 = vmatpush1.bf16.msra.mxu0 %v3599_v1  ;;  %v3792_v1 = vcombine.high %v542_v57, %v546_v58  ;;  %v347_v57 = vld [vmem:[%s4126_s29 + $0x278] sm:$0xff] }
  0xe6   : > { %2496 = vmatpush1.bf16.msra.mxu1 %v3727_v2  ;;  %2456 = vmatprep.subr.bf16.mxu0 %v3608_v3  ;;  %v3538_v2 = vcombine.high %v287_v61, %v291_v62  ;;  %v550_v3 = vld [vmem:[%s4126_s29 + $0x8d0] sm:$0xff] }
  0xe7   : > { %2497 = vmatprep.subr.bf16.mxu1 %v3736_v4  ;;  %v554_v4 = vld [vmem:[%s4126_s29 + $0x8f0] sm:$0xff] }
  0xe8   : > { %v3799_v15 = vcombine.low %v550_v3, %v554_v4 }
  0xe9   : > { %2457 = vmatpush1.bf16.msra.mxu0 %v3607_v9  ;;  %v3800_v9 = vcombine.high %v550_v3, %v554_v4  ;;  %v355_v3 = vld [vmem:[%s4126_s29 + $0x2b8] sm:$0xff] }
  0xea   : > { %2498 = vmatpush1.bf16.msra.mxu1 %v3735_v10  ;;  %2458 = vmatprep.subr.bf16.mxu0 %v3616_v11  ;;  %v3546_v10 = vcombine.high %v295_v5, %v299_v6  ;;  %v558_v11 = vld [vmem:[%s4126_s29 + $0x910] sm:$0xff] }
  0xeb   : > { %2499 = vmatprep.subr.bf16.mxu1 %v3744_v12  ;;  %v562_v12 = vld [vmem:[%s4126_s29 + $0x930] sm:$0xff] }
  0xec   : > { %v3808_v16 = vcombine.high %v558_v11, %v562_v12  ;;  %v3807_v24 = vcombine.low %v558_v11, %v562_v12  ;;  %v363_v11 = vld [vmem:[%s4126_s29 + $0x2f8] sm:$0xff] }
  0xed   : > { %2459 = vmatpush1.bf16.msra.mxu0 %v3615_v18  ;;  %v3554_v18 = vcombine.high %v303_v13, %v307_v14 }
  0xee   : > { %2500 = vmatpush1.bf16.msra.mxu1 %v3743_v19  ;;  %2460 = vmatprep.subr.bf16.mxu0 %v3624_v21  ;;  %v566_v19 = vld [vmem:[%s4126_s29 + $0x950] sm:$0xff] }
  0xef   : > { %2501 = vmatprep.subr.bf16.mxu1 %v3752_v22  ;;  %v570_v21 = vld [vmem:[%s4126_s29 + $0x970] sm:$0xff]  ;;  %v311_v22 = vld [vmem:[%s4126_s29 + $0x158] sm:$0xff] }
  0xf0   : > { %v3816_v27 = vcombine.high %v566_v19, %v570_v21  ;;  %v3815_v33 = vcombine.low %v566_v19, %v570_v21  ;;  %v3561_v34 = vcombine.low %v311_v22, %v315_v23 }
  0xf1   : > { %2461 = vmatpush1.bf16.msra.mxu0 %v3623_v28  ;;  %v3562_v28 = vcombine.high %v311_v22, %v315_v23 }
  0xf2   : > { %2502 = vmatpush1.bf16.msra.mxu1 %v3751_v29  ;;  %2462 = vmatprep.subr.bf16.mxu0 %v3632_v30  ;;  %v574_v29 = vld [vmem:[%s4126_s29 + $0x990] sm:$0xff] }
  0xf3   : > { %2503 = vmatprep.subr.bf16.mxu1 %v3760_v31  ;;  %v578_v30 = vld [vmem:[%s4126_s29 + $0x9b0] sm:$0xff]  ;;  %v319_v31 = vld [vmem:[%s4126_s29 + $0x198] sm:$0xff] }
  0xf4   : > { %v3824_v36 = vcombine.high %v574_v29, %v578_v30  ;;  %v3823_v42 = vcombine.low %v574_v29, %v578_v30  ;;  %v3569_v43 = vcombine.low %v319_v31, %v323_v32 }
  0xf5   : > { %2463 = vmatpush1.bf16.msra.mxu0 %v3631_v37  ;;  %v3570_v37 = vcombine.high %v319_v31, %v323_v32 }
  0xf6   : > { %2504 = vmatpush1.bf16.msra.mxu1 %v3759_v38  ;;  %2464 = vmatprep.subr.bf16.mxu0 %v3640_v39  ;;  %v582_v38 = vld [vmem:[%s4126_s29 + $0x9d0] sm:$0xff] }
  0xf7   : > { %2505 = vmatprep.subr.bf16.mxu1 %v3768_v40  ;;  %v586_v39 = vld [vmem:[%s4126_s29 + $0x9f0] sm:$0xff]  ;;  %v327_v40 = vld [vmem:[%s4126_s29 + $0x1d8] sm:$0xff] }
  0xf8   : > { %v3832_v44 = vcombine.high %v582_v38, %v586_v39  ;;  %v3831_v50 = vcombine.low %v582_v38, %v586_v39  ;;  %v3577_v51 = vcombine.low %v327_v40, %v331_v41 }
  0xf9   : > { %2465 = vmatpush1.bf16.msra.mxu0 %v3639_v45  ;;  %v3578_v45 = vcombine.high %v327_v40, %v331_v41 }
  0xfa   : > { %2506 = vmatpush1.bf16.msra.mxu1 %v3767_v46  ;;  %2516 = vmatprep.subr.bf16.mxu0 %v3776_v47  ;;  %v399_v46 = vld [vmem:[%s4126_s29 + $0x418] sm:$0xff] }
  0xfb   : > { %2557 = vmatprep.subr.bf16.mxu1 %v3522_v48  ;;  %v403_v47 = vld [vmem:[%s4126_s29 + $0x438] sm:$0xff] }
  0xfc   : > { %2467 = vmatmul.mubr.bf16.vlgmr.msra.gmra.mrb[12].mxu0 %v4209_v17  ;;  %v335_v48 = vld [vmem:[%s4126_s29 + $0x218] sm:$0xff]  ;;  %v3650_v52 = vcombine.high %v399_v46, %v403_v47  ;;  %v3649_v58 = vcombine.low %v399_v46, %v403_v47 }
  0xfd   : > { %2508 = vmatmul.mubr.bf16.vlgmr.msra.gmra.mrb[12].mxu1 %v4213_v20  ;;  %2517 = vmatpush1.bf16.msra.mxu0 %v3775_v53  ;;  %v3586_v53 = vcombine.high %v335_v48, %v339_v49  ;;  %v3585_v61 = vcombine.low %v335_v48, %v339_v49  ;;  %v391_v47 = vld [vmem:[%s4126_s29 + $0x3d8] sm:$0xff] }
  0xfe   : > { %2558 = vmatpush1.bf16.msra.mxu1 %v3521_v54  ;;  %2518 = vmatprep.subr.bf16.mxu0 %v3784_v55  ;;  %v407_v54 = vld [vmem:[%s4126_s29 + $0x458] sm:$0xff] }
  0xff   : > { %2559 = vmatprep.subr.bf16.mxu1 %v3530_v56  ;;  %2548 = vmatprep.mubr.bf16.mxu0 %v4075_v35  ;;  %v411_v55 = vld [vmem:[%s4126_s29 + $0x478] sm:$0xff] }
 0x100   : > { %2589 = vmatprep.mubr.bf16.mxu1 %v4161_v59  ;;  %v3545_v59 = vcombine.low %v295_v5, %v299_v6  ;;  %v343_v56 = vld [vmem:[%s4126_s29 + $0x258] sm:$0xff]  ;;  %v3658_v62 = vcombine.high %v407_v54, %v411_v55  ;;  %v3657_v4 = vcombine.low %v407_v54, %v411_v55 }
 0x101   : > { %2519 = vmatpush1.bf16.msra.mxu0 %v3783_v63  ;;  %v3594_v63 = vcombine.high %v343_v56, %v347_v57  ;;  %v3593_v5 = vcombine.low %v343_v56, %v347_v57  ;;  %v395_v48 = vld [vmem:[%s4126_s29 + $0x3f8] sm:$0xff] }
 0x102   : > { %2560 = vmatpush1.bf16.msra.mxu1 %v3529_v0  ;;  %2520 = vmatprep.subr.bf16.mxu0 %v3792_v1  ;;  %v415_v0 = vld [vmem:[%s4126_s29 + $0x498] sm:$0xff] }
 0x103   : > { %2561 = vmatprep.subr.bf16.mxu1 %v3538_v2  ;;  %v419_v1 = vld [vmem:[%s4126_s29 + $0x4b8] sm:$0xff] }
 0x104   : > { %v351_v2 = vld [vmem:[%s4126_s29 + $0x298] sm:$0xff]  ;;  %v3666_v6 = vcombine.high %v415_v0, %v419_v1  ;;  %v3665_v12 = vcombine.low %v415_v0, %v419_v1 }
 0x105   : > { %2521 = vmatpush1.bf16.msra.mxu0 %v3791_v7  ;;  %v3602_v7 = vcombine.high %v351_v2, %v355_v3  ;;  %v3601_v13 = vcombine.low %v351_v2, %v355_v3  ;;  %v527_v0 = vld [vmem:[%s4126_s29 + $0x818] sm:$0xff]  ;;  %v3641_v3 = vcombine.low %v391_v47, %v395_v48 }
 0x106   : > { %2562 = vmatpush1.bf16.msra.mxu1 %v3537_v8  ;;  %2522 = vmatprep.subr.bf16.mxu0 %v3800_v9  ;;  %v423_v8 = vld [vmem:[%s4126_s29 + $0x4d8] sm:$0xff] }
 0x107   : > { %2563 = vmatprep.subr.bf16.mxu1 %v3546_v10  ;;  %v427_v9 = vld [vmem:[%s4126_s29 + $0x4f8] sm:$0xff] }
 0x108   : > { %v359_v10 = vld [vmem:[%s4126_s29 + $0x2d8] sm:$0xff]  ;;  %v3673_v19 = vcombine.low %v423_v8, %v427_v9 }
 0x109   : > { %2523 = vmatpush1.bf16.msra.mxu0 %v3799_v15  ;;  %v3610_v14 = vcombine.high %v359_v10, %v363_v11  ;;  %v431_v15 = vld [vmem:[%s4126_s29 + $0x518] sm:$0xff]  ;;  %v3609_v21 = vcombine.low %v359_v10, %v363_v11 }
 0x10a   : > { %2564 = vmatpush1.bf16.msra.mxu1 %v3545_v59  ;;  %2524 = vmatprep.subr.bf16.mxu0 %v3808_v16  ;;  %v435_v59 = vld [vmem:[%s4126_s29 + $0x538] sm:$0xff] }
 0x10b   : > { %2565 = vmatprep.subr.bf16.mxu1 %v3554_v18  ;;  %v367_v16 = vld [vmem:[%s4126_s29 + $0x318] sm:$0xff]  ;;  %v3682_v22 = vcombine.high %v431_v15, %v435_v59  ;;  %v3681_v29 = vcombine.low %v431_v15, %v435_v59 }
 0x10c   : > { %v371_v18 = vld [vmem:[%s4126_s29 + $0x338] sm:$0xff] }
 0x10d   : > { %2525 = vmatpush1.bf16.msra.mxu0 %v3807_v24  ;;  %v3618_v23 = vcombine.high %v367_v16, %v371_v18  ;;  %v439_v24 = vld [vmem:[%s4126_s29 + $0x558] sm:$0xff]  ;;  %v3617_v30 = vcombine.low %v367_v16, %v371_v18 }
 0x10e   : > { %2566 = vmatpush1.bf16.msra.mxu1 %v3553_v26  ;;  %2526 = vmatprep.subr.bf16.mxu0 %v3816_v27  ;;  %v443_v26 = vld [vmem:[%s4126_s29 + $0x578] sm:$0xff] }
 0x10f   : > { %2567 = vmatprep.subr.bf16.mxu1 %v3562_v28  ;;  %v375_v27 = vld [vmem:[%s4126_s29 + $0x358] sm:$0xff]  ;;  %v3690_v31 = vcombine.high %v439_v24, %v443_v26  ;;  %v3689_v38 = vcombine.low %v439_v24, %v443_v26 }
 0x110   : > { %v379_v28 = vld [vmem:[%s4126_s29 + $0x378] sm:$0xff] }
 0x111   : > { %2527 = vmatpush1.bf16.msra.mxu0 %v3815_v33  ;;  %v3626_v32 = vcombine.high %v375_v27, %v379_v28  ;;  %v447_v33 = vld [vmem:[%s4126_s29 + $0x598] sm:$0xff]  ;;  %v3625_v39 = vcombine.low %v375_v27, %v379_v28 }
 0x112   : > { %2568 = vmatpush1.bf16.msra.mxu1 %v3561_v34  ;;  %2528 = vmatprep.subr.bf16.mxu0 %v3824_v36  ;;  %v451_v34 = vld [vmem:[%s4126_s29 + $0x5b8] sm:$0xff] }
 0x113   : > { %2569 = vmatprep.subr.bf16.mxu1 %v3570_v37  ;;  %v383_v36 = vld [vmem:[%s4126_s29 + $0x398] sm:$0xff]  ;;  %v3698_v40 = vcombine.high %v447_v33, %v451_v34 }
 0x114   : > { %v387_v37 = vld [vmem:[%s4126_s29 + $0x3b8] sm:$0xff] }
 0x115   : > { %2529 = vmatpush1.bf16.msra.mxu0 %v3823_v42  ;;  %v3634_v42 = vcombine.high %v383_v36, %v387_v37  ;;  %v3633_v56 = vcombine.low %v383_v36, %v387_v37  ;;  %v531_v1 = vld [vmem:[%s4126_s29 + $0x838] sm:$0xff] }
 0x116   : > { %2570 = vmatpush1.bf16.msra.mxu1 %v3569_v43  ;;  %2530 = vmatprep.subr.bf16.mxu0 %v3832_v44  ;;  %v455_v43 = vld [vmem:[%s4126_s29 + $0x5d8] sm:$0xff]  ;;  %v3777_v11 = vcombine.low %v527_v0, %v531_v1 }
 0x117   : > { %2571 = vmatprep.subr.bf16.mxu1 %v3578_v45  ;;  %v459_v44 = vld [vmem:[%s4126_s29 + $0x5f8] sm:$0xff] }
 0x118   : > { %v3706_v57 = vcombine.high %v455_v43, %v459_v44  ;;  %v3705_v2 = vcombine.low %v455_v43, %v459_v44  ;;  %v543_v15 = vld [vmem:[%s4126_s29 + $0x898] sm:$0xff] }
 0x119   : > { %2531 = vmatpush1.bf16.msra.mxu0 %v3831_v50  ;;  %v547_v59 = vld [vmem:[%s4126_s29 + $0x8b8] sm:$0xff] }
 0x11a   : > { %2572 = vmatpush1.bf16.msra.mxu1 %v3577_v51  ;;  %2598 = vmatprep.subr.bf16.mxu0 %v3650_v52  ;;  %v3697_v52 = vcombine.low %v447_v33, %v451_v34  ;;  %v551_v24 = vld [vmem:[%s4126_s29 + $0x8d8] sm:$0xff]  ;;  %v3793_v27 = vcombine.low %v543_v15, %v547_v59 }
 0x11b   : > { %2573 = vmatprep.subr.bf16.mxu1 %v3586_v53  ;;  %v555_v26 = vld [vmem:[%s4126_s29 + $0x8f8] sm:$0xff] }
 0x11c   : > { %2549 = vmatmul.mubr.bf16.vlgmr.msra.gmra.mrb[16].mxu0 %v4250_v25  ;;  %v563_v33 = vld [vmem:[%s4126_s29 + $0x938] sm:$0xff]  ;;  %v3801_v34 = vcombine.low %v551_v24, %v555_v26 }
 0x11d   : > { %2599 = vmatpush1.bf16.msra.mxu0 %v3649_v58  ;;  %2630 = vmatprep.mubr.bf16.mxu0 %v4163_v60  ;;  %v3674_v60 = vcombine.high %v423_v8, %v427_v9  ;;  %v535_v8 = vld [vmem:[%s4126_s29 + $0x858] sm:$0xff] }
 0x11e   : > { %2574 = vmatpush1.bf16.msra.mxu1 %v3585_v61  ;;  %2600 = vmatprep.subr.bf16.mxu0 %v3658_v62  ;;  %v3642_v61 = vcombine.high %v391_v47, %v395_v48  ;;  %v463_v62 = vld [vmem:[%s4126_s29 + $0x618] sm:$0xff] }
 0x11f   : > { %2575 = vmatprep.subr.bf16.mxu1 %v3594_v63  ;;  %v467_v63 = vld [vmem:[%s4126_s29 + $0x638] sm:$0xff] }
 0x120   : > { %v539_v9 = vld [vmem:[%s4126_s29 + $0x878] sm:$0xff]  ;;  %v3713_v10 = vcombine.low %v463_v62, %v467_v63 }
 0x121   : > { %2601 = vmatpush1.bf16.msra.mxu0 %v3657_v4  ;;  %v3714_v4 = vcombine.high %v463_v62, %v467_v63  ;;  %v3785_v18 = vcombine.low %v535_v8, %v539_v9  ;;  %v515_v47 = vld [vmem:[%s4126_s29 + $0x7b8] sm:$0xff]  ;;  %v251_v63 = vld [vmem:[#allocation2 + $0x8] sm:$0xff] }
 0x122   : > { %2576 = vmatpush1.bf16.msra.mxu1 %v3593_v5  ;;  %2602 = vmatprep.subr.bf16.mxu0 %v3666_v6  ;;  %v3778_v5 = vcombine.high %v527_v0, %v531_v1  ;;  %v471_v6 = vld [vmem:[%s4126_s29 + $0x658] sm:$0xff] }
 0x123   : > { %2577 = vmatprep.subr.bf16.mxu1 %v3602_v7  ;;  %v475_v7 = vld [vmem:[%s4126_s29 + $0x678] sm:$0xff] }
 0x124   : > { %v3721_v16 = vcombine.low %v471_v6, %v475_v7  ;;  %v575_v48 = vld [vmem:[%s4126_s29 + $0x998] sm:$0xff] }
 0x125   : > { %2603 = vmatpush1.bf16.msra.mxu0 %v3665_v12  ;;  %v3722_v12 = vcombine.high %v471_v6, %v475_v7  ;;  %v583_v1 = vld [vmem:[%s4126_s29 + $0x9d8] sm:$0xff] }
 0x126   : > { %2578 = vmatpush1.bf16.msra.mxu1 %v3601_v13  ;;  %2604 = vmatprep.subr.bf16.mxu0 %v3674_v60  ;;  %v3786_v13 = vcombine.high %v535_v8, %v539_v9  ;;  %v479_v60 = vld [vmem:[%s4126_s29 + $0x698] sm:$0xff] }
 0x127   : > { %2579 = vmatprep.subr.bf16.mxu1 %v3610_v14  ;;  %v483_v14 = vld [vmem:[%s4126_s29 + $0x6b8] sm:$0xff] }
 0x129   : > { %2605 = vmatpush1.bf16.msra.mxu0 %v3673_v19  ;;  %v3730_v19 = vcombine.high %v479_v60, %v483_v14 }
 0x12a   : > { %2580 = vmatpush1.bf16.msra.mxu1 %v3609_v21  ;;  %2606 = vmatprep.subr.bf16.mxu0 %v3682_v22  ;;  %v3794_v21 = vcombine.high %v543_v15, %v547_v59  ;;  %v487_v22 = vld [vmem:[%s4126_s29 + $0x6d8] sm:$0xff] }
 0x12b   : > { %2581 = vmatprep.subr.bf16.mxu1 %v3618_v23  ;;  %v491_v23 = vld [vmem:[%s4126_s29 + $0x6f8] sm:$0xff] }
 0x12c   : > { %v3738_v28 = vcombine.high %v487_v22, %v491_v23 }
 0x12d   : > { %2607 = vmatpush1.bf16.msra.mxu0 %v3681_v29  ;;  %v3802_v29 = vcombine.high %v551_v24, %v555_v26  ;;  %v253_v26 = vld [vmem:[#allocation2 + $0x18] sm:$0xff] }
 0x12e   : > { %2582 = vmatpush1.bf16.msra.mxu1 %v3617_v30  ;;  %2608 = vmatprep.subr.bf16.mxu0 %v3690_v31  ;;  %v495_v30 = vld [vmem:[%s4126_s29 + $0x718] sm:$0xff] }
 0x12f   : > { %v2222_v41 = vpop.f32.mrb[0].mxu0  ;;  %2583 = vmatprep.subr.bf16.mxu1 %v3626_v32  ;;  %v499_v31 = vld [vmem:[%s4126_s29 + $0x738] sm:$0xff] }
 0x130   : > { %v2263_v45 = vpop.f32.mrb[0].mxu1  ;;  %v2224_v46 = vpop.f32.mrb[1].mxu0  ;;  %v559_v32 = vld [vmem:[%s4126_s29 + $0x918] sm:$0xff]  ;;  %v3746_v36 = vcombine.high %v495_v30, %v499_v31 }
 0x131   : > { %v4452_v49 = vadd.f32 %v2263_v45, %v2222_v41  ;;  %v2265_v50 = vpop.f32.mrb[1].mxu1  ;;  %v2226_v51 = vpop.f32.mrb[2].mxu0  ;;  %2609 = vmatpush1.bf16.msra.mxu0 %v3689_v38  ;;  %v3810_v37 = vcombine.high %v559_v32, %v563_v33  ;;  %v503_v38 = vld [vmem:[%s4126_s29 + $0x758] sm:$0xff]  ;;  %v3809_v43 = vcombine.low %v559_v32, %v563_v33 }
 0x132   : > { %v4454_v53 = vadd.f32 %v2265_v50, %v2224_v46  ;;  %v2267_v54 = vpop.f32.mrb[2].mxu1  ;;  %2584 = vmatpush1.bf16.msra.mxu1 %v3625_v39  ;;  %v2227_v55 = vpop.f32.mrb[3].mxu0  ;;  %2610 = vmatprep.subr.bf16.mxu0 %v3698_v40  ;;  %v507_v39 = vld [vmem:[%s4126_s29 + $0x778] sm:$0xff] }
 0x133   : > { %v2268_v58 = vpop.f32.mrb[3].mxu1  ;;  %2585 = vmatprep.subr.bf16.mxu1 %v3634_v42  ;;  %v567_v40 = vld [vmem:[%s4126_s29 + $0x958] sm:$0xff]  ;;  %v3745_v42 = vcombine.low %v495_v30, %v499_v31  ;;  %v3754_v44 = vcombine.high %v503_v38, %v507_v39  ;;  %v3753_v51 = vcombine.low %v503_v38, %v507_v39  ;;  %v250_v55 = vld [vmem:[#allocation2] sm:$0xff] }
 0x134   : > { %v571_v41 = vld [vmem:[%s4126_s29 + $0x978] sm:$0xff] }
 0x135   : > { %2611 = vmatpush1.bf16.msra.mxu0 %v3697_v52  ;;  %v3818_v45 = vcombine.high %v567_v40, %v571_v41  ;;  %v511_v46 = vld [vmem:[%s4126_s29 + $0x798] sm:$0xff]  ;;  %v3817_v52 = vcombine.low %v567_v40, %v571_v41  ;;  %v254_v40 = vld [vmem:[#allocation2 + $0x20] sm:$0xff] }
 0x136   : > { %2586 = vmatpush1.bf16.msra.mxu1 %v3633_v56  ;;  %2612 = vmatprep.subr.bf16.mxu0 %v3706_v57  ;;  %v579_v50 = vld [vmem:[%s4126_s29 + $0x9b8] sm:$0xff]  ;;  %v3762_v54 = vcombine.high %v511_v46, %v515_v47 }
 0x137   : > { %2587 = vmatprep.subr.bf16.mxu1 %v3642_v61  ;;  %v3826_v57 = vcombine.high %v575_v48, %v579_v50  ;;  %v519_v58 = vld [vmem:[%s4126_s29 + $0x7d8] sm:$0xff]  ;;  %v3825_v8 = vcombine.low %v575_v48, %v579_v50 }
 0x138   : > { %v523_v61 = vld [vmem:[%s4126_s29 + $0x7f8] sm:$0xff] }
 0x139   : > { %2613 = vmatpush1.bf16.msra.mxu0 %v3705_v2  ;;  %v587_v2 = vld [vmem:[%s4126_s29 + $0x9f8] sm:$0xff]  ;;  %v3770_v9 = vcombine.high %v519_v58, %v523_v61 }
 0x13a   : > { %2588 = vmatpush1.bf16.msra.mxu1 %v3641_v3  ;;  %2614 = vmatprep.subr.bf16.mxu0 %v3714_v4 }
 0x13b   : > { %2639 = vmatprep.subr.bf16.mxu1 %v3778_v5  ;;  %v3761_v5 = vcombine.low %v511_v46, %v515_v47 }
 0x13d   : > { %2590 = vmatmul.mubr.bf16.vlgmr.msra.gmra.mrb[16].mxu1 %v4209_v17  ;;  %2615 = vmatpush1.bf16.msra.mxu0 %v3713_v10  ;;  %v3729_v17 = vcombine.low %v479_v60, %v483_v14 }
 0x13e   : > { %2640 = vmatpush1.bf16.msra.mxu1 %v3777_v11  ;;  %2616 = vmatprep.subr.bf16.mxu0 %v3722_v12  ;;  %v3834_v11 = vcombine.high %v583_v1, %v587_v2  ;;  %v3833_v12 = vcombine.low %v583_v1, %v587_v2 }
 0x13f   : > { %2641 = vmatprep.subr.bf16.mxu1 %v3786_v13  ;;  %2671 = vmatprep.mubr.bf16.mxu1 %v4075_v35  ;;  %v3737_v35 = vcombine.low %v487_v22, %v491_v23 }
 0x141   : > { %2617 = vmatpush1.bf16.msra.mxu0 %v3721_v16 }
 0x142   : > { %2642 = vmatpush1.bf16.msra.mxu1 %v3785_v18  ;;  %2618 = vmatprep.subr.bf16.mxu0 %v3730_v19  ;;  %v252_v19 = vld [vmem:[#allocation2 + $0x10] sm:$0xff] }
 0x143   : > { %2643 = vmatprep.subr.bf16.mxu1 %v3794_v21 }
 0x145   : > { %2619 = vmatpush1.bf16.msra.mxu0 %v3729_v17 }
 0x146   : > { %2644 = vmatpush1.bf16.msra.mxu1 %v3793_v27  ;;  %2620 = vmatprep.subr.bf16.mxu0 %v3738_v28 }
 0x147   : > { %2645 = vmatprep.subr.bf16.mxu1 %v3802_v29 }
 0x149   : > { %2621 = vmatpush1.bf16.msra.mxu0 %v3737_v35 }
 0x14a   : > { %2646 = vmatpush1.bf16.msra.mxu1 %v3801_v34  ;;  %2622 = vmatprep.subr.bf16.mxu0 %v3746_v36 }
 0x14b   : > { %2647 = vmatprep.subr.bf16.mxu1 %v3810_v37 }
 0x14d   : > { %2623 = vmatpush1.bf16.msra.mxu0 %v3745_v42 }
 0x14e   : > { %2648 = vmatpush1.bf16.msra.mxu1 %v3809_v43  ;;  %2624 = vmatprep.subr.bf16.mxu0 %v3754_v44  ;;  %v255_v43 = vld [vmem:[#allocation2 + $0x28] sm:$0xff] }
 0x14f   : > { %v2304_v56 = vpop.f32.mrb[4].mxu0  ;;  %2649 = vmatprep.subr.bf16.mxu1 %v3818_v45 }
 0x150   : > { %v2305_v62 = vadd.f32 %v2304_v56, %v4452_v49  ;;  %v2306_v0 = vpop.f32.mrb[5].mxu0  ;;  %v3769_v49 = vcombine.low %v519_v58, %v523_v61 }
 0x151   : > { %v2307_v3 = vadd.f32 %v2306_v0, %v4454_v53  ;;  %v2308_v4 = vpop.f32.mrb[6].mxu0  ;;  %2625 = vmatpush1.bf16.msra.mxu0 %v3753_v51 }
 0x152   : > { %v2680_v6 = vadd.f32 %v2305_v62, %v250_v55  ;;  %2650 = vmatpush1.bf16.msra.mxu1 %v3817_v52  ;;  %v2309_v7 = vpop.f32.mrb[7].mxu0  ;;  %2626 = vmatprep.subr.bf16.mxu0 %v3762_v54  ;;  %v256_v62 = vld [vmem:[#allocation2 + $0x30] sm:$0xff] }
 0x153   : > { %v2681_v10 = vadd.f32 %v2307_v3, %v251_v63  ;;  %2651 = vmatprep.subr.bf16.mxu1 %v3826_v57  ;;  %v257_v3 = vld [vmem:[#allocation2 + $0x38] sm:$0xff] }
 0x154   : > { %2688 = vst [vmem:[#allocation2] sm:$0xff] %v2680_v6 }
 0x155   : > { %2689 = vst [vmem:[#allocation2 + $0x8] sm:$0xff] %v2681_v10  ;;  %2627 = vmatpush1.bf16.msra.mxu0 %v3761_v5  ;;  %v4002_v10 = vld [vmem:[%s4724_s3 + $0x40] sm:$0xff] (!%p3835_p6)  }
 0x156   : > { %2652 = vmatpush1.bf16.msra.mxu1 %v3825_v8  ;;  %2628 = vmatprep.subr.bf16.mxu0 %v3770_v9 }
 0x157   : > { %2653 = vmatprep.subr.bf16.mxu1 %v3834_v11  ;;  %v4003_v11 = vld [vmem:[%s4724_s3 + $0xc0] sm:$0xff] (!%p3835_p6)  }
 0x159   : > { %2629 = vmatpush1.bf16.msra.mxu0 %v3769_v49  ;;  %v4004_v49 = vld [vmem:[%s4724_s3] sm:$0xff] (!%p3835_p6)  }
 0x15a   : > { %2654 = vmatpush1.bf16.msra.mxu1 %v3833_v12  ;;  %3904 = vmatprep.subr.bf16.mxu0 (!%p3835_p6), %v4002_v10  ;;  %v4005_v12 = vld [vmem:[%s4724_s3 + $0x80] sm:$0xff] (!%p3835_p6)   ;;  %v4039_v10 = vld [vmem:[%s4724_s3 + $0x1c8] sm:$0xff] (!%p3835_p6)  }
 0x15b   : > { %3926 = vmatprep.subr.bf16.mxu1 (!%p3835_p6), %v4003_v11  ;;  %v4040_v11 = vld [vmem:[%s4724_s3 + $0x108] sm:$0xff] (!%p3835_p6)  }
 0x15c   : > { %2631 = vmatmul.mubr.bf16.vlgmr.msra.gmra.mrb[20].mxu0 %v4213_v20 }
 0x15d   : > { %2672 = vmatmul.mubr.bf16.vlgmr.msra.gmra.mrb[20].mxu1 %v4250_v25  ;;  %3905 = vmatpush3.bf16.msra.mxu0 (!%p3835_p6), %v4004_v49  ;;  %v4041_v49 = vld [vmem:[%s4724_s3 + $0x188] sm:$0xff] (!%p3835_p6)  }
 0x15e   : > { %3927 = vmatpush3.bf16.msra.mxu1 (!%p3835_p6), %v4005_v12  ;;  %v4042_v12 = vld [vmem:[%s4724_s3 + $0x150] sm:$0xff] (!%p3835_p6)  }
 0x170   : > { %v2345_v53 = vpop.f32.mrb[4].mxu1 }
 0x171   : > { %v2347_v13 = vpop.f32.mrb[5].mxu1 }
 0x172   : > { %v2349_v60 = vpop.f32.mrb[6].mxu1 }
 0x173   : > { %v2350_v14 = vpop.f32.mrb[7].mxu1  ;;  %v4008_v60 = vld [vmem:[%s4724_s3 + $0x8] sm:$0xff] (!%p3835_p6)  }
 0x174   : > { %v4009_v14 = vld [vmem:[%s4724_s3 + $0x88] sm:$0xff] (!%p3835_p6)  }
 0x18f   : > { %v2386_v15 = vpop.f32.mrb[8].mxu0 }
 0x190   : > { %v2387_v59 = vadd.f32 %v2386_v15, %v2345_v53  ;;  %v2427_v16 = vpop.f32.mrb[8].mxu1  ;;  %v2388_v18 = vpop.f32.mrb[9].mxu0  ;;  %v4006_v53 = vld [vmem:[%s4724_s3 + $0x48] sm:$0xff] (!%p3835_p6)   ;;  %v4010_v15 = vld [vmem:[%s4724_s3 + $0x50] sm:$0xff] (!%p3835_p6)  }
 0x191   : > { %v2389_v21 = vadd.f32 %v2388_v18, %v2347_v13  ;;  %v2429_v22 = vpop.f32.mrb[9].mxu1  ;;  %v2390_v23 = vpop.f32.mrb[10].mxu0  ;;  %v4007_v13 = vld [vmem:[%s4724_s3 + $0xc8] sm:$0xff] (!%p3835_p6)   ;;  %3906 = vmatprep.subr.bf16.mxu0 (!%p3835_p6), %v4006_v53  ;;  %v4013_v18 = vld [vmem:[%s4724_s3 + $0x90] sm:$0xff] (!%p3835_p6)  }
 0x192   : > { %v2428_v24 = vadd.f32 %v2427_v16, %v2387_v59  ;;  %v2431_v17 = vpop.f32.mrb[10].mxu1  ;;  %v2391_v27 = vpop.f32.mrb[11].mxu0  ;;  %3928 = vmatprep.subr.bf16.mxu1 (!%p3835_p6), %v4007_v13  ;;  %3907 = vmatpush3.bf16.msra.mxu0 (!%p3835_p6), %v4008_v60  ;;  %v4011_v59 = vld [vmem:[%s4724_s3 + $0xd0] sm:$0xff] (!%p3835_p6)   ;;  %v4017_v23 = vld [vmem:[%s4724_s3 + $0x98] sm:$0xff] (!%p3835_p6)  }
 0x193   : > { %v2430_v28 = vadd.f32 %v2429_v22, %v2389_v21  ;;  %v2432_v20 = vpop.f32.mrb[11].mxu1  ;;  %3929 = vmatpush3.bf16.msra.mxu1 (!%p3835_p6), %v4009_v14  ;;  %3908 = vmatprep.subr.bf16.mxu0 (!%p3835_p6), %v4010_v15  ;;  %v4012_v16 = vld [vmem:[%s4724_s3 + $0x10] sm:$0xff] (!%p3835_p6)   ;;  %v4015_v21 = vld [vmem:[%s4724_s3 + $0xd8] sm:$0xff] (!%p3835_p6)   ;;  %v4020_v17 = vld [vmem:[%s4724_s3 + $0x20] sm:$0xff] (!%p3835_p6)   ;;  %v2710_v27 = vlaneseq (!%p3835_p6) }
 0x194   : > { %v2682_v29 = vadd.f32 %v2428_v24, %v252_v19  ;;  %3930 = vmatprep.subr.bf16.mxu1 (!%p3835_p6), %v4011_v59  ;;  %v4014_v19 = vld [vmem:[%s4724_s3 + $0x58] sm:$0xff] (!%p3835_p6)   ;;  %v4018_v24 = vld [vmem:[%s4724_s3 + $0x60] sm:$0xff] (!%p3835_p6)   ;;  %v4022_v20 = vld [vmem:[%s4724_s3 + $0x68] sm:$0xff] (!%p3835_p6)  }
 0x195   : > { %v2683_v25 = vadd.f32 %v2430_v28, %v253_v26  ;;  %v4016_v22 = vld [vmem:[%s4724_s3 + $0x18] sm:$0xff] (!%p3835_p6)   ;;  %v4019_v26 = vld [vmem:[%s4724_s3 + $0xe0] sm:$0xff] (!%p3835_p6)   ;;  %v4043_v53 = vld [vmem:[%s4724_s3 + $0x1d0] sm:$0xff] (!%p3835_p6)  }
 0x196   : > { %2690 = vst [vmem:[#allocation2 + $0x10] sm:$0xff] %v2682_v29  ;;  %3909 = vmatpush3.bf16.msra.mxu0 (!%p3835_p6), %v4012_v16  ;;  %v4021_v28 = vld [vmem:[%s4724_s3 + $0xa0] sm:$0xff] (!%p3835_p6)   ;;  %v4023_v29 = vld [vmem:[%s4724_s3 + $0xe8] sm:$0xff] (!%p3835_p6)   ;;  %v4044_v13 = vld [vmem:[%s4724_s3 + $0x110] sm:$0xff] (!%p3835_p6)  }
 0x197   : > { %2691 = vst [vmem:[#allocation2 + $0x18] sm:$0xff] %v2683_v25  ;;  %3931 = vmatpush3.bf16.msra.mxu1 (!%p3835_p6), %v4013_v18  ;;  %3910 = vmatprep.subr.bf16.mxu0 (!%p3835_p6), %v4014_v19  ;;  %v4024_v25 = vld [vmem:[%s4724_s3 + $0x28] sm:$0xff] (!%p3835_p6)   ;;  %v4045_v60 = vld [vmem:[%s4724_s3 + $0x190] sm:$0xff] (!%p3835_p6)   ;;  %v4046_v14 = vld [vmem:[%s4724_s3 + $0x158] sm:$0xff] (!%p3835_p6)  }
 0x198   : > { %3932 = vmatprep.subr.bf16.mxu1 (!%p3835_p6), %v4015_v21  ;;  %v4047_v15 = vld [vmem:[%s4724_s3 + $0x1d8] sm:$0xff] (!%p3835_p6)   ;;  %v4050_v18 = vld [vmem:[%s4724_s3 + $0x160] sm:$0xff] (!%p3835_p6)  }
 0x199   : > { %v4048_v59 = vld [vmem:[%s4724_s3 + $0x118] sm:$0xff] (!%p3835_p6)   ;;  %v4051_v19 = vld [vmem:[%s4724_s3 + $0x1e0] sm:$0xff] (!%p3835_p6)  }
 0x19a   : > { %3911 = vmatpush3.bf16.msra.mxu0 (!%p3835_p6), %v4016_v22  ;;  %v4049_v16 = vld [vmem:[%s4724_s3 + $0x198] sm:$0xff] (!%p3835_p6)   ;;  %v4052_v21 = vld [vmem:[%s4724_s3 + $0x120] sm:$0xff] (!%p3835_p6)  }
 0x19b   : > { %3933 = vmatpush3.bf16.msra.mxu1 (!%p3835_p6), %v4017_v23  ;;  %3912 = vmatprep.subr.bf16.mxu0 (!%p3835_p6), %v4018_v24  ;;  %v4053_v22 = vld [vmem:[%s4724_s3 + $0x1a0] sm:$0xff] (!%p3835_p6)   ;;  %v4054_v23 = vld [vmem:[%s4724_s3 + $0x168] sm:$0xff] (!%p3835_p6)  }
 0x19c   : > { %3934 = vmatprep.subr.bf16.mxu1 (!%p3835_p6), %v4019_v26  ;;  %v4055_v24 = vld [vmem:[%s4724_s3 + $0x1e8] sm:$0xff] (!%p3835_p6)  }
 0x19d   : > { %v4056_v26 = vld [vmem:[%s4724_s3 + $0x128] sm:$0xff] (!%p3835_p6)  }
 0x19e   : > { %3913 = vmatpush3.bf16.msra.mxu0 (!%p3835_p6), %v4020_v17 }
 0x19f   : > { %3935 = vmatpush3.bf16.msra.mxu1 (!%p3835_p6), %v4021_v28  ;;  %3914 = vmatprep.subr.bf16.mxu0 (!%p3835_p6), %v4022_v20  ;;  %v4057_v28 = vld [vmem:[%s4724_s3 + $0x1a8] sm:$0xff] (!%p3835_p6)  }
 0x1a0   : > { %3936 = vmatprep.subr.bf16.mxu1 (!%p3835_p6), %v4023_v29  ;;  %v4058_v29 = vld [vmem:[%s4724_s3 + $0x170] sm:$0xff] (!%p3835_p6)  }
 0x1a2   : > { %3915 = vmatpush3.bf16.msra.mxu0 (!%p3835_p6), %v4024_v25 }
 0x1cf   : > { %v2468_v30 = vpop.f32.mrb[12].mxu0 }
 0x1d0   : > { %v2509_v31 = vpop.f32.mrb[12].mxu1  ;;  %v2470_v32 = vpop.f32.mrb[13].mxu0 }
 0x1d1   : > { %v2510_v33 = vadd.f32 %v2509_v31, %v2468_v30  ;;  %v2511_v35 = vpop.f32.mrb[13].mxu1  ;;  %v2472_v34 = vpop.f32.mrb[14].mxu0  ;;  %v4565_v30 = vshrl.u32 (!%p3835_p6), %v2710_v27, 7  ;;  %v4025_v31 = vld [vmem:[%s4724_s3 + $0xa8] sm:$0xff] (!%p3835_p6)  }
 0x1d2   : > { %v2512_v36 = vadd.f32 %v2511_v35, %v2470_v32  ;;  %v2513_v37 = vpop.f32.mrb[14].mxu1  ;;  %v2473_v38 = vpop.f32.mrb[15].mxu0  ;;  %v4026_v32 = vld [vmem:[%s4724_s3 + $0x70] sm:$0xff] (!%p3835_p6)   ;;  %3937 = vmatpush3.bf16.msra.mxu1 (!%p3835_p6), %v4025_v31 }
 0x1d3   : > { %v2514_v39 = vpop.f32.mrb[15].mxu1  ;;  %3916 = vmatprep.subr.bf16.mxu0 (!%p3835_p6), %v4026_v32  ;;  %v4028_v35 = vld [vmem:[%s4724_s3 + $0x30] sm:$0xff] (!%p3835_p6)   ;;  %v2716_v34 = vsub.s32 (!%p3835_p6), 1, %v4565_v30  ;;  %v2724_v37 = vsub.s32 (!%p3835_p6), 3, %v4565_v30  ;;  %v4030_v38 = vld [vmem:[%s4724_s3 + $0x78] sm:$0xff] (!%p3835_p6)   ;;  %v2732_v17 = vsub.s32 (!%p3835_p6), 5, %v4565_v30 }
 0x1d4   : > { %3917 = vmatpush3.bf16.msra.mxu0 (!%p3835_p6), %v4028_v35  ;;  %v2712_v39 = vsub.s32 (!%p3835_p6), 0, %v4565_v30  ;;  %v2740_v20 = vsub.s32 (!%p3835_p6), 7, %v4565_v30  ;;  %v2728_v25 = vsub.s32 (!%p3835_p6), 4, %v4565_v30  ;;  %v4059_v31 = vld [vmem:[%s4724_s3 + $0x1f0] sm:$0xff] (!%p3835_p6)   ;;  %v2736_v32 = vsub.s32 (!%p3835_p6), 6, %v4565_v30 }
 0x1d5   : > { %3918 = vmatprep.subr.bf16.mxu0 (!%p3835_p6), %v4030_v38  ;;  %v4061_v35 = vld [vmem:[%s4724_s3 + $0x1b0] sm:$0xff] (!%p3835_p6)  }
 0x1ef   : > { %v2550_v41 = vpop.f32.mrb[16].mxu0 }
 0x1f0   : > { %v2551_v42 = vadd.f32 %v2550_v41, %v2510_v33  ;;  %v2552_v44 = vpop.f32.mrb[17].mxu0  ;;  %v4027_v33 = vld [vmem:[%s4724_s3 + $0xf0] sm:$0xff] (!%p3835_p6)   ;;  %v2720_v41 = vsub.s32 (!%p3835_p6), 2, %v4565_v30  ;;  %v4063_v30 = vld [vmem:[%s4724_s3 + $0x1f8] sm:$0xff] (!%p3835_p6)  }
 0x1f1   : > { %v2553_v45 = vadd.f32 %v2552_v44, %v2512_v36  ;;  %v2554_v46 = vpop.f32.mrb[18].mxu0  ;;  %3938 = vmatprep.subr.bf16.mxu1 (!%p3835_p6), %v4027_v33  ;;  %v4029_v36 = vld [vmem:[%s4724_s3 + $0xb0] sm:$0xff] (!%p3835_p6)   ;;  %v2701_v44 = vld [vmem:[#allocation2 + $0x8] sm:$0xff] (!%p3835_p6) }
 0x1f2   : > { %v2684_v47 = vadd.f32 %v2551_v42, %v254_v40  ;;  %v2555_v48 = vpop.f32.mrb[19].mxu0  ;;  %3939 = vmatpush3.bf16.msra.mxu1 (!%p3835_p6), %v4029_v36  ;;  %v4031_v40 = vld [vmem:[%s4724_s3 + $0xf8] sm:$0xff] (!%p3835_p6)   ;;  %v4060_v33 = vld [vmem:[%s4724_s3 + $0x130] sm:$0xff] (!%p3835_p6)  }
 0x1f3   : > { %v2685_v50 = vadd.f32 %v2553_v45, %v255_v43  ;;  %v4032_v42 = vld [vmem:[%s4724_s3 + $0x38] sm:$0xff] (!%p3835_p6)   ;;  %3940 = vmatprep.subr.bf16.mxu1 (!%p3835_p6), %v4031_v40  ;;  %v4601_v45 = vld [vmem:[%s4723_s2] sm:$0xff] (!%p3835_p6) }
 0x1f4   : > { %2692 = vst [vmem:[#allocation2 + $0x20] sm:$0xff] %v2684_v47  ;;  %v4033_v43 = vld [vmem:[%s4724_s3 + $0xb8] sm:$0xff] (!%p3835_p6)   ;;  %3919 = vmatpush3.bf16.msra.mxu0 (!%p3835_p6), %v4032_v42  ;;  %v2717_v47 = vrot.slane (!%p3835_p6), %v4601_v45, %v2716_v34  ;;  %v2725_v48 = vrot.slane (!%p3835_p6), %v4601_v45, %v2724_v37  ;;  %v2733_v36 = vrot.slane (!%p3835_p6), %v4601_v45, %v2732_v17 }
 0x1f5   : > { %2693 = vst [vmem:[#allocation2 + $0x28] sm:$0xff] %v2685_v50  ;;  %v2703_v46 = vld [vmem:[#allocation2 + $0x18] sm:$0xff] (!%p3835_p6)  ;;  %v2700_v50 = vld [vmem:[#allocation2] sm:$0xff] (!%p3835_p6)  ;;  %v2741_v37 = vrot.slane (!%p3835_p6), %v4601_v45, %v2740_v20  ;;  %v2729_v38 = vrot.slane (!%p3835_p6), %v4601_v45, %v2728_v25 }
 0x1f6   : > { %3941 = vmatpush3.bf16.msra.mxu1 (!%p3835_p6), %v4033_v43  ;;  %v4062_v34 = vld [vmem:[%s4724_s3 + $0x178] sm:$0xff] (!%p3835_p6)  }
 0x1f7   : > { %v4064_v40 = vld [vmem:[%s4724_s3 + $0x138] sm:$0xff] (!%p3835_p6)  }
 0x1f8   : > { %v4065_v43 = vld [vmem:[%s4724_s3 + $0x1b8] sm:$0xff] (!%p3835_p6)  }
 0x210   : > { %v2591_v51 = vpop.f32.mrb[16].mxu1 }
 0x211   : > { %v2593_v52 = vpop.f32.mrb[17].mxu1 }
 0x212   : > { %v2595_v54 = vpop.f32.mrb[18].mxu1 }
 0x213   : > { %v2596_v55 = vpop.f32.mrb[19].mxu1  ;;  %v2721_v54 = vrot.slane (!%p3835_p6), %v4601_v45, %v2720_v41  ;;  %v2705_v41 = vld [vmem:[#allocation2 + $0x28] sm:$0xff] (!%p3835_p6) }
 0x214   : > { %v4034_v55 = vld [vmem:[%s4724_s3 + $0x140] sm:$0xff] (!%p3835_p6)  }
 0x215   : > { %3948 = vmatprep.subr.bf16.mxu0 (!%p3835_p6), %v4034_v55 }
 0x22f   : > { %v2632_v56 = vpop.f32.mrb[20].mxu0 }
 0x230   : > { %v2633_v57 = vadd.f32 %v2632_v56, %v2591_v51  ;;  %v2673_v58 = vpop.f32.mrb[20].mxu1  ;;  %v2634_v61 = vpop.f32.mrb[21].mxu0  ;;  %v2713_v51 = vrot.slane (!%p3835_p6), %v4601_v45, %v2712_v39  ;;  %v2751_v56 = vadd.f32 (!%p3835_p6), %v2717_v47, %v2701_v44  ;;  %v2737_v39 = vrot.slane (!%p3835_p6), %v4601_v45, %v2736_v32  ;;  %v2704_v47 = vld [vmem:[#allocation2 + $0x20] sm:$0xff] (!%p3835_p6) }
 0x231   : > { %v2635_v63 = vadd.f32 %v2634_v61, %v2593_v52  ;;  %v2675_v0 = vpop.f32.mrb[21].mxu1  ;;  %v2636_v1 = vpop.f32.mrb[22].mxu0  ;;  %2699 = sbr.rel (%p3835_p6) target bundleno = 971 (0x3cb), region = 48  ;;  %v2702_v52 = vld [vmem:[#allocation2 + $0x10] sm:$0xff] (!%p3835_p6)  ;;  %v2755_v44 = vadd.f32 (!%p3835_p6), %v2733_v36, %v2705_v41 }
 0x232   : > { %v2674_v2 = vadd.f32 %v2673_v58, %v2633_v57  ;;  %v2677_v4 = vpop.f32.mrb[22].mxu1  ;;  %v2637_v5 = vpop.f32.mrb[23].mxu0  ;;  %v2753_v57 = vadd.f32 (!%p3835_p6), %v2725_v48, %v2703_v46  ;;  %v2750_v58 = vadd.f32 (!%p3835_p6), %v2713_v51, %v2700_v50  ;;  %v2752_v61 = vadd.f32 (!%p3835_p6), %v2721_v54, %v2702_v52 }
 0x233   : > { %v2676_v6 = vadd.f32 %v2675_v0, %v2635_v63  ;;  %v2678_v7 = vpop.f32.mrb[23].mxu1  ;;  %v2759_v63 = vmax.f32 (!%p3835_p6), %v2751_v56, 0.0  ;;  %v4037_v4 = vld [vmem:[%s4724_s3 + $0x180] sm:$0xff] (!%p3835_p6)   ;;  %v2754_v50 = vadd.f32 (!%p3835_p6), %v2729_v38, %v2704_v47  ;;  %v2763_v51 = vmax.f32 (!%p3835_p6), %v2755_v44, 0.0 }
 0x234   : > { %v2686_v8 = vadd.f32 %v2674_v2, %v256_v62  ;;  %v4035_v62 = vld [vmem:[%s4724_s3 + $0x1c0] sm:$0xff] (!%p3835_p6)   ;;  %v2761_v0 = vmax.f32 (!%p3835_p6), %v2753_v57, 0.0  ;;  %v2758_v1 = vmax.f32 (!%p3835_p6), %v2750_v58, 0.0  ;;  %v2760_v2 = vmax.f32 (!%p3835_p6), %v2752_v61, 0.0 }
 0x235   : > { %v2687_v9 = vadd.f32 %v2676_v6, %v257_v3  ;;  %3970 = vmatprep.subr.bf16.mxu1 (!%p3835_p6), %v4035_v62  ;;  %v4036_v3 = vld [vmem:[%s4724_s3 + $0x100] sm:$0xff] (!%p3835_p6)   ;;  %v2767_v5 = vpack.c.bf16 (!%p3835_p6), %v2759_v63, %v2759_v63  ;;  %v2762_v54 = vmax.f32 (!%p3835_p6), %v2754_v50, 0.0  ;;  %v2771_v56 = vpack.c.bf16 (!%p3835_p6), %v2763_v51, %v2763_v51 }
 0x236   : > { %2694 = vst [vmem:[#allocation2 + $0x30] sm:$0xff] %v2686_v8  ;;  %v2769_v6 = vpack.c.bf16 (!%p3835_p6), %v2761_v0, %v2761_v0  ;;  %v2766_v7 = vpack.c.bf16 (!%p3835_p6), %v2758_v1, %v2758_v1  ;;  %v2768_v8 = vpack.c.bf16 (!%p3835_p6), %v2760_v2, %v2760_v2  ;;  %v3836_v0 = vld [vmem:[%s4725_s4] ss:$0 sm:$0xff] (!%p3835_p6) }
 0x237   : > { %2695 = vst [vmem:[#allocation2 + $0x38] sm:$0xff] %v2687_v9  ;;  %v4038_v9 = vld [vmem:[%s4724_s3 + $0x148] sm:$0xff] (!%p3835_p6)   ;;  %3325 = vmatprep.mubr.bf16.mxu0 (!%p3835_p6), %v2767_v5  ;;  %v2770_v58 = vpack.c.bf16 (!%p3835_p6), %v2762_v54, %v2762_v54 }
 0x238   : > { %3365 = vmatprep.mubr.bf16.mxu1 %v2769_v6  ;;  %3326 = vmatmul.mubr.bf16.vlgmr.msra.gmra.mrb[0].mxu0 %v2766_v7 }
 0x239   : > { %3366 = vmatmul.mubr.bf16.vlgmr.msra.gmra.mrb[0].mxu1 %v2768_v8  ;;  %3949 = vmatpush3.bf16.msra.mxu0 %v4036_v3 }
 0x23a   : > { %3971 = vmatpush3.bf16.msra.mxu1 %v4037_v4  ;;  %3950 = vmatprep.subr.bf16.mxu0 %v4038_v9 }
 0x23b   : > { %3972 = vmatprep.subr.bf16.mxu1 %v4039_v10  ;;  %3405 = vmatprep.mubr.bf16.mxu0 %v2771_v56 }
 0x23d   : > { %3951 = vmatpush3.bf16.msra.mxu0 %v4040_v11  ;;  %v2706_v48 = vld [vmem:[#allocation2 + $0x30] sm:$0xff] }
 0x23e   : > { %3973 = vmatpush3.bf16.msra.mxu1 %v4041_v49  ;;  %3952 = vmatprep.subr.bf16.mxu0 %v4042_v12  ;;  %v2707_v42 = vld [vmem:[#allocation2 + $0x38] sm:$0xff]  ;;  %v2756_v45 = vadd.f32 %v2737_v39, %v2706_v48 }
 0x23f   : > { %3974 = vmatprep.subr.bf16.mxu1 %v4043_v53  ;;  %v2757_v46 = vadd.f32 %v2741_v37, %v2707_v42 }
 0x240   : > { %v2764_v55 = vmax.f32 %v2756_v45, 0.0 }
 0x241   : > { %3953 = vmatpush3.bf16.msra.mxu0 %v4044_v13  ;;  %v2765_v52 = vmax.f32 %v2757_v46, 0.0  ;;  %v3454_v13 = vand.u32 127, %v2710_v27 }
 0x242   : > { %3975 = vmatpush3.bf16.msra.mxu1 %v4045_v60  ;;  %3954 = vmatprep.subr.bf16.mxu0 %v4046_v14  ;;  %v2772_v61 = vpack.c.bf16 %v2764_v55, %v2764_v55 }
 0x243   : > { %3976 = vmatprep.subr.bf16.mxu1 %v4047_v15  ;;  %v2773_v57 = vpack.c.bf16 %v2765_v52, %v2765_v52  ;;  %vm3455_vm0 = vcmp.lt.s32.totalorder %v3454_v13, 6  ;;  %vm3459_vm1 = vcmp.eq.s32.totalorder %v3454_v13, 6 }
 0x245   : > { %3955 = vmatpush3.bf16.msra.mxu0 %v4048_v59  ;;  %3445 = vmatprep.mubr.bf16.mxu1 %v2773_v57 }
 0x246   : > { %3977 = vmatpush3.bf16.msra.mxu1 %v4049_v16  ;;  %3956 = vmatprep.subr.bf16.mxu0 %v4050_v18 }
 0x247   : > { %3978 = vmatprep.subr.bf16.mxu1 %v4051_v19 }
 0x249   : > { %3957 = vmatpush3.bf16.msra.mxu0 %v4052_v21 }
 0x24a   : > { %3979 = vmatpush3.bf16.msra.mxu1 %v4053_v22  ;;  %3958 = vmatprep.subr.bf16.mxu0 %v4054_v23 }
 0x24b   : > { %3980 = vmatprep.subr.bf16.mxu1 %v4055_v24 }
 0x24d   : > { %3959 = vmatpush3.bf16.msra.mxu0 %v4056_v26 }
 0x24e   : > { %3981 = vmatpush3.bf16.msra.mxu1 %v4057_v28  ;;  %3960 = vmatprep.subr.bf16.mxu0 %v4058_v29 }
 0x24f   : > { %3982 = vmatprep.subr.bf16.mxu1 %v4059_v31 }
 0x251   : > { %3961 = vmatpush3.bf16.msra.mxu0 %v4060_v33 }
 0x252   : > { %3983 = vmatpush3.bf16.msra.mxu1 %v4061_v35  ;;  %3962 = vmatprep.subr.bf16.mxu0 %v4062_v34 }
 0x253   : > { %3984 = vmatprep.subr.bf16.mxu1 %v4063_v30 }
 0x255   : > { %3963 = vmatpush3.bf16.msra.mxu0 %v4064_v40 }
 0x256   : > { %3985 = vmatpush3.bf16.msra.mxu1 %v4065_v43 }
 0x258   : > { %3406 = vmatmul.mubr.bf16.vlgmr.msra.gmra.mrb[4].mxu0 %v2770_v58 }
 0x259   : > { %3446 = vmatmul.mubr.bf16.vlgmr.msra.gmra.mrb[4].mxu1 %v2772_v61 }
 0x30b   : > { %v3920_v62 = vpop.f32.mrb[0].mxu0 }
 0x30c   : > { %v3942_v63 = vpop.f32.mrb[0].mxu1  ;;  %v3921_v1 = vpop.f32.mrb[1].mxu0 }
 0x30d   : > { %v3943_v2 = vpop.f32.mrb[1].mxu1  ;;  %v3922_v3 = vadd.f32 %v3921_v1, %v3920_v62  ;;  %v3923_v5 = vpop.f32.mrb[2].mxu0 }
 0x30e   : > { %v3944_v4 = vadd.f32 %v3943_v2, %v3942_v63  ;;  %v3945_v6 = vpop.f32.mrb[2].mxu1  ;;  %v3924_v7 = vpop.f32.mrb[3].mxu0 }
 0x30f   : > { %v3946_v8 = vpop.f32.mrb[3].mxu1  ;;  %v3328_v9 = vadd.f32 %v3922_v3, %v3836_v0 }
 0x311   : > { %v3368_v10 = vadd.f32 %v3944_v4, %v3328_v9 }
 0x32b   : > { %v3964_v11 = vpop.f32.mrb[4].mxu0 }
 0x32c   : > { %v3986_v49 = vpop.f32.mrb[4].mxu1  ;;  %v3965_v12 = vpop.f32.mrb[5].mxu0 }
 0x32d   : > { %v3987_v53 = vpop.f32.mrb[5].mxu1  ;;  %v3966_v60 = vadd.f32 %v3965_v12, %v3964_v11  ;;  %v3967_v15 = vpop.f32.mrb[6].mxu0 }
 0x32e   : > { %v3988_v14 = vadd.f32 %v3987_v53, %v3986_v49  ;;  %v3989_v59 = vpop.f32.mrb[6].mxu1  ;;  %v3968_v16 = vpop.f32.mrb[7].mxu0 }
 0x32f   : > { %v3990_v18 = vpop.f32.mrb[7].mxu1  ;;  %v3408_v19 = vadd.f32 %v3966_v60, %v3368_v10 }
 0x331   : > { %v3448_v21 = vadd.f32 %v3988_v14, %v3408_v19 }
 0x333   : > { %v3456_v22 = vsel %vm3455_vm0, %v3448_v21, 0.0  ;;  %v3460_v23 = vsel %vm3459_vm1, %v3448_v21, 0.0 }
 0x334   : > { %3457 = vadd.xlane.f32.xlu0 %v3456_v22 }
 0x338   : > { %3461 = vadd.xlane.f32.xlu0 %v3460_v23 }
 0x3c1   : > { %v3458_v24 = vpop.xlane.xlu0 %3457 }
 0x3c2   : > { %v3463_v26 = vmul.f32 0.16666667, %v3458_v24 }
 0x3c5   : > { %v3462_v17 = vpop.xlane.xlu0 %3461 }
 0x3c6   : > { %v3464_v28 = vsub.f32 %v3463_v26, %v3462_v17 }
 0x3c8   : > { %v3465_v20 = vsub.f32 %v3448_v21, %v3464_v28 }
 0x3ca   : > { %3466 = vst [vmem:[%s4726_s5] sm:$0xff] %v3465_v20 }
 0x3cb PF: > { %s15_s18 = sadd.s32 1, %s4072_s18  }
 0x3cc   : > { %p12_p7 = scmp.ge.s32.totalorder %s15_s18, 7  }
 0x3ce   :  { %14 = sbr.rel (!%p12_p7) target bundleno = 1 (0x1), region = 77 }

</bundles_post_ra>
